<compile_context>
chip_gen: v6e
topology: v6e:2x2x1
jax: 0.10.0
libtpu: 0.0.40
codegen_flags: <defaults>
</compile_context>

<pallas_src>
import numpy as np
import jax
import jax.numpy as jnp
from jax import lax
from jax.experimental import pallas as pl
from jax.experimental.pallas import tpu as pltpu


# ------------------------------ kernel --------------------------------------

def _make_edge_iou_kernel(n_class, edge_range):
    k2 = float((2 * edge_range + 1) ** 2)

    def kernel(band_h_ref, band_w_ref, logits_ref, tgt_ref, out_ref):
        C = n_class
        band_h = band_h_ref[...]            # (H, H) bf16, |i-j| <= r band
        band_w = band_w_ref[...]            # (W, W) bf16
        tgt = tgt_ref[0]                    # (H, W) int32

        def box_sum(seg_f32):
            # (2r+1)x(2r+1) box sum with zero padding via two MXU matmuls:
            #   box = Band_H @ seg @ Band_W
            # seg is a 0/1 map and band entries are 0/1, so every partial sum
            # is a small integer (<= (2r+1)^2) and the bf16-in / f32-acc
            # matmul is exact.
            seg_b = seg_f32.astype(jnp.bfloat16)
            rows = jnp.dot(band_h, seg_b, preferred_element_type=jnp.float32)
            rows_b = rows.astype(jnp.bfloat16)          # integers <= 2r+1, exact
            return jnp.dot(rows_b, band_w, preferred_element_type=jnp.float32)

        # ---- max over class logits (softmax shift AND argmax reference) ----
        m = logits_ref[0, 0]
        for c in range(1, C):
            m = jnp.maximum(m, logits_ref[0, c])

        # ---- softmax denominator (exps recomputed per class below) ----
        denom = jnp.exp(logits_ref[0, 0] - m)
        for c in range(1, C):
            denom = denom + jnp.exp(logits_ref[0, c] - m)
        inv_denom = 1.0 / denom

        # ---- fused per-class pass: one-hot, edges, IoU ----
        taken = jnp.zeros_like(m, dtype=jnp.bool_)
        results = []
        for c in range(C):
            lc = logits_ref[0, c]

            # argmax(dim=1) one-hot straight from logits (softmax is
            # monotone); first-max tie-break matches jnp.argmax.
            is_max = jnp.logical_and(lc == m, jnp.logical_not(taken))
            taken = jnp.logical_or(taken, is_max)
            pred_c = is_max.astype(jnp.float32)

            prob_c = jnp.exp(lc - m) * inv_denom
            tgt_c = (tgt == c).astype(jnp.float32)

            # edge_decision: seg * (AvgPool(seg) != seg).  For a 0/1 map this
            # is equivalent to comparing the exact integer box sum.
            p_edge = pred_c * (box_sum(pred_c) != pred_c * k2).astype(jnp.float32)
            t_edge = tgt_c * (box_sum(tgt_c) != tgt_c * k2).astype(jnp.float32)

            # targets * targets_edge == t_edge (t_edge already carries tgt_c).
            o = prob_c * p_edge
            inter = jnp.sum(jnp.sum(o * t_edge, axis=1, keepdims=True),
                            axis=0, keepdims=True)       # (1, 1)
            union = jnp.sum(jnp.sum(t_edge, axis=1, keepdims=True),
                            axis=0, keepdims=True)        # (1, 1)
            results.append((inter + 1e-24) / (union + 1e-24))

        out_ref[...] = jnp.concatenate(results, axis=1)   # (1, C)

    return kernel


# ------------------------------ wrapper --------------------------------------

def _band_matrix(n, r, dtype=jnp.bfloat16):
    idx = jnp.arange(n, dtype=jnp.int32)
    return (jnp.abs(idx[:, None] - idx[None, :]) <= r).astype(dtype)


def edge_iou_loss(outputs, targets, *, n_class, edge_range=3):
    """outputs: (B, C, H, W) float32 logits; targets: (B, H, W) integer map.
    Returns (B, C) float32 edge IoU loss (same as the PyTorch module)."""
    B, C, H, W = outputs.shape
    assert C == n_class
    outputs = outputs.astype(jnp.float32)
    targets = targets.astype(jnp.int32)

    band_h = _band_matrix(H, edge_range)                  # (H, H) bf16
    band_w = _band_matrix(W, edge_range)                  # (W, W) bf16

    return pl.pallas_call(
        _make_edge_iou_kernel(n_class, edge_range),
        out_shape=jax.ShapeDtypeStruct((B, C), jnp.float32),
        grid_spec=pltpu.PrefetchScalarGridSpec(
            num_scalar_prefetch=0,
            grid=(B,),
            in_specs=[
                # Constant blocks: DMA'd once, resident across the batch grid.
                pl.BlockSpec((H, H), lambda b: (0, 0)),
                pl.BlockSpec((W, W), lambda b: (0, 0)),
                pl.BlockSpec((1, C, H, W), lambda b: (b, 0, 0, 0)),
                pl.BlockSpec((1, H, W), lambda b: (b, 0, 0)),
            ],
            out_specs=pl.BlockSpec((1, C), lambda b: (b, 0)),
        ),
        compiler_params=pltpu.CompilerParams(
            dimension_semantics=("parallel",),
        ),
    )(band_h, band_w, outputs, targets)


# --------------------------- plain-JAX reference ----------------------------

def _ref_forward(logits, targets, n_class, edge_range=3):
    k = 2 * edge_range + 1
    probs = jax.nn.softmax(logits, axis=1)
    tgt_oh = jax.nn.one_hot(targets, n_class, axis=1, dtype=jnp.float32)
    pred_idx = jnp.argmax(probs, axis=1)
    pred_oh = jax.nn.one_hot(pred_idx, n_class, axis=1, dtype=jnp.float32)

    def edge(seg):
        s = lax.reduce_window(
            seg, 0.0, lax.add, (1, 1, k, k), (1, 1, 1, 1),
            padding=((0, 0), (0, 0),
                     (edge_range, edge_range), (edge_range, edge_range)))
        return seg * (s != seg * float(k * k)).astype(seg.dtype)

    o = probs * edge(pred_oh)
    t = tgt_oh * edge(tgt_oh)
    inter = jnp.sum(o * t, axis=(2, 3))
    union = jnp.sum(t, axis=(2, 3))
    return (inter + 1e-24) / (union + 1e-24)


# ------------------------------- main ----------------------------------------

if __name__ == "__main__":
    # Shapes forced by one_hot_changer's hard-coded view(1, 2, 224, 224).
    B, C, H, W = 1, 2, 224, 224
    EDGE_RANGE = 3

    key = jax.random.PRNGKey(0)
    k1, k2 = jax.random.split(key)
    # Quantize logits to a 0.25 grid so argmax ties are exact (deterministic
    # across softmax/argmax implementations).
    logits = jnp.round(jax.random.normal(k1, (B, C, H, W), jnp.float32) * 8.0) / 4.0
    targets = jax.random.randint(k2, (B, H, W), 0, C, dtype=jnp.int32)

    out = edge_iou_loss(logits, targets, n_class=C, edge_range=EDGE_RANGE)
    out = jax.block_until_ready(out)

    ref = _ref_forward(logits, targets, C, EDGE_RANGE)
    np.testing.assert_allclose(np.asarray(out), np.asarray(ref),
                               rtol=1e-4, atol=1e-6)
    print("KERNEL_OK")
</pallas_src>

<mosaic_0001>
module attributes {stable_mosaic.version = 11 : i64} {
  func.func @kernel(%arg0: i32, %arg1: memref<224x224xbf16, #tpu.memory_space<vmem>>, %arg2: memref<224x224xbf16, #tpu.memory_space<vmem>>, %arg3: memref<1x2x224x224xf32, #tpu.memory_space<vmem>>, %arg4: memref<1x224x224xi32, #tpu.memory_space<vmem>>, %arg5: memref<1x2xf32, #tpu.memory_space<vmem>>) attributes {dimension_semantics = [#tpu.dimension_semantics<parallel>], iteration_bounds = array<i64: 1>, scalar_prefetch = 0 : i64, scratch_operands = 0 : i64, tpu.core_type = #tpu.core_type<tc>, window_params = [{pipeline_mode = #tpu.pipeline_mode<synchronous>, transform_indices = @transform_0, window_bounds = array<i64: 224, 224>}, {pipeline_mode = #tpu.pipeline_mode<synchronous>, transform_indices = @transform_1, window_bounds = array<i64: 224, 224>}, {transform_indices = @transform_2, window_bounds = array<i64: 1, 2, 224, 224>}, {transform_indices = @transform_3, window_bounds = array<i64: 1, 224, 224>}, {transform_indices = @transform_4, window_bounds = array<i64: 1, 2>}]} {
    %c0 = arith.constant 0 : index
    %c0_0 = arith.constant 0 : index
    %0 = vector.load %arg1[%c0, %c0_0] : memref<224x224xbf16, #tpu.memory_space<vmem>>, vector<224x224xbf16>
    %c0_1 = arith.constant 0 : index
    %c0_2 = arith.constant 0 : index
    %1 = vector.load %arg2[%c0_1, %c0_2] : memref<224x224xbf16, #tpu.memory_space<vmem>>, vector<224x224xbf16>
    %c0_3 = arith.constant 0 : index
    %c0_4 = arith.constant 0 : index
    %c0_5 = arith.constant 0 : index
    %2 = vector.load %arg4[%c0_3, %c0_4, %c0_5] : memref<1x224x224xi32, #tpu.memory_space<vmem>>, vector<1x224x224xi32>
    %3 = vector.shape_cast %2 : vector<1x224x224xi32> to vector<224x224xi32>
    %c0_6 = arith.constant 0 : index
    %c0_7 = arith.constant 0 : index
    %c0_8 = arith.constant 0 : index
    %c0_9 = arith.constant 0 : index
    %4 = vector.load %arg3[%c0_6, %c0_7, %c0_8, %c0_9] : memref<1x2x224x224xf32, #tpu.memory_space<vmem>>, vector<1x1x224x224xf32>
    %5 = vector.shape_cast %4 : vector<1x1x224x224xf32> to vector<224x224xf32>
    %c0_10 = arith.constant 0 : index
    %c1 = arith.constant 1 : index
    %c0_11 = arith.constant 0 : index
    %c0_12 = arith.constant 0 : index
    %6 = vector.load %arg3[%c0_10, %c1, %c0_11, %c0_12] : memref<1x2x224x224xf32, #tpu.memory_space<vmem>>, vector<1x1x224x224xf32>
    %7 = vector.shape_cast %6 : vector<1x1x224x224xf32> to vector<224x224xf32>
    %8 = arith.maximumf %5, %7 : vector<224x224xf32>
    %c0_13 = arith.constant 0 : index
    %c0_14 = arith.constant 0 : index
    %c0_15 = arith.constant 0 : index
    %c0_16 = arith.constant 0 : index
    %9 = vector.load %arg3[%c0_13, %c0_14, %c0_15, %c0_16] : memref<1x2x224x224xf32, #tpu.memory_space<vmem>>, vector<1x1x224x224xf32>
    %10 = vector.shape_cast %9 : vector<1x1x224x224xf32> to vector<224x224xf32>
    %11 = arith.subf %10, %8 : vector<224x224xf32>
    %12 = math.exp %11 : vector<224x224xf32>
    %c0_17 = arith.constant 0 : index
    %c1_18 = arith.constant 1 : index
    %c0_19 = arith.constant 0 : index
    %c0_20 = arith.constant 0 : index
    %13 = vector.load %arg3[%c0_17, %c1_18, %c0_19, %c0_20] : memref<1x2x224x224xf32, #tpu.memory_space<vmem>>, vector<1x1x224x224xf32>
    %14 = vector.shape_cast %13 : vector<1x1x224x224xf32> to vector<224x224xf32>
    %15 = arith.subf %14, %8 : vector<224x224xf32>
    %16 = math.exp %15 : vector<224x224xf32>
    %17 = arith.addf %12, %16 : vector<224x224xf32>
    %cst = arith.constant 1.000000e+00 : f32
    %18 = vector.broadcast %cst : f32 to vector<224x224xf32>
    %19 = arith.divf %18, %17 : vector<224x224xf32>
    %false = arith.constant false
    %20 = vector.broadcast %false : i1 to vector<224x224xi1>
    %c0_21 = arith.constant 0 : index
    %c0_22 = arith.constant 0 : index
    %c0_23 = arith.constant 0 : index
    %c0_24 = arith.constant 0 : index
    %21 = vector.load %arg3[%c0_21, %c0_22, %c0_23, %c0_24] : memref<1x2x224x224xf32, #tpu.memory_space<vmem>>, vector<1x1x224x224xf32>
    %22 = vector.shape_cast %21 : vector<1x1x224x224xf32> to vector<224x224xf32>
    %23 = arith.cmpf oeq, %22, %8 : vector<224x224xf32>
    %cst_25 = arith.constant dense<true> : vector<224x224xi1>
    %24 = arith.xori %20, %cst_25 : vector<224x224xi1>
    %25 = arith.andi %23, %24 : vector<224x224xi1>
    %26 = arith.ori %20, %25 : vector<224x224xi1>
    %27 = arith.extui %25 : vector<224x224xi1> to vector<224x224xi32>
    %28 = arith.sitofp %27 : vector<224x224xi32> to vector<224x224xf32>
    %29 = arith.subf %22, %8 : vector<224x224xf32>
    %30 = math.exp %29 : vector<224x224xf32>
    %31 = arith.mulf %30, %19 : vector<224x224xf32>
    %c0_i32 = arith.constant 0 : i32
    %32 = vector.broadcast %c0_i32 : i32 to vector<224x224xi32>
    %33 = arith.cmpi eq, %3, %32 : vector<224x224xi32>
    %34 = arith.extui %33 : vector<224x224xi1> to vector<224x224xi32>
    %35 = arith.sitofp %34 : vector<224x224xi32> to vector<224x224xf32>
    %36 = arith.truncf %28 : vector<224x224xf32> to vector<224x224xbf16>
    %cst_26 = arith.constant dense<0.000000e+00> : vector<224x224xf32>
    %37 = tpu.matmul %0, %36, %cst_26 {dimension_numbers = #tpu.dot_dimension_numbers<[1], [0], [0], [1], [0, 0, 1, 1], [], []>} : vector<224x224xbf16>, vector<224x224xbf16>, vector<224x224xf32> -> vector<224x224xf32>
    %38 = arith.truncf %37 : vector<224x224xf32> to vector<224x224xbf16>
    %cst_27 = arith.constant dense<0.000000e+00> : vector<224x224xf32>
    %39 = tpu.matmul %38, %1, %cst_27 {dimension_numbers = #tpu.dot_dimension_numbers<[1], [0], [0], [1], [0, 0, 1, 1], [], []>} : vector<224x224xbf16>, vector<224x224xbf16>, vector<224x224xf32> -> vector<224x224xf32>
    %cst_28 = arith.constant 4.900000e+01 : f32
    %40 = vector.broadcast %cst_28 : f32 to vector<224x224xf32>
    %41 = arith.mulf %28, %40 : vector<224x224xf32>
    %42 = arith.cmpf one, %39, %41 : vector<224x224xf32>
    %43 = arith.extui %42 : vector<224x224xi1> to vector<224x224xi32>
    %44 = arith.sitofp %43 : vector<224x224xi32> to vector<224x224xf32>
    %45 = arith.mulf %28, %44 : vector<224x224xf32>
    %46 = arith.truncf %35 : vector<224x224xf32> to vector<224x224xbf16>
    %cst_29 = arith.constant dense<0.000000e+00> : vector<224x224xf32>
    %47 = tpu.matmul %0, %46, %cst_29 {dimension_numbers = #tpu.dot_dimension_numbers<[1], [0], [0], [1], [0, 0, 1, 1], [], []>} : vector<224x224xbf16>, vector<224x224xbf16>, vector<224x224xf32> -> vector<224x224xf32>
    %48 = arith.truncf %47 : vector<224x224xf32> to vector<224x224xbf16>
    %cst_30 = arith.constant dense<0.000000e+00> : vector<224x224xf32>
    %49 = tpu.matmul %48, %1, %cst_30 {dimension_numbers = #tpu.dot_dimension_numbers<[1], [0], [0], [1], [0, 0, 1, 1], [], []>} : vector<224x224xbf16>, vector<224x224xbf16>, vector<224x224xf32> -> vector<224x224xf32>
    %cst_31 = arith.constant 4.900000e+01 : f32
    %50 = vector.broadcast %cst_31 : f32 to vector<224x224xf32>
    %51 = arith.mulf %35, %50 : vector<224x224xf32>
    %52 = arith.cmpf one, %49, %51 : vector<224x224xf32>
    %53 = arith.extui %52 : vector<224x224xi1> to vector<224x224xi32>
    %54 = arith.sitofp %53 : vector<224x224xi32> to vector<224x224xf32>
    %55 = arith.mulf %35, %54 : vector<224x224xf32>
    %56 = arith.mulf %31, %45 : vector<224x224xf32>
    %57 = arith.mulf %56, %55 : vector<224x224xf32>
    %cst_32 = arith.constant dense<0.000000e+00> : vector<224xf32>
    %58 = vector.multi_reduction <add>, %57, %cst_32 [1] : vector<224x224xf32> to vector<224xf32>
    %59 = vector.shape_cast %58 : vector<224xf32> to vector<224x1xf32>
    %cst_33 = arith.constant dense<0.000000e+00> : vector<1xf32>
    %60 = vector.multi_reduction <add>, %59, %cst_33 [0] : vector<224x1xf32> to vector<1xf32>
    %61 = vector.shape_cast %60 : vector<1xf32> to vector<1x1xf32>
    %cst_34 = arith.constant dense<0.000000e+00> : vector<224xf32>
    %62 = vector.multi_reduction <add>, %55, %cst_34 [1] : vector<224x224xf32> to vector<224xf32>
    %63 = vector.shape_cast %62 : vector<224xf32> to vector<224x1xf32>
    %cst_35 = arith.constant dense<0.000000e+00> : vector<1xf32>
    %64 = vector.multi_reduction <add>, %63, %cst_35 [0] : vector<224x1xf32> to vector<1xf32>
    %65 = vector.shape_cast %64 : vector<1xf32> to vector<1x1xf32>
    %cst_36 = arith.constant 1.000000e-24 : f32
    %66 = vector.broadcast %cst_36 : f32 to vector<1x1xf32>
    %67 = arith.addf %61, %66 : vector<1x1xf32>
    %cst_37 = arith.constant 1.000000e-24 : f32
    %68 = vector.broadcast %cst_37 : f32 to vector<1x1xf32>
    %69 = arith.addf %65, %68 : vector<1x1xf32>
    %70 = arith.divf %67, %69 : vector<1x1xf32>
    %c0_38 = arith.constant 0 : index
    %c1_39 = arith.constant 1 : index
    %c0_40 = arith.constant 0 : index
    %c0_41 = arith.constant 0 : index
    %71 = vector.load %arg3[%c0_38, %c1_39, %c0_40, %c0_41] : memref<1x2x224x224xf32, #tpu.memory_space<vmem>>, vector<1x1x224x224xf32>
    %72 = vector.shape_cast %71 : vector<1x1x224x224xf32> to vector<224x224xf32>
    %73 = arith.cmpf oeq, %72, %8 : vector<224x224xf32>
    %cst_42 = arith.constant dense<true> : vector<224x224xi1>
    %74 = arith.xori %26, %cst_42 : vector<224x224xi1>
    %75 = arith.andi %73, %74 : vector<224x224xi1>
    %76 = arith.extui %75 : vector<224x224xi1> to vector<224x224xi32>
    %77 = arith.sitofp %76 : vector<224x224xi32> to vector<224x224xf32>
    %78 = arith.subf %72, %8 : vector<224x224xf32>
    %79 = math.exp %78 : vector<224x224xf32>
    %80 = arith.mulf %79, %19 : vector<224x224xf32>
    %c1_i32 = arith.constant 1 : i32
    %81 = vector.broadcast %c1_i32 : i32 to vector<224x224xi32>
    %82 = arith.cmpi eq, %3, %81 : vector<224x224xi32>
    %83 = arith.extui %82 : vector<224x224xi1> to vector<224x224xi32>
    %84 = arith.sitofp %83 : vector<224x224xi32> to vector<224x224xf32>
    %85 = arith.truncf %77 : vector<224x224xf32> to vector<224x224xbf16>
    %cst_43 = arith.constant dense<0.000000e+00> : vector<224x224xf32>
    %86 = tpu.matmul %0, %85, %cst_43 {dimension_numbers = #tpu.dot_dimension_numbers<[1], [0], [0], [1], [0, 0, 1, 1], [], []>} : vector<224x224xbf16>, vector<224x224xbf16>, vector<224x224xf32> -> vector<224x224xf32>
    %87 = arith.truncf %86 : vector<224x224xf32> to vector<224x224xbf16>
    %cst_44 = arith.constant dense<0.000000e+00> : vector<224x224xf32>
    %88 = tpu.matmul %87, %1, %cst_44 {dimension_numbers = #tpu.dot_dimension_numbers<[1], [0], [0], [1], [0, 0, 1, 1], [], []>} : vector<224x224xbf16>, vector<224x224xbf16>, vector<224x224xf32> -> vector<224x224xf32>
    %cst_45 = arith.constant 4.900000e+01 : f32
    %89 = vector.broadcast %cst_45 : f32 to vector<224x224xf32>
    %90 = arith.mulf %77, %89 : vector<224x224xf32>
    %91 = arith.cmpf one, %88, %90 : vector<224x224xf32>
    %92 = arith.extui %91 : vector<224x224xi1> to vector<224x224xi32>
    %93 = arith.sitofp %92 : vector<224x224xi32> to vector<224x224xf32>
    %94 = arith.mulf %77, %93 : vector<224x224xf32>
    %95 = arith.truncf %84 : vector<224x224xf32> to vector<224x224xbf16>
    %cst_46 = arith.constant dense<0.000000e+00> : vector<224x224xf32>
    %96 = tpu.matmul %0, %95, %cst_46 {dimension_numbers = #tpu.dot_dimension_numbers<[1], [0], [0], [1], [0, 0, 1, 1], [], []>} : vector<224x224xbf16>, vector<224x224xbf16>, vector<224x224xf32> -> vector<224x224xf32>
    %97 = arith.truncf %96 : vector<224x224xf32> to vector<224x224xbf16>
    %cst_47 = arith.constant dense<0.000000e+00> : vector<224x224xf32>
    %98 = tpu.matmul %97, %1, %cst_47 {dimension_numbers = #tpu.dot_dimension_numbers<[1], [0], [0], [1], [0, 0, 1, 1], [], []>} : vector<224x224xbf16>, vector<224x224xbf16>, vector<224x224xf32> -> vector<224x224xf32>
    %cst_48 = arith.constant 4.900000e+01 : f32
    %99 = vector.broadcast %cst_48 : f32 to vector<224x224xf32>
    %100 = arith.mulf %84, %99 : vector<224x224xf32>
    %101 = arith.cmpf one, %98, %100 : vector<224x224xf32>
    %102 = arith.extui %101 : vector<224x224xi1> to vector<224x224xi32>
    %103 = arith.sitofp %102 : vector<224x224xi32> to vector<224x224xf32>
    %104 = arith.mulf %84, %103 : vector<224x224xf32>
    %105 = arith.mulf %80, %94 : vector<224x224xf32>
    %106 = arith.mulf %105, %104 : vector<224x224xf32>
    %cst_49 = arith.constant dense<0.000000e+00> : vector<224xf32>
    %107 = vector.multi_reduction <add>, %106, %cst_49 [1] : vector<224x224xf32> to vector<224xf32>
    %108 = vector.shape_cast %107 : vector<224xf32> to vector<224x1xf32>
    %cst_50 = arith.constant dense<0.000000e+00> : vector<1xf32>
    %109 = vector.multi_reduction <add>, %108, %cst_50 [0] : vector<224x1xf32> to vector<1xf32>
    %110 = vector.shape_cast %109 : vector<1xf32> to vector<1x1xf32>
    %cst_51 = arith.constant dense<0.000000e+00> : vector<224xf32>
    %111 = vector.multi_reduction <add>, %104, %cst_51 [1] : vector<224x224xf32> to vector<224xf32>
    %112 = vector.shape_cast %111 : vector<224xf32> to vector<224x1xf32>
    %cst_52 = arith.constant dense<0.000000e+00> : vector<1xf32>
    %113 = vector.multi_reduction <add>, %112, %cst_52 [0] : vector<224x1xf32> to vector<1xf32>
    %114 = vector.shape_cast %113 : vector<1xf32> to vector<1x1xf32>
    %cst_53 = arith.constant 1.000000e-24 : f32
    %115 = vector.broadcast %cst_53 : f32 to vector<1x1xf32>
    %116 = arith.addf %110, %115 : vector<1x1xf32>
    %cst_54 = arith.constant 1.000000e-24 : f32
    %117 = vector.broadcast %cst_54 : f32 to vector<1x1xf32>
    %118 = arith.addf %114, %117 : vector<1x1xf32>
    %119 = arith.divf %116, %118 : vector<1x1xf32>
    %120 = tpu.concatenate %70, %119 in 1 : vector<1x1xf32>, vector<1x1xf32> -> vector<1x2xf32>
    %c0_55 = arith.constant 0 : index
    %c0_56 = arith.constant 0 : index
    %121 = vector.load %arg5[%c0_55, %c0_56] : memref<1x2xf32, #tpu.memory_space<vmem>>, vector<1x2xf32>
    tpu.vector_store %arg5[%c0_55, %c0_56], %120 {strides = array<i32>} : memref<1x2xf32, #tpu.memory_space<vmem>>, vector<1x2xf32>,
    return
  }
  func.func @transform_0(%arg0: i32) -> (i32, i32) {
    %c0_i32 = arith.constant 0 : i32
    %c0_i32_0 = arith.constant 0 : i32
    %c0_i32_1 = arith.constant 0 : i32
    return %c0_i32, %c0_i32_0 : i32, i32
  }
  func.func @transform_1(%arg0: i32) -> (i32, i32) {
    %c0_i32 = arith.constant 0 : i32
    %c0_i32_0 = arith.constant 0 : i32
    %c0_i32_1 = arith.constant 0 : i32
    return %c0_i32, %c0_i32_0 : i32, i32
  }
  func.func @transform_2(%arg0: i32) -> (i32, i32, i32, i32) {
    %c0_i32 = arith.constant 0 : i32
    %c0_i32_0 = arith.constant 0 : i32
    %c0_i32_1 = arith.constant 0 : i32
    %c0_i32_2 = arith.constant 0 : i32
    return %arg0, %c0_i32, %c0_i32_0, %c0_i32_1 : i32, i32, i32, i32
  }
  func.func @transform_3(%arg0: i32) -> (i32, i32, i32) {
    %c0_i32 = arith.constant 0 : i32
    %c0_i32_0 = arith.constant 0 : i32
    %c0_i32_1 = arith.constant 0 : i32
    return %arg0, %c0_i32, %c0_i32_0 : i32, i32, i32
  }
  func.func @transform_4(%arg0: i32) -> (i32, i32) {
    %c0_i32 = arith.constant 0 : i32
    %c0_i32_0 = arith.constant 0 : i32
    return %arg0, %c0_i32 : i32, i32
  }
}

</mosaic_0001>

<bundles_post_ra>
// kernel: tpu_custom_call.1
= control target key start
LH: loop header
LB: loop body
LE: loop exit
PB: predicated region body
PF: predicated region fallthrough
CT: control target
= control target key end

     0   :  { %9 = vsyncpa [#allocation3], 0  ;;  %s14686_s0 = inlined_call_operand.hbm [shape: bf16[224,224], index: 0, kind: input, shape index: {}]   ;;  %s14687_s1 = inlined_call_operand.hbm [shape: bf16[224,224], index: 1, kind: input, shape index: {}]   ;;  %s14688_s2 = inlined_call_operand.hbm [shape: f32[1,2,224,224], index: 2, kind: input, shape index: {}]   ;;  %s14689_s3 = inlined_call_operand.hbm [shape: s32[1,224,224], index: 3, kind: input, shape index: {}]   ;;  %s14690_s4 = inlined_call_operand.hbm [shape: f32[1,2], index: 4, kind: output, shape index: {}]  }
   0x1   :  { %10 = vsyncpa [#allocation6], 0 }
   0x2   :  { %11 = vsyncpa [#allocation9], 0 }
   0x3   :  { %12 = vsyncpa [#allocation4], 0  ;;  %s7498_s15 = smov [#allocation5]   ;;  %s7499_s17 = smov [#allocation2]  }
   0x4   :  { %s30_s16 = sshll.u32 %s7498_s15, 4  ;;  %s18_s18 = sshll.u32 %s7499_s17, 4  ;;  %s31_s16 = int_to_ptr.vmem [resolvable:$true] %s30_s16  ;;  %s19_s18 = int_to_ptr.vmem [resolvable:$true] %s18_s18 }
   0x5   :  { %s7398_s19 = scalar_lea.vmem %s31_s16, 3584  ;;  %p7403_p1 = scmp.lt.s32.totalorder %s31_s16, %s31_s16 }
   0x6   :  { %p7399_p0 = scmp.ne.s32.totalorder %s31_s16, %s7398_s19  ;;  %p7404_p2 = scmp.lt.s32.totalorder %s7398_s19, %s7398_s19 }
   0x8   :  { %p7405_p3 = por %p7404_p2, %p7403_p1 }
   0xa   :  { %p7406_p4 = pnand %p7405_p3, %p7399_p0 }
   0xc   :  { %7409 = shalt.err (!%p7406_p4)
}
   0xd   :  { %s7500_s20 = smov 128   ;;  %s7501_s21 = smov 8  }
   0xe   :  { %36 = dma.hbm_to_vmem [thread:$0]  %s14687_s1, 3584, %s31_s16, [#allocation6], %s7500_s20, %s7500_s20, %s7501_s21  }
   0xf   :  { %s7418_s24 = scalar_lea.vmem %s19_s18, 3584  ;;  %p7423_p6 = scmp.lt.s32.totalorder %s19_s18, %s19_s18 }
  0x10   :  { %p7419_p5 = scmp.ne.s32.totalorder %s19_s18, %s7418_s24  ;;  %p7424_p7 = scmp.lt.s32.totalorder %s7418_s24, %s7418_s24 }
  0x12   :  { %p7425_p8 = por %p7424_p7, %p7423_p6 }
  0x14   :  { %p7426_p9 = pnand %p7425_p8, %p7419_p5 }
  0x16   :  { %7429 = shalt.err (!%p7426_p9)
}
  0x17   :  { %24 = dma.hbm_to_vmem [thread:$0]  %s14686_s0, 3584, %s19_s18, [#allocation3], %s7500_s20, %s7500_s20, %s7501_s21  }
  0x18   :  { %s7502_s27 = smov [#allocation7]  }
  0x19   :  { %s42_s28 = sshll.u32 %s7502_s27, 4  ;;  %s43_s28 = int_to_ptr.vmem [resolvable:$true] %s42_s28 }
  0x1a   :  { %s7438_s29 = scalar_lea.vmem %s43_s28, 14336  ;;  %p7443_p11 = scmp.lt.s32.totalorder %s43_s28, %s43_s28 }
  0x1b   :  { %p7439_p10 = scmp.ne.s32.totalorder %s43_s28, %s7438_s29  ;;  %p7444_p12 = scmp.lt.s32.totalorder %s7438_s29, %s7438_s29 }
  0x1d   :  { %p7445_p13 = por %p7444_p12, %p7443_p11 }
  0x1f   :  { %p7446_p0 = pnand %p7445_p13, %p7439_p10 }
  0x21   :  { %7449 = shalt.err (!%p7446_p0)
}
  0x22   :  { %s7503_s1 = smov 256   ;;  %s7504_s30 = smov 16  }
  0x23   :  { %48 = dma.hbm_to_vmem [thread:$0]  %s14688_s2, 14336, %s43_s28, [#allocation6], %s7503_s1, %s7503_s1, %s7504_s30  }
  0x24   :  { %s7505_s7 = smov [#allocation8]  }
  0x25   :  { %s54_s8 = sshll.u32 %s7505_s7, 4  ;;  %s55_s8 = int_to_ptr.vmem [resolvable:$true] %s54_s8 }
  0x26   :  { %s7458_s0 = scalar_lea.vmem %s55_s8, 7168  ;;  %p7463_p2 = scmp.lt.s32.totalorder %s55_s8, %s55_s8 }
  0x27   :  { %p7459_p1 = scmp.ne.s32.totalorder %s55_s8, %s7458_s0  ;;  %p7464_p3 = scmp.lt.s32.totalorder %s7458_s0, %s7458_s0 }
  0x29   :  { %p7465_p4 = por %p7464_p3, %p7463_p2 }
  0x2b   :  { %p7466_p5 = pnand %p7465_p4, %p7459_p1 }
  0x2d   :  { %7469 = shalt.err (!%p7466_p5)
}
  0x2e   :  { %60 = dma.hbm_to_vmem [thread:$0]  %s14689_s3, 7168, %s55_s8, [#allocation9], %s7503_s1, %s7503_s1, %s7504_s30  }
  0x2f   :  { %7490 = dma.done.wait [#allocation3], 3584  }
  0x30   :  { %7491 = vsyncadd [#allocation3], 4294963712 }
  0x31   :  { %7492 = dma.done.wait [#allocation6], 17920  }
  0x32   :  { %7493 = vsyncadd [#allocation6], 4294949376 }
  0x33   :  { %7494 = dma.done.wait [#allocation9], 7168  }
  0x34   :  { %7495 = vsyncadd [#allocation9], 4294960128  ;;  %v7547_v0 = vld [vmem:[#allocation7 + $0xe8] sm:$0xff]  ;;  %v7549_v1 = vld [vmem:[#allocation7 + $0xf8] sm:$0xff]  ;;  %v14716_v13 = vmov 1.0|1.0  }
  0x35   :  { %15659 = vst [vmem:[#allocation15_spill] sm:$0xff] %v7547_v0  ;;  %15660 = vst [vmem:[#allocation16_spill] sm:$0xff] %v7549_v1  ;;  %v272_v2 = vld [vmem:[#allocation7 + $0x2a8] sm:$0xff]  ;;  %v274_v3 = vld [vmem:[#allocation7 + $0x2b8] sm:$0xff]  ;;  %s7509_s2 = smov [#allocation10]  }
  0x36   :  { %v7552_v4 = vmax.f32 %v7547_v0, %v272_v2  ;;  %v7554_v5 = vld [vmem:[#allocation7 + $0xe0] sm:$0xff]  ;;  %v7556_v6 = vld [vmem:[#allocation7 + $0xf0] sm:$0xff]  ;;  %v7559_v7 = vmax.f32 %v7549_v1, %v274_v3  ;;  %v7577_v12 = vld [vmem:[#allocation7 + $0xc8] sm:$0xff]  ;;  %s5782_s3 = sshll.u32 %s7509_s2, 4  ;;  %s5783_s3 = int_to_ptr.vmem [resolvable:$true] %s5782_s3 }
  0x37   :  { %15662 = vst [vmem:[#allocation18_spill] sm:$0xff] %v7554_v5  ;;  %15663 = vst [vmem:[#allocation19_spill] sm:$0xff] %v7556_v6  ;;  %v271_v8 = vld [vmem:[#allocation7 + $0x2a0] sm:$0xff]  ;;  %v273_v9 = vld [vmem:[#allocation7 + $0x2b0] sm:$0xff]  ;;  %s7470_s11 = scalar_lea.vmem %s5783_s3, 16  ;;  %s7474_s12 = scalar_lea.vmem %s5783_s3, 32 }
  0x38   :  { %15661 = vst [vmem:[#allocation17_spill] sm:$0xff] %v7552_v4  ;;  %15664 = vst [vmem:[#allocation20_spill] sm:$0xff] %v7559_v7  ;;  %vm14992_vm0 = vcmp.eq.f32.partialorder %v7547_v0, %v7552_v4  ;;  %v7564_v10 = vmax.f32 %v7554_v5, %v271_v8  ;;  %vm14991_vm1 = vcmp.eq.f32.partialorder %v7549_v1, %v7559_v7  ;;  %v7580_v14 = vld [vmem:[#allocation7 + $0xd8] sm:$0xff]  ;;  %v268_v15 = vld [vmem:[#allocation7 + $0x288] sm:$0xff]  ;;  %v15869_v1 = vmov 0  ;;  %p7471_p6 = scmp.ne.s32.totalorder %s5783_s3, %s7470_s11  ;;  %p7475_p7 = scmp.lt.s32.totalorder %s5783_s3, %s5783_s3 }
  0x39   :  { %v7569_v11 = vmax.f32 %v7556_v6, %v273_v9  ;;  %vm5933_vm2 = vmpackc.low %vm14991_vm1, %vm14992_vm0  ;;  %15667 = vst [vmem:[#allocation23_spill] sm:$0xff] %v7577_v12  ;;  %v270_v16 = vld [vmem:[#allocation7 + $0x298] sm:$0xff]  ;;  %v7586_v17 = vld [vmem:[#allocation7 + $0xc0] sm:$0xff]  ;;  %v7595_v19 = vmax.f32 %v7577_v12, %v268_v15  ;;  %p7476_p8 = scmp.lt.s32.totalorder %s7474_s12, %s7470_s11 }
  0x3a   :  { %15665 = vst [vmem:[#allocation21_spill] sm:$0xff] %v7564_v10  ;;  %5934 = vmatprep.subr.msk.bf16.mxu0 %vm5933_vm2, %v14716_v13  ;;  %15668 = vst [vmem:[#allocation24_spill] sm:$0xff] %v7580_v14  ;;  %vm15039_vm3 = vcmp.eq.f32.partialorder %v7554_v5, %v7564_v10  ;;  %v267_v18 = vld [vmem:[#allocation7 + $0x280] sm:$0xff]  ;;  %v7598_v20 = vmax.f32 %v7580_v14, %v270_v16  ;;  %v7600_v21 = vld [vmem:[#allocation7 + $0xd0] sm:$0xff] }
  0x3b   :  { %15666 = vst [vmem:[#allocation22_spill] sm:$0xff] %v7569_v11  ;;  %vm15004_vm4 = vcmp.eq.f32.partialorder %v7556_v6, %v7569_v11  ;;  %15669 = vst [vmem:[#allocation25_spill] sm:$0xff] %v7586_v17  ;;  %v269_v22 = vld [vmem:[#allocation7 + $0x290] sm:$0xff]  ;;  %v7604_v23 = vmax.f32 %v7586_v17, %v267_v18  ;;  %v7606_v24 = vld [vmem:[#allocation7 + $0xa8] sm:$0xff]  ;;  %vm15003_vm6 = vcmp.eq.f32.partialorder %v7577_v12, %v7595_v19  ;;  %p7477_p9 = por %p7476_p8, %p7475_p7 }
  0x3c   :  { %vm5935_vm5 = vmpackc.low %vm15004_vm4, %vm15039_vm3  ;;  %15670 = vst [vmem:[#allocation26_spill] sm:$0xff] %v7595_v19  ;;  %vm14865_vm7 = vcmp.eq.f32.partialorder %v7580_v14, %v7598_v20  ;;  %v7613_v25 = vmax.f32 %v7600_v21, %v269_v22  ;;  %v7615_v26 = vld [vmem:[#allocation7 + $0xb8] sm:$0xff]  ;;  %v264_v27 = vld [vmem:[#allocation7 + $0x268] sm:$0xff] }
  0x3d   :  { %15671 = vst [vmem:[#allocation27_spill] sm:$0xff] %v7598_v20  ;;  %15672 = vst [vmem:[#allocation28_spill] sm:$0xff] %v7600_v21  ;;  %5936 = vmatpush1.bf16.msk.msra.mxu0 %vm5935_vm5, %v14716_v13  ;;  %v266_v28 = vld [vmem:[#allocation7 + $0x278] sm:$0xff]  ;;  %vm14864_vm9 = vcmp.eq.f32.partialorder %v7586_v17, %v7604_v23  ;;  %v7627_v29 = vmax.f32 %v7606_v24, %v264_v27  ;;  %v7640_v31 = vld [vmem:[#allocation7 + $0xa0] sm:$0xff]  ;;  %p7478_p10 = pnand %p7477_p9, %p7471_p6 }
  0x3e   :  { %15673 = vst [vmem:[#allocation29_spill] sm:$0xff] %v7604_v23  ;;  %15674 = vst [vmem:[#allocation30_spill] sm:$0xff] %v7606_v24  ;;  %v7630_v30 = vmax.f32 %v7615_v26, %v266_v28  ;;  %vm14857_vm10 = vcmp.eq.f32.partialorder %v7600_v21, %v7613_v25  ;;  %v7643_v32 = vld [vmem:[#allocation7 + $0xb0] sm:$0xff]  ;;  %v263_v33 = vld [vmem:[#allocation7 + $0x260] sm:$0xff] }
  0x3f   :  { %15675 = vst [vmem:[#allocation31_spill] sm:$0xff] %v7613_v25  ;;  %15676 = vst [vmem:[#allocation32_spill] sm:$0xff] %v7615_v26  ;;  %v265_v34 = vld [vmem:[#allocation7 + $0x270] sm:$0xff]  ;;  %vm14852_vm12 = vcmp.eq.f32.partialorder %v7606_v24, %v7627_v29  ;;  %v7655_v35 = vld [vmem:[#allocation7 + $0x88] sm:$0xff]  ;;  %v7659_v37 = vmax.f32 %v7640_v31, %v263_v33 }
  0x40   :  { %vm5937_vm8 = vmpackc.low %vm14865_vm7, %vm15003_vm6  ;;  %15677 = vst [vmem:[#allocation33_spill] sm:$0xff] %v7627_v29  ;;  %vm14733_vm13 = vcmp.eq.f32.partialorder %v7615_v26, %v7630_v30  ;;  %v260_v36 = vld [vmem:[#allocation7 + $0x248] sm:$0xff]  ;;  %v7662_v38 = vmax.f32 %v7643_v32, %v265_v34  ;;  %v7664_v39 = vld [vmem:[#allocation7 + $0x98] sm:$0xff] }
  0x41   :  { %5938 = vmatprep.subr.msk.bf16.mxu0 %vm5937_vm8, %v14716_v13  ;;  %15678 = vst [vmem:[#allocation34_spill] sm:$0xff] %v7630_v30  ;;  %vm5939_vm11 = vmpackc.low %vm14857_vm10, %vm14864_vm9  ;;  %v262_v40 = vld [vmem:[#allocation7 + $0x258] sm:$0xff]  ;;  %v7667_v41 = vmax.f32 %v7655_v35, %v260_v36  ;;  %v7669_v42 = vld [vmem:[#allocation7 + $0x80] sm:$0xff]  ;;  %vm14702_vm15 = vcmp.eq.f32.partialorder %v7640_v31, %v7659_v37 }
  0x42   :  { %15679 = vst [vmem:[#allocation35_spill] sm:$0xff] %v7640_v31  ;;  %5940 = vmatpush1.bf16.msk.msra.mxu0 %vm5939_vm11, %v14716_v13  ;;  %15680 = vst [vmem:[#allocation36_spill] sm:$0xff] %v7643_v32  ;;  %vm14691_vm2 = vcmp.eq.f32.partialorder %v7643_v32, %v7662_v38  ;;  %v7676_v43 = vmax.f32 %v7664_v39, %v262_v40  ;;  %v7678_v44 = vld [vmem:[#allocation7 + $0x90] sm:$0xff]  ;;  %v259_v45 = vld [vmem:[#allocation7 + $0x240] sm:$0xff] }
  0x43   :  { %vm5941_vm14 = vmpackc.low %vm14733_vm13, %vm14852_vm12  ;;  %15681 = vst [vmem:[#allocation37_spill] sm:$0xff] %v7655_v35  ;;  %v261_v46 = vld [vmem:[#allocation7 + $0x250] sm:$0xff]  ;;  %vm14695_vm8 = vcmp.eq.f32.partialorder %v7655_v35, %v7667_v41  ;;  %v7690_v47 = vmax.f32 %v7669_v42, %v259_v45  ;;  %v7703_v49 = vld [vmem:[#allocation7 + $0x68] sm:$0xff] }
  0x44   :  { %5942 = vmatprep.subr.msk.bf16.mxu0 %vm5941_vm14, %v14716_v13  ;;  %15682 = vst [vmem:[#allocation38_spill] sm:$0xff] %v7659_v37  ;;  %15683 = vst [vmem:[#allocation39_spill] sm:$0xff] %v7662_v38  ;;  %v7693_v48 = vmax.f32 %v7678_v44, %v261_v46  ;;  %vm14692_vm11 = vcmp.eq.f32.partialorder %v7664_v39, %v7676_v43  ;;  %v7706_v50 = vld [vmem:[#allocation7 + $0x78] sm:$0xff]  ;;  %v256_v51 = vld [vmem:[#allocation7 + $0x228] sm:$0xff] }
  0x45   :  { %15684 = vst [vmem:[#allocation40_spill] sm:$0xff] %v7664_v39  ;;  %15685 = vst [vmem:[#allocation41_spill] sm:$0xff] %v7667_v41  ;;  %v258_v52 = vld [vmem:[#allocation7 + $0x238] sm:$0xff]  ;;  %v7718_v53 = vld [vmem:[#allocation7 + $0x60] sm:$0xff]  ;;  %v7722_v55 = vmax.f32 %v7703_v49, %v256_v51 }
  0x46   :  { %15686 = vst [vmem:[#allocation42_spill] sm:$0xff] %v7669_v42  ;;  %15687 = vst [vmem:[#allocation43_spill] sm:$0xff] %v7676_v43  ;;  %v255_v54 = vld [vmem:[#allocation7 + $0x220] sm:$0xff]  ;;  %v7725_v56 = vmax.f32 %v7706_v50, %v258_v52  ;;  %v7727_v57 = vld [vmem:[#allocation7 + $0x70] sm:$0xff] }
  0x47   :  { %15688 = vst [vmem:[#allocation44_spill] sm:$0xff] %v7678_v44  ;;  %vm5943_vm5 = vmpackc.low %vm14691_vm2, %vm14702_vm15  ;;  %vm14693_vm2 = vcmp.eq.f32.partialorder %v7678_v44, %v7693_v48  ;;  %v257_v58 = vld [vmem:[#allocation7 + $0x230] sm:$0xff]  ;;  %v7730_v59 = vmax.f32 %v7718_v53, %v255_v54  ;;  %v7732_v60 = vld [vmem:[#allocation7 + $0x48] sm:$0xff] }
  0x48   :  { %5944 = vmatpush1.bf16.msk.msra.mxu0 %vm5943_vm5, %v14716_v13  ;;  %15689 = vst [vmem:[#allocation45_spill] sm:$0xff] %v7690_v47  ;;  %15690 = vst [vmem:[#allocation46_spill] sm:$0xff] %v7693_v48  ;;  %vm14694_vm5 = vcmp.eq.f32.partialorder %v7669_v42, %v7690_v47  ;;  %v7739_v61 = vmax.f32 %v7727_v57, %v257_v58  ;;  %v7741_v62 = vld [vmem:[#allocation7 + $0x58] sm:$0xff]  ;;  %v252_v63 = vld [vmem:[#allocation7 + $0x208] sm:$0xff] }
  0x49   :  { %vm5945_vm14 = vmpackc.low %vm14692_vm11, %vm14695_vm8  ;;  %15691 = vst [vmem:[#allocation47_spill] sm:$0xff] %v7703_v49  ;;  %v254_v2 = vld [vmem:[#allocation7 + $0x218] sm:$0xff]  ;;  %v7753_v3 = vmax.f32 %v7732_v60, %v252_v63  ;;  %v7766_v9 = vld [vmem:[#allocation7 + $0x40] sm:$0xff] }
  0x4a   :  { %5946 = vmatprep.subr.msk.bf16.mxu0 %vm5945_vm14, %v14716_v13  ;;  %15692 = vst [vmem:[#allocation48_spill] sm:$0xff] %v7706_v50  ;;  %vm5947_vm11 = vmpackc.low %vm14693_vm2, %vm14694_vm5  ;;  %vm14697_vm14 = vcmp.eq.f32.partialorder %v7703_v49, %v7722_v55  ;;  %vm14701_vm5 = vcmp.eq.f32.partialorder %v7718_v53, %v7730_v59  ;;  %v7756_v8 = vmax.f32 %v7741_v62, %v254_v2  ;;  %v7769_v15 = vld [vmem:[#allocation7 + $0x50] sm:$0xff]  ;;  %v251_v16 = vld [vmem:[#allocation7 + $0x200] sm:$0xff] }
  0x4b   :  { %15693 = vst [vmem:[#allocation49_spill] sm:$0xff] %v7718_v53  ;;  %15694 = vst [vmem:[#allocation50_spill] sm:$0xff] %v7722_v55  ;;  %vm14698_vm8 = vcmp.eq.f32.partialorder %v7727_v57, %v7739_v61  ;;  %v253_v18 = vld [vmem:[#allocation7 + $0x210] sm:$0xff]  ;;  %v7781_v22 = vld [vmem:[#allocation7 + $0x28] sm:$0xff]  ;;  %v7785_v28 = vmax.f32 %v7766_v9, %v251_v16 }
  0x4c   :  { %5948 = vmatpush1.bf16.msk.msra.mxu0 %vm5947_vm11, %v14716_v13  ;;  %15695 = vst [vmem:[#allocation51_spill] sm:$0xff] %v7725_v56  ;;  %15696 = vst [vmem:[#allocation52_spill] sm:$0xff] %v7727_v57  ;;  %vm14696_vm11 = vcmp.eq.f32.partialorder %v7706_v50, %v7725_v56  ;;  %v248_v27 = vld [vmem:[#allocation7 + $0x1e8] sm:$0xff]  ;;  %v7788_v33 = vmax.f32 %v7769_v15, %v253_v18  ;;  %v7790_v34 = vld [vmem:[#allocation7 + $0x38] sm:$0xff] }
  0x4d   :  { %15697 = vst [vmem:[#allocation53_spill] sm:$0xff] %v7730_v59  ;;  %15698 = vst [vmem:[#allocation54_spill] sm:$0xff] %v7732_v60  ;;  %v250_v36 = vld [vmem:[#allocation7 + $0x1f8] sm:$0xff]  ;;  %v7792_v40 = vld [vmem:[#allocation7 + $0x20] sm:$0xff]  ;;  %v7795_v45 = vmax.f32 %v7781_v22, %v248_v27 }
  0x4e   :  { %15699 = vst [vmem:[#allocation55_spill] sm:$0xff] %v7739_v61  ;;  %15700 = vst [vmem:[#allocation56_spill] sm:$0xff] %v7741_v62  ;;  %v7797_v46 = vld [vmem:[#allocation7 + $0x30] sm:$0xff]  ;;  %v247_v51 = vld [vmem:[#allocation7 + $0x1e0] sm:$0xff]  ;;  %v7804_v52 = vmax.f32 %v7790_v34, %v250_v36 }
  0x4f   :  { %vm5949_vm2 = vmpackc.low %vm14696_vm11, %vm14697_vm14  ;;  %15701 = vst [vmem:[#allocation57_spill] sm:$0xff] %v7753_v3  ;;  %vm14699_vm14 = vcmp.eq.f32.partialorder %v7741_v62, %v7756_v8  ;;  %v249_v54 = vld [vmem:[#allocation7 + $0x1f0] sm:$0xff]  ;;  %v6645_v58 = vld [vmem:[#allocation2 + $0x4] ss:$8 sps:$4 sm:$0xff]   ;;  %v7817_v63 = vmax.f32 %v7792_v40, %v247_v51 }
  0x50   :  { %5950 = vmatprep.subr.msk.bf16.mxu0 %vm5949_vm2, %v14716_v13  ;;  %15702 = vst [vmem:[#allocation58_spill] sm:$0xff] %v7756_v8  ;;  %vm5951_vm11 = vmpackc.low %vm14698_vm8, %vm14701_vm5  ;;  %vm14700_vm2 = vcmp.eq.f32.partialorder %v7732_v60, %v7753_v3  ;;  %vm14724_vm5 = vcmp.eq.f32.partialorder %v7781_v22, %v7795_v45  ;;  %v7820_v2 = vmax.f32 %v7797_v46, %v249_v54  ;;  %v7830_v16 = vld [vmem:[#allocation7 + $0x8] sm:$0xff]  ;;  %v7833_v18 = vld [vmem:[#allocation7 + $0x18] sm:$0xff] }
  0x51   :  { %15703 = vst [vmem:[#allocation59_spill] sm:$0xff] %v7766_v9  ;;  %5952 = vmatpush1.bf16.msk.msra.mxu0 %vm5951_vm11, %v14716_v13  ;;  %15704 = vst [vmem:[#allocation60_spill] sm:$0xff] %v7769_v15  ;;  %vm15041_vm11 = vcmask 785408   ;;  %vm14705_vm15 = vcmp.eq.f32.partialorder %v7790_v34, %v7804_v52  ;;  %v244_v27 = vld [vmem:[#allocation7 + $0x1c8] sm:$0xff]  ;;  %v246_v36 = vld [vmem:[#allocation7 + $0x1d8] sm:$0xff] }
  0x52   :  { %vm5953_vm8 = vmpackc.low %vm14699_vm14, %vm14700_vm2  ;;  %15705 = vst [vmem:[#allocation61_spill] sm:$0xff] %v7781_v22  ;;  %vm14703_vm14 = vcmp.eq.f32.partialorder %v7769_v15, %v7788_v33  ;;  %5989 = vmatprep.mubr.msk.bf16.mxu0 %vm15041_vm11, %v6645_v58  ;;  %v7845_v51 = vld [vmem:[#allocation7] sm:$0xff]  ;;  %v7849_v58 = vmax.f32 %v7830_v16, %v244_v27  ;;  %v8786_v5 = vld [vmem:[#allocation2 + $0xd4] ss:$8 sps:$4 sm:$0xff]  }
  0x53   :  { %5954 = vmatprep.subr.msk.bf16.mxu0 %vm5953_vm8, %v14716_v13  ;;  %15706 = vst [vmem:[#allocation62_spill] sm:$0xff] %v7785_v28  ;;  %15707 = vst [vmem:[#allocation63_spill] sm:$0xff] %v7788_v33  ;;  %vm14704_vm8 = vcmp.eq.f32.partialorder %v7766_v9, %v7785_v28  ;;  %v243_v54 = vld [vmem:[#allocation7 + $0x1c0] sm:$0xff]  ;;  %v277_v33 = vld [vmem:[#allocation7 + $0x2d0] sm:$0xff] }
  0x54   :  { %15708 = vst [vmem:[#allocation64_spill] sm:$0xff] %v7790_v34  ;;  %15709 = vst [vmem:[#allocation65_spill] sm:$0xff] %v7792_v40  ;;  %v7852_v34 = vmax.f32 %v7833_v18, %v246_v36  ;;  %v296_v36 = vld [vmem:[#allocation7 + $0x368] sm:$0xff]  ;;  %v7887_v22 = vld [vmem:[#allocation7 + $0x1a0] sm:$0xff] }
  0x55   :  { %15710 = vst [vmem:[#allocation66_spill] sm:$0xff] %v7795_v45  ;;  %15711 = vst [vmem:[#allocation67_spill] sm:$0xff] %v7797_v46  ;;  %v245_v45 = vld [vmem:[#allocation7 + $0x1d0] sm:$0xff]  ;;  %v8624_v0 = vld [vmem:[#allocation5 + $0xc0] ss:$8 sps:$4 sm:$0xff]  }
  0x56   :  { %15712 = vst [vmem:[#allocation68_spill] sm:$0xff] %v7804_v52  ;;  %vm5955_vm2 = vmpackc.low %vm14703_vm14, %vm14704_vm8  ;;  %vm14721_vm14 = vcmp.eq.f32.partialorder %v7792_v40, %v7817_v63  ;;  %vm14720_vm8 = vcmp.eq.f32.partialorder %v7797_v46, %v7820_v2  ;;  %v7854_v52 = vld [vmem:[#allocation7 + $0x10] sm:$0xff]  ;;  %v7859_v40 = vld [vmem:[#allocation7 + $0x1a8] sm:$0xff] }
  0x57   :  { %5956 = vmatpush1.bf16.msk.msra.mxu0 %vm5955_vm2, %v14716_v13  ;;  %15713 = vst [vmem:[#allocation69_spill] sm:$0xff] %v7817_v63  ;;  %15714 = vst [vmem:[#allocation70_spill] sm:$0xff] %v7820_v2  ;;  %v7857_v63 = vmax.f32 %v7845_v51, %v243_v54  ;;  %v7866_v27 = vmax.f32 %v7854_v52, %v245_v45  ;;  %v298_v2 = vld [vmem:[#allocation7 + $0x378] sm:$0xff]  ;;  %v15725_v54 = vmov 1.0|1.0   ;;  %v7880_v46 = vmax.f32 %v7859_v40, %v296_v36  ;;  %v297_v36 = vld [vmem:[#allocation7 + $0x370] sm:$0xff] }
  0x58   :  { %vm5957_vm2 = vmpackc.low %vm14705_vm15, %vm14724_vm5  ;;  %15715 = vst [vmem:[#allocation71_spill] sm:$0xff] %v7830_v16 }
  0x59   :  { %5958 = vmatprep.subr.msk.bf16.mxu0 %vm5957_vm2, %v14716_v13  ;;  %15716 = vst [vmem:[#allocation72_spill] sm:$0xff] %v7833_v18  ;;  %vm5959_vm15 = vmpackc.low %vm14720_vm8, %vm14721_vm14  ;;  %vm14732_vm2 = vcmp.eq.f32.partialorder %v7830_v16, %v7849_v58  ;;  %vm14845_vm14 = vcmp.eq.f32.partialorder %v7845_v51, %v7857_v63  ;;  %vm14756_vm5 = vcmp.eq.f32.partialorder %v7854_v52, %v7866_v27 }
  0x5a   :  { %15717 = vst [vmem:[#allocation73_spill] sm:$0xff] %v7845_v51  ;;  %15718 = vst [vmem:[#allocation74_spill] sm:$0xff] %v7849_v58  ;;  %v7917_v51 = vld [vmem:[#allocation7 + $0x198] sm:$0xff] }
  0x5b   :  { %5960 = vmatpush1.bf16.msk.msra.mxu0 %vm5959_vm15, %v14716_v13  ;;  %15719 = vst [vmem:[#allocation75_spill] sm:$0xff] %v7852_v34  ;;  %15720 = vst [vmem:[#allocation76_spill] sm:$0xff] %v7854_v52  ;;  %vm14731_vm15 = vcmp.eq.f32.partialorder %v7833_v18, %v7852_v34  ;;  %v7868_v13 = vld [vmem:[#allocation7 + $0x1b8] sm:$0xff]  ;;  %v7895_v18 = vld [vmem:[#allocation7 + $0x1b0] sm:$0xff] }
  0x5c   :  { %15721 = vst [vmem:[#allocation77_spill] sm:$0xff] %v7857_v63  ;;  %15722 = vst [vmem:[#allocation78_spill] sm:$0xff] %v7859_v40  ;;  %v7883_v45 = vmax.f32 %v7868_v13, %v298_v2  ;;  %v295_v34 = vld [vmem:[#allocation7 + $0x360] sm:$0xff]  ;;  %v7908_v2 = vld [vmem:[#allocation7 + $0x188] sm:$0xff]  ;;  %v7915_v63 = vmax.f32 %v7895_v18, %v297_v36 }
  0x5d   :  { %15723 = vst [vmem:[#allocation79_spill] sm:$0xff] %v7866_v27  ;;  %15724 = vst [vmem:[#allocation80_spill] sm:$0xff] %v7868_v13  ;;  %v292_v27 = vld [vmem:[#allocation7 + $0x348] sm:$0xff]  ;;  %v7912_v52 = vmax.f32 %v7887_v22, %v295_v34  ;;  %v294_v58 = vld [vmem:[#allocation7 + $0x358] sm:$0xff] }
  0x5e   :  { %vm5961_vm8 = vmpackc.low %vm14731_vm15, %vm14732_vm2  ;;  %15726 = vst [vmem:[#allocation81_spill] sm:$0xff] %v7880_v46  ;;  %vm14753_vm15 = vcmp.eq.f32.partialorder %v7859_v40, %v7880_v46  ;;  %vm14752_vm2 = vcmp.eq.f32.partialorder %v7868_v13, %v7883_v45  ;;  %v7920_v46 = vmax.f32 %v7908_v2, %v292_v27  ;;  %v7922_v40 = vld [vmem:[#allocation7 + $0x180] sm:$0xff]  ;;  %v7931_v34 = vmax.f32 %v7917_v51, %v294_v58  ;;  %v293_v36 = vld [vmem:[#allocation7 + $0x350] sm:$0xff] }
  0x5f   :  { %5962 = vmatprep.subr.msk.bf16.mxu0 %vm5961_vm8, %v15725_v54  ;;  %15727 = vst [vmem:[#allocation82_spill] sm:$0xff] %v7883_v45  ;;  %15728 = vst [vmem:[#allocation83_spill] sm:$0xff] %v7887_v22  ;;  %v7924_v45 = vld [vmem:[#allocation7 + $0x190] sm:$0xff]  ;;  %v291_v13 = vld [vmem:[#allocation7 + $0x340] sm:$0xff] }
  0x60   :  { %vm5963_vm8 = vmpackc.low %vm14756_vm5, %vm14845_vm14  ;;  %15729 = vst [vmem:[#allocation84_spill] sm:$0xff] %v7895_v18  ;;  %v7943_v27 = vmax.f32 %v7922_v40, %v291_v13  ;;  %v7946_v16 = vmax.f32 %v7924_v45, %v293_v36  ;;  %vm14763_vm5 = vcmp.eq.f32.partialorder %v7917_v51, %v7931_v34  ;;  %v7956_v58 = vld [vmem:[#allocation7 + $0x168] sm:$0xff]  ;;  %v7971_v36 = vld [vmem:[#allocation7 + $0x160] sm:$0xff] }
  0x61   :  { %5964 = vmatpush1.bf16.msk.msra.mxu0 %vm5963_vm8, %v15725_v54  ;;  %vm5965_vm13 = vmpackc.low %vm14752_vm2, %vm14753_vm15  ;;  %15730 = vst [vmem:[#allocation85_spill] sm:$0xff] %v7908_v2  ;;  %vm14757_vm8 = vcmp.eq.f32.partialorder %v7895_v18, %v7915_v63  ;;  %vm14784_vm15 = vcmp.eq.f32.partialorder %v7908_v2, %v7920_v46  ;;  %v288_v13 = vld [vmem:[#allocation7 + $0x328] sm:$0xff]  ;;  %v290_v18 = vld [vmem:[#allocation7 + $0x338] sm:$0xff] }
  0x62   :  { %5966 = vmatprep.subr.msk.bf16.mxu0 %vm5965_vm13, %v15725_v54  ;;  %15731 = vst [vmem:[#allocation86_spill] sm:$0xff] %v7912_v52  ;;  %15732 = vst [vmem:[#allocation87_spill] sm:$0xff] %v7915_v63  ;;  %vm14762_vm13 = vcmp.eq.f32.partialorder %v7887_v22, %v7912_v52  ;;  %v7959_v63 = vld [vmem:[#allocation7 + $0x178] sm:$0xff]  ;;  %v7980_v2 = vld [vmem:[#allocation7 + $0x170] sm:$0xff] }
  0x63   :  { %15733 = vst [vmem:[#allocation88_spill] sm:$0xff] %v7917_v51  ;;  %15734 = vst [vmem:[#allocation89_spill] sm:$0xff] %v7920_v46  ;;  %v287_v51 = vld [vmem:[#allocation7 + $0x320] sm:$0xff]  ;;  %v7978_v46 = vmax.f32 %v7959_v63, %v290_v18  ;;  %v289_v52 = vld [vmem:[#allocation7 + $0x330] sm:$0xff] }
  0x64   :  { %15735 = vst [vmem:[#allocation90_spill] sm:$0xff] %v7922_v40  ;;  %15736 = vst [vmem:[#allocation91_spill] sm:$0xff] %v7924_v45  ;;  %v284_v18 = vld [vmem:[#allocation7 + $0x308] sm:$0xff] }
  0x65   :  { %15737 = vst [vmem:[#allocation92_spill] sm:$0xff] %v7931_v34  ;;  %vm5967_vm2 = vmpackc.low %vm14757_vm8, %vm14762_vm13  ;;  %vm14782_vm13 = vcmp.eq.f32.partialorder %v7924_v45, %v7946_v16  ;;  %v7975_v34 = vmax.f32 %v7956_v58, %v288_v13  ;;  %v7992_v13 = vmax.f32 %v7980_v2, %v289_v52  ;;  %v7994_v45 = vld [vmem:[#allocation7 + $0x158] sm:$0xff]  ;;  %v8076_v22 = vld [vmem:[#allocation7 + $0x108] sm:$0xff] }
  0x66   :  { %5968 = vmatpush2.bf16.msk.msra.mxu0 %vm5967_vm2, %v15725_v54  ;;  %15738 = vst [vmem:[#allocation93_spill] sm:$0xff] %v7943_v27  ;;  %15739 = vst [vmem:[#allocation94_spill] sm:$0xff] %v7946_v16  ;;  %vm14783_vm2 = vcmp.eq.f32.partialorder %v7922_v40, %v7943_v27  ;;  %v7983_v27 = vmax.f32 %v7971_v36, %v287_v51  ;;  %v7985_v40 = vld [vmem:[#allocation7 + $0x148] sm:$0xff]  ;;  %v286_v16 = vld [vmem:[#allocation7 + $0x318] sm:$0xff] }
  0x67   :  { %vm5969_vm8 = vmpackc.low %vm14763_vm5, %vm14784_vm15  ;;  %15740 = vst [vmem:[#allocation95_spill] sm:$0xff] %v7956_v58  ;;  %v8006_v51 = vmax.f32 %v7985_v40, %v284_v18  ;;  %v8009_v52 = vmax.f32 %v7994_v45, %v286_v16  ;;  %vm14793_vm15 = vcmp.eq.f32.partialorder %v7980_v2, %v7992_v13  ;;  %v283_v18 = vld [vmem:[#allocation7 + $0x300] sm:$0xff]  ;;  %v8034_v16 = vld [vmem:[#allocation7 + $0x128] sm:$0xff] }
  0x68   :  { %5970 = vmatprep.subr.msk.bf16.mxu0 %vm5969_vm8, %v15725_v54  ;;  %15741 = vst [vmem:[#allocation96_spill] sm:$0xff] %v7959_v63  ;;  %vm5971_vm5 = vmpackc.low %vm14782_vm13, %vm14783_vm2  ;;  %vm14792_vm8 = vcmp.eq.f32.partialorder %v7956_v58, %v7975_v34  ;;  %vm14814_vm2 = vcmp.eq.f32.partialorder %v7971_v36, %v7983_v27  ;;  %v285_v58 = vld [vmem:[#allocation7 + $0x310] sm:$0xff] }
  0x69   :  { %15742 = vst [vmem:[#allocation97_spill] sm:$0xff] %v7971_v36  ;;  %15743 = vst [vmem:[#allocation98_spill] sm:$0xff] %v7975_v34  ;;  %v282_v34 = vld [vmem:[#allocation7 + $0x2f8] sm:$0xff] }
  0x6a   :  { %5972 = vmatpush2.bf16.msk.msra.mxu0 %vm5971_vm5, %v15725_v54  ;;  %15744 = vst [vmem:[#allocation99_spill] sm:$0xff] %v7978_v46  ;;  %15745 = vst [vmem:[#allocation100_spill] sm:$0xff] %v7980_v2  ;;  %vm14785_vm5 = vcmp.eq.f32.partialorder %v7959_v63, %v7978_v46  ;;  %v8019_v63 = vld [vmem:[#allocation7 + $0x140] sm:$0xff]  ;;  %v8021_v46 = vld [vmem:[#allocation7 + $0x150] sm:$0xff] }
  0x6b   :  { %15746 = vst [vmem:[#allocation101_spill] sm:$0xff] %v7983_v27  ;;  %15747 = vst [vmem:[#allocation102_spill] sm:$0xff] %v7985_v40  ;;  %v280_v2 = vld [vmem:[#allocation7 + $0x2e8] sm:$0xff]  ;;  %v8041_v36 = vmax.f32 %v8021_v46, %v285_v58  ;;  %v8043_v27 = vld [vmem:[#allocation7 + $0x138] sm:$0xff] }
  0x6c   :  { %15748 = vst [vmem:[#allocation103_spill] sm:$0xff] %v7992_v13  ;;  %15749 = vst [vmem:[#allocation104_spill] sm:$0xff] %v7994_v45  ;;  %v8038_v13 = vmax.f32 %v8019_v63, %v283_v18  ;;  %v8055_v18 = vmax.f32 %v8043_v27, %v282_v34  ;;  %v279_v58 = vld [vmem:[#allocation7 + $0x2e0] sm:$0xff] }
  0x6d   :  { %vm5973_vm13 = vmpackc.low %vm14785_vm5, %vm14792_vm8  ;;  %15750 = vst [vmem:[#allocation105_spill] sm:$0xff] %v8006_v51  ;;  %vm14812_vm8 = vcmp.eq.f32.partialorder %v7994_v45, %v8009_v52  ;;  %v8057_v45 = vld [vmem:[#allocation7 + $0x130] sm:$0xff] }
  0x6e   :  { %5974 = vmatprep.subr.msk.bf16.mxu0 %vm5973_vm13, %v15725_v54  ;;  %15751 = vst [vmem:[#allocation106_spill] sm:$0xff] %v8009_v52  ;;  %vm5975_vm5 = vmpackc.low %vm14793_vm15, %vm14814_vm2  ;;  %vm14813_vm13 = vcmp.eq.f32.partialorder %v7985_v40, %v8006_v51  ;;  %v8046_v40 = vmax.f32 %v8034_v16, %v280_v2  ;;  %v8048_v51 = vld [vmem:[#allocation7 + $0x120] sm:$0xff]  ;;  %v281_v52 = vld [vmem:[#allocation7 + $0x2f0] sm:$0xff]  ;;  %vm14829_vm2 = vcmp.eq.f32.partialorder %v8043_v27, %v8055_v18 }
  0x6f   :  { %15752 = vst [vmem:[#allocation107_spill] sm:$0xff] %v8019_v63  ;;  %15753 = vst [vmem:[#allocation108_spill] sm:$0xff] %v8021_v46  ;;  %5976 = vmatpush2.bf16.msk.msra.mxu0 %vm5975_vm5, %v15725_v54  ;;  %vm14824_vm5 = vcmp.eq.f32.partialorder %v8019_v63, %v8038_v13  ;;  %v8069_v2 = vmax.f32 %v8048_v51, %v279_v58  ;;  %v8072_v34 = vmax.f32 %v8057_v45, %v281_v52  ;;  %v8078_v63 = vld [vmem:[#allocation7 + $0x118] sm:$0xff]  ;;  %v8087_v52 = vld [vmem:[#allocation7 + $0x100] sm:$0xff] }
  0x70   :  { %vm5977_vm15 = vmpackc.low %vm14812_vm8, %vm14813_vm13  ;;  %15754 = vst [vmem:[#allocation109_spill] sm:$0xff] %v8034_v16  ;;  %vm14844_vm13 = vcmp.eq.f32.partialorder %v8034_v16, %v8046_v40  ;;  %v275_v58 = vld [vmem:[#allocation7 + $0x2c0] sm:$0xff] }
  0x71   :  { %5978 = vmatprep.subr.msk.bf16.mxu0 %vm5977_vm15, %v15725_v54  ;;  %15755 = vst [vmem:[#allocation110_spill] sm:$0xff] %v8038_v13  ;;  %15756 = vst [vmem:[#allocation111_spill] sm:$0xff] %v8041_v36  ;;  %vm14823_vm15 = vcmp.eq.f32.partialorder %v8021_v46, %v8041_v36  ;;  %v276_v36 = vld [vmem:[#allocation7 + $0x2c8] sm:$0xff]  ;;  %v278_v46 = vld [vmem:[#allocation7 + $0x2d8] sm:$0xff]  ;;  %v8113_v15 = vmax.f32 %v8087_v52, %v275_v58 }
  0x72   :  { %15757 = vst [vmem:[#allocation112_spill] sm:$0xff] %v8043_v27  ;;  %15758 = vst [vmem:[#allocation113_spill] sm:$0xff] %v8046_v40  ;;  %v8093_v13 = vld [vmem:[#allocation7 + $0x110] sm:$0xff]  ;;  %v8101_v27 = vld [vmem:[#allocation8 + $0xe8] sm:$0xff]  ;;  %v8107_v16 = vmax.f32 %v8076_v22, %v276_v36  ;;  %v8110_v40 = vmax.f32 %v8078_v63, %v278_v46 }
  0x73   :  { %15759 = vst [vmem:[#allocation114_spill] sm:$0xff] %v8048_v51  ;;  %15760 = vst [vmem:[#allocation115_spill] sm:$0xff] %v8055_v18  ;;  %v8103_v18 = vld [vmem:[#allocation8 + $0xf8] sm:$0xff]  ;;  %v8131_v46 = vld [vmem:[#allocation8 + $0xe0] sm:$0xff]  ;;  %vm14863_vm14 = vcmp.eq.f32.partialorder %v8087_v52, %v8113_v15 }
  0x74   :  { %15761 = vst [vmem:[#allocation116_spill] sm:$0xff] %v8057_v45  ;;  %vm5979_vm8 = vmpackc.low %vm14823_vm15, %vm14824_vm5  ;;  %vm14843_vm15 = vcmp.eq.f32.partialorder %v8048_v51, %v8069_v2  ;;  %vm14840_vm5 = vcmp.eq.f32.partialorder %v8057_v45, %v8072_v34  ;;  %v8120_v45 = vmax.f32 %v8093_v13, %v277_v33  ;;  %v8135_v33 = vld [vmem:[#allocation8 + $0xf0] sm:$0xff]  ;;  %v8137_v36 = vld [vmem:[#allocation8 + $0xc8] sm:$0xff]  ;;  %vm14872_vm12 = vcmp.eq.s32.totalorder %v8131_v46, 0 }
  0x75   :  { %5980 = vmatpush2.bf16.msk.msra.mxu0 %vm5979_vm8, %v15725_v54  ;;  %15762 = vst [vmem:[#allocation117_spill] sm:$0xff] %v8069_v2  ;;  %15763 = vst [vmem:[#allocation118_spill] sm:$0xff] %v8072_v34  ;;  %v8139_v58 = vld [vmem:[#allocation8 + $0xd8] sm:$0xff]  ;;  %vm14871_vm10 = vcmp.eq.s32.totalorder %v8135_v33, 0  ;;  %v8283_v34 = vld [vmem:[#allocation8 + $0x20] sm:$0xff] }
  0x76   :  { %15764 = vst [vmem:[#allocation119_spill] sm:$0xff] %v8076_v22  ;;  %15765 = vst [vmem:[#allocation120_spill] sm:$0xff] %v8078_v63  ;;  %v8285_v51 = vld [vmem:[#allocation8 + $0x30] sm:$0xff]  ;;  %v8301_v2 = vld [vmem:[#allocation5 + $0x64] ss:$8 sps:$4 sm:$0xff]  }
  0x77   :  { %vm5981_vm8 = vmpackc.low %vm14829_vm2, %vm14844_vm13  ;;  %15766 = vst [vmem:[#allocation121_spill] sm:$0xff] %v8087_v52  ;;  %vm14858_vm13 = vcmp.eq.s32.totalorder %v8103_v18, 0  ;;  %v8235_v52 = vld [vmem:[#allocation8 + $0x60] sm:$0xff] }
  0x78   :  { %5982 = vmatprep.subr.msk.bf16.mxu0 %vm5981_vm8, %v15725_v54  ;;  %15767 = vst [vmem:[#allocation122_spill] sm:$0xff] %v8093_v13  ;;  %vm5983_vm2 = vmpackc.low %vm14840_vm5, %vm14843_vm15  ;;  %vm14851_vm8 = vcmp.eq.f32.partialorder %v8076_v22, %v8107_v16  ;;  %vm14846_vm5 = vcmp.eq.f32.partialorder %v8078_v63, %v8110_v40  ;;  %vm14859_vm15 = vcmp.eq.s32.totalorder %v8101_v27, 0  ;;  %v8143_v63 = vld [vmem:[#allocation2] ss:$8 sps:$4 sm:$0xff]  }
  0x79   :  { %15768 = vst [vmem:[#allocation123_spill] sm:$0xff] %v8101_v27  ;;  %15769 = vst [vmem:[#allocation124_spill] sm:$0xff] %v8103_v18  ;;  %5984 = vmatpush2.bf16.msk.msra.mxu0 %vm5983_vm2, %v15725_v54  ;;  %v8158_v22 = vld [vmem:[#allocation8 + $0xc0] sm:$0xff]  ;;  %v8166_v18 = vld [vmem:[#allocation8 + $0xa8] sm:$0xff] }
  0x7a   :  { %15770 = vst [vmem:[#allocation125_spill] sm:$0xff] %v8107_v16  ;;  %15771 = vst [vmem:[#allocation126_spill] sm:$0xff] %v8110_v40  ;;  %v8149_v40 = vld [vmem:[#allocation2 + $0x14] ss:$8 sps:$4 sm:$0xff]   ;;  %vm14885_vm7 = vcmp.eq.s32.totalorder %v8166_v18, 0 }
  0x7b   :  { %15772 = vst [vmem:[#allocation127_spill] sm:$0xff] %v8113_v15  ;;  %15773 = vst [vmem:[#allocation128_spill] sm:$0xff] %v8120_v45  ;;  %v8160_v16 = vld [vmem:[#allocation8 + $0xd0] sm:$0xff]  ;;  %v8168_v27 = vld [vmem:[#allocation8 + $0xb8] sm:$0xff] }
  0x7c   :  { %vm5985_vm2 = vmpackc.low %vm14846_vm5, %vm14851_vm8  ;;  %15774 = vst [vmem:[#allocation129_spill] sm:$0xff] %v8131_v46  ;;  %vm14862_vm5 = vcmp.eq.f32.partialorder %v8093_v13, %v8120_v45  ;;  %vm14882_vm9 = vcmp.eq.s32.totalorder %v8160_v16, 0  ;;  %v8184_v13 = vld [vmem:[#allocation8 + $0xa0] sm:$0xff]  ;;  %v8186_v46 = vld [vmem:[#allocation8 + $0xb0] sm:$0xff] }
  0x7d   :  { %5986 = vmatprep.subr.msk.bf16.mxu0 %vm5985_vm2, %v15725_v54  ;;  %15775 = vst [vmem:[#allocation130_spill] sm:$0xff] %v8135_v33  ;;  %15776 = vst [vmem:[#allocation131_spill] sm:$0xff] %v8137_v36  ;;  %v8191_v33 = vld [vmem:[#allocation8 + $0x88] sm:$0xff]  ;;  %v8210_v45 = vld [vmem:[#allocation8 + $0x80] sm:$0xff] }
  0x7e   :  { %15777 = vst [vmem:[#allocation132_spill] sm:$0xff] %v8139_v58  ;;  %15778 = vst [vmem:[#allocation133_spill] sm:$0xff] %v8143_v63  ;;  %v8261_v15 = vld [vmem:[#allocation8 + $0x40] sm:$0xff] }
  0x7f   :  { %vm6101_vm2 = vmpackc.low %vm14858_vm13, %vm14859_vm15  ;;  %15779 = vst [vmem:[#allocation134_spill] sm:$0xff] %v8149_v40  ;;  %vm14875_vm13 = vcmp.eq.s32.totalorder %v8137_v36, 0  ;;  %vm14873_vm15 = vcmp.eq.s32.totalorder %v8139_v58, 0  ;;  %v8193_v58 = vld [vmem:[#allocation8 + $0x98] sm:$0xff] }
  0x80   :  { %vm5987_vm8 = vmpackc.low %vm14862_vm5, %vm14863_vm14  ;;  %15780 = vst [vmem:[#allocation135_spill] sm:$0xff] %v8158_v22  ;;  %vm14883_vm14 = vcmp.eq.s32.totalorder %v8158_v22, 0  ;;  %v8206_v36 = vld [vmem:[#allocation2 + $0x10] ss:$8 sps:$4 sm:$0xff]  }
  0x81   :  { %15781 = vst [vmem:[#allocation136_spill] sm:$0xff] %v8160_v16  ;;  %5988 = vmatpush2.bf16.msk.msra.mxu0 %vm5987_vm8, %v15725_v54  ;;  %15782 = vst [vmem:[#allocation137_spill] sm:$0xff] %v8166_v18  ;;  %v8212_v22 = vld [vmem:[#allocation8 + $0x90] sm:$0xff]  ;;  %v8215_v16 = vld [vmem:[#allocation2 + $0x24] ss:$8 sps:$4 sm:$0xff]  }
  0x82   :  { %15783 = vst [vmem:[#allocation138_spill] sm:$0xff] %v8168_v27  ;;  %6102 = vmatprep.subr.msk.bf16.mxu0 %vm6101_vm2, %v15725_v54  ;;  %vm6103_vm5 = vmpackc.low %vm14871_vm10, %vm14872_vm12  ;;  %vm14884_vm2 = vcmp.eq.s32.totalorder %v8168_v27, 0  ;;  %v8217_v27 = vld [vmem:[#allocation8 + $0x68] sm:$0xff]  ;;  %v8219_v18 = vld [vmem:[#allocation8 + $0x78] sm:$0xff] }
  0x83   :  { %vm6105_vm8 = vmpackc.low %vm14873_vm15, %vm14875_vm13  ;;  %15784 = vst [vmem:[#allocation139_spill] sm:$0xff] %v8184_v13  ;;  %vm14891_vm15 = vcmp.eq.s32.totalorder %v8186_v46, 0  ;;  %vm14895_vm13 = vcmp.eq.s32.totalorder %v8191_v33, 0 }
  0x84   :  { %1481 = vmatmul.mubr.bf16.vlgmr.msra.gmra.mxu0 %v8143_v63  ;;  %15785 = vst [vmem:[#allocation140_spill] sm:$0xff] %v8186_v46  ;;  %15786 = vst [vmem:[#allocation141_spill] sm:$0xff] %v8191_v33  ;;  %v8242_v46 = vld [vmem:[#allocation8 + $0x48] sm:$0xff]  ;;  %v8513_v63 = vld [vmem:[#allocation5 + $0x10] ss:$8 sps:$4 sm:$0xff]  }
  0x85   :  { %6104 = vmatpush1.bf16.msk.msra.mxu0 %vm6103_vm5, %v15725_v54  ;;  %5990 = vmatprep.mubr.msk.bf16.mxu0 %vm15041_vm11, %v8149_v40  ;;  %15787 = vst [vmem:[#allocation142_spill] sm:$0xff] %v8193_v58  ;;  %vm6107_vm10 = vmpackc.low %vm14882_vm9, %vm14883_vm14  ;;  %vm14892_vm5 = vcmp.eq.s32.totalorder %v8184_v13, 0  ;;  %v8237_v13 = vld [vmem:[#allocation8 + $0x70] sm:$0xff]  ;;  %v8257_v33 = vld [vmem:[#allocation2 + $0x20] ss:$8 sps:$4 sm:$0xff]   ;;  %v15872_v40 = vmov 0 }
  0x86   :  { %6106 = vmatprep.subr.msk.bf16.mxu0 %vm6105_vm8, %v15725_v54  ;;  %vm6109_vm12 = vmpackc.low %vm14884_vm2, %vm14885_vm7  ;;  %15788 = vst [vmem:[#allocation143_spill] sm:$0xff] %v8206_v36  ;;  %vm14893_vm8 = vcmp.eq.s32.totalorder %v8193_v58, 0  ;;  %vm14902_vm2 = vcmp.eq.s32.totalorder %v8212_v22, 0  ;;  %vm14909_vm7 = vcmp.eq.s32.totalorder %v8217_v27, 0  ;;  %v8244_v58 = vld [vmem:[#allocation8 + $0x58] sm:$0xff] }
  0x87   :  { %15789 = vst [vmem:[#allocation144_spill] sm:$0xff] %v8210_v45  ;;  %15790 = vst [vmem:[#allocation145_spill] sm:$0xff] %v8212_v22  ;;  %v8265_v22 = vld [vmem:[#allocation2 + $0x34] ss:$8 sps:$4 sm:$0xff]  }
  0x88   :  { %15791 = vst [vmem:[#allocation146_spill] sm:$0xff] %v8215_v16  ;;  %15792 = vst [vmem:[#allocation147_spill] sm:$0xff] %v8217_v27  ;;  %v8270_v27 = vld [vmem:[#allocation8 + $0x38] sm:$0xff] }
  0x89   :  { %6108 = vmatpush1.bf16.msk.msra.mxu0 %vm6107_vm10, %v15725_v54  ;;  %15793 = vst [vmem:[#allocation148_spill] sm:$0xff] %v8219_v18  ;;  %vm6111_vm9 = vmpackc.low %vm14891_vm15, %vm14892_vm5  ;;  %vm14903_vm10 = vcmp.eq.s32.totalorder %v8210_v45, 0  ;;  %v8263_v45 = vld [vmem:[#allocation8 + $0x50] sm:$0xff] }
  0x8a   :  { %6110 = vmatprep.subr.msk.bf16.mxu0 %vm6109_vm12, %v15725_v54  ;;  %vm6113_vm14 = vmpackc.low %vm14893_vm8, %vm14895_vm13  ;;  %vm14904_vm12 = vcmp.eq.s32.totalorder %v8219_v18, 0  ;;  %15794 = vst [vmem:[#allocation149_spill] sm:$0xff] %v8235_v52  ;;  %vm14917_vm8 = vcmp.eq.s32.totalorder %v8235_v52, 0  ;;  %vm14927_vm13 = vcmp.eq.s32.totalorder %v8242_v46, 0  ;;  %v8268_v18 = vld [vmem:[#allocation8 + $0x28] sm:$0xff] }
  0x8b   :  { %15795 = vst [vmem:[#allocation150_spill] sm:$0xff] %v8237_v13  ;;  %15796 = vst [vmem:[#allocation151_spill] sm:$0xff] %v8242_v46  ;;  %v8292_v52 = vld [vmem:[#allocation5 + $0x70] ss:$8 sps:$4 sm:$0xff]  }
  0x8c   :  { %1491 = vmatmul.mubr.bf16.gmra.mxu0 %v8206_v36  ;;  %15797 = vst [vmem:[#allocation152_spill] sm:$0xff] %v8244_v58  ;;  %vm6115_vm15 = vmpackc.low %vm14902_vm2, %vm14903_vm10  ;;  %v8299_v46 = vld [vmem:[#allocation8 + $0x18] sm:$0xff]  ;;  %v8351_v36 = vld [vmem:[#allocation8 + $0x1b0] sm:$0xff] }
  0x8d   :  { %5991 = vmatprep.mubr.msk.bf16.mxu0 %vm15041_vm11, %v8215_v16  ;;  %6112 = vmatpush1.bf16.msk.msra.mxu0 %vm6111_vm9, %v15725_v54  ;;  %vm6117_vm5 = vmpackc.low %vm14904_vm12, %vm14909_vm7  ;;  %vm14916_vm9 = vcmp.eq.s32.totalorder %v8237_v13, 0  ;;  %15798 = vst [vmem:[#allocation153_spill] sm:$0xff] %v8257_v33  ;;  %vm14928_vm12 = vcmp.eq.s32.totalorder %v8261_v15, 0  ;;  %vm14930_vm7 = vcmp.eq.s32.totalorder %v8270_v27, 0  ;;  %v8290_v13 = vld [vmem:[#allocation5 + $0x74] ss:$8 sps:$4 sm:$0xff]  }
  0x8e   :  { %6114 = vmatprep.subr.msk.bf16.mxu0 %vm6113_vm14, %v15725_v54  ;;  %vm14918_vm14 = vcmp.eq.s32.totalorder %v8244_v58, 0  ;;  %15799 = vst [vmem:[#allocation154_spill] sm:$0xff] %v8261_v15  ;;  %15800 = vst [vmem:[#allocation155_spill] sm:$0xff] %v8263_v45  ;;  %v8297_v58 = vld [vmem:[#allocation8 + $0x8] sm:$0xff]  ;;  %1831 = vmatprep.subr.bf16.mxu1 %v8290_v13  ;;  %v8324_v15 = vld [vmem:[#allocation8 + $0x10] sm:$0xff] }
  0x8f   :  { %15801 = vst [vmem:[#allocation156_spill] sm:$0xff] %v8265_v22  ;;  %15802 = vst [vmem:[#allocation157_spill] sm:$0xff] %v8268_v18  ;;  %1832 = vmatpush1.bf16.msra.mxu1 %v8292_v52  ;;  %v8349_v16 = vld [vmem:[#allocation8 + $0x1a0] sm:$0xff] }
  0x90   :  { %15803 = vst [vmem:[#allocation158_spill] sm:$0xff] %v8270_v27  ;;  %vm6119_vm2 = vmpackc.low %vm14916_vm9, %vm14917_vm8  ;;  %vm14940_vm8 = vcmp.eq.s32.totalorder %v8283_v34, 0  ;;  %1833 = vmatprep.subr.bf16.mxu1 %v8301_v2  ;;  %v8327_v27 = vld [vmem:[#allocation2 + $0x44] ss:$8 sps:$4 sm:$0xff]  }
  0x91   :  { %6116 = vmatpush1.bf16.msk.msra.mxu0 %vm6115_vm15, %v15725_v54  ;;  %vm6121_vm10 = vmpackc.low %vm14918_vm14, %vm14927_vm13  ;;  %vm14921_vm15 = vcmp.eq.s32.totalorder %v8263_v45, 0  ;;  %15804 = vst [vmem:[#allocation159_spill] sm:$0xff] %v8283_v34  ;;  %vm14933_vm14 = vcmp.eq.s32.totalorder %v8285_v51, 0  ;;  %v8322_v45 = vld [vmem:[#allocation8] sm:$0xff]  ;;  %v8359_v34 = vld [vmem:[#allocation5 + $0x50] ss:$8 sps:$4 sm:$0xff]  }
  0x92   :  { %6118 = vmatprep.subr.msk.bf16.mxu0 %vm6117_vm5, %v15725_v54  ;;  %15805 = vst [vmem:[#allocation160_spill] sm:$0xff] %v8285_v51  ;;  %vm14939_vm5 = vcmp.eq.s32.totalorder %v8268_v18, 0  ;;  %15806 = vst [vmem:[#allocation161_spill] sm:$0xff] %v8292_v52  ;;  %v8330_v18 = vld [vmem:[#allocation8 + $0x1a8] sm:$0xff]  ;;  %v8332_v52 = vld [vmem:[#allocation8 + $0x1b8] sm:$0xff] }
  0x93   :  { %15807 = vst [vmem:[#allocation162_spill] sm:$0xff] %v8297_v58  ;;  %15808 = vst [vmem:[#allocation163_spill] sm:$0xff] %v8299_v46  ;;  %v8357_v51 = vld [vmem:[#allocation5 + $0x54] ss:$8 sps:$4 sm:$0xff]  }
  0x94   :  { %1501 = vmatmul.mubr.bf16.gmra.mxu0 %v8257_v33  ;;  %15809 = vst [vmem:[#allocation164_spill] sm:$0xff] %v8301_v2  ;;  %vm6123_vm9 = vmpackc.low %vm14921_vm15, %vm14928_vm12  ;;  %v8318_v33 = vld [vmem:[#allocation2 + $0x30] ss:$8 sps:$4 sm:$0xff]   ;;  %vm14941_vm15 = vcmp.eq.s32.totalorder %v8299_v46, 0  ;;  %v8364_v46 = vld [vmem:[#allocation8 + $0x188] sm:$0xff] }
  0x95   :  { %5992 = vmatprep.mubr.msk.bf16.mxu0 %vm15041_vm11, %v8265_v22  ;;  %6120 = vmatpush1.bf16.msk.msra.mxu0 %vm6119_vm2, %v15725_v54  ;;  %vm6125_vm2 = vmpackc.low %vm14930_vm7, %vm14939_vm5  ;;  %v8316_v22 = vld [vmem:[#allocation5 + $0x60] ss:$8 sps:$4 sm:$0xff]   ;;  %15811 = vst [vmem:[#allocation166_spill] sm:$0xff] %v8318_v33  ;;  %vm14943_vm7 = vcmp.eq.s32.totalorder %v8324_v15, 0 }
  0x96   :  { %6122 = vmatprep.subr.msk.bf16.mxu0 %vm6121_vm10, %v15725_v54  ;;  %15810 = vst [vmem:[#allocation165_spill] sm:$0xff] %v8316_v22  ;;  %vm14952_vm10 = vcmp.eq.s32.totalorder %v8297_v58, 0  ;;  %15812 = vst [vmem:[#allocation167_spill] sm:$0xff] %v8322_v45  ;;  %1834 = vmatpush1.bf16.msra.mxu1 %v8316_v22  ;;  %v8366_v58 = vld [vmem:[#allocation8 + $0x198] sm:$0xff]  ;;  %v8368_v22 = vld [vmem:[#allocation5 + $0x44] ss:$8 sps:$4 sm:$0xff]  }
  0x97   :  { %15813 = vst [vmem:[#allocation168_spill] sm:$0xff] %v8324_v15  ;;  %15814 = vst [vmem:[#allocation169_spill] sm:$0xff] %v8327_v27  ;;  %1835 = vmatprep.subr.bf16.mxu1 %v8357_v51  ;;  %v8385_v2 = vld [vmem:[#allocation5 + $0x40] ss:$8 sps:$4 sm:$0xff]  }
  0x98   :  { %15815 = vst [vmem:[#allocation170_spill] sm:$0xff] %v8330_v18  ;;  %15816 = vst [vmem:[#allocation171_spill] sm:$0xff] %v8332_v52  ;;  %v8391_v15 = vld [vmem:[#allocation8 + $0x180] sm:$0xff] }
  0x99   :  { %6124 = vmatpush1.bf16.msk.msra.mxu0 %vm6123_vm9, %v15725_v54  ;;  %vm6127_vm13 = vmpackc.low %vm14933_vm14, %vm14940_vm8  ;;  %vm14989_vm9 = vcmp.eq.s32.totalorder %v8322_v45, 0  ;;  %15819 = vst [vmem:[#allocation172_spill] sm:$0xff] %v8349_v16  ;;  %vm14949_vm14 = vcmp.eq.s32.totalorder %v8332_v52, 0  ;;  %vm14961_vm8 = vcmp.eq.s32.totalorder %v8349_v16, 0  ;;  %v8396_v52 = vld [vmem:[#allocation2 + $0x54] ss:$8 sps:$4 sm:$0xff]  }
  0x9a   :  { %6126 = vmatprep.subr.msk.bf16.mxu0 %vm6125_vm2, %v15725_v54  ;;  %vm8343_vm12 = vmpackc.low %vm14941_vm15, %vm14952_vm10  ;;  %15820 = vst [vmem:[#allocation173_spill] sm:$0xff] %v8351_v36  ;;  %vm14950_vm2 = vcmp.eq.s32.totalorder %v8330_v18, 0  ;;  %vm14955_vm15 = vcmp.eq.s32.totalorder %v8351_v36, 0  ;;  %1836 = vmatpush1.bf16.msra.mxu1 %v8359_v34  ;;  %v8393_v18 = vld [vmem:[#allocation8 + $0x190] sm:$0xff]  ;;  %v8399_v45 = vld [vmem:[#allocation8 + $0x168] sm:$0xff] }
  0x9b   :  { %15821 = vst [vmem:[#allocation174_spill] sm:$0xff] %v8357_v51  ;;  %15822 = vst [vmem:[#allocation175_spill] sm:$0xff] %v8359_v34  ;;  %1837 = vmatprep.subr.bf16.mxu1 %v8368_v22  ;;  %v8401_v34 = vld [vmem:[#allocation8 + $0x178] sm:$0xff]  ;;  %vm14965_vm10 = vcmp.eq.s32.totalorder %v8393_v18, 0  ;;  %v8418_v51 = vld [vmem:[#allocation8 + $0x160] sm:$0xff] }
  0x9c   :  { %1511 = vmatmul.mubr.bf16.gmra.mxu0 %v8318_v33  ;;  %15823 = vst [vmem:[#allocation176_spill] sm:$0xff] %v8364_v46  ;;  %15824 = vst [vmem:[#allocation177_spill] sm:$0xff] %v8366_v58  ;;  %v8420_v33 = vld [vmem:[#allocation8 + $0x170] sm:$0xff] }
  0x9d   :  { %5993 = vmatprep.mubr.msk.bf16.mxu0 %vm15041_vm11, %v8327_v27  ;;  %6128 = vmatpush1.bf16.msk.msra.mxu0 %vm6127_vm13, %v15725_v54  ;;  %15825 = vst [vmem:[#allocation178_spill] sm:$0xff] %v8368_v22  ;;  %vm6131_vm5 = vmpackc.low %vm14943_vm7, %vm14989_vm9  ;;  %v8387_v27 = vld [vmem:[#allocation2 + $0x40] ss:$8 sps:$4 sm:$0xff]   ;;  %vm14962_vm7 = vcmp.eq.s32.totalorder %v8366_v58, 0  ;;  %v8426_v36 = vld [vmem:[#allocation5 + $0x34] ss:$8 sps:$4 sm:$0xff]  }
  0x9e   :  { %6130 = vmatprep.subr.msk.bf16.mxu0 %vm8343_vm12, %v15725_v54  ;;  %vm6133_vm13 = vmpackc.low %vm14949_vm14, %vm14950_vm2  ;;  %15826 = vst [vmem:[#allocation179_spill] sm:$0xff] %v8385_v2  ;;  %vm14963_vm12 = vcmp.eq.s32.totalorder %v8364_v46, 0  ;;  %1838 = vmatpush1.bf16.msra.mxu1 %v8385_v2  ;;  %v8428_v16 = vld [vmem:[#allocation5 + $0x30] ss:$8 sps:$4 sm:$0xff]   ;;  %v8433_v58 = vld [vmem:[#allocation8 + $0x148] sm:$0xff] }
  0x9f   :  { %15827 = vst [vmem:[#allocation180_spill] sm:$0xff] %v8387_v27  ;;  %15828 = vst [vmem:[#allocation181_spill] sm:$0xff] %v8391_v15  ;;  %v8435_v46 = vld [vmem:[#allocation8 + $0x158] sm:$0xff]  ;;  %v8437_v2 = vld [vmem:[#allocation5 + $0x24] ss:$8 sps:$4 sm:$0xff]   ;;  %1839 = vmatprep.subr.bf16.mxu1 %v8426_v36 }
  0xa0   :  { %15829 = vst [vmem:[#allocation182_spill] sm:$0xff] %v8393_v18  ;;  %15830 = vst [vmem:[#allocation183_spill] sm:$0xff] %v8396_v52  ;;  %v8454_v22 = vld [vmem:[#allocation5 + $0x20] ss:$8 sps:$4 sm:$0xff]  }
  0xa1   :  { %6132 = vmatpush1.bf16.msk.msra.mxu0 %vm6131_vm5, %v15725_v54  ;;  %15831 = vst [vmem:[#allocation184_spill] sm:$0xff] %v8399_v45  ;;  %15832 = vst [vmem:[#allocation185_spill] sm:$0xff] %v8401_v34  ;;  %vm14971_vm5 = vcmp.eq.s32.totalorder %v8391_v15, 0  ;;  %v8460_v18 = vld [vmem:[#allocation8 + $0x140] sm:$0xff]  ;;  %v8462_v15 = vld [vmem:[#allocation8 + $0x150] sm:$0xff] }
  0xa2   :  { %6134 = vmatprep.subr.msk.bf16.mxu0 %vm6133_vm13, %v15725_v54  ;;  %vm6135_vm14 = vmpackc.low %vm14955_vm15, %vm14961_vm8  ;;  %15835 = vst [vmem:[#allocation186_spill] sm:$0xff] %v8418_v51  ;;  %vm14980_vm13 = vcmp.eq.s32.totalorder %v8399_v45, 0  ;;  %vm14976_vm15 = vcmp.eq.s32.totalorder %v8401_v34, 0  ;;  %1840 = vmatpush1.bf16.msra.mxu1 %v8428_v16  ;;  %v8465_v34 = vld [vmem:[#allocation2 + $0x64] ss:$8 sps:$4 sm:$0xff]  }
  0xa3   :  { %vm8412_vm2 = vmpackc.low %vm14962_vm7, %vm14963_vm12  ;;  %15836 = vst [vmem:[#allocation187_spill] sm:$0xff] %v8420_v33  ;;  %vm14982_vm7 = vcmp.eq.s32.totalorder %v8418_v51, 0  ;;  %vm14979_vm12 = vcmp.eq.s32.totalorder %v8420_v33, 0  ;;  %1841 = vmatprep.subr.bf16.mxu1 %v8437_v2  ;;  %v8468_v45 = vld [vmem:[#allocation8 + $0x128] sm:$0xff]  ;;  %v8497_v51 = vld [vmem:[#allocation8 + $0x118] sm:$0xff] }
  0xa4   :  { %1521 = vmatmul.mubr.bf16.gmra.mxu0 %v8387_v27  ;;  %15837 = vst [vmem:[#allocation188_spill] sm:$0xff] %v8426_v36  ;;  %15838 = vst [vmem:[#allocation189_spill] sm:$0xff] %v8428_v16  ;;  %v8470_v16 = vld [vmem:[#allocation8 + $0x138] sm:$0xff]  ;;  %v8481_v27 = vld [vmem:[#allocation8 + $0x120] sm:$0xff] }
  0xa5   :  { %5994 = vmatprep.mubr.msk.bf16.mxu0 %vm15041_vm11, %v8396_v52  ;;  %6136 = vmatpush2.bf16.msk.msra.mxu0 %vm6135_vm14, %v15725_v54  ;;  %15839 = vst [vmem:[#allocation190_spill] sm:$0xff] %v8433_v58  ;;  %15840 = vst [vmem:[#allocation191_spill] sm:$0xff] %v8435_v46  ;;  %v8456_v52 = vld [vmem:[#allocation2 + $0x50] ss:$8 sps:$4 sm:$0xff]   ;;  %v8495_v33 = vld [vmem:[#allocation8 + $0x108] sm:$0xff] }
  0xa6   :  { %15841 = vst [vmem:[#allocation192_spill] sm:$0xff] %v8437_v2  ;;  %6138 = vmatprep.subr.msk.bf16.mxu0 %vm8412_vm2, %v15725_v54  ;;  %vm6139_vm8 = vmpackc.low %vm14965_vm10, %vm14971_vm5  ;;  %vm14986_vm2 = vcmp.eq.s32.totalorder %v8433_v58, 0  ;;  %vm14983_vm10 = vcmp.eq.s32.totalorder %v8435_v46, 0  ;;  %v8483_v2 = vld [vmem:[#allocation8 + $0x130] sm:$0xff]  ;;  %1842 = vmatpush1.bf16.msra.mxu1 %v8454_v22  ;;  %v8555_v36 = vld [vmem:[#allocation5] ss:$8 sps:$4 sm:$0xff]  }
  0xa7   :  { %vm6141_vm14 = vmpackc.low %vm14976_vm15, %vm14980_vm13  ;;  %15842 = vst [vmem:[#allocation193_spill] sm:$0xff] %v8454_v22  ;;  %vm14993_vm15 = vcmp.eq.s32.totalorder %v8462_v15, 0  ;;  %v8511_v58 = vld [vmem:[#allocation5 + $0x14] ss:$8 sps:$4 sm:$0xff]   ;;  %v8528_v22 = vld [vmem:[#allocation5 + $0x4] ss:$8 sps:$4 sm:$0xff]  }
  0xa8   :  { %15843 = vst [vmem:[#allocation194_spill] sm:$0xff] %v8460_v18  ;;  %15844 = vst [vmem:[#allocation195_spill] sm:$0xff] %v8462_v15  ;;  %1843 = vmatprep.subr.bf16.mxu1 %v8511_v58  ;;  %v8557_v15 = vld [vmem:[#allocation2 + $0x60] ss:$8 sps:$4 sm:$0xff]   ;;  %v8611_v46 = vld [vmem:[#allocation5 + $0xc4] ss:$8 sps:$4 sm:$0xff]  }
  0xa9   :  { %6140 = vmatpush2.bf16.msk.msra.mxu0 %vm6139_vm8, %v15725_v54  ;;  %15845 = vst [vmem:[#allocation196_spill] sm:$0xff] %v8468_v45  ;;  %15846 = vst [vmem:[#allocation197_spill] sm:$0xff] %v8470_v16 }
  0xaa   :  { %6142 = vmatprep.subr.msk.bf16.mxu0 %vm6141_vm14, %v15725_v54  ;;  %vm8477_vm5 = vmpackc.low %vm14979_vm12, %vm14982_vm7  ;;  %15849 = vst [vmem:[#allocation198_spill] sm:$0xff] %v8481_v27  ;;  %vm14998_vm14 = vcmp.eq.s32.totalorder %v8460_v18, 0  ;;  %vm15046_vm12 = vmmov 1   ;;  %vm15002_vm7 = vcmp.eq.s32.totalorder %v8468_v45, 0  ;;  %1844 = vmatpush1.bf16.msra.mxu1 %v8513_v63  ;;  %v8559_v18 = vld [vmem:[#allocation8 + $0x100] sm:$0xff]  ;;  %v8563_v45 = vld [vmem:[#allocation7 + $0x2a8] sm:$0xff] }
  0xab   :  { %15850 = vst [vmem:[#allocation199_spill] sm:$0xff] %v8483_v2  ;;  %vm8489_vm8 = vmpackc.low %vm14983_vm10, %vm14986_vm2  ;;  %vm15000_vm10 = vcmp.eq.s32.totalorder %v8470_v16, 0  ;;  %1845 = vmatprep.subr.bf16.mxu1 %v8528_v22  ;;  %v8568_v16 = vld [vmem:[#allocation2 + $0x74] ss:$8 sps:$4 sm:$0xff]  }
  0xac   :  { %15853 = vst [vmem:[#allocation200_spill] sm:$0xff] %v8495_v33  ;;  %15854 = vst [vmem:[#allocation201_spill] sm:$0xff] %v8497_v51  ;;  %1531 = vmatmul.mubr.bf16.gmra.mxu0 %v8456_v52 }
  0xad   :  { %vm8504_vm13 = vmxor %vm14992_vm0, %vm15046_vm12  ;;  %15857 = vst [vmem:[#allocation202_spill] sm:$0xff] %v8511_v58  ;;  %5995 = vmatprep.mubr.msk.bf16.mxu0 %vm15041_vm11, %v8465_v34  ;;  %6144 = vmatpush2.bf16.msk.msra.mxu0 %vm8477_vm5, %v15725_v54  ;;  %vm15005_vm0 = vcmp.eq.s32.totalorder %v8483_v2, 0  ;;  %v8561_v58 = vld [vmem:[#allocation8 + $0x110] sm:$0xff] }
  0xae   :  { %15858 = vst [vmem:[#allocation203_spill] sm:$0xff] %v8513_v63  ;;  %vm8519_vm2 = vmxor %vm14991_vm1, %vm15046_vm12  ;;  %6146 = vmatprep.subr.msk.bf16.mxu0 %vm8489_vm8, %v15725_v54  ;;  %vm15031_vm1 = vcmp.eq.s32.totalorder %v8481_v27, 0  ;;  %vm15036_vm8 = vcmp.eq.s32.totalorder %v8495_v33, 0  ;;  %v8577_v63 = vld [vmem:[#allocation7 + $0x2b8] sm:$0xff]  ;;  %vm15035_vm4 = vcmp.eq.s32.totalorder %v8561_v58, 0  ;;  %1846 = vmatpush1.bf16.msra.mxu1 %v8555_v36 }
  0xaf   :  { %vm8537_vm9 = vmpackc.low %vm14993_vm15, %vm14998_vm14  ;;  %vm15033_vm15 = vcmp.eq.s32.totalorder %v8497_v51, 0  ;;  %15865 = vst [vmem:[#allocation204_spill] sm:$0xff] %v8559_v18  ;;  %vm3443_vm14 = vcmp.eq.f32.partialorder %v8563_v45, %v7552_v4  ;;  %v8604_v2 = vld [vmem:[#allocation5 + $0xd4] ss:$8 sps:$4 sm:$0xff]   ;;  %v8606_v27 = vld [vmem:[#allocation5 + $0xd0] ss:$8 sps:$4 sm:$0xff]  }
  0xb0   :  { %vm8548_vm5 = vmpackc.low %vm15000_vm10, %vm15002_vm7  ;;  %15866 = vst [vmem:[#allocation205_spill] sm:$0xff] %v8561_v58  ;;  %vm3445_vm7 = vcmp.eq.f32.partialorder %v8577_v63, %v7559_v7  ;;  %1851 = vmatprep.subr.bf16.mxu1 %v8604_v2  ;;  %v8626_v51 = vld [vmem:[#allocation2 + $0x70] ss:$8 sps:$4 sm:$0xff]   ;;  %v8629_v33 = vld [vmem:[#allocation2 + $0x84] ss:$8 sps:$4 sm:$0xff]  }
  0xb1   :  { %15867 = vst [vmem:[#allocation206_spill] sm:$0xff] %v8563_v45  ;;  %6148 = vmatpush2.bf16.msk.msra.mxu0 %vm8537_vm9, %v15725_v54  ;;  %vm6151_vm10 = vmpackc.low %vm15005_vm0, %vm15031_vm1  ;;  %vm15037_vm9 = vcmp.eq.s32.totalorder %v8559_v18, 0  ;;  %v8641_v58 = vld [vmem:[#allocation5 + $0xa4] ss:$8 sps:$4 sm:$0xff]   ;;  %v8645_v18 = vld [vmem:[#allocation5 + $0xa0] ss:$8 sps:$4 sm:$0xff]   ;;  %vm15897_vm1 = vcmp.eq.f32.partialorder %v7580_v14, %v7598_v20 }
  0xb2   :  { %15868 = vst [vmem:[#allocation207_spill] sm:$0xff] %v8577_v63  ;;  %6150 = vmatprep.subr.msk.bf16.mxu0 %vm8548_vm5, %v15725_v54  ;;  %vm6153_vm6 = vmpackc.low %vm15033_vm15, %vm15036_vm8  ;;  %1852 = vmatpush2.bf16.msra.mxu1 %v8606_v27  ;;  %v8666_v63 = vld [vmem:[#allocation2 + $0xa4] ss:$8 sps:$4 sm:$0xff]   ;;  %v8683_v45 = vld [vmem:[#allocation2 + $0xb0] ss:$8 sps:$4 sm:$0xff]   ;;  %vm15900_vm8 = vcmp.eq.f32.partialorder %v7586_v17, %v7604_v23  ;;  %v15909_v17 = vmov 0 }
  0xb3   :  { %vm8592_vm0 = vmand %vm3443_vm14, %vm8504_vm13  ;;  %15875 = vst [vmem:[#allocation210_spill] sm:$0xff] %v8604_v2  ;;  %1853 = vmatprep.subr.bf16.mxu1 %v8611_v46  ;;  %vm15892_vm14 = vcmp.eq.f32.partialorder %v7577_v12, %v7595_v19  ;;  %v8712_v7 = vld [vmem:[#allocation7 + $0x2a0] sm:$0xff]  ;;  %v8726_v12 = vld [vmem:[#allocation7 + $0x288] sm:$0xff]  ;;  %v15936_v14 = vmov 0 }
  0xb4   :  { %v15870_v1 = vsel %vm8592_vm0, 4294967295, %v15869_v1  ;;  %1541 = vmatmul.mubr.bf16.gmra.mxu0 %v8557_v15  ;;  %vm8600_vm5 = vmand %vm3445_vm7, %vm8519_vm2  ;;  %15876 = vst [vmem:[#allocation211_spill] sm:$0xff] %v8606_v27  ;;  %v8654_v27 = vld [vmem:[#allocation5 + $0x94] ss:$8 sps:$4 sm:$0xff]   ;;  %vm3439_vm15 = vcmp.eq.f32.partialorder %v8726_v12, %v7595_v19  ;;  %v8788_v19 = vld [vmem:[#allocation7 + $0x268] sm:$0xff] }
  0xb5   :  { %15871 = vst [vmem:[#allocation208_spill] sm:$0xff] %v15870_v1  ;;  %v15873_v40 = vsel %vm8600_vm5, 4294967295, %v15872_v40  ;;  %5996 = vmatprep.mubr.msk.bf16.mxu0 %vm15041_vm11, %v8568_v16  ;;  %6152 = vmatpush2.bf16.msk.msra.mxu0 %vm6151_vm10, %v15725_v54  ;;  %15877 = vst [vmem:[#allocation212_spill] sm:$0xff] %v8611_v46  ;;  %v8637_v1 = vld [vmem:[#allocation5 + $0xb0] ss:$8 sps:$4 sm:$0xff]   ;;  %vm15889_vm10 = vcmp.eq.f32.partialorder %v7556_v6, %v7569_v11 }
  0xb6   :  { %15874 = vst [vmem:[#allocation209_spill] sm:$0xff] %v15873_v40  ;;  %6154 = vmatprep.subr.msk.bf16.mxu0 %vm6153_vm6, %v15725_v54  ;;  %vm6155_vm7 = vmpackc.low %vm15035_vm4, %vm15037_vm9  ;;  %1854 = vmatpush2.bf16.msra.mxu1 %v8624_v0  ;;  %v8635_v40 = vld [vmem:[#allocation5 + $0xb4] ss:$8 sps:$4 sm:$0xff]   ;;  %v8647_v46 = vld [vmem:[#allocation2 + $0x80] ss:$8 sps:$4 sm:$0xff]  }
  0xb7   :  { %vm6353_vm13 = vmpackc.low %vm8600_vm5, %vm8592_vm0  ;;  %15878 = vst [vmem:[#allocation213_spill] sm:$0xff] %v8624_v0  ;;  %1855 = vmatprep.subr.bf16.mxu1 %v8635_v40  ;;  %v8650_v0 = vld [vmem:[#allocation2 + $0x94] ss:$8 sps:$4 sm:$0xff]  }
  0xb8   :  { %15879 = vst [vmem:[#allocation214_spill] sm:$0xff] %v8635_v40  ;;  %15880 = vst [vmem:[#allocation215_spill] sm:$0xff] %v8637_v1  ;;  %v8658_v40 = vld [vmem:[#allocation5 + $0x90] ss:$8 sps:$4 sm:$0xff]  }
  0xb9   :  { %6156 = vmatpush2.bf16.msk.msra.mxu0 %vm6155_vm7, %v15725_v54  ;;  %15881 = vst [vmem:[#allocation216_spill] sm:$0xff] %v8641_v58  ;;  %15882 = vst [vmem:[#allocation217_spill] sm:$0xff] %v8645_v18  ;;  %v8716_v6 = vld [vmem:[#allocation7 + $0x2b0] sm:$0xff]  ;;  %v8730_v2 = vld [vmem:[#allocation7 + $0x298] sm:$0xff] }
  0xba   :  { %6354 = vmatprep.subr.msk.bf16.mxu0 %vm6353_vm13, %v15725_v54  ;;  %1856 = vmatpush2.bf16.msra.mxu1 %v8637_v1  ;;  %15883 = vst [vmem:[#allocation218_spill] sm:$0xff] %v8654_v27  ;;  %15884 = vst [vmem:[#allocation219_spill] sm:$0xff] %v8658_v40  ;;  %v8662_v1 = vld [vmem:[#allocation2 + $0x90] ss:$8 sps:$4 sm:$0xff]   ;;  %vm3442_vm13 = vcmp.eq.f32.partialorder %v8712_v7, %v7564_v10  ;;  %vm3441_vm4 = vcmp.eq.f32.partialorder %v8730_v2, %v7598_v20  ;;  %v8774_v20 = vld [vmem:[#allocation7 + $0x280] sm:$0xff] }
  0xbb   :  { %1857 = vmatprep.subr.bf16.mxu1 %v8641_v58  ;;  %v8664_v58 = vld [vmem:[#allocation5 + $0x84] ss:$8 sps:$4 sm:$0xff]   ;;  %vm8689_vm6 = vmxor %vm15039_vm3, %vm15046_vm12  ;;  %15895 = vst [vmem:[#allocation222_spill] sm:$0xff] %v8712_v7  ;;  %v8792_v7 = vld [vmem:[#allocation7 + $0x278] sm:$0xff] }
  0xbc   :  { %1551 = vmatmul.mubr.bf16.gmra.mxu0 %v8626_v51  ;;  %15885 = vst [vmem:[#allocation220_spill] sm:$0xff] %v8664_v58  ;;  %vm8699_vm2 = vmxor %vm15889_vm10, %vm15046_vm12  ;;  %vm3444_vm10 = vcmp.eq.f32.partialorder %v8716_v6, %v7569_v11 }
  0xbd   :  { %5997 = vmatprep.mubr.msk.bf16.mxu0 %vm15041_vm11, %v8629_v33  ;;  %vm8707_vm7 = vmxor %vm15892_vm14, %vm15046_vm12  ;;  %15896 = vst [vmem:[#allocation223_spill] sm:$0xff] %v8716_v6  ;;  %v15939_v6 = vmov 0 }
  0xbe   :  { %1858 = vmatpush2.bf16.msra.mxu1 %v8645_v18  ;;  %v8668_v18 = vld [vmem:[#allocation5 + $0x80] ss:$8 sps:$4 sm:$0xff]   ;;  %vm3497_vm14 = vmxor %vm15897_vm1, %vm15046_vm12  ;;  %15898 = vst [vmem:[#allocation224_spill] sm:$0xff] %v8726_v12  ;;  %vm15903_vm1 = vcmp.eq.f32.partialorder %v7600_v21, %v7613_v25  ;;  %v15912_v21 = vmov 0 }
  0xbf   :  { %1859 = vmatprep.subr.bf16.mxu1 %v8654_v27  ;;  %15886 = vst [vmem:[#allocation221_spill] sm:$0xff] %v8668_v18  ;;  %v8678_v27 = vld [vmem:[#allocation2 + $0xb4] ss:$8 sps:$4 sm:$0xff]   ;;  %15899 = vst [vmem:[#allocation225_spill] sm:$0xff] %v8730_v2  ;;  %v15906_v2 = vmov 0 }
  0xc0   :  { %vm8738_vm9 = vmxor %vm15900_vm8, %vm15046_vm12  ;;  %v8762_v12 = vld [vmem:[#allocation2 + $0xc0] ss:$8 sps:$4 sm:$0xff]   ;;  %15921 = vst [vmem:[#allocation231_spill] sm:$0xff] %v8788_v19 }
  0xc1   :  { %vm8746_vm3 = vmxor %vm15903_vm1, %vm15046_vm12  ;;  %15922 = vst [vmem:[#allocation232_spill] sm:$0xff] %v8792_v7 }
  0xc2   :  { %1860 = vmatpush2.bf16.msra.mxu1 %v8658_v40  ;;  %v8676_v40 = vld [vmem:[#allocation2 + $0xa0] ss:$8 sps:$4 sm:$0xff]   ;;  %vm8758_vm8 = vmand %vm3444_vm10, %vm8699_vm2  ;;  %vm3437_vm10 = vcmp.eq.f32.partialorder %v8792_v7, %v7630_v30  ;;  %v15930_v7 = vmov 0 }
  0xc3   :  { %1861 = vmatprep.subr.bf16.mxu1 %v8664_v58  ;;  %v15910_v17 = vsel %vm8758_vm8, 4294967295, %v15909_v17  ;;  %vm8766_vm1 = vmand %vm3439_vm15, %vm8707_vm7  ;;  %v8778_v58 = vld [vmem:[#allocation7 + $0x290] sm:$0xff]  ;;  %vm15920_vm15 = vcmp.eq.f32.partialorder %v7606_v24, %v7627_v29  ;;  %v15961_v24 = vmov 0 }
  0xc4   :  { %1561 = vmatmul.mubr.bf16.gmra.mxu0 %v8647_v46  ;;  %15911 = vst [vmem:[#allocation227_spill] sm:$0xff] %v15910_v17  ;;  %v15913_v21 = vsel %vm8766_vm1, 4294967295, %v15912_v21  ;;  %vm8770_vm12 = vmand %vm3441_vm4, %vm3497_vm14  ;;  %vm3440_vm2 = vcmp.eq.f32.partialorder %v8778_v58, %v7613_v25  ;;  %vm3435_vm4 = vcmp.eq.f32.partialorder %v8788_v19, %v7627_v29  ;;  %vm15923_vm14 = vcmp.eq.f32.partialorder %v7615_v26, %v7630_v30  ;;  %v8851_v30 = vld [vmem:[#allocation7 + $0x248] sm:$0xff]  ;;  %v8855_v29 = vld [vmem:[#allocation7 + $0x258] sm:$0xff] }
  0xc5   :  { %5998 = vmatprep.mubr.msk.bf16.mxu0 %vm15041_vm11, %v8650_v0  ;;  %15914 = vst [vmem:[#allocation228_spill] sm:$0xff] %v15913_v21  ;;  %15918 = vst [vmem:[#allocation230_spill] sm:$0xff] %v8778_v58  ;;  %v15927_v19 = vmov 0  ;;  %v15964_v26 = vmov 0  ;;  %v16147_v58 = vmov 0 }
  0xc6   :  { %1862 = vmatpush2.bf16.msra.mxu1 %v8668_v18  ;;  %v8693_v18 = vld [vmem:[#allocation2 + $0xc4] ss:$8 sps:$4 sm:$0xff]   ;;  %vm8816_vm1 = vmand %vm3440_vm2, %vm8746_vm3  ;;  %15946 = vst [vmem:[#allocation239_spill] sm:$0xff] %v8851_v30 }
  0xc7   :  { %2555 = vmatprep.subr.bf16.mxu1 %v8290_v13  ;;  %v15915_v13 = vmov 0  ;;  %v15931_v7 = vsel %vm8816_vm1, 4294967295, %v15930_v7  ;;  %15947 = vst [vmem:[#allocation240_spill] sm:$0xff] %v8855_v29 }
  0xc8   :  { %v15916_v13 = vsel %vm8770_vm12, 4294967295, %v15915_v13  ;;  %15932 = vst [vmem:[#allocation234_spill] sm:$0xff] %v15931_v7 }
  0xc9   :  { %15917 = vst [vmem:[#allocation229_spill] sm:$0xff] %v15916_v13 }
  0xcc   :  { %1571 = vmatmul.mubr.bf16.gmra.mxu0 %v8662_v1 }
  0xcd   :  { %5999 = vmatprep.mubr.msk.bf16.mxu0 %vm15041_vm11, %v8666_v63 }
  0xd4   :  { %1581 = vmatmul.mubr.bf16.gmra.mxu0 %v8676_v40 }
  0xd5   :  { %6000 = vmatprep.mubr.msk.bf16.mxu0 %vm15041_vm11, %v8678_v27 }
  0xdc   :  { %1591 = vmatmul.mubr.bf16.gmra.mxu0 %v8683_v45 }
  0xdd   :  { %6001 = vmatprep.mubr.msk.bf16.mxu0 %vm15041_vm11, %v8693_v18  ;;  %vm8752_vm11 = vmand %vm3442_vm13, %vm8689_vm6  ;;  %vm3438_vm6 = vcmp.eq.f32.partialorder %v8774_v20, %v7604_v23  ;;  %vm15919_vm13 = vmmov 1  }
  0xde   :  { %v15907_v2 = vsel %vm8752_vm11, 4294967295, %v15906_v2  ;;  %vm3491_vm7 = vmxor %vm15920_vm15, %vm15919_vm13  ;;  %vm15924_vm15 = vcmp.eq.f32.partialorder %v7640_v31, %v7659_v37  ;;  %v8837_v31 = vld [vmem:[#allocation7 + $0x260] sm:$0xff] }
  0xdf   :  { %15908 = vst [vmem:[#allocation226_spill] sm:$0xff] %v15907_v2  ;;  %vm3493_vm5 = vmxor %vm15923_vm14, %vm15919_vm13  ;;  %vm15933_vm14 = vcmp.eq.f32.partialorder %v7643_v32, %v7662_v38  ;;  %vm3434_vm3 = vcmp.eq.f32.partialorder %v8837_v31, %v7659_v37  ;;  %v8841_v32 = vld [vmem:[#allocation7 + $0x270] sm:$0xff] }
  0xe0   :  { %vm8804_vm0 = vmxor %vm15924_vm15, %vm15919_vm13  ;;  %15942 = vst [vmem:[#allocation237_spill] sm:$0xff] %v8837_v31  ;;  %vm3436_vm2 = vcmp.eq.f32.partialorder %v8841_v32, %v7662_v38  ;;  %v16064_v31 = vld [vmem:[#allocation134_spill] sm:$0xff]  ;;  %v7098_v38 = vld [vmem:[#allocation7 + $0x1c8] sm:$0xff] }
  0xe1   :  { %vm8810_vm12 = vmand %vm3438_vm6, %vm8738_vm9  ;;  %15943 = vst [vmem:[#allocation238_spill] sm:$0xff] %v8841_v32  ;;  %v7086_v32 = vld [vmem:[#allocation7 + $0x238] sm:$0xff] }
  0xe2   :  { %v15928_v19 = vsel %vm8810_vm12, 4294967295, %v15927_v19  ;;  %vm8824_vm15 = vmxor %vm15933_vm14, %vm15919_vm13  ;;  %vm3433_vm14 = vcmp.eq.f32.partialorder %v8855_v29, %v7676_v43  ;;  %v15955_v29 = vmov 0  ;;  %v16145_v37 = vld [vmem:[#allocation89_spill] sm:$0xff] }
  0xe3   :  { %15929 = vst [vmem:[#allocation233_spill] sm:$0xff] %v15928_v19  ;;  %vm8829_vm9 = vmand %vm3435_vm4, %vm3491_vm7  ;;  %vm15944_vm7 = vcmp.eq.f32.partialorder %v7655_v35, %v7667_v41  ;;  %v15986_v35 = vmov 0 }
  0xe4   :  { %1601 = vmatmul.mubr.bf16.gmra.mxu0 %v8762_v12  ;;  %v15937_v14 = vsel %vm8829_vm9, 4294967295, %v15936_v14  ;;  %vm8833_vm6 = vmand %vm3437_vm10, %vm3493_vm5  ;;  %vm15945_vm5 = vcmask 785408   ;;  %vm3431_vm10 = vcmp.eq.f32.partialorder %v8851_v30, %v7667_v41  ;;  %v15952_v30 = vmov 0  ;;  %v7085_v41 = vld [vmem:[#allocation7 + $0x228] sm:$0xff] }
  0xe5   :  { %15938 = vst [vmem:[#allocation235_spill] sm:$0xff] %v15937_v14  ;;  %v15940_v6 = vsel %vm8833_vm6, 4294967295, %v15939_v6  ;;  %vm3487_vm4 = vmxor %vm15944_vm7, %vm15919_vm13  ;;  %6002 = vmatprep.mubr.msk.bf16.mxu0 %vm15945_vm5, %v8786_v5  ;;  %vm15948_vm6 = vcmp.eq.f32.partialorder %v7664_v39, %v7676_v43  ;;  %vm15949_vm7 = vcmp.eq.f32.partialorder %v7669_v42, %v7690_v47  ;;  %v15959_v39 = vmov 0  ;;  %v8891_v42 = vld [vmem:[#allocation2 + $0xd0] ss:$8 sps:$4 sm:$0xff]   ;;  %v8901_v43 = vld [vmem:[#allocation7 + $0x240] sm:$0xff] }
  0xe6   :  { %15941 = vst [vmem:[#allocation236_spill] sm:$0xff] %v15940_v6  ;;  %vm3489_vm9 = vmxor %vm15948_vm6, %vm15919_vm13  ;;  %vm15958_vm6 = vcmp.eq.f32.partialorder %v7678_v44, %v7693_v48  ;;  %v7084_v44 = vld [vmem:[#allocation7 + $0x250] sm:$0xff] }
  0xe7   :  { %vm8867_vm5 = vmxor %vm15949_vm7, %vm15919_vm13  ;;  %15967 = vst [vmem:[#allocation245_spill] sm:$0xff] %v8901_v43 }
  0xe8   :  { %vm8873_vm1 = vmand %vm3434_vm3, %vm8804_vm0 }
  0xe9   :  { %v15953_v30 = vsel %vm8873_vm1, 4294967295, %v15952_v30  ;;  %vm8879_vm12 = vmand %vm3436_vm2, %vm8824_vm15  ;;  %vm3430_vm15 = vcmp.eq.f32.partialorder %v8901_v43, %v7690_v47  ;;  %vm3432_vm2 = vcmp.eq.f32.partialorder %v7084_v44, %v7693_v48  ;;  %v15971_v44 = vmov 0  ;;  %v16024_v43 = vld [vmem:[#allocation68_spill] sm:$0xff]  ;;  %v16057_v47 = vld [vmem:[#allocation74_spill] sm:$0xff] }
  0xea   :  { %15954 = vst [vmem:[#allocation241_spill] sm:$0xff] %v15953_v30  ;;  %v15956_v29 = vsel %vm8879_vm12, 4294967295, %v15955_v29  ;;  %vm8887_vm7 = vmxor %vm15958_vm6, %vm15919_vm13  ;;  %vm15968_vm6 = vcmp.eq.f32.partialorder %v7703_v49, %v7722_v55  ;;  %v7087_v49 = vld [vmem:[#allocation7 + $0x220] sm:$0xff]  ;;  %v16025_v48 = vld [vmem:[#allocation64_spill] sm:$0xff] }
  0xeb   :  { %15957 = vst [vmem:[#allocation242_spill] sm:$0xff] %v15956_v29  ;;  %v15960_v39 = vsel %vm8887_vm7, 4294967295, %v15959_v39  ;;  %vm8893_vm0 = vmand %vm3431_vm10, %vm3487_vm4  ;;  %vm3427_vm10 = vcmp.eq.f32.partialorder %v7085_v41, %v7722_v55  ;;  %v15980_v41 = vmov 0  ;;  %v7091_v55 = vld [vmem:[#allocation7 + $0x218] sm:$0xff] }
  0xec   :  { %v15962_v24 = vsel %vm8893_vm0, 4294967295, %v15961_v24  ;;  %vm8897_vm3 = vmand %vm3433_vm14, %vm3489_vm9  ;;  %vm3429_vm9 = vcmp.eq.f32.partialorder %v7086_v32, %v7725_v56  ;;  %vm15969_vm14 = vcmp.eq.f32.partialorder %v7706_v50, %v7725_v56  ;;  %v15976_v32 = vmov 0  ;;  %1611 = vmatmul.mubr.bf16.gmra.mxu0 %v8891_v42  ;;  %v7090_v56 = vld [vmem:[#allocation7 + $0x208] sm:$0xff]  ;;  %v7092_v50 = vld [vmem:[#allocation7 + $0x200] sm:$0xff] }
  0xed   :  { %15963 = vst [vmem:[#allocation243_spill] sm:$0xff] %v15962_v24  ;;  %v15965_v26 = vsel %vm8897_vm3, 4294967295, %v15964_v26  ;;  %vm3483_vm4 = vmxor %vm15968_vm6, %vm15919_vm13  ;;  %vm15970_vm6 = vcmp.eq.f32.partialorder %v7718_v53, %v7730_v59  ;;  %vm15979_vm11 = vnez %v15960_v39  ;;  %v15989_v39 = vmov 0  ;;  %v7088_v53 = vld [vmem:[#allocation7 + $0x230] sm:$0xff] }
  0xee   :  { %15966 = vst [vmem:[#allocation244_spill] sm:$0xff] %v15965_v26  ;;  %vm3485_vm3 = vmxor %vm15969_vm14, %vm15919_vm13 }
  0xef   :  { %vm8924_vm12 = vmxor %vm15970_vm6, %vm15919_vm13  ;;  %vm15983_vm6 = vcmp.eq.f32.partialorder %v7727_v57, %v7739_v61  ;;  %v8967_v57 = vld [vmem:[#allocation2 + $0x4] ss:$8 sps:$4 sm:$0xff]  }
  0xf0   :  { %v15972_v44 = vsel %vm8924_vm12, 4294967295, %v15971_v44  ;;  %vm15975_vm14 = vmmov %vm8867_vm5 }
  0xf1   :  { %vm8934_vm0 = vmand %vm3430_vm15, %vm15975_vm14 }
  0xf2   :  { %v15977_v32 = vsel %vm8934_vm0, 4294967295, %v15976_v32  ;;  %vm8940_vm8 = vmand %vm3432_vm2, %vm15979_vm11  ;;  %vm3426_vm11 = vcmp.eq.f32.partialorder %v7087_v49, %v7730_v59  ;;  %vm3428_vm2 = vcmp.eq.f32.partialorder %v7088_v53, %v7739_v61  ;;  %v15998_v49 = vmov 0  ;;  %v7094_v61 = vld [vmem:[#allocation7 + $0x1e8] sm:$0xff]  ;;  %v7095_v59 = vld [vmem:[#allocation7 + $0x1f8] sm:$0xff] }
  0xf3   :  { %15978 = vst [vmem:[#allocation246_spill] sm:$0xff] %v15977_v32  ;;  %v15981_v41 = vsel %vm8940_vm8, 4294967295, %v15980_v41  ;;  %vm8948_vm12 = vmxor %vm15983_vm6, %vm15919_vm13  ;;  %vm15992_vm6 = vcmp.eq.f32.partialorder %v7732_v60, %v7753_v3  ;;  %v16003_v53 = vmov 0  ;;  %v16053_v60 = vmov 0 }
  0xf4   :  { %15982 = vst [vmem:[#allocation247_spill] sm:$0xff] %v15981_v41  ;;  %vm8953_vm15 = vmand %vm3427_vm10, %vm3483_vm4  ;;  %vm15993_vm4 = vcmask 785408   ;;  %vm3425_vm10 = vcmp.eq.f32.partialorder %v7091_v55, %v7756_v8  ;;  %v16007_v55 = vmov 0 }
  0xf5   :  { %v15987_v35 = vsel %vm8953_vm15, 4294967295, %v15986_v35  ;;  %vm8957_vm14 = vmand %vm3429_vm9, %vm3485_vm3  ;;  %6157 = vmatprep.mubr.msk.bf16.mxu0 %vm15993_vm4, %v8967_v57  ;;  %vm3423_vm3 = vcmp.eq.f32.partialorder %v7090_v56, %v7753_v3  ;;  %vm15994_vm9 = vcmp.eq.f32.partialorder %v7741_v62, %v7756_v8  ;;  %vm15997_vm4 = vcmp.eq.f32.partialorder %v7766_v9, %v7785_v28  ;;  %v16010_v56 = vld [vmem:[#allocation60_spill] sm:$0xff]  ;;  %v16011_v62 = vld [vmem:[#allocation63_spill] sm:$0xff] }
  0xf6   :  { %15988 = vst [vmem:[#allocation248_spill] sm:$0xff] %v15987_v35  ;;  %v15990_v39 = vsel %vm8957_vm14, 4294967295, %v15989_v39  ;;  %vm3479_vm5 = vmxor %vm15992_vm6, %vm15919_vm13  ;;  %v16018_v9 = vmov 0  ;;  %v7093_v8 = vld [vmem:[#allocation7 + $0x210] sm:$0xff]  ;;  %v16022_v3 = vld [vmem:[#allocation66_spill] sm:$0xff] }
  0xf7   :  { %15991 = vst [vmem:[#allocation249_spill] sm:$0xff] %v15990_v39  ;;  %vm3481_vm14 = vmxor %vm15994_vm9, %vm15919_vm13  ;;  %vm16002_vm9 = vnez %v15972_v44  ;;  %v16015_v44 = vmov 0 }
  0xf8   :  { %vm8985_vm0 = vmxor %vm15997_vm4, %vm15919_vm13  ;;  %vm16012_vm4 = vcmp.eq.f32.partialorder %v16010_v56, %v16011_v62  ;;  %v16021_v56 = vld [vmem:[#allocation61_spill] sm:$0xff] }
  0xf9   :  { %v15999_v49 = vsel %vm8985_vm0, 4294967295, %v15998_v49  ;;  %vm8995_vm6 = vmand %vm3426_vm11, %vm16002_vm9  ;;  %vm16023_vm9 = vcmp.eq.f32.partialorder %v16021_v56, %v16022_v3  ;;  %v16032_v56 = vmov 0 }
  0xfa   :  { %v16004_v53 = vsel %vm8995_vm6, 4294967295, %v16003_v53  ;;  %vm16006_vm8 = vmmov %vm8948_vm12 }
  0xfb   :  { %16005 = vst [vmem:[#allocation250_spill] sm:$0xff] %v16004_v53  ;;  %vm9001_vm15 = vmand %vm3428_vm2, %vm16006_vm8  ;;  %vm3422_vm8 = vcmp.eq.f32.partialorder %v7092_v50, %v7785_v28  ;;  %vm3424_vm2 = vcmp.eq.f32.partialorder %v7093_v8, %v16011_v62  ;;  %v16029_v8 = vld [vmem:[#allocation65_spill] sm:$0xff]  ;;  %v7096_v62 = vld [vmem:[#allocation7 + $0x1e0] sm:$0xff] }
  0xfc   :  { %v16008_v55 = vsel %vm9001_vm15, 4294967295, %v16007_v55  ;;  %vm9009_vm0 = vmxor %vm16012_vm4, %vm15919_vm13  ;;  %v16030_v50 = vld [vmem:[#allocation69_spill] sm:$0xff] }
  0xfd   :  { %16009 = vst [vmem:[#allocation251_spill] sm:$0xff] %v16008_v55  ;;  %vm9013_vm12 = vmand %vm3423_vm3, %vm3479_vm5  ;;  %vm3419_vm5 = vcmp.eq.f32.partialorder %v7094_v61, %v16022_v3  ;;  %vm16026_vm3 = vcmp.eq.f32.partialorder %v16025_v48, %v16024_v43  ;;  %v16041_v61 = vmov 0  ;;  %v16044_v48 = vld [vmem:[#allocation67_spill] sm:$0xff]  ;;  %v16049_v3 = vld [vmem:[#allocation133_spill] sm:$0xff] }
  0xfe   :  { %v16016_v44 = vsel %vm9013_vm12, 4294967295, %v16015_v44  ;;  %vm9017_vm11 = vmand %vm3425_vm10, %vm3481_vm14  ;;  %vm3421_vm14 = vcmp.eq.f32.partialorder %v7095_v59, %v16024_v43  ;;  %v16037_v59 = vmov 0  ;;  %2345 = vmatmul.mubr.bf16.vlgmr.msra.gmra.mxu0 %v16049_v3  ;;  %v7097_v28 = vld [vmem:[#allocation7 + $0x1f0] sm:$0xff]  ;;  %v16059_v3 = vmov 0 }
  0xff   :  { %16017 = vst [vmem:[#allocation252_spill] sm:$0xff] %v16016_v44  ;;  %v16019_v9 = vsel %vm9017_vm11, 4294967295, %v16018_v9  ;;  %vm3475_vm4 = vmxor %vm16023_vm9, %vm15919_vm13  ;;  %vm16031_vm9 = vcmp.eq.f32.partialorder %v16029_v8, %v16030_v50  ;;  %v16045_v8 = vld [vmem:[#allocation70_spill] sm:$0xff]  ;;  %v16099_v43 = vmov 0 }
 0x100   :  { %16020 = vst [vmem:[#allocation253_spill] sm:$0xff] %v16019_v9  ;;  %vm3477_vm10 = vmxor %vm16026_vm3, %vm15919_vm13  ;;  %vm16036_vm3 = vnez %v15999_v49  ;;  %v16050_v49 = vmov 0 }
 0x101   :  { %vm9041_vm6 = vmxor %vm16031_vm9, %vm15919_vm13  ;;  %vm16046_vm9 = vcmp.eq.f32.partialorder %v16044_v48, %v16045_v8  ;;  %v16056_v48 = vld [vmem:[#allocation71_spill] sm:$0xff] }
 0x102   :  { %v16033_v56 = vsel %vm9041_vm6, 4294967295, %v16032_v56  ;;  %vm9051_vm11 = vmand %vm3422_vm8, %vm16036_vm3 }
 0x103   :  { %v16038_v59 = vsel %vm9051_vm11, 4294967295, %v16037_v59  ;;  %vm16040_vm15 = vmmov %vm9009_vm0 }
 0x104   :  { %16039 = vst [vmem:[#allocation254_spill] sm:$0xff] %v16038_v59  ;;  %vm9057_vm12 = vmand %vm3424_vm2, %vm16040_vm15  ;;  %vm3420_vm2 = vcmp.eq.f32.partialorder %v7097_v28, %v16045_v8  ;;  %vm3415_vm15 = vcmp.eq.f32.partialorder %v7098_v38, %v16057_v47  ;;  %v7099_v28 = vld [vmem:[#allocation7 + $0x1d8] sm:$0xff]  ;;  %v16066_v8 = vld [vmem:[#allocation75_spill] sm:$0xff] }
 0x105   :  { %v16042_v61 = vsel %vm9057_vm12, 4294967295, %v16041_v61  ;;  %vm9065_vm6 = vmxor %vm16046_vm9, %vm15919_vm13  ;;  %vm16058_vm9 = vcmp.eq.f32.partialorder %v16056_v48, %v16057_v47  ;;  %v16067_v48 = vld [vmem:[#allocation72_spill] sm:$0xff]  ;;  %vm16069_vm12 = vnez %v15916_v13  ;;  %v16075_v38 = vld [vmem:[#allocation77_spill] sm:$0xff] }
 0x106   :  { %16043 = vst [vmem:[#allocation255_spill] sm:$0xff] %v16042_v61  ;;  %vm9070_vm8 = vmand %vm3419_vm5, %vm3475_vm4  ;;  %vm16061_vm4 = vnez %v15910_v17  ;;  %vm16062_vm5 = vnez %v15907_v2  ;;  %v16083_v17 = vmov 0  ;;  %v16087_v2 = vmov 0  ;;  %v16090_v13 = vld [vmem:[#allocation76_spill] sm:$0xff] }
 0x107   :  { %v16051_v49 = vsel %vm9070_vm8, 4294967295, %v16050_v49  ;;  %vm9074_vm3 = vmand %vm3421_vm14, %vm3477_vm10  ;;  %vm16065_vm10 = vcmask 785408   ;;  %v7102_v47 = vld [vmem:[#allocation7 + $0x368] sm:$0xff] }
 0x108   :  { %16052 = vst [vmem:[#allocation133_spill] sm:$0xff] %v16051_v49  ;;  %v16054_v60 = vsel %vm9074_vm3, 4294967295, %v16053_v60  ;;  %vm9084_vm0 = vmxor %vm16058_vm9, %vm15919_vm13  ;;  %6158 = vmatprep.mubr.msk.bf16.mxu0 %vm16065_vm10, %v16064_v31  ;;  %vm3417_vm3 = vcmp.eq.f32.partialorder %v7099_v28, %v16066_v8  ;;  %vm16068_vm9 = vcmp.eq.f32.partialorder %v16067_v48, %v16066_v8  ;;  %v16074_v31 = vld [vmem:[#allocation73_spill] sm:$0xff]  ;;  %v16139_v28 = vld [vmem:[#allocation143_spill] sm:$0xff]  ;;  %v16141_v48 = vmov 0 }
 0x109   :  { %16055 = vst [vmem:[#allocation256_spill] sm:$0xff] %v16054_v60  ;;  %v16060_v3 = vsel %vm9084_vm0, 4294967295, %v16059_v3  ;;  %vm16063_vm14 = vmpackc.low %vm16061_vm4, %vm16062_vm5  ;;  %vm16070_vm4 = vnez %v15913_v21  ;;  %vm16076_vm1 = vcmp.eq.f32.partialorder %v16074_v31, %v16075_v38  ;;  %v16091_v21 = vld [vmem:[#allocation79_spill] sm:$0xff]  ;;  %v7101_v31 = vld [vmem:[#allocation7 + $0x1d0] sm:$0xff]  ;;  %2355 = vmatmul.mubr.bf16.gmra.mxu0 %v16139_v28 }
 0x10a   :  { %6356 = vmatpush1.bf16.msk.msra.mxu0 %vm16063_vm14, %v15725_v54  ;;  %vm3473_vm8 = vmxor %vm16068_vm9, %vm15919_vm13  ;;  %v16103_v8 = vld [vmem:[#allocation81_spill] sm:$0xff]  ;;  %v16149_v28 = vld [vmem:[#allocation146_spill] sm:$0xff] }
 0x10b   :  { %vm16071_vm14 = vmpackc.low %vm16069_vm12, %vm16070_vm4  ;;  %vm16082_vm12 = vcmp.eq.f32.partialorder %v7096_v62, %v16030_v50  ;;  %v16096_v62 = vmov 0  ;;  %v7105_v50 = vld [vmem:[#allocation7 + $0x370] sm:$0xff] }
 0x10c   :  { %6358 = vmatprep.subr.msk.bf16.mxu0 %vm16071_vm14, %v15725_v54  ;;  %vm9116_vm7 = vmxor %vm16076_vm1, %vm15919_vm13  ;;  %vm16081_vm14 = vnez %v16033_v56  ;;  %vm16092_vm1 = vcmp.eq.f32.partialorder %v16090_v13, %v16091_v21  ;;  %v7100_v56 = vld [vmem:[#allocation7 + $0x1c0] sm:$0xff] }
 0x10d   :  { %vm9128_vm4 = vmand %vm16082_vm12, %vm16081_vm14  ;;  %v16102_v13 = vld [vmem:[#allocation78_spill] sm:$0xff] }
 0x10e   :  { %v16084_v17 = vsel %vm9128_vm4, 4294967295, %v16083_v17  ;;  %vm16086_vm11 = vmmov %vm9065_vm6  ;;  %vm16095_vm6 = vnez %v16060_v3  ;;  %v16105_v3 = vmov 0  ;;  %vm16116_vm4 = vnez %v15937_v14 }
 0x10f   :  { %16085 = vst [vmem:[#allocation134_spill] sm:$0xff] %v16084_v17  ;;  %vm9134_vm10 = vmand %vm3420_vm2, %vm16086_vm11  ;;  %vm3414_vm11 = vcmp.eq.f32.partialorder %v7100_v56, %v16075_v38  ;;  %vm3416_vm2 = vcmp.eq.f32.partialorder %v7101_v31, %v16091_v21  ;;  %v16110_v31 = vld [vmem:[#allocation80_spill] sm:$0xff]  ;;  %v16111_v56 = vld [vmem:[#allocation82_spill] sm:$0xff]  ;;  %v16131_v14 = vmov 0  ;;  %v16137_v21 = vmov 0 }
 0x110   :  { %v16088_v2 = vsel %vm9134_vm10, 4294967295, %v16087_v2  ;;  %vm9142_vm5 = vmxor %vm16092_vm1, %vm15919_vm13  ;;  %vm16104_vm1 = vcmp.eq.f32.partialorder %v16102_v13, %v16103_v8  ;;  %v16113_v13 = vmov 0  ;;  %v7104_v38 = vld [vmem:[#allocation7 + $0x360] sm:$0xff] }
 0x111   :  { %16089 = vst [vmem:[#allocation257_spill] sm:$0xff] %v16088_v2  ;;  %vm9148_vm12 = vmand %vm3415_vm15, %vm16095_vm6  ;;  %vm16107_vm6 = vnez %v15931_v7  ;;  %vm3467_vm15 = vcmp.eq.f32.partialorder %v7102_v47, %v16103_v8  ;;  %v16120_v47 = vld [vmem:[#allocation83_spill] sm:$0xff]  ;;  %v16121_v7 = vld [vmem:[#allocation86_spill] sm:$0xff] }
 0x112   :  { %v16097_v62 = vsel %vm9148_vm12, 4294967295, %v16096_v62  ;;  %vm9152_vm14 = vmand %vm3417_vm3, %vm3473_vm8  ;;  %vm16108_vm8 = vnez %v15928_v19  ;;  %vm16122_vm0 = vcmp.eq.f32.partialorder %v16120_v47, %v16121_v7  ;;  %v16134_v47 = vld [vmem:[#allocation84_spill] sm:$0xff]  ;;  %v16135_v8 = vld [vmem:[#allocation87_spill] sm:$0xff]  ;;  %v16185_v19 = vmov 0 }
 0x113   :  { %16098 = vst [vmem:[#allocation258_spill] sm:$0xff] %v16097_v62  ;;  %v16100_v43 = vsel %vm9152_vm14, 4294967295, %v16099_v43  ;;  %vm9162_vm10 = vmxor %vm16104_vm1, %vm15919_vm13  ;;  %vm16112_vm14 = vcmp.eq.f32.partialorder %v16110_v31, %v16111_v56  ;;  %vm16115_vm1 = vnez %v15940_v6  ;;  %v16127_v6 = vmov 0  ;;  %v7103_v31 = vld [vmem:[#allocation7 + $0x378] sm:$0xff] }
 0x114   :  { %16101 = vst [vmem:[#allocation259_spill] sm:$0xff] %v16100_v43  ;;  %v16106_v3 = vsel %vm9162_vm10, 4294967295, %v16105_v3  ;;  %vm16109_vm3 = vmpackc.low %vm16107_vm6, %vm16108_vm8  ;;  %vm16158_vm10 = vnez %v15962_v24  ;;  %v16192_v24 = vld [vmem:[#allocation91_spill] sm:$0xff] }
 0x115   :  { %6360 = vmatpush1.bf16.msk.msra.mxu0 %vm16109_vm3, %v15725_v54  ;;  %vm9177_vm12 = vmxor %vm16112_vm14, %vm15919_vm13 }
 0x116   :  { %v16114_v13 = vsel %vm9177_vm12, 4294967295, %v16113_v13  ;;  %vm16117_vm9 = vmpackc.low %vm16115_vm1, %vm16116_vm4  ;;  %vm16136_vm4 = vcmp.eq.f32.partialorder %v16134_v47, %v16135_v8  ;;  %v16144_v47 = vld [vmem:[#allocation85_spill] sm:$0xff] }
 0x117   :  { %6362 = vmatprep.subr.msk.bf16.mxu0 %vm16117_vm9, %v15725_v54  ;;  %vm9195_vm14 = vmxor %vm16122_vm0, %vm15919_vm13  ;;  %vm16162_vm6 = vnez %v16114_v13  ;;  %v16175_v13 = vmov 0 }
 0x118   :  { %vm9205_vm9 = vmand %vm3414_vm11, %vm9116_vm7  ;;  %vm16140_vm7 = vnez %v16106_v3  ;;  %v7106_v3 = vld [vmem:[#allocation7 + $0x348] sm:$0xff] }
 0x119   :  { %v16128_v6 = vsel %vm9205_vm9, 4294967295, %v16127_v6  ;;  %vm16130_vm8 = vmmov %vm9142_vm5 }
 0x11a   :  { %16129 = vst [vmem:[#allocation260_spill] sm:$0xff] %v16128_v6  ;;  %vm9211_vm1 = vmand %vm3416_vm2, %vm16130_vm8  ;;  %vm3468_vm8 = vcmp.eq.f32.partialorder %v7105_v50, %v16135_v8  ;;  %v7107_v50 = vld [vmem:[#allocation7 + $0x358] sm:$0xff]  ;;  %v16154_v8 = vld [vmem:[#allocation92_spill] sm:$0xff] }
 0x11b   :  { %v16132_v14 = vsel %vm9211_vm1, 4294967295, %v16131_v14  ;;  %vm9220_vm5 = vmxor %vm16136_vm4, %vm15919_vm13  ;;  %vm16146_vm4 = vcmp.eq.f32.partialorder %v16144_v47, %v16145_v37  ;;  %vm16150_vm1 = vcmask 785408   ;;  %vm3465_vm9 = vcmp.eq.f32.partialorder %v7107_v50, %v16154_v8  ;;  %v16155_v47 = vld [vmem:[#allocation88_spill] sm:$0xff]  ;;  %v16180_v50 = vld [vmem:[#allocation93_spill] sm:$0xff] }
 0x11c   :  { %16133 = vst [vmem:[#allocation261_spill] sm:$0xff] %v16132_v14  ;;  %v16138_v21 = vsel %vm9220_vm5, 4294967295, %v16137_v21  ;;  %vm9227_vm11 = vmand %vm3467_vm15, %vm16140_vm7  ;;  %6159 = vmatprep.mubr.msk.bf16.mxu0 %vm16150_vm1, %v16149_v28  ;;  %vm16151_vm15 = vnez %v15956_v29  ;;  %vm16152_vm7 = vnez %v15953_v30  ;;  %vm16157_vm1 = vnez %v15965_v26  ;;  %v7109_v30 = vld [vmem:[#allocation7 + $0x350] sm:$0xff]  ;;  %v16191_v26 = vld [vmem:[#allocation94_spill] sm:$0xff] }
 0x11d   :  { %v16142_v48 = vsel %vm9227_vm11, 4294967295, %v16141_v48  ;;  %vm9237_vm0 = vmxor %vm16146_vm4, %vm15919_vm13  ;;  %vm3463_vm11 = vcmp.eq.f32.partialorder %v7106_v3, %v16145_v37  ;;  %vm16156_vm4 = vcmp.eq.f32.partialorder %v16155_v47, %v16154_v8  ;;  %v16164_v28 = vmov 0  ;;  %v16197_v47 = vld [vmem:[#allocation98_spill] sm:$0xff] }
 0x11e   :  { %16143 = vst [vmem:[#allocation143_spill] sm:$0xff] %v16142_v48  ;;  %v16148_v58 = vsel %vm9237_vm0, 4294967295, %v16147_v58  ;;  %vm16153_vm2 = vmpackc.low %vm16151_vm15, %vm16152_vm7  ;;  %vm16163_vm0 = vcmp.eq.f32.partialorder %v7103_v31, %v16111_v56  ;;  %v16171_v3 = vmov 0  ;;  %vm16174_vm7 = vnez %v16138_v21  ;;  %v16179_v31 = vld [vmem:[#allocation90_spill] sm:$0xff] }
 0x11f   :  { %6364 = vmatpush1.bf16.msk.msra.mxu0 %vm16153_vm2, %v15725_v54  ;;  %vm3521_vm12 = vmxor %vm16156_vm4, %vm15919_vm13  ;;  %v16182_v29 = vmov 0  ;;  %v16188_v21 = vmov 0 }
 0x120   :  { %vm16159_vm3 = vmpackc.low %vm16157_vm1, %vm16158_vm10  ;;  %vm16170_vm1 = vcmp.eq.f32.partialorder %v7104_v38, %v16121_v7  ;;  %v7108_v38 = vld [vmem:[#allocation7 + $0x340] sm:$0xff] }
 0x121   :  { %6366 = vmatprep.subr.msk.bf16.mxu0 %vm16159_vm3, %v15725_v54  ;;  %vm9269_vm5 = vmand %vm16163_vm0, %vm16162_vm6  ;;  %vm16178_vm6 = vmmov 1   ;;  %vm16181_vm0 = vcmp.eq.f32.partialorder %v16179_v31, %v16180_v50  ;;  %v16221_v31 = vld [vmem:[#allocation101_spill] sm:$0xff] }
 0x122   :  { %v16165_v28 = vsel %vm9269_vm5, 4294967295, %v16164_v28  ;;  %vm16169_vm3 = vmmov %vm9195_vm14  ;;  %vm16184_vm14 = vnez %v16148_v58  ;;  %v7110_v58 = vld [vmem:[#allocation7 + $0x328] sm:$0xff] }
 0x123   :  { %16166 = vst [vmem:[#allocation146_spill] sm:$0xff] %v16165_v28  ;;  %vm9281_vm10 = vmand %vm16170_vm1, %vm16169_vm3 }
 0x124   :  { %v16172_v3 = vsel %vm9281_vm10, 4294967295, %v16171_v3  ;;  %vm9287_vm2 = vmand %vm3468_vm8, %vm16174_vm7  ;;  %vm3462_vm8 = vcmp.eq.f32.partialorder %v7108_v38, %v16180_v50  ;;  %vm3464_vm7 = vcmp.eq.f32.partialorder %v7109_v30, %v16191_v26  ;;  %v16198_v38 = vld [vmem:[#allocation95_spill] sm:$0xff]  ;;  %vm16200_vm10 = vnez %v15990_v39  ;;  %v7111_v30 = vld [vmem:[#allocation7 + $0x338] sm:$0xff] }
 0x125   :  { %16173 = vst [vmem:[#allocation262_spill] sm:$0xff] %v16172_v3  ;;  %v16176_v13 = vsel %vm9287_vm2, 4294967295, %v16175_v13  ;;  %vm9295_vm15 = vmxor %vm16181_vm0, %vm16178_vm6  ;;  %vm16193_vm0 = vcmp.eq.f32.partialorder %v16192_v24, %v16191_v26  ;;  %v16214_v39 = vmov 0  ;;  %v7112_v24 = vld [vmem:[#allocation7 + $0x320] sm:$0xff] }
 0x126   :  { %16177 = vst [vmem:[#allocation263_spill] sm:$0xff] %v16176_v13  ;;  %v16183_v29 = vsel %vm9295_vm15, 4294967295, %v16182_v29  ;;  %vm9301_vm1 = vmand %vm3463_vm11, %vm16184_vm14  ;;  %vm16194_vm14 = vnez %v15981_v41  ;;  %vm16195_vm11 = vnez %v15977_v32  ;;  %v16205_v41 = vld [vmem:[#allocation99_spill] sm:$0xff]  ;;  %v16211_v32 = vmov 0 }
 0x127   :  { %v16186_v19 = vsel %vm9301_vm1, 4294967295, %v16185_v19  ;;  %vm9305_vm3 = vmand %vm3465_vm9, %vm3521_vm12  ;;  %vm3459_vm9 = vcmp.eq.f32.partialorder %v7110_v58, %v16197_v47  ;;  %v16206_v58 = vld [vmem:[#allocation96_spill] sm:$0xff] }
 0x128   :  { %16187 = vst [vmem:[#allocation264_spill] sm:$0xff] %v16186_v19  ;;  %v16189_v21 = vsel %vm9305_vm3, 4294967295, %v16188_v21  ;;  %vm3520_vm2 = vmxor %vm16193_vm0, %vm16178_vm6  ;;  %vm16199_vm3 = vcmp.eq.f32.partialorder %v16198_v38, %v16197_v47  ;;  %vm16201_vm0 = vnez %v15987_v35  ;;  %vm16207_vm5 = vcmp.eq.f32.partialorder %v16206_v58, %v16205_v41  ;;  %v16222_v58 = vld [vmem:[#allocation97_spill] sm:$0xff]  ;;  %v16246_v38 = vld [vmem:[#allocation102_spill] sm:$0xff] }
 0x129   :  { %16190 = vst [vmem:[#allocation265_spill] sm:$0xff] %v16189_v21  ;;  %vm16196_vm12 = vmpackc.low %vm16194_vm14, %vm16195_vm11  ;;  %vm3461_vm11 = vcmp.eq.f32.partialorder %v7111_v30, %v16205_v41  ;;  %v16217_v30 = vld [vmem:[#allocation153_spill] sm:$0xff]  ;;  %v16218_v35 = vmov 0 }
 0x12a   :  { %6368 = vmatpush1.bf16.msk.msra.mxu0 %vm16196_vm12, %v15725_v54  ;;  %vm3515_vm1 = vmxor %vm16199_vm3, %vm16178_vm6 }
 0x12b   :  { %vm16202_vm4 = vmpackc.low %vm16200_vm10, %vm16201_vm0  ;;  %vm16209_vm0 = vnez %v16100_v43  ;;  %2365 = vmatmul.mubr.bf16.gmra.mxu0 %v16217_v30  ;;  %vm16225_vm10 = vcmask 785408   ;;  %v16229_v30 = vmov 0  ;;  %v7118_v43 = vld [vmem:[#allocation7 + $0x2e8] sm:$0xff] }
 0x12c   :  { %6370 = vmatprep.subr.msk.bf16.mxu0 %vm16202_vm4, %v15725_v54  ;;  %vm3517_vm3 = vmxor %vm16207_vm5, %vm16178_vm6  ;;  %vm16210_vm4 = vnez %v16183_v29  ;;  %vm3458_vm5 = vcmp.eq.f32.partialorder %v7112_v24, %v16221_v31  ;;  %v16224_v29 = vld [vmem:[#allocation156_spill] sm:$0xff] }
 0x12d   :  { %vm9347_vm12 = vmand %vm3462_vm8, %vm16210_vm4  ;;  %vm16223_vm8 = vcmp.eq.f32.partialorder %v16222_v58, %v16221_v31  ;;  %6160 = vmatprep.mubr.msk.bf16.mxu0 %vm16225_vm10, %v16224_v29  ;;  %v7113_v24 = vld [vmem:[#allocation7 + $0x330] sm:$0xff]  ;;  %v16237_v29 = vld [vmem:[#allocation103_spill] sm:$0xff]  ;;  %vm16249_vm10 = vnez %v16038_v59 }
 0x12e   :  { %v16212_v32 = vsel %vm9347_vm12, 4294967295, %v16211_v32  ;;  %vm9351_vm13 = vmand %vm3464_vm7, %vm3520_vm2  ;;  %vm16226_vm2 = vnez %v16008_v55  ;;  %vm16227_vm7 = vnez %v16004_v53  ;;  %v16238_v55 = vld [vmem:[#allocation100_spill] sm:$0xff]  ;;  %v16242_v53 = vmov 0  ;;  %v16268_v58 = vld [vmem:[#allocation110_spill] sm:$0xff] }
 0x12f   :  { %16213 = vst [vmem:[#allocation266_spill] sm:$0xff] %v16212_v32  ;;  %v16215_v39 = vsel %vm9351_vm13, 4294967295, %v16214_v39  ;;  %vm9356_vm14 = vmand %vm3459_vm9, %vm3515_vm1  ;;  %vm16233_vm13 = vnez %v16016_v44  ;;  %v16245_v44 = vld [vmem:[#allocation105_spill] sm:$0xff]  ;;  %v16260_v59 = vld [vmem:[#allocation104_spill] sm:$0xff] }
 0x130   :  { %16216 = vst [vmem:[#allocation267_spill] sm:$0xff] %v16215_v39  ;;  %v16219_v35 = vsel %vm9356_vm14, 4294967295, %v16218_v35  ;;  %vm3514_vm4 = vmxor %vm16223_vm8, %vm16178_vm6  ;;  %vm16232_vm14 = vnez %v16019_v9  ;;  %v7114_v9 = vld [vmem:[#allocation7 + $0x308] sm:$0xff]  ;;  %vm16247_vm15 = vcmp.eq.f32.partialorder %v16246_v38, %v16245_v44  ;;  %v16292_v38 = vld [vmem:[#allocation109_spill] sm:$0xff] }
 0x131   :  { %16220 = vst [vmem:[#allocation153_spill] sm:$0xff] %v16219_v35  ;;  %vm16228_vm1 = vmpackc.low %vm16226_vm2, %vm16227_vm7  ;;  %vm3460_vm2 = vcmp.eq.f32.partialorder %v7113_v24, %v16237_v29  ;;  %v16251_v24 = vmov 0 }
 0x132   :  { %6372 = vmatpush1.bf16.msk.msra.mxu0 %vm16228_vm1, %v15725_v54  ;;  %vm9373_vm9 = vmand %vm3461_vm11, %vm3517_vm3  ;;  %vm16239_vm11 = vcmp.eq.f32.partialorder %v16238_v55, %v16237_v29  ;;  %v7116_v55 = vld [vmem:[#allocation7 + $0x300] sm:$0xff] }
 0x133   :  { %v16230_v30 = vsel %vm9373_vm9, 4294967295, %v16229_v30  ;;  %vm16234_vm8 = vmpackc.low %vm16232_vm14, %vm16233_vm13 }
 0x134   :  { %16231 = vst [vmem:[#allocation156_spill] sm:$0xff] %v16230_v30  ;;  %6374 = vmatprep.subr.msk.bf16.mxu0 %vm16234_vm8, %v15725_v54  ;;  %vm3516_vm3 = vmxor %vm16239_vm11, %vm16178_vm6  ;;  %vm3455_vm8 = vcmp.eq.f32.partialorder %v7114_v9, %v16245_v44  ;;  %vm16248_vm11 = vnez %v16042_v61  ;;  %v7115_v9 = vld [vmem:[#allocation7 + $0x318] sm:$0xff] }
 0x135   :  { %vm9396_vm14 = vmand %vm3458_vm5, %vm3514_vm4  ;;  %vm16254_vm5 = vnez %v16054_v60  ;;  %vm16255_vm4 = vnez %v16051_v49  ;;  %v16259_v61 = vld [vmem:[#allocation106_spill] sm:$0xff]  ;;  %v16264_v60 = vmov 0 }
 0x136   :  { %v16243_v53 = vsel %vm9396_vm14, 4294967295, %v16242_v53  ;;  %vm3511_vm13 = vmxor %vm16247_vm15, %vm16178_vm6  ;;  %v16267_v49 = vld [vmem:[#allocation166_spill] sm:$0xff] }
 0x137   :  { %16244 = vst [vmem:[#allocation268_spill] sm:$0xff] %v16243_v53  ;;  %vm16250_vm12 = vmpackc.low %vm16248_vm11, %vm16249_vm10  ;;  %vm3457_vm11 = vcmp.eq.f32.partialorder %v7115_v9, %v16259_v61  ;;  %2375 = vmatmul.mubr.bf16.gmra.mxu0 %v16267_v49  ;;  %v16269_v9 = vld [vmem:[#allocation107_spill] sm:$0xff]  ;;  %v16276_v49 = vmov 0  ;;  %vm16279_vm10 = vnez %v16097_v62  ;;  %v16291_v62 = vld [vmem:[#allocation113_spill] sm:$0xff] }
 0x138   :  { %6376 = vmatpush1.bf16.msk.msra.mxu0 %vm16250_vm12, %v15725_v54  ;;  %vm9411_vm9 = vmand %vm3460_vm2, %vm3516_vm3  ;;  %vm16261_vm12 = vcmp.eq.f32.partialorder %v16260_v59, %v16259_v61  ;;  %vm16270_vm7 = vcmp.eq.f32.partialorder %v16269_v9, %v16268_v58  ;;  %v16271_v59 = vld [vmem:[#allocation169_spill] sm:$0xff]  ;;  %vm16293_vm1 = vcmp.eq.f32.partialorder %v16292_v38, %v16291_v62  ;;  %v16298_v9 = vld [vmem:[#allocation112_spill] sm:$0xff] }
 0x139   :  { %v16252_v24 = vsel %vm9411_vm9, 4294967295, %v16251_v24  ;;  %vm16256_vm14 = vmpackc.low %vm16254_vm5, %vm16255_vm4  ;;  %vm16273_vm9 = vnez %v16088_v2  ;;  %v7117_v2 = vld [vmem:[#allocation7 + $0x310] sm:$0xff]  ;;  %v16323_v38 = vld [vmem:[#allocation114_spill] sm:$0xff] }
 0x13a   :  { %16253 = vst [vmem:[#allocation269_spill] sm:$0xff] %v16252_v24  ;;  %6378 = vmatprep.subr.msk.bf16.mxu0 %vm16256_vm14, %v15725_v54  ;;  %vm3513_vm2 = vmxor %vm16261_vm12, %vm16178_vm6  ;;  %vm3454_vm14 = vcmp.eq.f32.partialorder %v7116_v55, %v16268_v58  ;;  %vm16272_vm12 = vcmask 785408   ;;  %v16283_v55 = vld [vmem:[#allocation108_spill] sm:$0xff] }
 0x13b   :  { %vm9434_vm5 = vmand %vm3455_vm8, %vm3511_vm13  ;;  %6161 = vmatprep.mubr.msk.bf16.mxu0 %vm16272_vm12, %v16271_v59  ;;  %vm16274_vm13 = vnez %v16084_v17  ;;  %v16284_v59 = vld [vmem:[#allocation111_spill] sm:$0xff]  ;;  %v16288_v17 = vmov 0  ;;  %vm16300_vm12 = vnez %v16165_v28  ;;  %v16312_v28 = vld [vmem:[#allocation180_spill] sm:$0xff] }
 0x13c   :  { %v16265_v60 = vsel %vm9434_vm5, 4294967295, %v16264_v60  ;;  %vm3510_vm4 = vmxor %vm16270_vm7, %vm16178_vm6 }
 0x13d   :  { %16266 = vst [vmem:[#allocation270_spill] sm:$0xff] %v16265_v60  ;;  %vm16275_vm8 = vmpackc.low %vm16273_vm9, %vm16274_vm13  ;;  %vm16295_vm13 = vnez %v16128_v6  ;;  %v7120_v6 = vld [vmem:[#allocation7 + $0x2e0] sm:$0xff] }
 0x13e   :  { %6380 = vmatpush1.bf16.msk.msra.mxu0 %vm16275_vm8, %v15725_v54  ;;  %vm9452_vm3 = vmand %vm3457_vm11, %vm3513_vm2  ;;  %vm16285_vm8 = vcmp.eq.f32.partialorder %v16283_v55, %v16284_v59  ;;  %v16297_v55 = vld [vmem:[#allocation115_spill] sm:$0xff] }
 0x13f   :  { %v16277_v49 = vsel %vm9452_vm3, 4294967295, %v16276_v49  ;;  %vm16280_vm7 = vmpackc.low %vm16209_vm0, %vm16279_vm10  ;;  %vm3456_vm3 = vcmp.eq.f32.partialorder %v7117_v2, %v16284_v59  ;;  %vm16294_vm10 = vnez %v16132_v14  ;;  %v7119_v2 = vld [vmem:[#allocation7 + $0x2f8] sm:$0xff]  ;;  %2385 = vmatmul.mubr.bf16.gmra.mxu0 %v16312_v28  ;;  %v16316_v14 = vld [vmem:[#allocation183_spill] sm:$0xff] }
 0x140   :  { %16278 = vst [vmem:[#allocation166_spill] sm:$0xff] %v16277_v49  ;;  %6382 = vmatprep.subr.msk.bf16.mxu0 %vm16280_vm7, %v15725_v54  ;;  %vm3512_vm11 = vmxor %vm16285_vm8, %vm16178_vm6  ;;  %vm3451_vm7 = vcmp.eq.f32.partialorder %v7118_v43, %v16291_v62  ;;  %v16305_v43 = vmov 0  ;;  %v16329_v28 = vld [vmem:[#allocation118_spill] sm:$0xff] }
 0x141   :  { %vm9475_vm0 = vmand %vm3454_vm14, %vm3510_vm4  ;;  %vm3453_vm4 = vcmp.eq.f32.partialorder %v7119_v2, %v16297_v55  ;;  %vm16299_vm14 = vcmp.eq.f32.partialorder %v16298_v9, %v16297_v55  ;;  %v16309_v2 = vmov 0  ;;  %v16321_v9 = vld [vmem:[#allocation117_spill] sm:$0xff] }
 0x142   :  { %v16289_v17 = vsel %vm9475_vm0, 4294967295, %v16288_v17  ;;  %vm3507_vm8 = vmxor %vm16293_vm1, %vm16178_vm6  ;;  %vm16301_vm1 = vnez %v16142_v48  ;;  %v16313_v48 = vmov 0  ;;  %vm16342_vm0 = vnez %v16219_v35  ;;  %v16365_v35 = vld [vmem:[#allocation128_spill] sm:$0xff] }
 0x143   :  { %16290 = vst [vmem:[#allocation169_spill] sm:$0xff] %v16289_v17  ;;  %vm16296_vm2 = vmpackc.low %vm16294_vm10, %vm16295_vm13  ;;  %vm16304_vm10 = vnez %v16252_v24  ;;  %v7125_v24 = vld [vmem:[#allocation7 + $0x2d0] sm:$0xff] }
 0x144   :  { %6384 = vmatpush1.bf16.msk.msra.mxu0 %vm16296_vm2, %v15725_v54  ;;  %vm3509_vm9 = vmxor %vm16299_vm14, %vm16178_vm6  ;;  %vm16319_vm2 = vnez %v16172_v3  ;;  %v7122_v3 = vld [vmem:[#allocation7 + $0x2c8] sm:$0xff] }
 0x145   :  { %vm16302_vm15 = vmpackc.low %vm16300_vm12, %vm16301_vm1 }
 0x146   :  { %6386 = vmatprep.subr.msk.bf16.mxu0 %vm16302_vm15, %v15725_v54  ;;  %vm9505_vm13 = vmand %vm3456_vm3, %vm3512_vm11  ;;  %vm16317_vm3 = vcmask 785408   ;;  %vm16318_vm11 = vnez %v16176_v13  ;;  %v16332_v13 = vmov 0 }
 0x147   :  { %v16306_v43 = vsel %vm9505_vm13, 4294967295, %v16305_v43  ;;  %vm9513_vm1 = vmand %vm3451_vm7, %vm3507_vm8  ;;  %6162 = vmatprep.mubr.msk.bf16.mxu0 %vm16317_vm3, %v16316_v14  ;;  %vm3450_vm7 = vcmp.eq.f32.partialorder %v7120_v6, %v16321_v9  ;;  %vm16326_vm3 = vnez %v16186_v19  ;;  %v7121_v14 = vld [vmem:[#allocation7 + $0x2f0] sm:$0xff]  ;;  %v7123_v19 = vld [vmem:[#allocation7 + $0x2d8] sm:$0xff] }
 0x148   :  { %16307 = vst [vmem:[#allocation271_spill] sm:$0xff] %v16306_v43  ;;  %v16310_v2 = vsel %vm9513_vm1, 4294967295, %v16309_v2  ;;  %vm9518_vm15 = vmand %vm3453_vm4, %vm3509_vm9  ;;  %vm16324_vm9 = vcmp.eq.f32.partialorder %v16323_v38, %v16321_v9  ;;  %v16330_v6 = vld [vmem:[#allocation116_spill] sm:$0xff]  ;;  %2395 = vmatmul.mubr.bf16.gmra.mxu0 %v8456_v52  ;;  %v7124_v52 = vld [vmem:[#allocation7 + $0x2c0] sm:$0xff] }
 0x149   :  { %16311 = vst [vmem:[#allocation272_spill] sm:$0xff] %v16310_v2  ;;  %v16314_v48 = vsel %vm9518_vm15, 4294967295, %v16313_v48  ;;  %vm16320_vm12 = vmpackc.low %vm16318_vm11, %vm16319_vm2  ;;  %vm3452_vm11 = vcmp.eq.f32.partialorder %v7121_v14, %v16329_v28  ;;  %vm16331_vm2 = vcmp.eq.f32.partialorder %v16330_v6, %v16329_v28  ;;  %v16338_v14 = vmov 0  ;;  %v16348_v6 = vld [vmem:[#allocation120_spill] sm:$0xff]  ;;  %v9649_v43 = vld [vmem:[#allocation8 + $0xf8] sm:$0xff] }
 0x14a   :  { %16315 = vst [vmem:[#allocation180_spill] sm:$0xff] %v16314_v48  ;;  %6388 = vmatpush2.bf16.msk.msra.mxu0 %vm16320_vm12, %v15725_v54  ;;  %vm16322_vm8 = vmmov %vm16178_vm6  ;;  %vm16325_vm6 = vnez %v16189_v21  ;;  %vm16336_vm12 = vnez %v16212_v32  ;;  %v16344_v21 = vld [vmem:[#allocation125_spill] sm:$0xff]  ;;  %v16347_v32 = vld [vmem:[#allocation126_spill] sm:$0xff]  ;;  %vm16357_vm15 = vnez %v16265_v60 }
 0x14b   :  { %vm3506_vm4 = vmxor %vm16324_vm9, %vm16322_vm8  ;;  %16380 = vst [vmem:[#allocation279_spill] sm:$0xff] %v9649_v43  ;;  %v16522_v38 = vld [vmem:[#allocation39_spill] sm:$0xff] }
 0x14c   :  { %vm16327_vm5 = vmpackc.low %vm16325_vm6, %vm16326_vm3 }
 0x14d   :  { %6390 = vmatprep.subr.msk.bf16.mxu0 %vm16327_vm5, %v15725_v54  ;;  %vm3508_vm9 = vmxor %vm16331_vm2, %vm16322_vm8  ;;  %vm16335_vm5 = vnez %v16215_v39  ;;  %vm16341_vm2 = vnez %v16230_v30  ;;  %v16345_v39 = vld [vmem:[#allocation119_spill] sm:$0xff]  ;;  %v16363_v30 = vld [vmem:[#allocation121_spill] sm:$0xff] }
 0x14e   :  { %vm9554_vm6 = vmand %vm3450_vm7, %vm3506_vm4  ;;  %vm3447_vm4 = vcmp.eq.f32.partialorder %v7122_v3, %v16344_v21  ;;  %vm16346_vm1 = vcmp.eq.f32.partialorder %v16345_v39, %v16344_v21  ;;  %v16353_v3 = vmov 0 }
 0x14f   :  { %v16333_v13 = vsel %vm9554_vm6, 4294967295, %v16332_v13  ;;  %vm16337_vm3 = vmpackc.low %vm16335_vm5, %vm16336_vm12  ;;  %vm16350_vm12 = vcmask 785408  }
 0x150   :  { %16334 = vst [vmem:[#allocation183_spill] sm:$0xff] %v16333_v13  ;;  %6392 = vmatpush2.bf16.msk.msra.mxu0 %vm16337_vm3, %v15725_v54  ;;  %vm9564_vm14 = vmand %vm3452_vm11, %vm3508_vm9  ;;  %vm3449_vm11 = vcmp.eq.f32.partialorder %v7123_v19, %v16347_v32  ;;  %vm16349_vm3 = vcmp.eq.f32.partialorder %v16348_v6, %v16347_v32  ;;  %6163 = vmatprep.mubr.msk.bf16.mxu0 %vm16350_vm12, %v8465_v34  ;;  %v16359_v34 = vmov 0  ;;  %v16362_v19 = vld [vmem:[#allocation127_spill] sm:$0xff] }
 0x151   :  { %v16339_v14 = vsel %vm9564_vm14, 4294967295, %v16338_v14  ;;  %vm16343_vm7 = vmpackc.low %vm16341_vm2, %vm16342_vm0  ;;  %vm3446_vm12 = vcmp.eq.f32.partialorder %v7124_v52, %v16362_v19  ;;  %v16376_v52 = vmov 0  ;;  %2405 = vmatmul.mubr.bf16.gmra.mxu0 %v8557_v15  ;;  %v1482_v15 = vpop.f32.mrf.mxu0 }
 0x152   :  { %16340 = vst [vmem:[#allocation273_spill] sm:$0xff] %v16339_v14  ;;  %6394 = vmatprep.subr.msk.bf16.mxu0 %vm16343_vm7, %v15725_v54  ;;  %vm3503_vm5 = vmxor %vm16346_vm1, %vm16322_vm8  ;;  %vm16351_vm1 = vnez %v16243_v53  ;;  %v16366_v53 = vld [vmem:[#allocation122_spill] sm:$0xff] }
 0x153   :  { %vm3505_vm9 = vmxor %vm16349_vm3, %vm16322_vm8  ;;  %vm16356_vm3 = vnez %v16277_v49  ;;  %v9646_v49 = vld [vmem:[#allocation8 + $0xe8] sm:$0xff] }
 0x154   :  { %vm16352_vm2 = vmpackc.low %vm16304_vm10, %vm16351_vm1  ;;  %vm16367_vm10 = vcmp.eq.f32.partialorder %v16366_v53, %v16365_v35  ;;  %vm16370_vm1 = vnez %v16314_v48  ;;  %16379 = vst [vmem:[#allocation278_spill] sm:$0xff] %v9646_v49 }
 0x155   :  { %6396 = vmatpush2.bf16.msk.msra.mxu0 %vm16352_vm2, %v15725_v54  ;;  %vm9597_vm0 = vmand %vm3447_vm4, %vm3503_vm5  ;;  %vm16364_vm5 = vcmp.eq.f32.partialorder %v16363_v30, %v16362_v19  ;;  %vm3448_vm4 = vcmp.eq.f32.partialorder %v7125_v24, %v16365_v35  ;;  %v16373_v24 = vmov 0  ;;  %v16525_v30 = vld [vmem:[#allocation238_spill] sm:$0xff] }
 0x156   :  { %v16354_v3 = vsel %vm9597_vm0, 4294967295, %v16353_v3  ;;  %vm16358_vm7 = vmpackc.low %vm16356_vm3, %vm16357_vm15  ;;  %vm16371_vm3 = vnez %v16310_v2 }
 0x157   :  { %16355 = vst [vmem:[#allocation274_spill] sm:$0xff] %v16354_v3  ;;  %6398 = vmatprep.subr.msk.bf16.mxu0 %vm16358_vm7, %v15725_v54  ;;  %vm9607_vm6 = vmand %vm3449_vm11, %vm3505_vm9  ;;  %vm16368_vm11 = vnez %v16289_v17  ;;  %v16391_v17 = vld [vmem:[#allocation165_spill] sm:$0xff] }
 0x158   :  { %v16360_v34 = vsel %vm9607_vm6, 4294967295, %v16359_v34  ;;  %vm3502_vm2 = vmxor %vm16364_vm5, %vm16322_vm8 }
 0x159   :  { %16361 = vst [vmem:[#allocation275_spill] sm:$0xff] %v16360_v34  ;;  %vm3504_vm7 = vmxor %vm16367_vm10, %vm16322_vm8 }
 0x15a   :  { %vm16369_vm9 = vmpackc.low %vm9505_vm13, %vm16368_vm11  ;;  %vm15226_vm13 = vcmp.eq.s32.totalorder %v9649_v43, 1 }
 0x15b   :  { %6400 = vmatpush2.bf16.msk.msra.mxu0 %vm16369_vm9, %v15725_v54  ;;  %vm6405_vm5 = vmpackc.low %vm9607_vm6, %vm9597_vm0  ;;  %vm15227_vm9 = vcmp.eq.s32.totalorder %v9646_v49, 1 }
 0x15c   :  { %vm16372_vm15 = vmpackc.low %vm16370_vm1, %vm16371_vm3 }
 0x15d   :  { %6402 = vmatprep.subr.msk.bf16.mxu0 %vm16372_vm15, %v15725_v54  ;;  %vm9637_vm10 = vmand %vm3446_vm12, %vm3502_vm2  ;;  %vm16381_vm15 = vcmask 785408   ;;  %vm16382_vm12 = vnez %v16333_v13 }
 0x15e   :  { %v16374_v24 = vsel %vm9637_vm10, 4294967295, %v16373_v24  ;;  %vm9641_vm8 = vmand %vm3448_vm4, %vm3504_vm7  ;;  %6164 = vmatprep.mubr.msk.bf16.mxu0 %vm16381_vm15, %v8568_v16 }
 0x15f   :  { %16375 = vst [vmem:[#allocation276_spill] sm:$0xff] %v16374_v24  ;;  %v16377_v52 = vsel %vm9641_vm8, 4294967295, %v16376_v52  ;;  %vm16383_vm2 = vmpackc.low %vm9564_vm14, %vm16382_vm12  ;;  %2415 = vmatmul.mubr.bf16.gmra.mxu0 %v8626_v51  ;;  %v1484_v51 = vpop.f32.mrf.mxu0 }
 0x160   :  { %16378 = vst [vmem:[#allocation277_spill] sm:$0xff] %v16377_v52  ;;  %6404 = vmatpush2.bf16.msk.msra.mxu0 %vm16383_vm2, %v15725_v54  ;;  %vm6407_vm4 = vmpackc.low %vm9641_vm8, %vm9637_vm10  ;;  %6165 = vmatprep.mubr.msk.bf16.mxu0 %vm16381_vm15, %v8629_v33 }
 0x161   :  { %6406 = vmatprep.subr.msk.bf16.mxu0 %vm6405_vm5, %v15725_v54  ;;  %vm6493_vm7 = vmpackc.low %vm15226_vm13, %vm15227_vm9  ;;  %v1486_v16 = vpop.f32.mrf.mxu0  ;;  %vm16414_vm9 = vcmask 785408  }
 0x162   :  { %vm16384_vm5 = vmmov %vm16381_vm15  ;;  %v1621_v49 = vpack.c.bf16 %v1486_v16, %v1482_v15  ;;  %v16395_v16 = vld [vmem:[#allocation178_spill] sm:$0xff] }
 0x163   :  { %vm16385_vm2 = vmmov %vm16384_vm5  ;;  %v1488_v43 = vpop.f32.mrf.mxu0 }
 0x164   :  { %6408 = vmatpush2.bf16.msk.msra.mxu0 %vm6407_vm4, %v15725_v54  ;;  %vm16386_vm4 = vmmov %vm16385_vm2  ;;  %v1622_v33 = vpack.c.bf16 %v1488_v43, %v1484_v51 }
 0x165   :  { %6494 = vmatprep.subr.msk.bf16.mxu0 %vm6493_vm7, %v15725_v54  ;;  %vm16387_vm7 = vmmov %vm16385_vm2 }
 0x166   :  { %6031 = vmatprep.mubr.msk.bf16.mxu1 %vm16387_vm7, %v1622_v33  ;;  %vm16388_vm15 = vmmov %vm16385_vm2 }
 0x167   :  { %2425 = vmatmul.mubr.bf16.gmra.mxu0 %v8647_v46  ;;  %v1492_v46 = vpop.f32.mrf.mxu0  ;;  %1864 = vmatmul.mubr.bf16.vlgmr.msra.gmra.mxu1 %v1621_v49  ;;  %v16394_v49 = vld [vmem:[#allocation175_spill] sm:$0xff]  ;;  %vm16399_vm7 = vmmov %vm16385_vm2 }
 0x168   :  { %6166 = vmatprep.mubr.msk.bf16.mxu0 %vm16384_vm5, %v8650_v0  ;;  %v16390_v0 = vld [vmem:[#allocation164_spill] sm:$0xff]  ;;  %vm16393_vm5 = vmmov %vm16385_vm2 }
 0x16f   :  { %2435 = vmatmul.mubr.bf16.gmra.mxu0 %v8662_v1  ;;  %v16389_v1 = vld [vmem:[#allocation161_spill] sm:$0xff] }
 0x170   :  { %6167 = vmatprep.mubr.msk.bf16.mxu0 %vm16385_vm2, %v8666_v63  ;;  %v1494_v63 = vpop.f32.mrf.mxu0  ;;  %2556 = vmatpush1.bf16.msra.mxu1 %v16389_v1  ;;  %v16397_v1 = vld [vmem:[#allocation188_spill] sm:$0xff] }
 0x171   :  { %2557 = vmatprep.subr.bf16.mxu1 %v16390_v0  ;;  %v16402_v0 = vld [vmem:[#allocation189_spill] sm:$0xff] }
 0x174   :  { %2558 = vmatpush1.bf16.msra.mxu1 %v16391_v17 }
 0x177   :  { %2445 = vmatmul.mubr.bf16.gmra.mxu0 %v8676_v40  ;;  %v1496_v40 = vpop.f32.mrf.mxu0 }
 0x178   :  { %6168 = vmatprep.mubr.msk.bf16.mxu0 %vm16386_vm4, %v8678_v27  ;;  %v1623_v43 = vpack.c.bf16 %v1496_v40, %v1492_v46  ;;  %v16396_v46 = vld [vmem:[#allocation179_spill] sm:$0xff]  ;;  %vm16398_vm4 = vmmov %vm16385_vm2  ;;  %v9706_v40 = vld [vmem:[#allocation8 + $0xf0] sm:$0xff] }
 0x179   :  { %v1498_v27 = vpop.f32.mrf.mxu0  ;;  %16401 = vst [vmem:[#allocation164_spill] sm:$0xff] %v9706_v40 }
 0x17a   :  { %v1624_v60 = vpack.c.bf16 %v1498_v27, %v1494_v63  ;;  %v16403_v27 = vld [vmem:[#allocation192_spill] sm:$0xff] }
 0x17b   :  { %v1502_v15 = vpop.f32.mrf.mxu0 }
 0x17c   :  { %6032 = vmatprep.mubr.msk.bf16.mxu1 %vm16393_vm5, %v1624_v60  ;;  %v9703_v60 = vld [vmem:[#allocation8 + $0xe0] sm:$0xff]  ;;  %vm15228_vm5 = vcmp.eq.s32.totalorder %v9706_v40, 1 }
 0x17d   :  { %1874 = vmatmul.mubr.bf16.gmra.mxu1 %v1623_v43  ;;  %16400 = vst [vmem:[#allocation161_spill] sm:$0xff] %v9703_v60  ;;  %v9711_v43 = vld [vmem:[#allocation8 + $0xc8] sm:$0xff] }
 0x17e   :  { %16404 = vst [vmem:[#allocation165_spill] sm:$0xff] %v9711_v43 }
 0x17f   :  { %2455 = vmatmul.mubr.bf16.gmra.mxu0 %v8683_v45  ;;  %v16392_v45 = vld [vmem:[#allocation174_spill] sm:$0xff] }
 0x180   :  { %6169 = vmatprep.mubr.msk.bf16.mxu0 %vm16388_vm15, %v8693_v18  ;;  %2559 = vmatprep.subr.bf16.mxu1 %v16392_v45  ;;  %v1504_v18 = vpop.f32.mrf.mxu0  ;;  %vm15229_vm15 = vcmp.eq.s32.totalorder %v9703_v60, 1  ;;  %v9761_v45 = vld [vmem:[#allocation8 + $0xb0] sm:$0xff] }
 0x181   :  { %2560 = vmatpush1.bf16.msra.mxu1 %v16394_v49  ;;  %v9725_v49 = vld [vmem:[#allocation8 + $0xc0] sm:$0xff]  ;;  %16422 = vst [vmem:[#allocation192_spill] sm:$0xff] %v9761_v45  ;;  %v7143_v60 = vld [vmem:[#allocation2 + $0x10] ss:$8 sps:$4 sm:$0xff]  }
 0x182   :  { %v1506_v51 = vpop.f32.mrf.mxu0  ;;  %2561 = vmatprep.subr.bf16.mxu1 %v16395_v16  ;;  %16408 = vst [vmem:[#allocation175_spill] sm:$0xff] %v9725_v49  ;;  %v16410_v16 = vld [vmem:[#allocation193_spill] sm:$0xff] }
 0x183   :  { %v1625_v63 = vpack.c.bf16 %v1506_v51, %v1502_v15  ;;  %v9728_v51 = vld [vmem:[#allocation8 + $0xd0] sm:$0xff] }
 0x184   :  { %v1508_v33 = vpop.f32.mrf.mxu0  ;;  %16409 = vst [vmem:[#allocation178_spill] sm:$0xff] %v9728_v51 }
 0x185   :  { %v1626_v17 = vpack.c.bf16 %v1508_v33, %v1504_v18  ;;  %2562 = vmatpush1.bf16.msra.mxu1 %v16396_v46  ;;  %v7134_v46 = vld [vmem:[#allocation2] ss:$8 sps:$4 sm:$0xff]  }
 0x186   :  { %2563 = vmatprep.subr.bf16.mxu1 %v16397_v1  ;;  %v9739_v1 = vld [vmem:[#allocation8 + $0xb8] sm:$0xff] }
 0x187   :  { %2465 = vmatmul.mubr.bf16.gmra.mxu0 %v8762_v12  ;;  %v1512_v12 = vpop.f32.mrf.mxu0  ;;  %6033 = vmatprep.mubr.msk.bf16.mxu1 %vm16398_vm4, %v1626_v17  ;;  %16412 = vst [vmem:[#allocation188_spill] sm:$0xff] %v9739_v1 }
 0x188   :  { %6170 = vmatprep.mubr.msk.bf16.mxu0 %vm16385_vm2, %v8786_v5  ;;  %1884 = vmatmul.mubr.bf16.gmra.mxu1 %v1625_v63  ;;  %vm15231_vm2 = vcmp.eq.s32.totalorder %v9711_v43, 1  ;;  %v9736_v63 = vld [vmem:[#allocation8 + $0xa8] sm:$0xff]  ;;  %v9806_v43 = vld [vmem:[#allocation8 + $0x78] sm:$0xff] }
 0x189   :  { %v1514_v5 = vpop.f32.mrf.mxu0  ;;  %2564 = vmatpush1.bf16.msra.mxu1 %v16402_v0  ;;  %16411 = vst [vmem:[#allocation179_spill] sm:$0xff] %v9736_v63  ;;  %v7137_v0 = vld [vmem:[#allocation2 + $0x14] ss:$8 sps:$4 sm:$0xff]   ;;  %vm16418_vm13 = vcmp.eq.s32.totalorder %v9736_v63, 1  ;;  %16436 = vst [vmem:[#allocation281_spill] sm:$0xff] %v9806_v43 }
 0x18a   :  { %2565 = vmatprep.subr.bf16.mxu1 %v16403_v27  ;;  %v9840_v63 = vld [vmem:[#allocation8 + $0x70] sm:$0xff] }
 0x18d   :  { %2566 = vmatpush1.bf16.msra.mxu1 %v16410_v16  ;;  %v9769_v16 = vld [vmem:[#allocation8 + $0x98] sm:$0xff] }
 0x18f   :  { %2475 = vmatmul.mubr.bf16.gmra.mxu0 %v8891_v42  ;;  %v1516_v42 = vpop.f32.mrf.mxu0 }
 0x190   :  { %6409 = vmatprep.mubr.msk.bf16.mxu0 %vm16399_vm7, %v8967_v57  ;;  %v9714_v57 = vld [vmem:[#allocation8 + $0xd8] sm:$0xff]  ;;  %vm9721_vm7 = vmpackc.low %vm15228_vm5, %vm15229_vm15  ;;  %v1627_v33 = vpack.c.bf16 %v1516_v42, %v1512_v12  ;;  %vm16417_vm15 = vcmp.eq.s32.totalorder %v9728_v51, 1  ;;  %v16420_v42 = vld [vmem:[#allocation203_spill] sm:$0xff] }
 0x191   :  { %16405 = vst [vmem:[#allocation174_spill] sm:$0xff] %v9714_v57  ;;  %vm15230_vm4 = vcmp.eq.s32.totalorder %v9714_v57, 1  ;;  %v1518_v15 = vpop.f32.mrf.mxu0  ;;  %v7147_v57 = vld [vmem:[#allocation2 + $0x24] ss:$8 sps:$4 sm:$0xff]  }
 0x192   :  { %v1628_v18 = vpack.c.bf16 %v1518_v15, %v1514_v5  ;;  %vm6497_vm5 = vmpackc.low %vm15230_vm4, %vm15231_vm2  ;;  %v16413_v5 = vld [vmem:[#allocation202_spill] sm:$0xff]  ;;  %vm16416_vm2 = vcmp.eq.s32.totalorder %v9725_v49, 1  ;;  %v9803_v51 = vld [vmem:[#allocation8 + $0x68] sm:$0xff] }
 0x193   :  { %v1522_v17 = vpop.f32.mrf.mxu0  ;;  %2567 = vmatprep.subr.bf16.mxu1 %v16413_v5  ;;  %vm16415_vm4 = vmmov %vm16414_vm9  ;;  %v9758_v15 = vld [vmem:[#allocation8 + $0xa0] sm:$0xff]  ;;  %16424 = vst [vmem:[#allocation202_spill] sm:$0xff] %v9769_v16 }
 0x194   :  { %6034 = vmatprep.mubr.msk.bf16.mxu1 %vm16414_vm9, %v1628_v18  ;;  %vm6499_vm11 = vmpackc.low %vm16417_vm15, %vm16416_vm2  ;;  %vm16419_vm9 = vcmp.eq.s32.totalorder %v9739_v1, 1  ;;  %2568 = vmatpush1.bf16.msra.mxu1 %v16420_v42  ;;  %16421 = vst [vmem:[#allocation189_spill] sm:$0xff] %v9758_v15  ;;  %v9766_v18 = vld [vmem:[#allocation8 + $0x88] sm:$0xff]  ;;  %v16437_v49 = vld [vmem:[#allocation206_spill] sm:$0xff] }
 0x195   :  { %v1524_v12 = vpop.f32.mrf.mxu0  ;;  %1894 = vmatmul.mubr.bf16.gmra.mxu1 %v1627_v33  ;;  %vm6501_vm1 = vmpackc.low %vm16419_vm9, %vm16418_vm13  ;;  %2569 = vmatprep.subr.bf16.mxu1 %v8528_v22  ;;  %16423 = vst [vmem:[#allocation193_spill] sm:$0xff] %v9766_v18  ;;  %vm15249_vm15 = vcmp.eq.s32.totalorder %v9766_v18, 1  ;;  %vm15239_vm13 = vcmp.eq.s32.totalorder %v9769_v16, 1  ;;  %vm16433_vm9 = vcmask 785408   ;;  %v552_v1 = vsub.f32 %v16437_v49, %v7552_v4  ;;  %v7150_v22 = vld [vmem:[#allocation7 + $0xe0] sm:$0xff]  ;;  %v9848_v18 = vld [vmem:[#allocation8 + $0x58] sm:$0xff] }
 0x197   :  { %3979 = vmatmul.mubr.bf16.vlgmr.msra.gmra.mxu0 %v7134_v46  ;;  %v1526_v27 = vpop.f32.mrf.mxu0  ;;  %v7142_v46 = vld [vmem:[#allocation7 + $0xe8] sm:$0xff] }
 0x198   :  { %6496 = vmatpush1.bf16.msk.msra.mxu0 %vm9721_vm7, %v15725_v54  ;;  %6410 = vmatprep.mubr.msk.bf16.mxu0 %vm16415_vm4, %v7137_v0  ;;  %vm15237_vm7 = vcmp.eq.s32.totalorder %v9758_v15, 1  ;;  %vm15235_vm4 = vcmp.eq.s32.totalorder %v9761_v45, 1  ;;  %v384_v5 = vsub.f32 %v7142_v46, %v7552_v4  ;;  %v1629_v42 = vpack.c.bf16 %v1526_v27, %v1522_v17  ;;  %v9796_v46 = vld [vmem:[#allocation8 + $0x90] sm:$0xff]  ;;  %v7146_v17 = vld [vmem:[#allocation7 + $0xf8] sm:$0xff] }
 0x199   :  { %6498 = vmatprep.subr.msk.bf16.mxu0 %vm6497_vm5, %v15725_v54  ;;  %v1528_v33 = vpop.f32.mrf.mxu0  ;;  %2570 = vmatpush1.bf16.msra.mxu1 %v8555_v36  ;;  %16430 = vst [vmem:[#allocation280_spill] sm:$0xff] %v9796_v46  ;;  %vm15247_vm2 = vcmp.eq.s32.totalorder %v9796_v46, 1  ;;  %v16431_v36 = vld [vmem:[#allocation210_spill] sm:$0xff]  ;;  %v7153_v15 = vld [vmem:[#allocation7 + $0xf0] sm:$0xff]  ;;  %v9845_v46 = vld [vmem:[#allocation8 + $0x48] sm:$0xff] }
 0x19a   :  { %v1630_v0 = vpack.c.bf16 %v1528_v33, %v1524_v12  ;;  %v9793_v33 = vld [vmem:[#allocation8 + $0x80] sm:$0xff]  ;;  %2575 = vmatprep.subr.bf16.mxu1 %v16431_v36  ;;  %16435 = vst [vmem:[#allocation210_spill] sm:$0xff] %v9803_v51  ;;  %v385_v16 = vsub.f32 %v7153_v15, %v7569_v11 }
 0x19b   :  { %v9783_v40 = vpop.f32.mrf.mxu0  ;;  %16429 = vst [vmem:[#allocation203_spill] sm:$0xff] %v9793_v33  ;;  %vm15255_vm5 = vcmp.eq.s32.totalorder %v9793_v33, 1  ;;  %v637_v33 = vmul.f32 1.442695, %v552_v1  ;;  %v16450_v15 = vld [vmem:[#allocation223_spill] sm:$0xff]  ;;  %v16453_v1 = vld [vmem:[#allocation213_spill] sm:$0xff] }
 0x19c   :  { %6500 = vmatpush1.bf16.msk.msra.mxu0 %vm6499_vm11, %v15725_v54  ;;  %vm9778_vm11 = vmpackc.low %vm15235_vm4, %vm15237_vm7  ;;  %6035 = vmatprep.mubr.msk.bf16.mxu1 %vm16433_vm9, %v1630_v0  ;;  %vm15258_vm7 = vcmp.eq.s32.totalorder %v9803_v51, 1  ;;  %v469_v0 = vmul.f32 1.442695, %v384_v5  ;;  %v383_v5 = vsub.f32 %v7150_v22, %v7564_v10  ;;  %v9881_v12 = vld [vmem:[#allocation8 + $0x40] sm:$0xff] }
 0x19d   :  { %6502 = vmatprep.subr.msk.bf16.mxu0 %vm6501_vm1, %v15725_v54  ;;  %vm9789_vm1 = vmpackc.low %vm15239_vm13, %vm15249_vm15  ;;  %vm15256_vm13 = vcmp.eq.s32.totalorder %v9806_v43, 1  ;;  %v1534_v36 = vpop.f32.mrf.mxu0  ;;  %1904 = vmatmul.mubr.bf16.gmra.mxu1 %v1629_v42  ;;  %v16441_v42 = vld [vmem:[#allocation211_spill] sm:$0xff]  ;;  %vm15260_vm15 = vcmp.eq.s32.totalorder %v9848_v18, 1  ;;  %v16449_v43 = vld [vmem:[#allocation222_spill] sm:$0xff] }
 0x19e   :  { %vm16434_vm4 = vmmov %vm16433_vm9  ;;  %2576 = vmatpush2.bf16.msra.mxu1 %v16441_v42  ;;  %vm15257_vm9 = vcmp.eq.s32.totalorder %v9840_v63, 1  ;;  %v16446_v42 = vld [vmem:[#allocation212_spill] sm:$0xff]  ;;  %16447 = vst [vmem:[#allocation211_spill] sm:$0xff] %v9845_v46  ;;  %v551_v51 = vsub.f32 %v16449_v43, %v7564_v10  ;;  %6729 = vpow2.f32 %v469_v0  ;;  %v467_v0 = vmul.f32 1.442695, %v383_v5  ;;  %v9923_v43 = vld [vmem:[#allocation8 + $0x20] sm:$0xff] }
 0x19f   :  { %3989 = vmatmul.mubr.bf16.gmra.mxu0 %v7143_v60  ;;  %v16432_v60 = vld [vmem:[#allocation20_spill] sm:$0xff]  ;;  %v1536_v45 = vpop.f32.mrf.mxu0  ;;  %2577 = vmatprep.subr.bf16.mxu1 %v16446_v42  ;;  %16448 = vst [vmem:[#allocation212_spill] sm:$0xff] %v9848_v18  ;;  %v553_v42 = vsub.f32 %v16450_v15, %v7569_v11  ;;  %16456 = vst [vmem:[#allocation222_spill] sm:$0xff] %v9881_v12  ;;  %v7159_v5 = vld [vmem:[#allocation2 + $0x34] ss:$8 sps:$4 sm:$0xff]  }
 0x1a0   :  { %v386_v27 = vsub.f32 %v7146_v17, %v16432_v60  ;;  %6411 = vmatprep.mubr.msk.bf16.mxu0 %vm16434_vm4, %v7147_v57  ;;  %6504 = vmatpush1.bf16.msk.msra.mxu0 %vm9778_vm11, %v15725_v54  ;;  %v16438_v57 = vld [vmem:[#allocation207_spill] sm:$0xff]  ;;  %vm9823_vm4 = vmpackc.low %vm15247_vm2, %vm15255_vm5  ;;  %vm15267_vm2 = vcmp.eq.s32.totalorder %v9845_v46, 1  ;;  %v9884_v15 = vld [vmem:[#allocation8 + $0x50] sm:$0xff] }
 0x1a1   :  { %v554_v17 = vsub.f32 %v16438_v57, %v16432_v60  ;;  %6506 = vmatprep.subr.msk.bf16.mxu0 %vm9789_vm1, %v15725_v54  ;;  %vm9833_vm11 = vmpackc.low %vm15256_vm13, %vm15258_vm7  ;;  %v9837_v57 = vld [vmem:[#allocation8 + $0x60] sm:$0xff]  ;;  %16445 = vst [vmem:[#allocation207_spill] sm:$0xff] %v9840_v63  ;;  %v1538_v48 = vpop.f32.mrf.mxu0  ;;  %vm15266_vm13 = vcmp.eq.s32.totalorder %v9884_v15, 1  ;;  %v635_v63 = vmul.f32 1.442695, %v551_v51  ;;  %v16465_v46 = vld [vmem:[#allocation224_spill] sm:$0xff] }
 0x1a2   :  { %16444 = vst [vmem:[#allocation206_spill] sm:$0xff] %v9837_v57  ;;  %vm15259_vm1 = vcmp.eq.s32.totalorder %v9837_v57, 1  ;;  %v473_v22 = vmul.f32 1.442695, %v386_v27  ;;  %v1632_v14 = vpack.c.bf16 %v1538_v48, %v1534_v36  ;;  %2578 = vmatpush2.bf16.msra.mxu1 %v16453_v1  ;;  %v7156_v48 = vld [vmem:[#allocation2 + $0x20] ss:$8 sps:$4 sm:$0xff]  }
 0x1a3   :  { %v641_v27 = vmul.f32 1.442695, %v554_v17  ;;  %vm9865_vm5 = vmpackc.low %vm15257_vm9, %vm15259_vm1  ;;  %v1631_v17 = vpack.c.bf16 %v1536_v45, %v9783_v40  ;;  %v9871_v49 = vpop.f32.mrf.mxu0  ;;  %16457 = vst [vmem:[#allocation223_spill] sm:$0xff] %v9884_v15  ;;  %v16458_v40 = vld [vmem:[#allocation214_spill] sm:$0xff]  ;;  %v471_v45 = vmul.f32 1.442695, %v385_v16 }
 0x1a4   :  { %6508 = vmatpush1.bf16.msk.msra.mxu0 %vm9823_vm4, %v15725_v54  ;;  %vm9877_vm4 = vmpackc.low %vm15260_vm15, %vm15267_vm2  ;;  %2579 = vmatprep.subr.bf16.mxu1 %v16458_v40  ;;  %6731 = vpow2.f32 %v473_v22  ;;  %vm16459_vm9 = vcmask 785408   ;;  %v9890_v1 = vld [vmem:[#allocation8 + $0x28] sm:$0xff]  ;;  %v16463_v18 = vld [vmem:[#allocation26_spill] sm:$0xff]  ;;  %16471 = vst [vmem:[#allocation224_spill] sm:$0xff] %v9923_v43 }
 0x1a5   :  { %6510 = vmatprep.subr.msk.bf16.mxu0 %vm9833_vm11, %v15725_v54  ;;  %vm15274_vm11 = vcmp.eq.s32.totalorder %v9881_v12, 1  ;;  %6036 = vmatprep.mubr.msk.bf16.mxu1 %vm16459_vm9, %v1632_v14  ;;  %vm16460_vm7 = vmmov %vm16459_vm9  ;;  %16461 = vst [vmem:[#allocation213_spill] sm:$0xff] %v9890_v1  ;;  %vm15277_vm1 = vcmp.eq.s32.totalorder %v9890_v1, 1  ;;  %6733 = vpow2.f32 %v637_v33  ;;  %v7162_v57 = vld [vmem:[#allocation7 + $0xc8] sm:$0xff]  ;;  %v1544_v22 = vpop.f32.mrf.mxu0  ;;  %v7163_v14 = vld [vmem:[#allocation7 + $0xd8] sm:$0xff]  ;;  %v548_v2 = vsub.f32 %v16465_v46, %v16463_v18 }
 0x1a6   :  { %v380_v40 = vsub.f32 %v7162_v57, %v16463_v18  ;;  %1914 = vmatmul.mubr.bf16.gmra.mxu1 %v1631_v17  ;;  %6735 = vpow2.f32 %v641_v27  ;;  %v16464_v16 = vld [vmem:[#allocation27_spill] sm:$0xff]  ;;  %v639_v57 = vmul.f32 1.442695, %v553_v42  ;;  %vm15278_vm9 = vcmp.eq.s32.totalorder %v9923_v43, 1  ;;  %v9926_v17 = vld [vmem:[#allocation8 + $0x30] sm:$0xff]  ;;  %v7196_v60 = vld [vmem:[#allocation7 + $0x98] sm:$0xff] }
 0x1a7   :  { %3999 = vmatmul.mubr.bf16.gmra.mxu0 %v7156_v48  ;;  %v9893_v48 = vld [vmem:[#allocation8 + $0x38] sm:$0xff]  ;;  %v16468_v33 = vld [vmem:[#allocation215_spill] sm:$0xff]  ;;  %6737 = vpow2.f32 %v467_v0  ;;  %v1546_v27 = vpop.f32.mrf.mxu0  ;;  %v16473_v36 = vld [vmem:[#allocation216_spill] sm:$0xff] }
 0x1a8   :  { %6412 = vmatprep.mubr.msk.bf16.mxu0 %vm16460_vm7, %v7159_v5  ;;  %16462 = vst [vmem:[#allocation214_spill] sm:$0xff] %v9893_v48  ;;  %vm15275_vm15 = vcmp.eq.s32.totalorder %v9893_v48, 1  ;;  %6512 = vmatpush1.bf16.msk.msra.mxu0 %vm9865_vm5, %v15725_v54  ;;  %v382_v5 = vsub.f32 %v7163_v14, %v16464_v16  ;;  %vm9910_vm7 = vmpackc.low %vm15266_vm13, %vm15274_vm11  ;;  %6739 = vpow2.f32 %v471_v45  ;;  %v16474_v42 = vld [vmem:[#allocation225_spill] sm:$0xff]  ;;  %v9932_v14 = vld [vmem:[#allocation8 + $0x8] sm:$0xff]  ;;  %v461_v15 = vmul.f32 1.442695, %v380_v40 }
 0x1a9   :  { %6514 = vmatprep.subr.msk.bf16.mxu0 %vm9877_vm4, %v15725_v54  ;;  %2580 = vmatpush2.bf16.msra.mxu1 %v16468_v33  ;;  %vm9919_vm5 = vmpackc.low %vm15275_vm15, %vm15277_vm1  ;;  %16472 = vst [vmem:[#allocation215_spill] sm:$0xff] %v9926_v17  ;;  %vm15276_vm4 = vcmp.eq.s32.totalorder %v9926_v17, 1  ;;  %v550_v0 = vsub.f32 %v16474_v42, %v16464_v16  ;;  %vm15301_vm13 = vcmp.eq.s32.totalorder %v9932_v14, 1  ;;  %v9935_v33 = vld [vmem:[#allocation8 + $0x18] sm:$0xff]  ;;  %6741 = vpow2.f32 %v635_v63  ;;  %v7168_v12 = vld [vmem:[#allocation7 + $0xc0] sm:$0xff]  ;;  %v1548_v1 = vpop.f32.mrf.mxu0 }
 0x1aa   :  { %2581 = vmatprep.subr.bf16.mxu1 %v16473_v36  ;;  %16475 = vst [vmem:[#allocation216_spill] sm:$0xff] %v9932_v14  ;;  %16476 = vst [vmem:[#allocation225_spill] sm:$0xff] %v9935_v33  ;;  %vm15279_vm2 = vcmp.eq.s32.totalorder %v9935_v33, 1  ;;  %v379_v48 = vsub.f32 %v7168_v12, %v7604_v23  ;;  %v465_v45 = vmul.f32 1.442695, %v382_v5  ;;  %v7169_v42 = vld [vmem:[#allocation7 + $0xd0] sm:$0xff]  ;;  %v1634_v34 = vpack.c.bf16 %v1548_v1, %v1544_v22 }
 0x1ab   :  { %v629_v36 = vmul.f32 1.442695, %v548_v2  ;;  %v381_v13 = vsub.f32 %v7169_v42, %v7613_v25  ;;  %vm9950_vm11 = vmpackc.low %vm15276_vm4, %vm15278_vm9  ;;  %v16479_v12 = vld [vmem:[#allocation217_spill] sm:$0xff]  ;;  %6743 = vpow2.f32 %v639_v57  ;;  %v1633_v2 = vpack.c.bf16 %v1546_v27, %v9871_v49  ;;  %v9956_v40 = vpop.f32.mrf.mxu0  ;;  %v9966_v5 = vld [vmem:[#allocation8] sm:$0xff]  ;;  %v10001_v63 = vpop.eup %6729 }
 0x1ac   :  { %6516 = vmatpush1.bf16.msk.msra.mxu0 %vm9910_vm7, %v15725_v54  ;;  %v7170_v1 = vld [vmem:[#allocation2 + $0x30] ss:$8 sps:$4 sm:$0xff]   ;;  %vm9962_vm7 = vmpackc.low %vm15279_vm2, %vm15301_vm13  ;;  %16482 = vst [vmem:[#allocation217_spill] sm:$0xff] %v9966_v5  ;;  %v633_v57 = vmul.f32 1.442695, %v550_v0  ;;  %v547_v27 = vsub.f32 %v8774_v20, %v7604_v23  ;;  %vm16485_vm4 = vcmask 785408   ;;  %6745 = vpow2.f32 %v461_v15 }
 0x1ad   :  { %6518 = vmatprep.subr.msk.bf16.mxu0 %vm9919_vm5, %v15725_v54  ;;  %2582 = vmatpush2.bf16.msra.mxu1 %v16479_v12  ;;  %vm3750_vm5 = vcmp.eq.s32.totalorder %v9966_v5, 1  ;;  %v9969_v51 = vld [vmem:[#allocation8 + $0x10] sm:$0xff]  ;;  %v16484_v49 = vld [vmem:[#allocation218_spill] sm:$0xff]  ;;  %v7173_v46 = vld [vmem:[#allocation2 + $0x44] ss:$8 sps:$4 sm:$0xff]   ;;  %v1554_v17 = vpop.f32.mrf.mxu0  ;;  %6747 = vpow2.f32 %v465_v45 }
 0x1ae   :  { %16483 = vst [vmem:[#allocation282_spill] sm:$0xff] %v9969_v51  ;;  %vm15283_vm15 = vcmp.eq.s32.totalorder %v9969_v51, 1  ;;  %2583 = vmatprep.subr.bf16.mxu1 %v16484_v49  ;;  %6037 = vmatprep.mubr.msk.bf16.mxu1 %vm16485_vm4, %v1634_v34  ;;  %vm16486_vm1 = vmmov %vm16485_vm4  ;;  %v9977_v42 = vld [vmem:[#allocation8 + $0x1a8] sm:$0xff]  ;;  %v9980_v12 = vld [vmem:[#allocation8 + $0x1b8] sm:$0xff]  ;;  %v463_v20 = vmul.f32 1.442695, %v381_v13  ;;  %6749 = vpow2.f32 %v629_v36 }
 0x1af   :  { %4009 = vmatmul.mubr.bf16.gmra.mxu0 %v7170_v1  ;;  %16487 = vst [vmem:[#allocation218_spill] sm:$0xff] %v9977_v42  ;;  %vm15293_vm9 = vcmp.eq.s32.totalorder %v9977_v42, 1  ;;  %16488 = vst [vmem:[#allocation283_spill] sm:$0xff] %v9980_v12  ;;  %vm15285_vm2 = vcmp.eq.s32.totalorder %v9980_v12, 1  ;;  %v459_v1 = vmul.f32 1.442695, %v379_v48  ;;  %1924 = vmatmul.mubr.bf16.gmra.mxu1 %v1633_v2  ;;  %6751 = vpow2.f32 %v633_v57 }
 0x1b0   :  { %6413 = vmatprep.mubr.msk.bf16.mxu0 %vm16486_vm1, %v7173_v46  ;;  %v16489_v0 = vld [vmem:[#allocation230_spill] sm:$0xff]  ;;  %6520 = vmatpush1.bf16.msk.msra.mxu0 %vm9950_vm11, %v15725_v54  ;;  %v7176_v34 = vld [vmem:[#allocation7 + $0xa8] sm:$0xff]  ;;  %v16490_v46 = vld [vmem:[#allocation33_spill] sm:$0xff] }
 0x1b1   :  { %v549_v49 = vsub.f32 %v16489_v0, %v7613_v25  ;;  %v376_v43 = vsub.f32 %v7176_v34, %v16490_v46  ;;  %6522 = vmatprep.subr.msk.bf16.mxu0 %vm9962_vm7, %v15725_v54  ;;  %vm9996_vm1 = vmpackc.low %vm15283_vm15, %vm3750_vm5  ;;  %v16493_v48 = vld [vmem:[#allocation219_spill] sm:$0xff]  ;;  %16494 = vst [vmem:[#allocation230_spill] sm:$0xff] %v10001_v63  ;;  %v7177_v13 = vld [vmem:[#allocation7 + $0xb8] sm:$0xff]  ;;  %v1556_v0 = vpop.f32.mrf.mxu0  ;;  %v10025_v42 = vpop.eup %6731  ;;  %6753 = vpow2.f32 %v459_v1 }
 0x1b2   :  { %2584 = vmatpush2.bf16.msra.mxu1 %v16493_v48  ;;  %v16495_v45 = vld [vmem:[#allocation34_spill] sm:$0xff]  ;;  %vm10008_vm11 = vmpackc.low %vm15285_vm2, %vm15293_vm9  ;;  %v10015_v48 = vld [vmem:[#allocation8 + $0x1b0] sm:$0xff]  ;;  %16503 = vst [vmem:[#allocation286_spill] sm:$0xff] %v10025_v42  ;;  %v10032_v57 = vpop.eup %6733  ;;  %6755 = vpow2.f32 %v463_v20  ;;  %v1635_v20 = vpack.c.bf16 %v1556_v0, %v9956_v40 }
 0x1b3   :  { %v378_v2 = vsub.f32 %v7177_v13, %v16495_v45  ;;  %v10012_v34 = vld [vmem:[#allocation8 + $0x1a0] sm:$0xff]  ;;  %16499 = vst [vmem:[#allocation284_spill] sm:$0xff] %v10015_v48  ;;  %vm15294_vm7 = vcmp.eq.s32.totalorder %v10015_v48, 1  ;;  %v16500_v36 = vld [vmem:[#allocation220_spill] sm:$0xff]  ;;  %v627_v13 = vmul.f32 1.442695, %v547_v27  ;;  %v1558_v52 = vpop.f32.mrf.mxu0 }
 0x1b4   :  { %16498 = vst [vmem:[#allocation219_spill] sm:$0xff] %v10012_v34  ;;  %vm15295_vm4 = vcmp.eq.s32.totalorder %v10012_v34, 1  ;;  %2585 = vmatprep.subr.bf16.mxu1 %v16500_v36  ;;  %v10019_v33 = vld [vmem:[#allocation8 + $0x188] sm:$0xff]  ;;  %v10022_v12 = vld [vmem:[#allocation8 + $0x198] sm:$0xff]  ;;  %v631_v51 = vmul.f32 1.442695, %v549_v49  ;;  %6524 = vmatpush1.bf16.msk.msra.mxu0 %vm9996_vm1, %v15725_v54  ;;  %v1636_v24 = vpack.c.bf16 %v1558_v52, %v1554_v17  ;;  %v10048_v49 = vpop.eup %6735 }
 0x1b5   :  { %16501 = vst [vmem:[#allocation220_spill] sm:$0xff] %v10019_v33  ;;  %vm15299_vm15 = vcmp.eq.s32.totalorder %v10019_v33, 1  ;;  %16502 = vst [vmem:[#allocation285_spill] sm:$0xff] %v10022_v12  ;;  %vm15297_vm2 = vcmp.eq.s32.totalorder %v10022_v12, 1  ;;  %v16504_v14 = vld [vmem:[#allocation231_spill] sm:$0xff]  ;;  %v16506_v36 = vld [vmem:[#allocation232_spill] sm:$0xff]  ;;  %6526 = vmatprep.subr.msk.bf16.mxu0 %vm10008_vm11, %v15725_v54  ;;  %v10051_v52 = vpop.f32.mrf.mxu0  ;;  %6757 = vpow2.f32 %v627_v13 }
 0x1b6   :  { %v544_v5 = vsub.f32 %v16504_v14, %v16490_v46  ;;  %16505 = vst [vmem:[#allocation231_spill] sm:$0xff] %v10032_v57  ;;  %v453_v27 = vmul.f32 1.442695, %v376_v43  ;;  %v546_v3 = vsub.f32 %v16506_v36, %v16495_v45  ;;  %vm10043_vm9 = vmpackc.low %vm15294_vm7, %vm15295_vm4  ;;  %v16509_v1 = vld [vmem:[#allocation221_spill] sm:$0xff]  ;;  %v457_v43 = vmul.f32 1.442695, %v378_v2  ;;  %v10067_v2 = vpop.eup %6737 }
 0x1b7   :  { %2586 = vmatpush2.bf16.msra.mxu1 %v16509_v1  ;;  %16510 = vst [vmem:[#allocation232_spill] sm:$0xff] %v10048_v49  ;;  %v7182_v17 = vld [vmem:[#allocation2 + $0x40] ss:$8 sps:$4 sm:$0xff]   ;;  %vm10057_vm1 = vmpackc.low %vm15297_vm2, %vm15299_vm15  ;;  %v10064_v36 = vld [vmem:[#allocation8 + $0x190] sm:$0xff]  ;;  %vm16517_vm4 = vcmask 785408   ;;  %6759 = vpow2.f32 %v631_v51  ;;  %v1564_v53 = vpop.f32.mrf.mxu0  ;;  %v545_v51 = vsub.f32 %v16525_v30, %v16522_v38 }
 0x1b8   :  { %4019 = vmatmul.mubr.bf16.gmra.mxu0 %v7182_v17  ;;  %v10061_v22 = vld [vmem:[#allocation8 + $0x180] sm:$0xff]  ;;  %16514 = vst [vmem:[#allocation287_spill] sm:$0xff] %v10064_v36  ;;  %vm15304_vm7 = vcmp.eq.s32.totalorder %v10064_v36, 1  ;;  %v7185_v40 = vld [vmem:[#allocation5 + $0x74] ss:$8 sps:$4 sm:$0xff]   ;;  %16515 = vst [vmem:[#allocation288_spill] sm:$0xff] %v10067_v2  ;;  %6038 = vmatprep.mubr.msk.bf16.mxu1 %vm16517_vm4, %v1636_v24  ;;  %6761 = vpow2.f32 %v453_v27 }
 0x1b9   :  { %16513 = vst [vmem:[#allocation221_spill] sm:$0xff] %v10061_v22  ;;  %vm15306_vm11 = vcmp.eq.s32.totalorder %v10061_v22, 1  ;;  %4189 = vmatprep.subr.bf16.mxu1 %v7185_v40  ;;  %v7186_v0 = vld [vmem:[#allocation7 + $0xa0] sm:$0xff]  ;;  %v7187_v48 = vld [vmem:[#allocation2 + $0x54] ss:$8 sps:$4 sm:$0xff]   ;;  %vm16518_vm2 = vmmov %vm16517_vm4  ;;  %v10078_v40 = vpop.eup %6739  ;;  %1934 = vmatmul.mubr.bf16.gmra.mxu1 %v1635_v20  ;;  %6763 = vpow2.f32 %v457_v43 }
 0x1ba   :  { %v16516_v1 = vld [vmem:[#allocation38_spill] sm:$0xff]  ;;  %6414 = vmatprep.mubr.msk.bf16.mxu0 %vm16518_vm2, %v7187_v48  ;;  %v10072_v34 = vld [vmem:[#allocation8 + $0x168] sm:$0xff]  ;;  %16521 = vst [vmem:[#allocation291_spill] sm:$0xff] %v10078_v40  ;;  %v621_v13 = vmul.f32 1.442695, %v544_v5  ;;  %v7190_v33 = vld [vmem:[#allocation7 + $0xb0] sm:$0xff]  ;;  %6528 = vmatpush2.bf16.msk.msra.mxu0 %vm10043_vm9, %v15725_v54  ;;  %v10086_v48 = vpop.eup %6741  ;;  %v1566_v5 = vpop.f32.mrf.mxu0 }
 0x1bb   :  { %v375_v17 = vsub.f32 %v7186_v0, %v16516_v1  ;;  %16519 = vst [vmem:[#allocation289_spill] sm:$0xff] %v10072_v34  ;;  %vm15318_vm15 = vcmp.eq.s32.totalorder %v10072_v34, 1  ;;  %v10075_v12 = vld [vmem:[#allocation8 + $0x178] sm:$0xff]  ;;  %v377_v0 = vsub.f32 %v7190_v33, %v16522_v38  ;;  %v625_v39 = vmul.f32 1.442695, %v546_v3  ;;  %6530 = vmatprep.subr.msk.bf16.mxu0 %vm10057_vm1, %v15725_v54  ;;  %vm10097_vm2 = vmpackc.low %vm15304_vm7, %vm15306_vm11  ;;  %v10109_v3 = vld [vmem:[#allocation8 + $0x160] sm:$0xff]  ;;  %v10115_v14 = vpop.eup %6743 }
 0x1bc   :  { %16520 = vst [vmem:[#allocation290_spill] sm:$0xff] %v10075_v12  ;;  %vm15316_vm13 = vcmp.eq.s32.totalorder %v10075_v12, 1  ;;  %v16523_v24 = vld [vmem:[#allocation237_spill] sm:$0xff]  ;;  %16530 = vst [vmem:[#allocation238_spill] sm:$0xff] %v10109_v3  ;;  %vm15319_vm4 = vcmp.eq.s32.totalorder %v10109_v3, 1  ;;  %v7193_v20 = vld [vmem:[#allocation7 + $0x88] sm:$0xff]  ;;  %6765 = vpow2.f32 %v621_v13  ;;  %v1568_v10 = vpop.f32.mrf.mxu0 }
 0x1bd   :  { %v543_v6 = vsub.f32 %v16523_v24, %v16516_v1  ;;  %16524 = vst [vmem:[#allocation237_spill] sm:$0xff] %v10086_v48  ;;  %vm10105_vm9 = vmpackc.low %vm15316_vm13, %vm15318_vm15  ;;  %v10112_v27 = vld [vmem:[#allocation8 + $0x170] sm:$0xff]  ;;  %v451_v43 = vmul.f32 1.442695, %v375_v17  ;;  %v10118_v36 = vld [vmem:[#allocation8 + $0x148] sm:$0xff]  ;;  %v10128_v17 = vpop.eup %6745  ;;  %6767 = vpow2.f32 %v625_v39  ;;  %v1638_v49 = vpack.c.bf16 %v1568_v10, %v1564_v53 }
 0x1be   :  { %16531 = vst [vmem:[#allocation292_spill] sm:$0xff] %v10112_v27  ;;  %vm15317_vm1 = vcmp.eq.s32.totalorder %v10112_v27, 1  ;;  %16532 = vst [vmem:[#allocation293_spill] sm:$0xff] %v10115_v14  ;;  %v16533_v15 = vld [vmem:[#allocation41_spill] sm:$0xff]  ;;  %vm15321_vm7 = vcmp.eq.s32.totalorder %v10118_v36, 1  ;;  %v16536_v11 = vld [vmem:[#allocation43_spill] sm:$0xff]  ;;  %6532 = vmatpush2.bf16.msk.msra.mxu0 %vm10097_vm2, %v15725_v54  ;;  %v10148_v10 = vpop.f32.mrf.mxu0 }
 0x1bf   :  { %v372_v24 = vsub.f32 %v7193_v20, %v16533_v15  ;;  %16534 = vst [vmem:[#allocation294_spill] sm:$0xff] %v10118_v36  ;;  %v10121_v22 = vld [vmem:[#allocation8 + $0x158] sm:$0xff]  ;;  %v455_v12 = vmul.f32 1.442695, %v377_v0  ;;  %v619_v34 = vmul.f32 1.442695, %v543_v6  ;;  %v374_v4 = vsub.f32 %v7196_v60, %v16536_v11  ;;  %6534 = vmatprep.subr.msk.bf16.mxu0 %vm10105_vm9, %v15725_v54  ;;  %vm10139_vm13 = vmpackc.low %vm15317_vm1, %vm15319_vm4  ;;  %v10143_v60 = vpop.eup %6747 }
 0x1c0   :  { %16535 = vst [vmem:[#allocation295_spill] sm:$0xff] %v10121_v22  ;;  %vm15320_vm11 = vcmp.eq.s32.totalorder %v10121_v22, 1  ;;  %16537 = vst [vmem:[#allocation296_spill] sm:$0xff] %v10128_v17  ;;  %v623_v20 = vmul.f32 1.442695, %v545_v51  ;;  %v16538_v16 = vld [vmem:[#allocation239_spill] sm:$0xff]  ;;  %6769 = vpow2.f32 %v451_v43  ;;  %v1574_v14 = vpop.f32.mrf.mxu0 }
 0x1c1   :  { %v540_v25 = vsub.f32 %v16538_v16, %v16533_v15  ;;  %16541 = vst [vmem:[#allocation239_spill] sm:$0xff] %v10143_v60  ;;  %v16542_v39 = vld [vmem:[#allocation240_spill] sm:$0xff]  ;;  %v1637_v16 = vpack.c.bf16 %v1566_v5, %v10051_v52  ;;  %vm10154_vm2 = vmpackc.low %vm15320_vm11, %vm15321_vm7  ;;  %v10158_v51 = vld [vmem:[#allocation8 + $0x140] sm:$0xff]  ;;  %v10164_v52 = vpop.eup %6749  ;;  %v445_v5 = vmul.f32 1.442695, %v372_v24  ;;  %vm16548_vm15 = vcmask 785408  }
 0x1c2   :  { %v542_v13 = vsub.f32 %v16542_v39, %v16536_v11  ;;  %v7197_v53 = vld [vmem:[#allocation2 + $0x50] ss:$8 sps:$4 sm:$0xff]   ;;  %16545 = vst [vmem:[#allocation240_spill] sm:$0xff] %v10158_v51  ;;  %vm15331_vm9 = vcmp.eq.s32.totalorder %v10158_v51, 1  ;;  %16547 = vst [vmem:[#allocation298_spill] sm:$0xff] %v10164_v52  ;;  %6039 = vmatprep.mubr.msk.bf16.mxu1 %vm16548_vm15, %v1638_v49  ;;  %v10168_v39 = vld [vmem:[#allocation8 + $0x128] sm:$0xff]  ;;  %v10174_v27 = vpop.eup %6751  ;;  %6771 = vpow2.f32 %v455_v12  ;;  %6536 = vmatpush2.bf16.msk.msra.mxu0 %vm10139_vm13, %v15725_v54 }
 0x1c3   :  { %4029 = vmatmul.mubr.bf16.gmra.mxu0 %v7197_v53  ;;  %v10161_v33 = vld [vmem:[#allocation8 + $0x150] sm:$0xff]  ;;  %v7200_v30 = vld [vmem:[#allocation2 + $0x64] ss:$8 sps:$4 sm:$0xff]   ;;  %vm16549_vm4 = vmmov %vm16548_vm15  ;;  %16550 = vst [vmem:[#allocation299_spill] sm:$0xff] %v10168_v39  ;;  %vm15345_vm11 = vcmp.eq.s32.totalorder %v10168_v39, 1  ;;  %1944 = vmatmul.mubr.bf16.gmra.mxu1 %v1637_v16  ;;  %6773 = vpow2.f32 %v619_v34 }
 0x1c4   :  { %16546 = vst [vmem:[#allocation297_spill] sm:$0xff] %v10161_v33  ;;  %vm15330_vm1 = vcmp.eq.s32.totalorder %v10161_v33, 1  ;;  %6415 = vmatprep.mubr.msk.bf16.mxu0 %vm16549_vm4, %v7200_v30  ;;  %v10171_v53 = vld [vmem:[#allocation8 + $0x138] sm:$0xff]  ;;  %16552 = vst [vmem:[#allocation301_spill] sm:$0xff] %v10174_v27  ;;  %v449_v3 = vmul.f32 1.442695, %v374_v4  ;;  %v10181_v30 = vpop.eup %6753  ;;  %6538 = vmatprep.subr.msk.bf16.mxu0 %vm10154_vm2, %v15725_v54  ;;  %6775 = vpow2.f32 %v623_v20 }
 0x1c5   :  { %16551 = vst [vmem:[#allocation300_spill] sm:$0xff] %v10171_v53  ;;  %vm15343_vm7 = vcmp.eq.s32.totalorder %v10171_v53, 1  ;;  %v7203_v22 = vld [vmem:[#allocation7 + $0x80] sm:$0xff]  ;;  %v16553_v43 = vld [vmem:[#allocation45_spill] sm:$0xff]  ;;  %16555 = vst [vmem:[#allocation302_spill] sm:$0xff] %v10181_v30  ;;  %6777 = vpow2.f32 %v445_v5 }
 0x1c6   :  { %v371_v24 = vsub.f32 %v7203_v22, %v16553_v43  ;;  %v7204_v36 = vld [vmem:[#allocation7 + $0x90] sm:$0xff]  ;;  %v16554_v49 = vld [vmem:[#allocation46_spill] sm:$0xff]  ;;  %v613_v40 = vmul.f32 1.442695, %v540_v25  ;;  %vm10192_vm15 = vmpackc.low %vm15330_vm1, %vm15331_vm9  ;;  %v10196_v22 = vpop.eup %6755  ;;  %v617_v34 = vmul.f32 1.442695, %v542_v13  ;;  %v1576_v25 = vpop.f32.mrf.mxu0  ;;  %6779 = vpow2.f32 %v449_v3 }
 0x1c7   :  { %v373_v42 = vsub.f32 %v7204_v36, %v16554_v49  ;;  %v16556_v18 = vld [vmem:[#allocation245_spill] sm:$0xff]  ;;  %vm10202_vm13 = vmpackc.low %vm15343_vm7, %vm15345_vm11  ;;  %v10206_v36 = vld [vmem:[#allocation8 + $0x120] sm:$0xff]  ;;  %v10219_v33 = vpop.eup %6757  ;;  %6540 = vmatpush2.bf16.msk.msra.mxu0 %vm10192_vm15, %v15725_v54  ;;  %vm16578_vm11 = vcmask 785408  }
 0x1c8   :  { %v539_v12 = vsub.f32 %v16556_v18, %v16553_v43  ;;  %16559 = vst [vmem:[#allocation245_spill] sm:$0xff] %v10196_v22  ;;  %16562 = vst [vmem:[#allocation303_spill] sm:$0xff] %v10206_v36  ;;  %vm15346_vm4 = vcmp.eq.s32.totalorder %v10206_v36, 1  ;;  %v10209_v6 = vld [vmem:[#allocation8 + $0x130] sm:$0xff]  ;;  %v10213_v16 = vld [vmem:[#allocation8 + $0x108] sm:$0xff]  ;;  %v1578_v5 = vpop.f32.mrf.mxu0  ;;  %6781 = vpow2.f32 %v613_v40  ;;  %6542 = vmatprep.subr.msk.bf16.mxu0 %vm10202_vm13, %v15725_v54 }
 0x1c9   :  { %16563 = vst [vmem:[#allocation304_spill] sm:$0xff] %v10209_v6  ;;  %vm15344_vm2 = vcmp.eq.s32.totalorder %v10209_v6, 1  ;;  %v7207_v20 = vld [vmem:[#allocation7 + $0x250] sm:$0xff]  ;;  %16564 = vst [vmem:[#allocation305_spill] sm:$0xff] %v10213_v16  ;;  %vm3783_vm1 = vcmp.eq.s32.totalorder %v10213_v16, 1  ;;  %v10216_v0 = vld [vmem:[#allocation8 + $0x118] sm:$0xff]  ;;  %v1640_v27 = vpack.c.bf16 %v1578_v5, %v1574_v14  ;;  %6783 = vpow2.f32 %v617_v34 }
 0x1ca   :  { %v541_v13 = vsub.f32 %v7207_v20, %v16554_v49  ;;  %16565 = vst [vmem:[#allocation306_spill] sm:$0xff] %v10216_v0  ;;  %vm15569_vm9 = vcmp.eq.s32.totalorder %v10216_v0, 1  ;;  %16566 = vst [vmem:[#allocation307_spill] sm:$0xff] %v10219_v33  ;;  %v443_v51 = vmul.f32 1.442695, %v371_v24  ;;  %v7210_v39 = vld [vmem:[#allocation7 + $0x68] sm:$0xff]  ;;  %v10225_v20 = vpop.eup %6759  ;;  %v10243_v14 = vpop.f32.mrf.mxu0 }
 0x1cb   :  { %v447_v53 = vmul.f32 1.442695, %v373_v42  ;;  %v16567_v57 = vld [vmem:[#allocation50_spill] sm:$0xff]  ;;  %16568 = vst [vmem:[#allocation308_spill] sm:$0xff] %v10225_v20  ;;  %v611_v23 = vmul.f32 1.442695, %v539_v12  ;;  %vm10235_vm7 = vmpackc.low %vm15344_vm2, %vm15346_vm4  ;;  %v10239_v3 = vpop.eup %6761  ;;  %6040 = vmatprep.mubr.msk.bf16.mxu1 %vm16578_vm11, %v1640_v27 }
 0x1cc   :  { %v368_v63 = vsub.f32 %v7210_v39, %v16567_v57  ;;  %v7211_v48 = vld [vmem:[#allocation7 + $0x78] sm:$0xff]  ;;  %v16569_v2 = vld [vmem:[#allocation51_spill] sm:$0xff]  ;;  %16572 = vst [vmem:[#allocation309_spill] sm:$0xff] %v10239_v3  ;;  %vm10249_vm15 = vmpackc.low %vm15569_vm9, %vm3783_vm1  ;;  %6785 = vpow2.f32 %v443_v51  ;;  %v1584_v60 = vpop.f32.mrf.mxu0  ;;  %6544 = vmatpush2.bf16.msk.msra.mxu0 %vm10235_vm7, %v15725_v54 }
 0x1cd   :  { %v370_v45 = vsub.f32 %v7211_v48, %v16569_v2  ;;  %v7212_v40 = vld [vmem:[#allocation7 + $0x228] sm:$0xff]  ;;  %v1639_v48 = vpack.c.bf16 %v1576_v25, %v10148_v10  ;;  %v10253_v4 = vld [vmem:[#allocation8 + $0x100] sm:$0xff]  ;;  %v10256_v18 = vld [vmem:[#allocation8 + $0x110] sm:$0xff]  ;;  %v10259_v10 = vpop.eup %6763  ;;  %v615_v25 = vmul.f32 1.442695, %v541_v13  ;;  %6787 = vpow2.f32 %v447_v53  ;;  %6546 = vmatprep.subr.msk.bf16.mxu0 %vm10249_vm15, %v15725_v54 }
 0x1ce   :  { %v536_v39 = vsub.f32 %v7212_v40, %v16567_v57  ;;  %v7213_v24 = vld [vmem:[#allocation2 + $0x60] ss:$8 sps:$4 sm:$0xff]   ;;  %16575 = vst [vmem:[#allocation310_spill] sm:$0xff] %v10253_v4  ;;  %vm3782_vm13 = vcmp.eq.s32.totalorder %v10253_v4, 1  ;;  %16576 = vst [vmem:[#allocation311_spill] sm:$0xff] %v10256_v18  ;;  %vm15570_vm2 = vcmp.eq.s32.totalorder %v10256_v18, 1  ;;  %v10268_v34 = vpop.eup %6765  ;;  %6789 = vpow2.f32 %v611_v23  ;;  %v1586_v42 = vpop.f32.mrf.mxu0 }
 0x1cf   :  { %4039 = vmatmul.mubr.bf16.gmra.mxu0 %v7213_v24  ;;  %16577 = vst [vmem:[#allocation312_spill] sm:$0xff] %v10259_v10  ;;  %v7216_v5 = vld [vmem:[#allocation7 + $0x238] sm:$0xff]  ;;  %vm16579_vm4 = vmmov %vm16578_vm11  ;;  %v437_v6 = vmul.f32 1.442695, %v368_v63  ;;  %v7218_v36 = vld [vmem:[#allocation7 + $0x60] sm:$0xff]  ;;  %1954 = vmatmul.mubr.bf16.gmra.mxu1 %v1639_v48  ;;  %v10282_v51 = vpop.eup %6767  ;;  %6791 = vpow2.f32 %v615_v25  ;;  %v1641_v11 = vpack.c.bf16 %v1586_v42, %v10243_v14 }
 0x1d0   :  { %v538_v40 = vsub.f32 %v7216_v5, %v16569_v2  ;;  %v7217_v24 = vld [vmem:[#allocation2 + $0x74] ss:$8 sps:$4 sm:$0xff]   ;;  %16581 = vst [vmem:[#allocation313_spill] sm:$0xff] %v10268_v34  ;;  %v441_v13 = vmul.f32 1.442695, %v370_v45  ;;  %v16582_v27 = vld [vmem:[#allocation55_spill] sm:$0xff]  ;;  %vm10278_vm11 = vmpackc.low %vm15570_vm2, %vm3782_vm13  ;;  %v1588_v20 = vpop.f32.mrf.mxu0 }
 0x1d1   :  { %6416 = vmatprep.mubr.msk.bf16.mxu0 %vm16579_vm4, %v7217_v24  ;;  %v16580_v0 = vld [vmem:[#allocation53_spill] sm:$0xff]  ;;  %16585 = vst [vmem:[#allocation314_spill] sm:$0xff] %v10282_v51  ;;  %v605_v53 = vmul.f32 1.442695, %v536_v39  ;;  %v7220_v45 = vld [vmem:[#allocation7 + $0x220] sm:$0xff]  ;;  %6793 = vpow2.f32 %v437_v6  ;;  %v7222_v4 = vld [vmem:[#allocation7 + $0x48] sm:$0xff]  ;;  %6548 = vmatpush2.bf16.msk.msra.mxu0 %vm10278_vm11, %v15725_v54 }
 0x1d2   :  { %v367_v16 = vsub.f32 %v7218_v36, %v16580_v0  ;;  %v7219_v5 = vld [vmem:[#allocation7 + $0x70] sm:$0xff]  ;;  %v535_v36 = vsub.f32 %v7220_v45, %v16580_v0  ;;  %v609_v48 = vmul.f32 1.442695, %v538_v40  ;;  %6795 = vpow2.f32 %v441_v13  ;;  %v7223_v25 = vld [vmem:[#allocation7 + $0x58] sm:$0xff]  ;;  %v10299_v49 = vpop.f32.mrf.mxu0  ;;  %vm16592_vm7 = vmmov %vm16579_vm4 }
 0x1d3   :  { %v369_v38 = vsub.f32 %v7219_v5, %v16582_v27  ;;  %v7221_v12 = vld [vmem:[#allocation7 + $0x230] sm:$0xff]  ;;  %v10286_v5 = vpop.eup %6769  ;;  %v16589_v40 = vld [vmem:[#allocation58_spill] sm:$0xff]  ;;  %6797 = vpow2.f32 %v605_v53  ;;  %v7234_v57 = vld [vmem:[#allocation7 + $0x1e8] sm:$0xff] }
 0x1d4   :  { %v537_v24 = vsub.f32 %v7221_v12, %v16582_v27  ;;  %16586 = vst [vmem:[#allocation315_spill] sm:$0xff] %v10286_v5  ;;  %v435_v18 = vmul.f32 1.442695, %v367_v16  ;;  %v16587_v46 = vld [vmem:[#allocation57_spill] sm:$0xff]  ;;  %v10292_v23 = vpop.eup %6771  ;;  %v366_v45 = vsub.f32 %v7223_v25, %v16589_v40  ;;  %v1642_v12 = vpack.c.bf16 %v1588_v20, %v1584_v60  ;;  %v7224_v16 = vld [vmem:[#allocation7 + $0x208] sm:$0xff]  ;;  %v16594_v42 = vld [vmem:[#allocation62_spill] sm:$0xff] }
 0x1d5   :  { %v364_v1 = vsub.f32 %v7222_v4, %v16587_v46  ;;  %16588 = vst [vmem:[#allocation316_spill] sm:$0xff] %v10292_v23  ;;  %v439_v39 = vmul.f32 1.442695, %v369_v38  ;;  %v10295_v22 = vpop.eup %6773  ;;  %v603_v6 = vmul.f32 1.442695, %v535_v36  ;;  %v532_v4 = vsub.f32 %v7224_v16, %v16587_v46  ;;  %v7226_v13 = vld [vmem:[#allocation7 + $0x218] sm:$0xff]  ;;  %v1594_v16 = vpop.f32.mrf.mxu0  ;;  %vm16604_vm15 = vmmov %vm16579_vm4 }
 0x1d6   :  { %16590 = vst [vmem:[#allocation317_spill] sm:$0xff] %v10295_v22  ;;  %v7225_v54 = vld [vmem:[#allocation2 + $0x70] ss:$8 sps:$4 sm:$0xff]   ;;  %v10301_v63 = vpop.eup %6775  ;;  %6799 = vpow2.f32 %v609_v48  ;;  %v607_v38 = vmul.f32 1.442695, %v537_v24  ;;  %v534_v60 = vsub.f32 %v7226_v13, %v16589_v40  ;;  %6041 = vmatprep.mubr.msk.bf16.mxu1 %vm16592_vm7, %v1642_v12  ;;  %v7228_v36 = vld [vmem:[#allocation7 + $0x40] sm:$0xff]  ;;  %vm16605_vm11 = vmmov %vm16579_vm4 }
 0x1d7   :  { %4049 = vmatmul.mubr.bf16.gmra.mxu0 %v7225_v54  ;;  %16591 = vst [vmem:[#allocation318_spill] sm:$0xff] %v10301_v63  ;;  %v7227_v20 = vld [vmem:[#allocation2 + $0x84] ss:$8 sps:$4 sm:$0xff]   ;;  %v10306_v53 = vpop.eup %6777  ;;  %6801 = vpow2.f32 %v435_v18  ;;  %v429_v14 = vmul.f32 1.442695, %v364_v1  ;;  %v363_v25 = vsub.f32 %v7228_v36, %v16594_v42  ;;  %1964 = vmatmul.mubr.bf16.gmra.mxu1 %v1641_v11  ;;  %v7229_v24 = vld [vmem:[#allocation7 + $0x50] sm:$0xff]  ;;  %v1596_v1 = vpop.f32.mrf.mxu0  ;;  %vm16616_vm7 = vmmov %vm16579_vm4 }
 0x1d8   :  { %6417 = vmatprep.mubr.msk.bf16.mxu0 %vm16579_vm4, %v7227_v20  ;;  %16593 = vst [vmem:[#allocation319_spill] sm:$0xff] %v10306_v53  ;;  %v10309_v54 = vpop.eup %6779  ;;  %6803 = vpow2.f32 %v439_v39  ;;  %v433_v48 = vmul.f32 1.442695, %v366_v45  ;;  %v16596_v13 = vld [vmem:[#allocation63_spill] sm:$0xff]  ;;  %v597_v20 = vmul.f32 1.442695, %v532_v4 }
 0x1d9   :  { %16595 = vst [vmem:[#allocation320_spill] sm:$0xff] %v10309_v54  ;;  %v365_v15 = vsub.f32 %v7229_v24, %v16596_v13  ;;  %v10312_v12 = vpop.eup %6781  ;;  %6805 = vpow2.f32 %v603_v6  ;;  %v7230_v52 = vld [vmem:[#allocation7 + $0x200] sm:$0xff]  ;;  %v601_v17 = vmul.f32 1.442695, %v534_v60  ;;  %v7231_v36 = vld [vmem:[#allocation7 + $0x210] sm:$0xff]  ;;  %v7232_v45 = vld [vmem:[#allocation7 + $0x28] sm:$0xff]  ;;  %v1598_v30 = vpop.f32.mrf.mxu0 }
 0x1da   :  { %16597 = vst [vmem:[#allocation321_spill] sm:$0xff] %v10312_v12  ;;  %v531_v18 = vsub.f32 %v7230_v52, %v16594_v42  ;;  %6807 = vpow2.f32 %v607_v38  ;;  %v533_v11 = vsub.f32 %v7231_v36, %v16596_v13  ;;  %v10316_v43 = vpop.eup %6783  ;;  %v427_v39 = vmul.f32 1.442695, %v363_v25  ;;  %v16599_v33 = vld [vmem:[#allocation66_spill] sm:$0xff]  ;;  %v16601_v52 = vld [vmem:[#allocation68_spill] sm:$0xff]  ;;  %v16613_v34 = vld [vmem:[#allocation75_spill] sm:$0xff] }
 0x1db   :  { %16598 = vst [vmem:[#allocation322_spill] sm:$0xff] %v10316_v43  ;;  %6809 = vpow2.f32 %v429_v14  ;;  %v360_v24 = vsub.f32 %v7232_v45, %v16599_v33  ;;  %v10319_v2 = vpop.eup %6785  ;;  %v431_v6 = vmul.f32 1.442695, %v365_v15  ;;  %v7233_v4 = vld [vmem:[#allocation7 + $0x38] sm:$0xff]  ;;  %v1644_v38 = vpack.c.bf16 %v1598_v30, %v1594_v16  ;;  %v10326_v51 = vpop.f32.mrf.mxu0  ;;  %v7235_v45 = vld [vmem:[#allocation2 + $0x80] ss:$8 sps:$4 sm:$0xff]  }
 0x1dc   :  { %16600 = vst [vmem:[#allocation323_spill] sm:$0xff] %v10319_v2  ;;  %6811 = vpow2.f32 %v433_v48  ;;  %v362_v27 = vsub.f32 %v7233_v4, %v16601_v52  ;;  %v10322_v60 = vpop.eup %6787  ;;  %v595_v36 = vmul.f32 1.442695, %v531_v18  ;;  %v528_v14 = vsub.f32 %v7234_v57, %v16599_v33  ;;  %v7236_v48 = vld [vmem:[#allocation7 + $0x1f8] sm:$0xff]  ;;  %v7240_v40 = vld [vmem:[#allocation7 + $0x1e0] sm:$0xff]  ;;  %v7254_v53 = vld [vmem:[#allocation7 + $0x368] sm:$0xff] }
 0x1dd   :  { %16602 = vst [vmem:[#allocation324_spill] sm:$0xff] %v10322_v60  ;;  %6813 = vpow2.f32 %v597_v20  ;;  %v1643_v25 = vpack.c.bf16 %v1596_v1, %v10299_v49  ;;  %v10328_v10 = vpop.eup %6789  ;;  %v599_v15 = vmul.f32 1.442695, %v533_v11  ;;  %v530_v30 = vsub.f32 %v7236_v48, %v16601_v52  ;;  %6042 = vmatprep.mubr.msk.bf16.mxu1 %vm16604_vm15, %v1644_v38  ;;  %v7237_v16 = vld [vmem:[#allocation2 + $0x94] ss:$8 sps:$4 sm:$0xff]   ;;  %v7238_v49 = vld [vmem:[#allocation7 + $0x20] sm:$0xff]  ;;  %v1604_v4 = vpop.f32.mrf.mxu0  ;;  %vm16624_vm15 = vmmov %vm16579_vm4 }
 0x1de   :  { %16603 = vst [vmem:[#allocation325_spill] sm:$0xff] %v10328_v10  ;;  %6815 = vpow2.f32 %v601_v17  ;;  %v10333_v20 = vpop.eup %6791  ;;  %v421_v57 = vmul.f32 1.442695, %v360_v24  ;;  %v16607_v18 = vld [vmem:[#allocation69_spill] sm:$0xff]  ;;  %v425_v17 = vmul.f32 1.442695, %v362_v27 }
 0x1df   :  { %4059 = vmatmul.mubr.bf16.gmra.mxu0 %v7235_v45  ;;  %16606 = vst [vmem:[#allocation326_spill] sm:$0xff] %v10333_v20  ;;  %6817 = vpow2.f32 %v427_v39  ;;  %v359_v1 = vsub.f32 %v7238_v49, %v16607_v18  ;;  %1974 = vmatmul.mubr.bf16.gmra.mxu1 %v1643_v25  ;;  %v10336_v45 = vpop.eup %6793  ;;  %v7239_v11 = vld [vmem:[#allocation7 + $0x30] sm:$0xff]  ;;  %v16608_v48 = vld [vmem:[#allocation70_spill] sm:$0xff]  ;;  %v527_v39 = vsub.f32 %v7240_v40, %v16607_v18  ;;  %v1606_v24 = vpop.f32.mrf.mxu0  ;;  %v593_v49 = vmul.f32 1.442695, %v530_v30  ;;  %v7244_v52 = vld [vmem:[#allocation7 + $0x1c8] sm:$0xff] }
 0x1e0   :  { %6418 = vmatprep.mubr.msk.bf16.mxu0 %vm16605_vm11, %v7237_v16  ;;  %6819 = vpow2.f32 %v431_v6  ;;  %v361_v0 = vsub.f32 %v7239_v11, %v16608_v48  ;;  %v10339_v38 = vpop.eup %6795  ;;  %v589_v16 = vmul.f32 1.442695, %v528_v14  ;;  %v7241_v25 = vld [vmem:[#allocation7 + $0x1f0] sm:$0xff]  ;;  %v7242_v11 = vld [vmem:[#allocation7 + $0x8] sm:$0xff]  ;;  %v16612_v63 = vld [vmem:[#allocation74_spill] sm:$0xff] }
 0x1e1   :  { %16609 = vst [vmem:[#allocation327_spill] sm:$0xff] %v10339_v38  ;;  %6821 = vpow2.f32 %v595_v36  ;;  %v10342_v13 = vpop.eup %6797  ;;  %v529_v46 = vsub.f32 %v7241_v25, %v16608_v48  ;;  %v419_v27 = vmul.f32 1.442695, %v359_v1  ;;  %v356_v23 = vsub.f32 %v7242_v11, %v16612_v63  ;;  %v1608_v36 = vpop.f32.mrf.mxu0  ;;  %v7243_v42 = vld [vmem:[#allocation7 + $0x18] sm:$0xff]  ;;  %v7250_v33 = vld [vmem:[#allocation7 + $0x1c0] sm:$0xff]  ;;  %vm16625_vm11 = vmmov %vm16579_vm4 }
 0x1e2   :  { %16610 = vst [vmem:[#allocation328_spill] sm:$0xff] %v10342_v13  ;;  %6823 = vpow2.f32 %v599_v15  ;;  %v423_v40 = vmul.f32 1.442695, %v361_v0  ;;  %v358_v3 = vsub.f32 %v7243_v42, %v16613_v34  ;;  %v1646_v15 = vpack.c.bf16 %v1608_v36, %v1604_v4  ;;  %v7245_v11 = vld [vmem:[#allocation2 + $0x90] ss:$8 sps:$4 sm:$0xff]  }
 0x1e3   :  { %v10345_v6 = vpop.eup %6799  ;;  %6825 = vpow2.f32 %v421_v57  ;;  %v587_v25 = vmul.f32 1.442695, %v527_v39  ;;  %v524_v57 = vsub.f32 %v7244_v52, %v16612_v63  ;;  %v1645_v1 = vpack.c.bf16 %v1606_v24, %v10326_v51  ;;  %v10355_v48 = vpop.f32.mrf.mxu0  ;;  %v7247_v4 = vld [vmem:[#allocation2 + $0xa4] ss:$8 sps:$4 sm:$0xff]   ;;  %v16618_v39 = vld [vmem:[#allocation77_spill] sm:$0xff] }
 0x1e4   :  { %16611 = vst [vmem:[#allocation329_spill] sm:$0xff] %v10345_v6  ;;  %v10348_v14 = vpop.eup %6801  ;;  %6827 = vpow2.f32 %v425_v17  ;;  %v591_v0 = vmul.f32 1.442695, %v529_v46  ;;  %v7246_v17 = vld [vmem:[#allocation7 + $0x1d8] sm:$0xff]  ;;  %6043 = vmatprep.mubr.msk.bf16.mxu1 %vm16616_vm7, %v1646_v15  ;;  %v413_v51 = vmul.f32 1.442695, %v356_v23  ;;  %vm16631_vm7 = vmmov %vm16579_vm4 }
 0x1e5   :  { %v10351_v30 = vpop.eup %6803  ;;  %6829 = vpow2.f32 %v589_v16  ;;  %v526_v42 = vsub.f32 %v7246_v17, %v16613_v34  ;;  %v7248_v52 = vld [vmem:[#allocation7] sm:$0xff]  ;;  %v1614_v36 = vpop.f32.mrf.mxu0  ;;  %v417_v46 = vmul.f32 1.442695, %v358_v3  ;;  %v16622_v20 = vld [vmem:[#allocation81_spill] sm:$0xff] }
 0x1e6   :  { %16614 = vst [vmem:[#allocation330_spill] sm:$0xff] %v10351_v30  ;;  %v10357_v22 = vpop.eup %6805  ;;  %6831 = vpow2.f32 %v593_v49  ;;  %v355_v24 = vsub.f32 %v7248_v52, %v16618_v39  ;;  %v7249_v49 = vld [vmem:[#allocation7 + $0x10] sm:$0xff]  ;;  %v16619_v17 = vld [vmem:[#allocation79_spill] sm:$0xff]  ;;  %v7253_v18 = vld [vmem:[#allocation7 + $0x1b8] sm:$0xff] }
 0x1e7   :  { %4069 = vmatmul.mubr.bf16.gmra.mxu0 %v7245_v11  ;;  %16615 = vst [vmem:[#allocation331_spill] sm:$0xff] %v10357_v22  ;;  %v10362_v16 = vpop.eup %6807  ;;  %6833 = vpow2.f32 %v419_v27  ;;  %1984 = vmatmul.mubr.bf16.gmra.mxu1 %v1645_v1  ;;  %v357_v5 = vsub.f32 %v7249_v49, %v16619_v17  ;;  %v523_v27 = vsub.f32 %v7250_v33, %v16618_v39  ;;  %v1616_v23 = vpop.f32.mrf.mxu0  ;;  %v585_v52 = vmul.f32 1.442695, %v526_v42  ;;  %v7251_v1 = vld [vmem:[#allocation7 + $0x1d0] sm:$0xff]  ;;  %v7252_v49 = vld [vmem:[#allocation7 + $0x1a8] sm:$0xff] }
 0x1e8   :  { %6419 = vmatprep.mubr.msk.bf16.mxu0 %vm16579_vm4, %v7247_v4  ;;  %16617 = vst [vmem:[#allocation332_spill] sm:$0xff] %v10362_v16  ;;  %v10365_v11 = vpop.eup %6809  ;;  %6835 = vpow2.f32 %v423_v40  ;;  %v581_v4 = vmul.f32 1.442695, %v524_v57  ;;  %v525_v54 = vsub.f32 %v7251_v1, %v16619_v17  ;;  %v411_v3 = vmul.f32 1.442695, %v355_v24  ;;  %v7274_v16 = vld [vmem:[#allocation7 + $0x168] sm:$0xff] }
 0x1e9   :  { %v10368_v15 = vpop.eup %6811  ;;  %6837 = vpow2.f32 %v587_v25  ;;  %v408_v60 = vsub.f32 %v7252_v49, %v16622_v20  ;;  %v1618_v25 = vpop.f32.mrf.mxu0  ;;  %v415_v33 = vmul.f32 1.442695, %v357_v5  ;;  %v410_v12 = vsub.f32 %v7253_v18, %v16111_v56  ;;  %v7255_v49 = vld [vmem:[#allocation2 + $0xa0] ss:$8 sps:$4 sm:$0xff]  }
 0x1ea   :  { %v10371_v43 = vpop.eup %6813  ;;  %6839 = vpow2.f32 %v591_v0  ;;  %v1648_v0 = vpack.c.bf16 %v1618_v25, %v1614_v36  ;;  %v579_v1 = vmul.f32 1.442695, %v523_v27  ;;  %v1647_v24 = vpack.c.bf16 %v1616_v23, %v10355_v48  ;;  %v7257_v36 = vld [vmem:[#allocation2 + $0xb4] ss:$8 sps:$4 sm:$0xff]   ;;  %v7258_v48 = vld [vmem:[#allocation7 + $0x1a0] sm:$0xff] }
 0x1eb   :  { %16620 = vst [vmem:[#allocation333_spill] sm:$0xff] %v10371_v43  ;;  %v10374_v40 = vpop.eup %6815  ;;  %6841 = vpow2.f32 %v413_v51  ;;  %v576_v51 = vsub.f32 %v7254_v53, %v16622_v20  ;;  %v10384_v34 = vpop.f32.mrf.mxu0  ;;  %v583_v5 = vmul.f32 1.442695, %v525_v54  ;;  %v517_v53 = vmul.f32 1.442695, %v408_v60 }
 0x1ec   :  { %16621 = vst [vmem:[#allocation334_spill] sm:$0xff] %v10374_v40  ;;  %v10377_v57 = vpop.eup %6817  ;;  %6843 = vpow2.f32 %v417_v46  ;;  %v7256_v46 = vld [vmem:[#allocation7 + $0x378] sm:$0xff]  ;;  %6044 = vmatprep.mubr.msk.bf16.mxu1 %vm16624_vm15, %v1648_v0  ;;  %v407_v27 = vsub.f32 %v7258_v48, %v16121_v7  ;;  %v521_v54 = vmul.f32 1.442695, %v410_v12  ;;  %v7261_v48 = vld [vmem:[#allocation7 + $0x370] sm:$0xff]  ;;  %vm16636_vm15 = vmmov %vm16579_vm4 }
 0x1ed   :  { %v10380_v42 = vpop.eup %6819  ;;  %6845 = vpow2.f32 %v581_v4  ;;  %v578_v18 = vsub.f32 %v7256_v46, %v16111_v56  ;;  %v2348_v23 = vpop.f32.mrf.mxu0  ;;  %v7260_v56 = vld [vmem:[#allocation7 + $0x360] sm:$0xff] }
 0x1ee   :  { %v10386_v10 = vpop.eup %6821  ;;  %6847 = vpow2.f32 %v585_v52  ;;  %v7259_v52 = vld [vmem:[#allocation7 + $0x1b0] sm:$0xff]  ;;  %v515_v12 = vmul.f32 1.442695, %v407_v27  ;;  %v7278_v13 = vld [vmem:[#allocation2 + $0xc0] ss:$8 sps:$4 sm:$0xff]  }
 0x1ef   :  { %4079 = vmatmul.mubr.bf16.gmra.mxu0 %v7255_v49  ;;  %16623 = vst [vmem:[#allocation335_spill] sm:$0xff] %v10386_v10  ;;  %v10391_v4 = vpop.eup %6823  ;;  %6849 = vpow2.f32 %v411_v3  ;;  %1994 = vmatmul.mubr.bf16.gmra.mxu1 %v1647_v24  ;;  %v16627_v49 = vld [vmem:[#allocation87_spill] sm:$0xff]  ;;  %v575_v3 = vsub.f32 %v7260_v56, %v16121_v7  ;;  %v2350_v60 = vpop.f32.mrf.mxu0  ;;  %v689_v24 = vmul.f32 1.442695, %v578_v18  ;;  %v7263_v7 = vld [vmem:[#allocation7 + $0x198] sm:$0xff] }
 0x1f0   :  { %6420 = vmatprep.mubr.msk.bf16.mxu0 %vm16625_vm11, %v7257_v36  ;;  %16626 = vst [vmem:[#allocation336_spill] sm:$0xff] %v10391_v4  ;;  %v10394_v25 = vpop.eup %6825  ;;  %6851 = vpow2.f32 %v415_v33  ;;  %v409_v46 = vsub.f32 %v7259_v52, %v16627_v49  ;;  %v685_v36 = vmul.f32 1.442695, %v576_v51  ;;  %v577_v2 = vsub.f32 %v7261_v48, %v16627_v49  ;;  %v7262_v52 = vld [vmem:[#allocation7 + $0x188] sm:$0xff]  ;;  %vm16637_vm11 = vmmov %vm16579_vm4 }
 0x1f1   :  { %v10397_v0 = vpop.eup %6827  ;;  %6853 = vpow2.f32 %v579_v1  ;;  %v404_v17 = vsub.f32 %v7262_v52, %v16145_v37  ;;  %v2352_v1 = vpop.f32.mrf.mxu0  ;;  %v406_v6 = vsub.f32 %v7263_v7, %v16154_v8  ;;  %v683_v48 = vmul.f32 1.442695, %v575_v3  ;;  %v7264_v49 = vld [vmem:[#allocation7 + $0x348] sm:$0xff]  ;;  %v7265_v52 = vld [vmem:[#allocation2 + $0xb0] ss:$8 sps:$4 sm:$0xff]  }
 0x1f2   :  { %v10400_v20 = vpop.eup %6829  ;;  %6855 = vpow2.f32 %v583_v5  ;;  %v519_v56 = vmul.f32 1.442695, %v409_v46  ;;  %v2486_v5 = vpack.c.bf16 %v2352_v1, %v2348_v23  ;;  %v2485_v27 = vpack.c.bf16 %v2350_v60, %v10384_v34  ;;  %v7266_v46 = vld [vmem:[#allocation7 + $0x358] sm:$0xff]  ;;  %v7267_v23 = vld [vmem:[#allocation2 + $0xc4] ss:$8 sps:$4 sm:$0xff]  }
 0x1f3   :  { %16628 = vst [vmem:[#allocation337_spill] sm:$0xff] %v10400_v20  ;;  %v10403_v33 = vpop.eup %6831  ;;  %6857 = vpow2.f32 %v517_v53  ;;  %v572_v53 = vsub.f32 %v7264_v49, %v16145_v37  ;;  %v10413_v38 = vpop.f32.mrf.mxu0  ;;  %v574_v7 = vsub.f32 %v7266_v46, %v16154_v8  ;;  %v509_v34 = vmul.f32 1.442695, %v404_v17  ;;  %v7268_v49 = vld [vmem:[#allocation7 + $0x180] sm:$0xff] }
 0x1f4   :  { %16629 = vst [vmem:[#allocation338_spill] sm:$0xff] %v10403_v33  ;;  %v10406_v51 = vpop.eup %6833  ;;  %6859 = vpow2.f32 %v521_v54  ;;  %v687_v54 = vmul.f32 1.442695, %v577_v2  ;;  %6171 = vmatprep.mubr.msk.bf16.mxu1 %vm16631_vm7, %v2486_v5  ;;  %v403_v3 = vsub.f32 %v7268_v49, %v16180_v50  ;;  %v513_v2 = vmul.f32 1.442695, %v406_v6  ;;  %v7273_v6 = vld [vmem:[#allocation7 + $0x350] sm:$0xff]  ;;  %vm16646_vm7 = vmmov %vm16579_vm4 }
 0x1f5   :  { %v10409_v18 = vpop.eup %6835  ;;  %6861 = vpow2.f32 %v685_v36  ;;  %v2358_v60 = vpop.f32.mrf.mxu0  ;;  %v7270_v5 = vld [vmem:[#allocation5 + $0x70] ss:$8 sps:$4 sm:$0xff]   ;;  %v7272_v49 = vld [vmem:[#allocation5 + $0x64] ss:$8 sps:$4 sm:$0xff]   ;;  %v573_v37 = vsub.f32 %v7273_v6, %v16191_v26 }
 0x1f6   :  { %v10415_v63 = vpop.eup %6837  ;;  %6863 = vpow2.f32 %v689_v24  ;;  %v7269_v24 = vld [vmem:[#allocation7 + $0x190] sm:$0xff] }
 0x1f7   :  { %4089 = vmatmul.mubr.bf16.gmra.mxu0 %v7265_v52  ;;  %16630 = vst [vmem:[#allocation339_spill] sm:$0xff] %v10415_v63  ;;  %v10420_v36 = vpop.eup %6839  ;;  %6865 = vpow2.f32 %v515_v12  ;;  %2588 = vmatmul.mubr.bf16.vlgmr.msra.gmra.mxu1 %v2485_v27  ;;  %v405_v52 = vsub.f32 %v7269_v24, %v16191_v26  ;;  %v7271_v12 = vld [vmem:[#allocation7 + $0x340] sm:$0xff]  ;;  %v2360_v8 = vpop.f32.mrf.mxu0 }
 0x1f8   :  { %6421 = vmatprep.mubr.msk.bf16.mxu0 %vm16579_vm4, %v7267_v23  ;;  %16632 = vst [vmem:[#allocation340_spill] sm:$0xff] %v10420_v36  ;;  %v10423_v1 = vpop.eup %6841  ;;  %6867 = vpow2.f32 %v519_v56  ;;  %4190 = vmatpush1.bf16.msra.mxu1 %v7270_v5  ;;  %v677_v23 = vmul.f32 1.442695, %v572_v53  ;;  %v571_v17 = vsub.f32 %v7271_v12, %v16180_v50  ;;  %v681_v56 = vmul.f32 1.442695, %v574_v7 }
 0x1f9   :  { %v10426_v46 = vpop.eup %6843  ;;  %6869 = vpow2.f32 %v683_v48  ;;  %4191 = vmatprep.subr.bf16.mxu1 %v7272_v49  ;;  %v507_v5 = vmul.f32 1.442695, %v403_v3  ;;  %v400_v48 = vsub.f32 %v7274_v16, %v16197_v47  ;;  %v2362_v53 = vpop.f32.mrf.mxu0  ;;  %v511_v12 = vmul.f32 1.442695, %v405_v52  ;;  %v7275_v49 = vld [vmem:[#allocation7 + $0x178] sm:$0xff] }
 0x1fa   :  { %v10429_v27 = vpop.eup %6845  ;;  %6871 = vpow2.f32 %v687_v54  ;;  %v402_v50 = vsub.f32 %v7275_v49, %v16205_v41  ;;  %v2488_v54 = vpack.c.bf16 %v2362_v53, %v2358_v60  ;;  %v7276_v7 = vld [vmem:[#allocation5 + $0x60] ss:$8 sps:$4 sm:$0xff]   ;;  %v675_v6 = vmul.f32 1.442695, %v571_v17  ;;  %v7280_v53 = vld [vmem:[#allocation7 + $0x338] sm:$0xff] }
 0x1fb   :  { %16633 = vst [vmem:[#allocation341_spill] sm:$0xff] %v10429_v27  ;;  %v10432_v24 = vpop.eup %6847  ;;  %6873 = vpow2.f32 %v509_v34  ;;  %v7277_v34 = vld [vmem:[#allocation7 + $0x328] sm:$0xff]  ;;  %v2487_v16 = vpack.c.bf16 %v2360_v8, %v10413_v38  ;;  %v10442_v26 = vpop.f32.mrf.mxu0  ;;  %v679_v60 = vmul.f32 1.442695, %v573_v37  ;;  %v570_v49 = vsub.f32 %v7280_v53, %v16205_v41  ;;  %v7282_v38 = vld [vmem:[#allocation7 + $0x160] sm:$0xff] }
 0x1fc   :  { %16634 = vst [vmem:[#allocation342_spill] sm:$0xff] %v10432_v24  ;;  %v10435_v30 = vpop.eup %6849  ;;  %6875 = vpow2.f32 %v513_v2  ;;  %4192 = vmatpush1.bf16.msra.mxu1 %v7276_v7  ;;  %v568_v3 = vsub.f32 %v7277_v34, %v16197_v47  ;;  %v7279_v2 = vld [vmem:[#allocation5 + $0x54] ss:$8 sps:$4 sm:$0xff]   ;;  %6172 = vmatprep.mubr.msk.bf16.mxu1 %vm16636_vm15, %v2488_v54  ;;  %v501_v8 = vmul.f32 1.442695, %v400_v48  ;;  %vm16655_vm15 = vmmov %vm16579_vm4 }
 0x1fd   :  { %v10438_v39 = vpop.eup %6851  ;;  %6877 = vpow2.f32 %v677_v23  ;;  %4193 = vmatprep.subr.bf16.mxu1 %v7279_v2  ;;  %v7281_v23 = vld [vmem:[#allocation2 + $0xd4] ss:$8 sps:$4 sm:$0xff]   ;;  %v2368_v7 = vpop.f32.mrf.mxu0  ;;  %v505_v37 = vmul.f32 1.442695, %v402_v50  ;;  %v7284_v54 = vld [vmem:[#allocation5 + $0x50] ss:$8 sps:$4 sm:$0xff]  }
 0x1fe   :  { %v10444_v52 = vpop.eup %6853  ;;  %6879 = vpow2.f32 %v681_v56  ;;  %v7283_v56 = vld [vmem:[#allocation7 + $0x170] sm:$0xff] }
 0x1ff   :  { %4099 = vmatmul.mubr.bf16.gmra.mxu0 %v7278_v13  ;;  %16635 = vst [vmem:[#allocation343_spill] sm:$0xff] %v10444_v52  ;;  %v10449_v17 = vpop.eup %6855  ;;  %6881 = vpow2.f32 %v507_v5  ;;  %v399_v13 = vsub.f32 %v7282_v38, %v16221_v31  ;;  %2598 = vmatmul.mubr.bf16.gmra.mxu1 %v2487_v16  ;;  %v401_v2 = vsub.f32 %v7283_v56, %v16237_v29  ;;  %v7285_v5 = vld [vmem:[#allocation7 + $0x320] sm:$0xff]  ;;  %v2370_v41 = vpop.f32.mrf.mxu0  ;;  %v7287_v50 = vld [vmem:[#allocation7 + $0x330] sm:$0xff] }
 0x200   :  { %6422 = vmatprep.mubr.msk.bf16.mxu0 %vm16637_vm11, %v7281_v23  ;;  %16638 = vst [vmem:[#allocation344_spill] sm:$0xff] %v10449_v17  ;;  %v10452_v34 = vpop.eup %6857  ;;  %6883 = vpow2.f32 %v511_v12  ;;  %4194 = vmatpush1.bf16.msra.mxu1 %v7284_v54  ;;  %v669_v23 = vmul.f32 1.442695, %v568_v3  ;;  %v567_v48 = vsub.f32 %v7285_v5, %v16221_v31  ;;  %v7286_v38 = vld [vmem:[#allocation5 + $0x44] ss:$8 sps:$4 sm:$0xff]   ;;  %vm16656_vm11 = vmmov %vm16579_vm4 }
 0x201   :  { %16639 = vst [vmem:[#allocation345_spill] sm:$0xff] %v10452_v34  ;;  %v10455_v53 = vpop.eup %6859  ;;  %6885 = vpow2.f32 %v675_v6  ;;  %4195 = vmatprep.subr.bf16.mxu1 %v7286_v38  ;;  %v673_v12 = vmul.f32 1.442695, %v570_v49  ;;  %v569_v34 = vsub.f32 %v7287_v50, %v16237_v29  ;;  %v499_v54 = vmul.f32 1.442695, %v399_v13  ;;  %v2372_v3 = vpop.f32.mrf.mxu0  ;;  %v7289_v38 = vld [vmem:[#allocation7 + $0x158] sm:$0xff] }
 0x202   :  { %16640 = vst [vmem:[#allocation346_spill] sm:$0xff] %v10455_v53  ;;  %v10458_v16 = vpop.eup %6861  ;;  %6887 = vpow2.f32 %v679_v60  ;;  %v7288_v53 = vld [vmem:[#allocation7 + $0x148] sm:$0xff]  ;;  %v503_v5 = vmul.f32 1.442695, %v401_v2  ;;  %v2490_v60 = vpack.c.bf16 %v2372_v3, %v2368_v7  ;;  %v667_v50 = vmul.f32 1.442695, %v567_v48 }
 0x203   :  { %16641 = vst [vmem:[#allocation347_spill] sm:$0xff] %v10458_v16  ;;  %v10461_v56 = vpop.eup %6863  ;;  %6889 = vpow2.f32 %v501_v8  ;;  %v396_v6 = vsub.f32 %v7288_v53, %v16245_v44  ;;  %v398_v16 = vsub.f32 %v7289_v38, %v16259_v61  ;;  %v7290_v49 = vld [vmem:[#allocation5 + $0x40] ss:$8 sps:$4 sm:$0xff]   ;;  %v2489_v53 = vpack.c.bf16 %v2370_v41, %v10442_v26  ;;  %v7294_v3 = vld [vmem:[#allocation7 + $0x318] sm:$0xff] }
 0x204   :  { %16642 = vst [vmem:[#allocation348_spill] sm:$0xff] %v10461_v56  ;;  %v10464_v47 = vpop.eup %6865  ;;  %6891 = vpow2.f32 %v505_v37  ;;  %4196 = vmatpush1.bf16.msra.mxu1 %v7290_v49  ;;  %v7291_v8 = vld [vmem:[#allocation7 + $0x308] sm:$0xff]  ;;  %v10471_v56 = vpop.f32.mrf.mxu0  ;;  %v7293_v37 = vld [vmem:[#allocation5 + $0x34] ss:$8 sps:$4 sm:$0xff]   ;;  %v671_v7 = vmul.f32 1.442695, %v569_v34  ;;  %v566_v38 = vsub.f32 %v7294_v3, %v16259_v61  ;;  %6173 = vmatprep.mubr.msk.bf16.mxu1 %vm16646_vm7, %v2490_v60  ;;  %vm16665_vm7 = vmmov %vm16579_vm4 }
 0x205   :  { %16643 = vst [vmem:[#allocation349_spill] sm:$0xff] %v10464_v47  ;;  %v10467_v31 = vpop.eup %6867  ;;  %6893 = vpow2.f32 %v669_v23  ;;  %v564_v13 = vsub.f32 %v7291_v8, %v16245_v44  ;;  %v7292_v47 = vld [vmem:[#allocation2 + $0xd0] ss:$8 sps:$4 sm:$0xff]   ;;  %4197 = vmatprep.subr.bf16.mxu1 %v7293_v37  ;;  %v7295_v23 = vld [vmem:[#allocation2 + $0x4] ss:$8 sps:$4 sm:$0xff]  }
 0x206   :  { %16644 = vst [vmem:[#allocation350_spill] sm:$0xff] %v10467_v31  ;;  %v10473_v2 = vpop.eup %6869  ;;  %6895 = vpow2.f32 %v673_v12  ;;  %v493_v26 = vmul.f32 1.442695, %v396_v6  ;;  %v7296_v41 = vld [vmem:[#allocation7 + $0x140] sm:$0xff]  ;;  %v2378_v49 = vpop.f32.mrf.mxu0  ;;  %v497_v34 = vmul.f32 1.442695, %v398_v16 }
 0x207   :  { %4109 = vmatmul.mubr.bf16.gmra.mxu0 %v7292_v47  ;;  %16645 = vst [vmem:[#allocation351_spill] sm:$0xff] %v10473_v2  ;;  %v10478_v48 = vpop.eup %6871  ;;  %6897 = vpow2.f32 %v499_v54  ;;  %v395_v47 = vsub.f32 %v7296_v41, %v16268_v58  ;;  %2608 = vmatmul.mubr.bf16.gmra.mxu1 %v2489_v53  ;;  %v7297_v12 = vld [vmem:[#allocation7 + $0x150] sm:$0xff]  ;;  %v7299_v54 = vld [vmem:[#allocation7 + $0x300] sm:$0xff]  ;;  %v7302_v2 = vld [vmem:[#allocation7 + $0x128] sm:$0xff] }
 0x208   :  { %6549 = vmatprep.mubr.msk.bf16.mxu0 %vm16579_vm4, %v7295_v23  ;;  %16647 = vst [vmem:[#allocation352_spill] sm:$0xff] %v10478_v48  ;;  %v10481_v8 = vpop.eup %6873  ;;  %6899 = vpow2.f32 %v503_v5  ;;  %v397_v37 = vsub.f32 %v7297_v12, %v16284_v59  ;;  %v7298_v60 = vld [vmem:[#allocation5 + $0x30] ss:$8 sps:$4 sm:$0xff]   ;;  %v661_v23 = vmul.f32 1.442695, %v564_v13  ;;  %v563_v6 = vsub.f32 %v7299_v54, %v16268_v58  ;;  %v2380_v48 = vpop.f32.mrf.mxu0 }
 0x209   :  { %16648 = vst [vmem:[#allocation353_spill] sm:$0xff] %v10481_v8  ;;  %4198 = vmatpush1.bf16.msra.mxu1 %v7298_v60  ;;  %v10484_v3 = vpop.eup %6875  ;;  %6901 = vpow2.f32 %v667_v50  ;;  %v7300_v41 = vld [vmem:[#allocation5 + $0x24] ss:$8 sps:$4 sm:$0xff]   ;;  %v665_v5 = vmul.f32 1.442695, %v566_v38  ;;  %v7301_v16 = vld [vmem:[#allocation7 + $0x310] sm:$0xff]  ;;  %v392_v50 = vsub.f32 %v7302_v2, %v16291_v62  ;;  %v2491_v2 = vpack.c.bf16 %v2380_v48, %v10471_v56 }
 0x20a   :  { %16649 = vst [vmem:[#allocation354_spill] sm:$0xff] %v10484_v3  ;;  %4199 = vmatprep.subr.bf16.mxu1 %v7300_v41  ;;  %v10487_v53 = vpop.eup %6877  ;;  %6903 = vpow2.f32 %v671_v7  ;;  %v565_v31 = vsub.f32 %v7301_v16, %v16284_v59  ;;  %v491_v60 = vmul.f32 1.442695, %v395_v47  ;;  %v2382_v13 = vpop.f32.mrf.mxu0  ;;  %v495_v54 = vmul.f32 1.442695, %v397_v37  ;;  %v7303_v41 = vld [vmem:[#allocation7 + $0x138] sm:$0xff] }
 0x20b   :  { %16650 = vst [vmem:[#allocation355_spill] sm:$0xff] %v10487_v53  ;;  %v10490_v12 = vpop.eup %6879  ;;  %6905 = vpow2.f32 %v493_v26  ;;  %v394_v29 = vsub.f32 %v7303_v41, %v16297_v55  ;;  %v2492_v7 = vpack.c.bf16 %v2382_v13, %v2378_v49  ;;  %v7304_v38 = vld [vmem:[#allocation5 + $0x20] ss:$8 sps:$4 sm:$0xff]   ;;  %v659_v16 = vmul.f32 1.442695, %v563_v6  ;;  %v7308_v13 = vld [vmem:[#allocation7 + $0x2f8] sm:$0xff] }
 0x20c   :  { %16651 = vst [vmem:[#allocation356_spill] sm:$0xff] %v10490_v12  ;;  %v10493_v3 = vpop.eup %6881  ;;  %6907 = vpow2.f32 %v497_v34  ;;  %v7305_v26 = vld [vmem:[#allocation7 + $0x2e8] sm:$0xff]  ;;  %v10500_v12 = vpop.f32.mrf.mxu0  ;;  %v7307_v34 = vld [vmem:[#allocation5 + $0x14] ss:$8 sps:$4 sm:$0xff]   ;;  %v663_v49 = vmul.f32 1.442695, %v565_v31  ;;  %v562_v41 = vsub.f32 %v7308_v13, %v16297_v55 }
 0x20d   :  { %16652 = vst [vmem:[#allocation357_spill] sm:$0xff] %v10493_v3  ;;  %4200 = vmatpush1.bf16.msra.mxu1 %v7304_v38  ;;  %v10496_v53 = vpop.eup %6883  ;;  %6909 = vpow2.f32 %v661_v23  ;;  %v560_v47 = vsub.f32 %v7305_v26, %v16291_v62  ;;  %v7306_v8 = vld [vmem:[#allocation2] ss:$8 sps:$4 sm:$0xff]   ;;  %6174 = vmatprep.mubr.msk.bf16.mxu1 %vm16655_vm15, %v2492_v7  ;;  %v7309_v23 = vld [vmem:[#allocation2 + $0x14] ss:$8 sps:$4 sm:$0xff]   ;;  %vm16674_vm15 = vmmov %vm16579_vm4 }
 0x20e   :  { %16653 = vst [vmem:[#allocation358_spill] sm:$0xff] %v10496_v53  ;;  %4201 = vmatprep.subr.bf16.mxu1 %v7307_v34  ;;  %v10502_v37 = vpop.eup %6885  ;;  %6911 = vpow2.f32 %v665_v5  ;;  %v485_v56 = vmul.f32 1.442695, %v392_v50  ;;  %v7310_v48 = vld [vmem:[#allocation7 + $0x120] sm:$0xff]  ;;  %v2388_v38 = vpop.f32.mrf.mxu0  ;;  %v489_v31 = vmul.f32 1.442695, %v394_v29 }
 0x20f   :  { %4703 = vmatmul.mubr.bf16.vlgmr.msra.gmra.mxu0 %v7306_v8  ;;  %16654 = vst [vmem:[#allocation359_spill] sm:$0xff] %v10502_v37  ;;  %v10507_v6 = vpop.eup %6887  ;;  %6913 = vpow2.f32 %v491_v60  ;;  %v391_v8 = vsub.f32 %v7310_v48, %v16321_v9  ;;  %2618 = vmatmul.mubr.bf16.gmra.mxu1 %v2491_v2  ;;  %v7311_v5 = vld [vmem:[#allocation7 + $0x130] sm:$0xff]  ;;  %v7313_v60 = vld [vmem:[#allocation7 + $0x2e0] sm:$0xff]  ;;  %v7316_v37 = vld [vmem:[#allocation7 + $0x108] sm:$0xff] }
 0x210   :  { %6550 = vmatprep.mubr.msk.bf16.mxu0 %vm16656_vm11, %v7309_v23  ;;  %16657 = vst [vmem:[#allocation360_spill] sm:$0xff] %v10507_v6  ;;  %v10510_v26 = vpop.eup %6889  ;;  %6915 = vpow2.f32 %v495_v54  ;;  %v393_v34 = vsub.f32 %v7311_v5, %v16329_v28  ;;  %v7312_v7 = vld [vmem:[#allocation5 + $0x10] ss:$8 sps:$4 sm:$0xff]   ;;  %v653_v23 = vmul.f32 1.442695, %v560_v47  ;;  %v559_v50 = vsub.f32 %v7313_v60, %v16321_v9  ;;  %v2390_v6 = vpop.f32.mrf.mxu0  ;;  %vm16675_vm11 = vmmov %vm16579_vm4 }
 0x211   :  { %16658 = vst [vmem:[#allocation361_spill] sm:$0xff] %v10510_v26  ;;  %4202 = vmatpush1.bf16.msra.mxu1 %v7312_v7  ;;  %v10513_v13 = vpop.eup %6891  ;;  %6917 = vpow2.f32 %v659_v16  ;;  %v7314_v48 = vld [vmem:[#allocation5 + $0x4] ss:$8 sps:$4 sm:$0xff]   ;;  %v657_v54 = vmul.f32 1.442695, %v562_v41  ;;  %v7315_v29 = vld [vmem:[#allocation7 + $0x2f0] sm:$0xff]  ;;  %v388_v16 = vsub.f32 %v7316_v37, %v16344_v21  ;;  %v2493_v37 = vpack.c.bf16 %v2390_v6, %v10500_v12 }
 0x212   :  { %16659 = vst [vmem:[#allocation362_spill] sm:$0xff] %v10513_v13  ;;  %4203 = vmatprep.subr.bf16.mxu1 %v7314_v48  ;;  %v10516_v2 = vpop.eup %6893  ;;  %6919 = vpow2.f32 %v663_v49  ;;  %v561_v53 = vsub.f32 %v7315_v29, %v16329_v28  ;;  %v483_v7 = vmul.f32 1.442695, %v391_v8  ;;  %v2392_v47 = vpop.f32.mrf.mxu0  ;;  %v487_v60 = vmul.f32 1.442695, %v393_v34  ;;  %v7317_v48 = vld [vmem:[#allocation7 + $0x118] sm:$0xff] }
 0x213   :  { %16660 = vst [vmem:[#allocation363_spill] sm:$0xff] %v10516_v2  ;;  %v10519_v5 = vpop.eup %6895  ;;  %6921 = vpow2.f32 %v485_v56  ;;  %v390_v61 = vsub.f32 %v7317_v48, %v16347_v32  ;;  %v2494_v49 = vpack.c.bf16 %v2392_v47, %v2388_v38  ;;  %v7318_v41 = vld [vmem:[#allocation5] ss:$8 sps:$4 sm:$0xff]   ;;  %v651_v29 = vmul.f32 1.442695, %v559_v50  ;;  %v7322_v47 = vld [vmem:[#allocation7 + $0x2d8] sm:$0xff] }
 0x214   :  { %16661 = vst [vmem:[#allocation364_spill] sm:$0xff] %v10519_v5  ;;  %v10522_v3 = vpop.eup %6897  ;;  %6923 = vpow2.f32 %v489_v31  ;;  %v7319_v56 = vld [vmem:[#allocation7 + $0x2c8] sm:$0xff]  ;;  %v10529_v5 = vpop.f32.mrf.mxu0  ;;  %v7320_v59 = vld [vmem:[#allocation2 + $0x10] ss:$8 sps:$4 sm:$0xff]   ;;  %v7321_v31 = vld [vmem:[#allocation5 + $0xd4] ss:$8 sps:$4 sm:$0xff]   ;;  %v558_v48 = vsub.f32 %v7322_v47, %v16347_v32 }
 0x215   :  { %16662 = vst [vmem:[#allocation365_spill] sm:$0xff] %v10522_v3  ;;  %4204 = vmatpush1.bf16.msra.mxu1 %v7318_v41  ;;  %v10525_v13 = vpop.eup %6899  ;;  %6925 = vpow2.f32 %v653_v23  ;;  %v556_v8 = vsub.f32 %v7319_v56, %v16344_v21  ;;  %v655_v38 = vmul.f32 1.442695, %v561_v53  ;;  %6175 = vmatprep.mubr.msk.bf16.mxu1 %vm16665_vm7, %v2494_v49  ;;  %v7323_v23 = vld [vmem:[#allocation2 + $0x24] ss:$8 sps:$4 sm:$0xff]   ;;  %vm16684_vm7 = vmmov %vm16579_vm4  ;;  %v16690_v26 = vld [vmem:[#allocation73_spill] sm:$0xff] }
 0x216   :  { %16663 = vst [vmem:[#allocation366_spill] sm:$0xff] %v10525_v13  ;;  %4209 = vmatprep.subr.bf16.mxu1 %v7321_v31  ;;  %v10531_v34 = vpop.eup %6901  ;;  %6927 = vpow2.f32 %v657_v54  ;;  %v477_v12 = vmul.f32 1.442695, %v388_v16  ;;  %v7324_v6 = vld [vmem:[#allocation7 + $0x100] sm:$0xff]  ;;  %v2398_v41 = vpop.f32.mrf.mxu0  ;;  %v481_v53 = vmul.f32 1.442695, %v390_v61 }
 0x217   :  { %4713 = vmatmul.mubr.bf16.gmra.mxu0 %v7320_v59  ;;  %16664 = vst [vmem:[#allocation367_spill] sm:$0xff] %v10531_v34  ;;  %v10536_v50 = vpop.eup %6903  ;;  %6929 = vpow2.f32 %v483_v7  ;;  %v387_v59 = vsub.f32 %v7324_v6, %v16362_v19  ;;  %2628 = vmatmul.mubr.bf16.gmra.mxu1 %v2493_v37  ;;  %v7325_v54 = vld [vmem:[#allocation7 + $0x110] sm:$0xff]  ;;  %v7327_v16 = vld [vmem:[#allocation5 + $0xc4] ss:$8 sps:$4 sm:$0xff]   ;;  %v649_v37 = vmul.f32 1.442695, %v558_v48 }
 0x218   :  { %6551 = vmatprep.mubr.msk.bf16.mxu0 %vm16579_vm4, %v7323_v23  ;;  %16666 = vst [vmem:[#allocation368_spill] sm:$0xff] %v10536_v50  ;;  %v10539_v56 = vpop.eup %6905  ;;  %6931 = vpow2.f32 %v487_v60  ;;  %v389_v31 = vsub.f32 %v7325_v54, %v16365_v35  ;;  %v7326_v49 = vld [vmem:[#allocation5 + $0xd0] ss:$8 sps:$4 sm:$0xff]   ;;  %v645_v23 = vmul.f32 1.442695, %v556_v8  ;;  %v2400_v7 = vpop.f32.mrf.mxu0  ;;  %v7328_v6 = vld [vmem:[#allocation7 + $0x2c0] sm:$0xff] }
 0x219   :  { %16667 = vst [vmem:[#allocation369_spill] sm:$0xff] %v10539_v56  ;;  %4210 = vmatpush2.bf16.msra.mxu1 %v7326_v49  ;;  %v10542_v47 = vpop.eup %6907  ;;  %6933 = vpow2.f32 %v651_v29  ;;  %v555_v60 = vsub.f32 %v7328_v6, %v16362_v19  ;;  %v475_v54 = vmul.f32 1.442695, %v387_v59  ;;  %v7329_v44 = vld [vmem:[#allocation5 + $0xc0] ss:$8 sps:$4 sm:$0xff]   ;;  %v2495_v6 = vpack.c.bf16 %v2400_v7, %v10529_v5 }
 0x21a   :  { %16668 = vst [vmem:[#allocation370_spill] sm:$0xff] %v10542_v47  ;;  %4211 = vmatprep.subr.bf16.mxu1 %v7327_v16  ;;  %v10544_v50 = vpop.eup %6909  ;;  %6935 = vpow2.f32 %v655_v38  ;;  %v2402_v13 = vpop.f32.mrf.mxu0  ;;  %v479_v29 = vmul.f32 1.442695, %v389_v31  ;;  %v7330_v38 = vld [vmem:[#allocation7 + $0x2d0] sm:$0xff]  ;;  %v7331_v2 = vld [vmem:[#allocation2 + $0x20] ss:$8 sps:$4 sm:$0xff]   ;;  %v693_v7 = vadd.f32 %v10449_v17, %v10438_v39 }
 0x21b   :  { %16669 = vst [vmem:[#allocation371_spill] sm:$0xff] %v10544_v50  ;;  %v10547_v61 = vpop.eup %6911  ;;  %6937 = vpow2.f32 %v477_v12  ;;  %v2496_v8 = vpack.c.bf16 %v2402_v13, %v2398_v41  ;;  %v557_v48 = vsub.f32 %v7330_v38, %v16365_v35  ;;  %v691_v12 = vadd.f32 %v10444_v52, %v10435_v30  ;;  %v7332_v59 = vld [vmem:[#allocation5 + $0xb4] ss:$8 sps:$4 sm:$0xff]   ;;  %v7335_v38 = vld [vmem:[#allocation5 + $0xa4] ss:$8 sps:$4 sm:$0xff]  }
 0x21c   :  { %16670 = vst [vmem:[#allocation372_spill] sm:$0xff] %v10547_v61  ;;  %v10549_v49 = vpop.eup %6913  ;;  %6939 = vpow2.f32 %v481_v53  ;;  %v2406_v58 = vpop.f32.mrf.mxu0  ;;  %v7333_v13 = vld [vmem:[#allocation2 + $0x34] ss:$8 sps:$4 sm:$0xff]   ;;  %v16704_v55 = vld [vmem:[#allocation76_spill] sm:$0xff]  ;;  %v16711_v47 = vld [vmem:[#allocation75_spill] sm:$0xff] }
 0x21d   :  { %16671 = vst [vmem:[#allocation373_spill] sm:$0xff] %v10549_v49  ;;  %4212 = vmatpush2.bf16.msra.mxu1 %v7329_v44  ;;  %v10551_v16 = vpop.eup %6915  ;;  %6941 = vpow2.f32 %v645_v23  ;;  %v643_v44 = vmul.f32 1.442695, %v555_v60  ;;  %6176 = vmatprep.mubr.msk.bf16.mxu1 %vm16674_vm15, %v2496_v8  ;;  %v7334_v23 = vld [vmem:[#allocation5 + $0xb0] ss:$8 sps:$4 sm:$0xff]  }
 0x21e   :  { %16672 = vst [vmem:[#allocation374_spill] sm:$0xff] %v10551_v16  ;;  %4213 = vmatprep.subr.bf16.mxu1 %v7332_v59  ;;  %v10557_v53 = vpop.eup %6917  ;;  %6943 = vpow2.f32 %v649_v37  ;;  %v2408_v5 = vpop.f32.mrf.mxu0  ;;  %v647_v60 = vmul.f32 1.442695, %v557_v48  ;;  %v16708_v61 = vld [vmem:[#allocation325_spill] sm:$0xff]  ;;  %v16723_v32 = vld [vmem:[#allocation320_spill] sm:$0xff]  ;;  %v16724_v35 = vld [vmem:[#allocation322_spill] sm:$0xff] }
 0x21f   :  { %4723 = vmatmul.mubr.bf16.gmra.mxu0 %v7331_v2  ;;  %16673 = vst [vmem:[#allocation375_spill] sm:$0xff] %v10557_v53  ;;  %v10561_v41 = vpop.eup %6919  ;;  %6945 = vpow2.f32 %v475_v54  ;;  %2638 = vmatmul.mubr.bf16.gmra.mxu1 %v2495_v6  ;;  %v692_v2 = vadd.f32 %v10429_v27, %v10423_v1  ;;  %v694_v6 = vadd.f32 %v10432_v24, %v10426_v46  ;;  %v7337_v27 = vld [vmem:[#allocation2 + $0x30] ss:$8 sps:$4 sm:$0xff]  }
 0x220   :  { %6552 = vmatprep.mubr.msk.bf16.mxu0 %vm16675_vm11, %v7333_v13  ;;  %16676 = vst [vmem:[#allocation376_spill] sm:$0xff] %v10561_v41  ;;  %v10565_v31 = vpop.eup %6921  ;;  %6947 = vpow2.f32 %v479_v29  ;;  %v2410_v8 = vpop.f32.mrf.mxu0  ;;  %v695_v13 = vadd.f32 %v10415_v63, %v10406_v51  ;;  %v7338_v63 = vld [vmem:[#allocation5 + $0x94] ss:$8 sps:$4 sm:$0xff]   ;;  %vm16696_vm11 = vmmov %vm16579_vm4 }
 0x221   :  { %16677 = vst [vmem:[#allocation377_spill] sm:$0xff] %v10565_v31  ;;  %4214 = vmatpush2.bf16.msra.mxu1 %v7334_v23  ;;  %v10569_v37 = vpop.eup %6923  ;;  %6949 = vrcp.f32 %v691_v12  ;;  %v7336_v12 = vld [vmem:[#allocation5 + $0xa0] ss:$8 sps:$4 sm:$0xff]   ;;  %v2497_v24 = vpack.c.bf16 %v2410_v8, %v2406_v58  ;;  %v7340_v8 = vld [vmem:[#allocation5 + $0x90] ss:$8 sps:$4 sm:$0xff]  }
 0x222   :  { %16678 = vst [vmem:[#allocation378_spill] sm:$0xff] %v10569_v37  ;;  %4215 = vmatprep.subr.bf16.mxu1 %v7335_v38  ;;  %v10571_v54 = vpop.eup %6925  ;;  %6951 = vpow2.f32 %v643_v44  ;;  %v2412_v29 = vpop.f32.mrf.mxu0  ;;  %v696_v38 = vadd.f32 %v10400_v20, %v10394_v25  ;;  %v7343_v20 = vld [vmem:[#allocation2 + $0x40] ss:$8 sps:$4 sm:$0xff]   ;;  %v16715_v41 = vld [vmem:[#allocation321_spill] sm:$0xff] }
 0x223   :  { %16679 = vst [vmem:[#allocation379_spill] sm:$0xff] %v10571_v54  ;;  %v10575_v59 = vpop.eup %6927  ;;  %6953 = vrcp.f32 %v692_v2  ;;  %v2498_v48 = vpack.c.bf16 %v2412_v29, %v2408_v5  ;;  %v697_v2 = vadd.f32 %v10420_v36, %v10409_v18  ;;  %v7339_v5 = vld [vmem:[#allocation2 + $0x44] ss:$8 sps:$4 sm:$0xff]   ;;  %v700_v29 = vadd.f32 %v10371_v43, %v10365_v11  ;;  %v16728_v37 = vld [vmem:[#allocation66_spill] sm:$0xff] }
 0x224   :  { %16680 = vst [vmem:[#allocation380_spill] sm:$0xff] %v10575_v59  ;;  %v10579_v23 = vpop.eup %6929  ;;  %6955 = vrcp.f32 %v693_v7  ;;  %v2416_v17 = vpop.f32.mrf.mxu0  ;;  %v698_v7 = vadd.f32 %v10403_v33, %v10397_v0  ;;  %v703_v43 = vadd.f32 %v10357_v22, %v10348_v14  ;;  %v16691_v22 = vld [vmem:[#allocation77_spill] sm:$0xff] }
 0x225   :  { %16681 = vst [vmem:[#allocation381_spill] sm:$0xff] %v10579_v23  ;;  %4216 = vmatpush2.bf16.msra.mxu1 %v7336_v12  ;;  %v10583_v44 = vpop.eup %6931  ;;  %6957 = vpow2.f32 %v647_v60  ;;  %6177 = vmatprep.mubr.msk.bf16.mxu1 %vm16684_vm7, %v2498_v48  ;;  %v701_v12 = vadd.f32 %v10391_v4, %v10380_v42  ;;  %v7342_v4 = vld [vmem:[#allocation5 + $0x80] ss:$8 sps:$4 sm:$0xff]   ;;  %vm16692_vm15 = vcmp.eq.f32.partialorder %v16690_v26, %v16691_v22  ;;  %vm16697_vm7 = vmmov %vm16579_vm4  ;;  %v16727_v59 = vld [vmem:[#allocation61_spill] sm:$0xff] }
 0x226   :  { %16682 = vst [vmem:[#allocation382_spill] sm:$0xff] %v10583_v44  ;;  %4217 = vmatprep.subr.bf16.mxu1 %v7338_v63  ;;  %v10587_v52 = vpop.eup %6933  ;;  %6959 = vrcp.f32 %v694_v6  ;;  %v2418_v60 = vpop.f32.mrf.mxu0  ;;  %v16701_v26 = vld [vmem:[#allocation327_spill] sm:$0xff]  ;;  %v16753_v23 = vld [vmem:[#allocation54_spill] sm:$0xff] }
 0x227   :  { %4733 = vmatmul.mubr.bf16.gmra.mxu0 %v7337_v27  ;;  %16683 = vst [vmem:[#allocation383_spill] sm:$0xff] %v10587_v52  ;;  %v10593_v58 = vpop.eup %6935  ;;  %2648 = vmatmul.mubr.bf16.gmra.mxu1 %v2497_v24  ;;  %6961 = vrcp.f32 %v695_v13  ;;  %v699_v27 = vadd.f32 %v10386_v10, %v10377_v57  ;;  %v7341_v24 = vld [vmem:[#allocation5 + $0x84] ss:$8 sps:$4 sm:$0xff]  }
 0x228   :  { %6553 = vmatprep.mubr.msk.bf16.mxu0 %vm16579_vm4, %v7339_v5  ;;  %16685 = vst [vmem:[#allocation384_spill] sm:$0xff] %v10593_v58  ;;  %v10597_v63 = vpop.eup %6937  ;;  %6963 = vrcp.f32 %v696_v38  ;;  %v2420_v48 = vpop.f32.mrf.mxu0  ;;  %v702_v38 = vadd.f32 %v10374_v40, %v10368_v15  ;;  %v16731_v58 = vld [vmem:[#allocation317_spill] sm:$0xff] }
 0x229   :  { %4218 = vmatpush2.bf16.msra.mxu1 %v7340_v8  ;;  %v10601_v6 = vpop.eup %6939  ;;  %6965 = vrcp.f32 %v697_v2  ;;  %v2499_v36 = vpack.c.bf16 %v2420_v48, %v2416_v17  ;;  %v7345_v17 = vld [vmem:[#allocation2 + $0x54] ss:$8 sps:$4 sm:$0xff]  }
 0x22a   :  { %16686 = vst [vmem:[#allocation385_spill] sm:$0xff] %v10601_v6  ;;  %4219 = vmatprep.subr.bf16.mxu1 %v7341_v24  ;;  %v10605_v13 = vpop.eup %6941  ;;  %6967 = vrcp.f32 %v698_v7  ;;  %v2422_v8 = vpop.f32.mrf.mxu0  ;;  %v16689_v24 = vld [vmem:[#allocation328_spill] sm:$0xff]  ;;  %v16699_v48 = vld [vmem:[#allocation74_spill] sm:$0xff] }
 0x22b   :  { %16687 = vst [vmem:[#allocation386_spill] sm:$0xff] %v10605_v13  ;;  %v10609_v5 = vpop.eup %6943  ;;  %6969 = vrcp.f32 %v699_v27  ;;  %v2500_v2 = vpack.c.bf16 %v2422_v8, %v2418_v60  ;;  %v704_v33 = vadd.f32 %v16689_v24, %v10336_v45  ;;  %v15472_v27 = vmov 0.0   ;;  %v16693_v60 = vld [vmem:[#allocation330_spill] sm:$0xff]  ;;  %v16759_v6 = vld [vmem:[#allocation60_spill] sm:$0xff] }
 0x22c   :  { %16688 = vst [vmem:[#allocation387_spill] sm:$0xff] %v10609_v5  ;;  %v10613_v10 = vpop.eup %6945  ;;  %6971 = vrcp.f32 %v700_v29  ;;  %v10619_v40 = vpop.f32.mrf.mxu0  ;;  %v10625_v34 = vsel %vm16692_vm15, 1.0, %v15472_v27  ;;  %v7344_v8 = vld [vmem:[#allocation5 + $0x74] ss:$8 sps:$4 sm:$0xff]  }
 0x22d   :  { %4220 = vmatpush2.bf16.msra.mxu1 %v7342_v4  ;;  %v10617_v7 = vpop.eup %6947  ;;  %6973 = vrcp.f32 %v701_v12  ;;  %v16694_v4 = vld [vmem:[#allocation332_spill] sm:$0xff]  ;;  %6178 = vmatprep.mubr.msk.bf16.mxu1 %vm16696_vm11, %v2500_v2  ;;  %v16702_v12 = vld [vmem:[#allocation329_spill] sm:$0xff]  ;;  %v16705_v2 = vld [vmem:[#allocation79_spill] sm:$0xff] }
 0x22e   :  { %v705_v29 = vadd.f32 %v16694_v4, %v16693_v60  ;;  %4913 = vmatprep.subr.bf16.mxu1 %v7344_v8  ;;  %v10629_v24 = vpop.eup %6949  ;;  %6975 = vrcp.f32 %v702_v38  ;;  %v706_v3 = vadd.f32 %v16702_v12, %v16701_v26  ;;  %v2428_v8 = vpop.f32.mrf.mxu0  ;;  %vm16706_vm15 = vcmp.eq.f32.partialorder %v16704_v55, %v16705_v2  ;;  %v16710_v12 = vld [vmem:[#allocation72_spill] sm:$0xff]  ;;  %v16754_v5 = vld [vmem:[#allocation57_spill] sm:$0xff] }
 0x22f   :  { %4743 = vmatmul.mubr.bf16.gmra.mxu0 %v7343_v20  ;;  %16695 = vst [vmem:[#allocation73_spill] sm:$0xff] %v10629_v24  ;;  %v16698_v20 = vld [vmem:[#allocation71_spill] sm:$0xff]  ;;  %v10641_v4 = vpop.eup %6951  ;;  %2658 = vmatmul.mubr.bf16.gmra.mxu1 %v2499_v36  ;;  %v10647_v28 = vsel %vm16706_vm15, 1.0, %v15472_v27  ;;  %6977 = vrcp.f32 %v703_v43  ;;  %v10654_v38 = vmul.f32 49.0, %v10625_v34  ;;  %vm16712_vm11 = vcmp.eq.f32.partialorder %v16710_v12, %v16711_v47  ;;  %v16718_v12 = vld [vmem:[#allocation69_spill] sm:$0xff] }
 0x230   :  { %6554 = vmatprep.mubr.msk.bf16.mxu0 %vm16697_vm7, %v7345_v17  ;;  %vm16700_vm4 = vcmp.eq.f32.partialorder %v16698_v20, %v16699_v48  ;;  %16703 = vst [vmem:[#allocation77_spill] sm:$0xff] %v10641_v4  ;;  %v16707_v17 = vld [vmem:[#allocation323_spill] sm:$0xff]  ;;  %v10651_v48 = vpop.eup %6953  ;;  %v10660_v36 = vsel %vm16712_vm11, 1.0, %v15472_v27  ;;  %6979 = vrcp.f32 %v704_v33  ;;  %v2430_v55 = vpop.f32.mrf.mxu0  ;;  %v10666_v43 = vmul.f32 %v10629_v24, %v10435_v30  ;;  %v16717_v33 = vld [vmem:[#allocation65_spill] sm:$0xff]  ;;  %v16720_v30 = vld [vmem:[#allocation324_spill] sm:$0xff] }
 0x231   :  { %v10637_v22 = vsel %vm16700_vm4, 1.0, %v15472_v27  ;;  %v707_v20 = vadd.f32 %v16708_v61, %v16707_v17  ;;  %16709 = vst [vmem:[#allocation330_spill] sm:$0xff] %v10651_v48  ;;  %v10662_v62 = vpop.eup %6955  ;;  %6981 = vrcp.f32 %v705_v29  ;;  %v16714_v61 = vld [vmem:[#allocation319_spill] sm:$0xff]  ;;  %v10676_v47 = vmul.f32 49.0, %v10647_v28  ;;  %v16721_v24 = vld [vmem:[#allocation326_spill] sm:$0xff] }
 0x232   :  { %16713 = vst [vmem:[#allocation71_spill] sm:$0xff] %v10662_v62  ;;  %v10669_v2 = vmul.f32 49.0, %v10637_v22  ;;  %v708_v16 = vadd.f32 %v16715_v41, %v16714_v61  ;;  %v10673_v50 = vpop.eup %6957  ;;  %vm16719_vm7 = vcmp.eq.f32.partialorder %v16717_v33, %v16718_v12  ;;  %6983 = vrcp.f32 %v706_v3  ;;  %v2432_v29 = vpop.f32.mrf.mxu0 }
 0x233   :  { %16716 = vst [vmem:[#allocation74_spill] sm:$0xff] %v10673_v50  ;;  %v10682_v56 = vsel %vm16719_vm7, 1.0, %v15472_v27  ;;  %v709_v9 = vadd.f32 %v16721_v24, %v16720_v30  ;;  %v10686_v53 = vpop.eup %6959  ;;  %v10690_v41 = vmul.f32 %v10651_v48, %v10423_v1  ;;  %v10693_v49 = vmul.f32 49.0, %v10660_v36  ;;  %v16730_v48 = vld [vmem:[#allocation315_spill] sm:$0xff] }
 0x234   :  { %16722 = vst [vmem:[#allocation327_spill] sm:$0xff] %v10686_v53  ;;  %6985 = vrcp.f32 %v707_v20  ;;  %v710_v33 = vadd.f32 %v16724_v35, %v16723_v32  ;;  %v10697_v12 = vpop.eup %6961  ;;  %v2502_v3 = vpack.c.bf16 %v2432_v29, %v2428_v8  ;;  %v10701_v27 = vmul.f32 %v10662_v62, %v10438_v39  ;;  %v10714_v21 = vpop.f32.mrf.mxu0  ;;  %v7346_v8 = vld [vmem:[#allocation2 + $0x50] ss:$8 sps:$4 sm:$0xff]   ;;  %v16733_v29 = vld [vmem:[#allocation67_spill] sm:$0xff] }
 0x235   :  { %16725 = vst [vmem:[#allocation76_spill] sm:$0xff] %v10697_v12  ;;  %v16726_v24 = vmov 0.0   ;;  %vm16729_vm4 = vcmp.eq.f32.partialorder %v16727_v59, %v16728_v37  ;;  %v711_v44 = vadd.f32 %v16731_v58, %v16730_v48  ;;  %v10711_v20 = vpop.eup %6963  ;;  %v2501_v35 = vpack.c.bf16 %v2430_v55, %v10619_v40  ;;  %v16734_v62 = vld [vmem:[#allocation70_spill] sm:$0xff]  ;;  %v7347_v58 = vld [vmem:[#allocation2 + $0x64] ss:$8 sps:$4 sm:$0xff]  }
 0x236   :  { %v10707_v1 = vsel %vm16729_vm4, 1.0, %v16726_v24  ;;  %16732 = vst [vmem:[#allocation79_spill] sm:$0xff] %v10711_v20  ;;  %v10717_v39 = vmul.f32 49.0, %v10682_v56  ;;  %vm16735_vm15 = vcmp.eq.f32.partialorder %v16733_v29, %v16734_v62  ;;  %6987 = vrcp.f32 %v708_v16  ;;  %v10725_v59 = vpop.eup %6965  ;;  %v16739_v55 = vld [vmem:[#allocation64_spill] sm:$0xff]  ;;  %v16743_v62 = vld [vmem:[#allocation309_spill] sm:$0xff] }
 0x237   :  { %4753 = vmatmul.mubr.bf16.gmra.mxu0 %v7346_v8  ;;  %v10723_v37 = vsel %vm16735_vm15, 1.0, %v16726_v24  ;;  %16736 = vst [vmem:[#allocation323_spill] sm:$0xff] %v10725_v59  ;;  %vm16737_vm11 = vcmask 785408   ;;  %v10731_v40 = vmul.f32 %v10686_v53, %v10426_v46  ;;  %v16740_v8 = vld [vmem:[#allocation68_spill] sm:$0xff]  ;;  %6989 = vrcp.f32 %v709_v9  ;;  %v16744_v16 = vld [vmem:[#allocation313_spill] sm:$0xff]  ;;  %v10741_v31 = vpop.eup %6967  ;;  %v16746_v46 = vld [vmem:[#allocation59_spill] sm:$0xff] }
 0x238   :  { %6179 = vmatprep.mubr.msk.bf16.mxu1 %vm16737_vm11, %v2502_v3  ;;  %vm16738_vm7 = vmmov %vm16737_vm11  ;;  %vm16741_vm4 = vcmp.eq.f32.partialorder %v16739_v55, %v16740_v8  ;;  %v712_v29 = vadd.f32 %v16744_v16, %v16743_v62  ;;  %16745 = vst [vmem:[#allocation75_spill] sm:$0xff] %v10741_v31  ;;  %v2438_v3 = vpop.f32.mrf.mxu0  ;;  %v16747_v53 = vld [vmem:[#allocation62_spill] sm:$0xff]  ;;  %6991 = vrcp.f32 %v710_v33  ;;  %v16750_v55 = vld [vmem:[#allocation316_spill] sm:$0xff]  ;;  %v10754_v52 = vpop.eup %6969  ;;  %v10758_v16 = vmul.f32 %v10697_v12, %v10406_v51 }
 0x239   :  { %6555 = vmatprep.mubr.msk.bf16.mxu0 %vm16738_vm7, %v7347_v58  ;;  %v10737_v54 = vsel %vm16741_vm4, 1.0, %v16726_v24  ;;  %2668 = vmatmul.mubr.bf16.gmra.mxu1 %v2501_v35  ;;  %v10744_v58 = vmul.f32 49.0, %v10707_v1  ;;  %vm16748_vm15 = vcmp.eq.f32.partialorder %v16746_v46, %v16747_v53  ;;  %v16751_v8 = vld [vmem:[#allocation318_spill] sm:$0xff]  ;;  %16752 = vst [vmem:[#allocation65_spill] sm:$0xff] %v10754_v52  ;;  %v10761_v35 = vmul.f32 49.0, %v10723_v37  ;;  %v10769_v33 = vpop.eup %6971 }
 0x23a   :  { %16742 = vst [vmem:[#allocation72_spill] sm:$0xff] %v10737_v54  ;;  %v10750_v19 = vsel %vm16748_vm15, 1.0, %v16726_v24  ;;  %v713_v9 = vadd.f32 %v16751_v8, %v16750_v55  ;;  %vm16755_vm11 = vcmp.eq.f32.partialorder %v16753_v23, %v16754_v5  ;;  %6993 = vrcp.f32 %v711_v44  ;;  %16757 = vst [vmem:[#allocation324_spill] sm:$0xff] %v10769_v33  ;;  %v2440_v46 = vpop.f32.mrf.mxu0  ;;  %v16760_v23 = vld [vmem:[#allocation63_spill] sm:$0xff]  ;;  %v10788_v44 = vpop.eup %6973 }
 0x23b   :  { %16749 = vst [vmem:[#allocation319_spill] sm:$0xff] %v10750_v19  ;;  %v10767_v53 = vsel %vm16755_vm11, 1.0, %v16726_v24  ;;  %v10773_v8 = vmul.f32 %v10711_v20, %v10394_v25  ;;  %v10777_v51 = vmul.f32 %v10725_v59, %v10409_v18  ;;  %v10780_v12 = vmul.f32 49.0, %v10737_v54  ;;  %16763 = vst [vmem:[#allocation66_spill] sm:$0xff] %v10788_v44  ;;  %v16766_v18 = vld [vmem:[#allocation56_spill] sm:$0xff]  ;;  %v16767_v59 = vld [vmem:[#allocation58_spill] sm:$0xff]  ;;  %v10803_v54 = vpop.eup %6975 }
 0x23c   :  { %16756 = vst [vmem:[#allocation69_spill] sm:$0xff] %v10767_v53  ;;  %vm16761_vm7 = vcmp.eq.f32.partialorder %v16759_v6, %v16760_v23  ;;  %v10792_v50 = vmul.f32 %v10741_v31, %v10397_v0  ;;  %v10795_v25 = vmul.f32 49.0, %v10750_v19  ;;  %vm16768_vm4 = vcmp.eq.f32.partialorder %v16766_v18, %v16767_v59  ;;  %16770 = vst [vmem:[#allocation64_spill] sm:$0xff] %v10803_v54  ;;  %v2442_v6 = vpop.f32.mrf.mxu0  ;;  %v16773_v0 = vld [vmem:[#allocation53_spill] sm:$0xff]  ;;  %v16776_v19 = vld [vmem:[#allocation312_spill] sm:$0xff]  ;;  %v10816_v59 = vpop.eup %6977 }
 0x23d   :  { %16758 = vst [vmem:[#allocation320_spill] sm:$0xff] %v10777_v51  ;;  %v10786_v5 = vsel %vm16761_vm7, 1.0, %v16726_v24  ;;  %v10801_v20 = vsel %vm16768_vm4, 1.0, %v16726_v24  ;;  %6995 = vrcp.f32 %v712_v29  ;;  %v10806_v23 = vmul.f32 49.0, %v10767_v53  ;;  %v16772_v51 = vld [vmem:[#allocation49_spill] sm:$0xff]  ;;  %16778 = vst [vmem:[#allocation59_spill] sm:$0xff] %v10816_v59 }
 0x23e   :  { %16762 = vst [vmem:[#allocation61_spill] sm:$0xff] %v10786_v5  ;;  %16764 = vst [vmem:[#allocation315_spill] sm:$0xff] %v10792_v50  ;;  %vm16774_vm15 = vcmp.eq.f32.partialorder %v16772_v51, %v16773_v0  ;;  %6997 = vrcp.f32 %v713_v9  ;;  %v16777_v50 = vld [vmem:[#allocation314_spill] sm:$0xff]  ;;  %v2504_v18 = vpack.c.bf16 %v2442_v6, %v2438_v3  ;;  %v10820_v29 = vmul.f32 %v10754_v52, %v10377_v57  ;;  %v10829_v51 = vpop.eup %6979  ;;  %v10832_v0 = vpop.f32.mrf.mxu0  ;;  %v16783_v57 = vld [vmem:[#allocation47_spill] sm:$0xff] }
 0x23f   :  { %16765 = vst [vmem:[#allocation67_spill] sm:$0xff] %v10795_v25  ;;  %16769 = vst [vmem:[#allocation70_spill] sm:$0xff] %v10801_v20  ;;  %v10812_v31 = vsel %vm16774_vm15, 1.0, %v16726_v24  ;;  %v714_v25 = vadd.f32 %v16777_v50, %v16776_v19  ;;  %v10824_v53 = vmul.f32 %v10769_v33, %v10365_v11  ;;  %v2503_v9 = vpack.c.bf16 %v2440_v46, %v10714_v21  ;;  %v7348_v50 = vld [vmem:[#allocation2 + $0x60] ss:$8 sps:$4 sm:$0xff]   ;;  %v10849_v21 = vpop.eup %6981 }
 0x240   :  { %16771 = vst [vmem:[#allocation68_spill] sm:$0xff] %v10806_v23  ;;  %16775 = vst [vmem:[#allocation309_spill] sm:$0xff] %v10812_v31  ;;  %v10827_v23 = vmul.f32 49.0, %v10786_v5  ;;  %4763 = vmatmul.mubr.bf16.gmra.mxu0 %v7348_v50  ;;  %v10835_v3 = vmul.f32 49.0, %v10801_v20  ;;  %v16784_v6 = vld [vmem:[#allocation50_spill] sm:$0xff]  ;;  %v16787_v33 = vld [vmem:[#allocation52_spill] sm:$0xff]  ;;  %v10855_v46 = vmul.f32 %v10788_v44, %v10380_v42  ;;  %v10872_v42 = vmul.f32 %v10803_v54, %v10368_v15 }
 0x241   :  { %16779 = vst [vmem:[#allocation62_spill] sm:$0xff] %v10824_v53  ;;  %16781 = vst [vmem:[#allocation54_spill] sm:$0xff] %v10829_v51  ;;  %vm16785_vm11 = vcmp.eq.f32.partialorder %v16783_v57, %v16784_v6  ;;  %v16788_v52 = vld [vmem:[#allocation55_spill] sm:$0xff]  ;;  %vm16792_vm4 = vcmask 785408   ;;  %v7349_v50 = vld [vmem:[#allocation2 + $0x74] ss:$8 sps:$4 sm:$0xff]   ;;  %6999 = vrcp.f32 %v714_v25 }
 0x242   :  { %16780 = vst [vmem:[#allocation316_spill] sm:$0xff] %v10827_v23  ;;  %16782 = vst [vmem:[#allocation57_spill] sm:$0xff] %v10835_v3  ;;  %v10841_v11 = vsel %vm16785_vm11, 1.0, %v16726_v24  ;;  %vm16789_vm7 = vcmp.eq.f32.partialorder %v16787_v33, %v16788_v52  ;;  %6180 = vmatprep.mubr.msk.bf16.mxu1 %vm16792_vm4, %v2504_v18  ;;  %v10858_v57 = vmul.f32 49.0, %v10812_v31  ;;  %v16796_v6 = vld [vmem:[#allocation48_spill] sm:$0xff]  ;;  %v16797_v20 = vld [vmem:[#allocation51_spill] sm:$0xff]  ;;  %v10868_v18 = vpop.eup %6983  ;;  %v2448_v23 = vpop.f32.mrf.mxu0 }
 0x243   :  { %16786 = vst [vmem:[#allocation60_spill] sm:$0xff] %v10841_v11  ;;  %v10847_v5 = vsel %vm16789_vm7, 1.0, %v16726_v24  ;;  %16791 = vst [vmem:[#allocation56_spill] sm:$0xff] %v10849_v21  ;;  %vm16798_vm11 = vcmp.eq.f32.partialorder %v16796_v6, %v16797_v20  ;;  %v16800_v33 = vld [vmem:[#allocation302_spill] sm:$0xff]  ;;  %v16801_v3 = vld [vmem:[#allocation307_spill] sm:$0xff]  ;;  %2678 = vmatmul.mubr.bf16.gmra.mxu1 %v2503_v9  ;;  %v10889_v9 = vmul.f32 49.0, %v10841_v11 }
 0x244   :  { %16790 = vst [vmem:[#allocation63_spill] sm:$0xff] %v10847_v5  ;;  %vm16793_vm15 = vmmov %vm16792_vm4  ;;  %v10864_v52 = vsel %vm16798_vm11, 1.0, %v16726_v24  ;;  %v715_v53 = vadd.f32 %v16801_v3, %v16800_v33  ;;  %v16804_v44 = vld [vmem:[#allocation45_spill] sm:$0xff]  ;;  %v16807_v20 = vld [vmem:[#allocation296_spill] sm:$0xff]  ;;  %v10886_v3 = vmul.f32 %v10816_v59, %v10348_v14  ;;  %v10892_v15 = vmul.f32 49.0, %v10847_v5  ;;  %v2450_v54 = vpop.f32.mrf.mxu0 }
 0x245   :  { %6556 = vmatprep.mubr.msk.bf16.mxu0 %vm16793_vm15, %v7349_v50  ;;  %16794 = vst [vmem:[#allocation58_spill] sm:$0xff] %v10855_v46  ;;  %16795 = vst [vmem:[#allocation49_spill] sm:$0xff] %v10858_v57  ;;  %v16803_v50 = vld [vmem:[#allocation42_spill] sm:$0xff]  ;;  %v10882_v46 = vpop.eup %6985  ;;  %v10906_v14 = vmul.f32 %v10849_v21, %v16693_v60  ;;  %v10909_v59 = vmul.f32 49.0, %v10864_v52  ;;  %v16818_v5 = vld [vmem:[#allocation44_spill] sm:$0xff] }
 0x246   :  { %16799 = vst [vmem:[#allocation53_spill] sm:$0xff] %v10864_v52  ;;  %16802 = vst [vmem:[#allocation312_spill] sm:$0xff] %v10868_v18  ;;  %vm16805_vm7 = vcmp.eq.f32.partialorder %v16803_v50, %v16804_v44  ;;  %v16808_v6 = vld [vmem:[#allocation298_spill] sm:$0xff]  ;;  %v16811_v44 = vld [vmem:[#allocation37_spill] sm:$0xff]  ;;  %7001 = vrcp.f32 %v715_v53 }
 0x247   :  { %v10878_v31 = vsel %vm16805_vm7, 1.0, %v16726_v24  ;;  %v716_v57 = vadd.f32 %v16808_v6, %v16807_v20  ;;  %16809 = vst [vmem:[#allocation50_spill] sm:$0xff] %v10882_v46  ;;  %16810 = vst [vmem:[#allocation52_spill] sm:$0xff] %v10892_v15  ;;  %v16812_v50 = vld [vmem:[#allocation41_spill] sm:$0xff]  ;;  %v10902_v6 = vmul.f32 %v10829_v51, %v10336_v45  ;;  %v16819_v15 = vld [vmem:[#allocation46_spill] sm:$0xff] }
 0x248   :  { %16806 = vst [vmem:[#allocation47_spill] sm:$0xff] %v10878_v31  ;;  %vm16813_vm4 = vcmp.eq.f32.partialorder %v16811_v44, %v16812_v50  ;;  %16816 = vst [vmem:[#allocation51_spill] sm:$0xff] %v10906_v14  ;;  %vm16820_vm15 = vcmp.eq.f32.partialorder %v16818_v5, %v16819_v15  ;;  %v10917_v44 = vpop.eup %6987  ;;  %v10921_v50 = vmul.f32 %v10868_v18, %v16701_v26  ;;  %v10924_v45 = vmul.f32 49.0, %v10878_v31  ;;  %v16825_v60 = vld [vmem:[#allocation40_spill] sm:$0xff]  ;;  %v16826_v21 = vld [vmem:[#allocation43_spill] sm:$0xff]  ;;  %v2452_v5 = vpop.f32.mrf.mxu0 }
 0x249   :  { %v10898_v25 = vsel %vm16813_vm4, 1.0, %v16726_v24  ;;  %16815 = vst [vmem:[#allocation48_spill] sm:$0xff] %v10902_v6  ;;  %16817 = vst [vmem:[#allocation302_spill] sm:$0xff] %v10909_v59  ;;  %v10915_v11 = vsel %vm16820_vm15, 1.0, %v16726_v24  ;;  %vm16827_vm11 = vcmp.eq.f32.partialorder %v16825_v60, %v16826_v21  ;;  %v10932_v52 = vpop.eup %6989  ;;  %v10936_v15 = vmul.f32 %v10882_v46, %v16707_v17  ;;  %v16832_v18 = vld [vmem:[#allocation245_spill] sm:$0xff]  ;;  %v16833_v31 = vld [vmem:[#allocation308_spill] sm:$0xff] }
 0x24a   :  { %16814 = vst [vmem:[#allocation55_spill] sm:$0xff] %v10898_v25  ;;  %16821 = vst [vmem:[#allocation42_spill] sm:$0xff] %v10915_v11  ;;  %v10930_v51 = vsel %vm16827_vm11, 1.0, %v16726_v24  ;;  %v10939_v26 = vmul.f32 49.0, %v10898_v25  ;;  %7003 = vrcp.f32 %v716_v57  ;;  %v2506_v21 = vpack.c.bf16 %v2452_v5, %v2448_v23  ;;  %v16836_v53 = vld [vmem:[#allocation35_spill] sm:$0xff]  ;;  %v16837_v14 = vld [vmem:[#allocation38_spill] sm:$0xff]  ;;  %v10963_v23 = vpop.f32.mrf.mxu0 }
 0x24b   :  { %16822 = vst [vmem:[#allocation45_spill] sm:$0xff] %v10917_v44  ;;  %16823 = vst [vmem:[#allocation296_spill] sm:$0xff] %v10921_v50  ;;  %v717_v50 = vadd.f32 %v16833_v31, %v16832_v18  ;;  %v10946_v60 = vmul.f32 49.0, %v10915_v11  ;;  %vm16838_vm7 = vcmp.eq.f32.partialorder %v16836_v53, %v16837_v14  ;;  %v16839_v17 = vld [vmem:[#allocation30_spill] sm:$0xff]  ;;  %v16840_v46 = vld [vmem:[#allocation33_spill] sm:$0xff]  ;;  %v2505_v31 = vpack.c.bf16 %v2450_v54, %v10832_v0 }
 0x24c   :  { %16824 = vst [vmem:[#allocation37_spill] sm:$0xff] %v10924_v45  ;;  %16828 = vst [vmem:[#allocation41_spill] sm:$0xff] %v10930_v51  ;;  %v10943_v45 = vpop.eup %6991  ;;  %v10952_v59 = vsel %vm16838_vm7, 1.0, %v16726_v24  ;;  %vm16841_vm4 = vcmp.eq.f32.partialorder %v16839_v17, %v16840_v46  ;;  %v7350_v5 = vld [vmem:[#allocation2 + $0x70] ss:$8 sps:$4 sm:$0xff]   ;;  %v10966_v11 = vmul.f32 49.0, %v10930_v51  ;;  %v10980_v54 = vmul.f32 %v10917_v44, %v16714_v61  ;;  %v2458_v6 = vpop.f32.mrf.mxu0 }
 0x24d   :  { %16829 = vst [vmem:[#allocation44_spill] sm:$0xff] %v10932_v52  ;;  %16830 = vst [vmem:[#allocation46_spill] sm:$0xff] %v10936_v15  ;;  %v10958_v57 = vsel %vm16841_vm4, 1.0, %v16726_v24  ;;  %v10960_v25 = vpop.eup %6993  ;;  %4773 = vmatmul.mubr.bf16.gmra.mxu0 %v7350_v5  ;;  %v16845_v14 = vld [vmem:[#allocation36_spill] sm:$0xff]  ;;  %v16846_v53 = vld [vmem:[#allocation39_spill] sm:$0xff]  ;;  %vm16851_vm11 = vcmask 785408   ;;  %v10984_v0 = vmul.f32 %v10932_v52, %v16720_v30  ;;  %v10998_v61 = vmul.f32 %v10943_v45, %v16723_v32 }
 0x24e   :  { %16831 = vst [vmem:[#allocation40_spill] sm:$0xff] %v10939_v26  ;;  %16834 = vst [vmem:[#allocation43_spill] sm:$0xff] %v10943_v45  ;;  %vm16847_vm15 = vcmp.eq.f32.partialorder %v16845_v14, %v16846_v53  ;;  %v16849_v46 = vld [vmem:[#allocation239_spill] sm:$0xff]  ;;  %v16850_v17 = vld [vmem:[#allocation301_spill] sm:$0xff]  ;;  %6181 = vmatprep.mubr.msk.bf16.mxu1 %vm16851_vm11, %v2506_v21  ;;  %v11001_v30 = vmul.f32 49.0, %v10952_v59  ;;  %v11004_v52 = vmul.f32 49.0, %v10958_v57  ;;  %7005 = vrcp.f32 %v717_v50 }
 0x24f   :  { %16835 = vst [vmem:[#allocation245_spill] sm:$0xff] %v10946_v60  ;;  %16842 = vst [vmem:[#allocation35_spill] sm:$0xff] %v10958_v57  ;;  %v10972_v60 = vsel %vm16847_vm15, 1.0, %v16726_v24  ;;  %v718_v15 = vadd.f32 %v16850_v17, %v16849_v46  ;;  %v7351_v26 = vld [vmem:[#allocation2 + $0x84] ss:$8 sps:$4 sm:$0xff]   ;;  %v16854_v14 = vld [vmem:[#allocation34_spill] sm:$0xff]  ;;  %2688 = vmatmul.mubr.bf16.gmra.mxu1 %v2505_v31  ;;  %v2460_v57 = vpop.f32.mrf.mxu0 }
 0x250   :  { %16843 = vst [vmem:[#allocation38_spill] sm:$0xff] %v10960_v25  ;;  %16844 = vst [vmem:[#allocation30_spill] sm:$0xff] %v10966_v11  ;;  %v16853_v5 = vld [vmem:[#allocation32_spill] sm:$0xff]  ;;  %v16858_v51 = vld [vmem:[#allocation237_spill] sm:$0xff]  ;;  %v10994_v11 = vpop.eup %6995  ;;  %v11014_v31 = vmul.f32 49.0, %v10972_v60 }
 0x251   :  { %16848 = vst [vmem:[#allocation33_spill] sm:$0xff] %v10972_v60  ;;  %vm16852_vm7 = vmmov %vm16851_vm11  ;;  %vm16855_vm4 = vcmp.eq.f32.partialorder %v16853_v5, %v16854_v14  ;;  %v16857_v17 = vld [vmem:[#allocation288_spill] sm:$0xff]  ;;  %v11006_v5 = vpop.eup %6997  ;;  %v11011_v14 = vmul.f32 %v10960_v25, %v16730_v48  ;;  %v16863_v32 = vld [vmem:[#allocation25_spill] sm:$0xff]  ;;  %7007 = vrcp.f32 %v718_v15 }
 0x252   :  { %6557 = vmatprep.mubr.msk.bf16.mxu0 %vm16852_vm7, %v7351_v26  ;;  %v10990_v53 = vsel %vm16855_vm4, 1.0, %v16726_v24  ;;  %v719_v21 = vadd.f32 %v16858_v51, %v16857_v17  ;;  %16859 = vst [vmem:[#allocation39_spill] sm:$0xff] %v10994_v11  ;;  %v1865_v26 = vpop.f32.mrf.mxu1  ;;  %16860 = vst [vmem:[#allocation239_spill] sm:$0xff] %v11004_v52  ;;  %v16864_v51 = vld [vmem:[#allocation29_spill] sm:$0xff]  ;;  %v16869_v48 = vld [vmem:[#allocation231_spill] sm:$0xff] }
 0x253   :  { %16856 = vst [vmem:[#allocation36_spill] sm:$0xff] %v10990_v53  ;;  %16861 = vst [vmem:[#allocation32_spill] sm:$0xff] %v11006_v5  ;;  %vm2060_vm15 = vcmp.ne.f32.partialorder %v1865_v26, %v10654_v38  ;;  %vm16865_vm11 = vcmp.eq.f32.partialorder %v16863_v32, %v16864_v51  ;;  %v11024_v52 = vmul.f32 49.0, %v10990_v53  ;;  %v16868_v38 = vld [vmem:[#allocation230_spill] sm:$0xff]  ;;  %v11032_v51 = vmul.f32 %v10994_v11, %v16743_v62  ;;  %v11048_v62 = vpop.eup %6999 }
 0x254   :  { %16862 = vst [vmem:[#allocation34_spill] sm:$0xff] %v11014_v31  ;;  %v11020_v45 = vsel %vm16865_vm11, 1.0, %v16726_v24  ;;  %v6045_v44 = vsel %vm2060_vm15, 1.0, %v16726_v24  ;;  %v1867_v50 = vpop.f32.mrf.mxu1  ;;  %v720_v26 = vadd.f32 %v16869_v48, %v16868_v38  ;;  %7009 = vrcp.f32 %v719_v21  ;;  %v2462_v31 = vpop.f32.mrf.mxu0 }
 0x255   :  { %16866 = vst [vmem:[#allocation288_spill] sm:$0xff] %v11020_v45  ;;  %16867 = vst [vmem:[#allocation25_spill] sm:$0xff] %v11024_v52  ;;  %v2228_v25 = vmul.f32 %v6045_v44, %v10625_v34  ;;  %vm2061_vm7 = vcmp.ne.f32.partialorder %v1867_v50, %v10669_v2  ;;  %v11037_v53 = vmul.f32 %v11006_v5, %v16750_v55  ;;  %v11040_v15 = vmul.f32 49.0, %v11020_v45  ;;  %v16872_v34 = vld [vmem:[#allocation23_spill] sm:$0xff]  ;;  %v16873_v44 = vld [vmem:[#allocation26_spill] sm:$0xff] }
 0x256   :  { %v6046_v32 = vsel %vm2061_vm7, 1.0, %v16726_v24  ;;  %v1869_v60 = vpop.f32.mrf.mxu1  ;;  %vm16874_vm4 = vcmp.eq.f32.partialorder %v16872_v34, %v16873_v44  ;;  %16875 = vst [vmem:[#allocation23_spill] sm:$0xff] %v11048_v62  ;;  %v2508_v55 = vpack.c.bf16 %v2462_v31, %v2458_v6  ;;  %v2507_v48 = vpack.c.bf16 %v2460_v57, %v10963_v23  ;;  %v11057_v45 = vpop.f32.mrf.mxu0  ;;  %v7352_v34 = vld [vmem:[#allocation2 + $0x80] ss:$8 sps:$4 sm:$0xff]   ;;  %v7353_v6 = vld [vmem:[#allocation2 + $0x94] ss:$8 sps:$4 sm:$0xff]  }
 0x257   :  { %16870 = vst [vmem:[#allocation29_spill] sm:$0xff] %v11037_v53  ;;  %16871 = vst [vmem:[#allocation230_spill] sm:$0xff] %v11040_v15  ;;  %v11046_v2 = vsel %vm16874_vm4, 1.0, %v16726_v24  ;;  %v11051_v21 = vmul.f32 %v2228_v25, %v10666_v43  ;;  %v2229_v50 = vmul.f32 %v6046_v32, %v10637_v22  ;;  %vm2062_vm15 = vcmp.ne.f32.partialorder %v1869_v60, %v10676_v47  ;;  %v16877_v44 = vld [vmem:[#allocation291_spill] sm:$0xff]  ;;  %v16878_v15 = vld [vmem:[#allocation293_spill] sm:$0xff]  ;;  %v11076_v31 = vpop.eup %7001 }
 0x258   :  { %v6047_v5 = vsel %vm2062_vm15, 1.0, %v16726_v24  ;;  %v1871_v11 = vpop.f32.mrf.mxu1  ;;  %4783 = vmatmul.mubr.bf16.gmra.mxu0 %v7352_v34  ;;  %v721_v53 = vadd.f32 %v16878_v15, %v16877_v44  ;;  %v16879_v52 = vld [vmem:[#allocation286_spill] sm:$0xff]  ;;  %v16880_v43 = vld [vmem:[#allocation232_spill] sm:$0xff]  ;;  %vm16882_vm7 = vcmask 785408   ;;  %v16885_v57 = vld [vmem:[#allocation31_spill] sm:$0xff]  ;;  %7011 = vrcp.f32 %v720_v26 }
 0x259   :  { %16876 = vst [vmem:[#allocation26_spill] sm:$0xff] %v11051_v21  ;;  %v722_v25 = vadd.f32 %v16880_v43, %v16879_v52  ;;  %v11064_v22 = vmul.f32 %v2229_v50, %v10690_v41  ;;  %v2230_v47 = vmul.f32 %v6047_v5, %v10647_v28  ;;  %vm2063_vm11 = vcmp.ne.f32.partialorder %v1871_v11, %v10693_v49  ;;  %vm16883_vm4 = vmmov %vm16882_vm7  ;;  %v16884_v60 = vld [vmem:[#allocation28_spill] sm:$0xff]  ;;  %v2468_v50 = vpop.f32.mrf.mxu0  ;;  %v11086_v11 = vpop.eup %7003 }
 0x25a   :  { %6182 = vmatprep.mubr.msk.bf16.mxu1 %vm16882_vm7, %v2508_v55  ;;  %6558 = vmatprep.mubr.msk.bf16.mxu0 %vm16883_vm4, %v7353_v6  ;;  %vm16886_vm15 = vcmp.eq.f32.partialorder %v16884_v60, %v16885_v57  ;;  %16887 = vst [vmem:[#allocation286_spill] sm:$0xff] %v11076_v31  ;;  %v6048_v41 = vsel %vm2063_vm11, 1.0, %v16726_v24  ;;  %v1875_v32 = vpop.f32.mrf.mxu1  ;;  %v11081_v28 = vmul.f32 %v11048_v62, %v16776_v19  ;;  %v11084_v49 = vmul.f32 49.0, %v11046_v2  ;;  %v16890_v34 = vld [vmem:[#allocation24_spill] sm:$0xff] }
 0x25b   :  { %16881 = vst [vmem:[#allocation291_spill] sm:$0xff] %v11064_v22  ;;  %v11074_v23 = vsel %vm16886_vm15, 1.0, %v16726_v24  ;;  %2698 = vmatmul.mubr.bf16.gmra.mxu1 %v2507_v48  ;;  %16888 = vst [vmem:[#allocation28_spill] sm:$0xff] %v11086_v11  ;;  %v11089_v5 = vmul.f32 %v2230_v47, %v10701_v27  ;;  %v2231_v55 = vmul.f32 %v6048_v41, %v10660_v36  ;;  %v16891_v48 = vld [vmem:[#allocation27_spill] sm:$0xff]  ;;  %v2470_v57 = vpop.f32.mrf.mxu0  ;;  %7013 = vrcp.f32 %v721_v53 }
 0x25c   :  { %vm2064_vm11 = vcmp.ne.f32.partialorder %v1875_v32, %v10717_v39  ;;  %vm16892_vm7 = vcmp.eq.f32.partialorder %v16890_v34, %v16891_v48  ;;  %v1877_v60 = vpop.f32.mrf.mxu1  ;;  %v11101_v26 = vmul.f32 49.0, %v11074_v23  ;;  %v723_v27 = vadd.f32 %v10641_v4, %v10613_v10 }
 0x25d   :  { %16889 = vst [vmem:[#allocation31_spill] sm:$0xff] %v11089_v5  ;;  %v11097_v6 = vsel %vm16892_vm7, 1.0, %v16726_v24  ;;  %v6049_v19 = vsel %vm2064_vm11, 1.0, %v16726_v24  ;;  %v11106_v36 = vmul.f32 %v2231_v55, %v10731_v40  ;;  %vm2065_vm4 = vcmp.ne.f32.partialorder %v1877_v60, %v10744_v58  ;;  %v2472_v32 = vpop.f32.mrf.mxu0  ;;  %v11122_v55 = vpop.eup %7005  ;;  %v7354_v60 = vld [vmem:[#allocation2 + $0x90] ss:$8 sps:$4 sm:$0xff]  }
 0x25e   :  { %v2232_v39 = vmul.f32 %v6049_v19, %v10682_v56  ;;  %7015 = vrcp.f32 %v722_v25  ;;  %v6050_v47 = vsel %vm2065_vm4, 1.0, %v16726_v24  ;;  %v1879_v41 = vpop.f32.mrf.mxu1  ;;  %v11113_v34 = vmul.f32 %v11076_v31, %v16800_v33  ;;  %16894 = vst [vmem:[#allocation27_spill] sm:$0xff] %v11122_v55 }
 0x25f   :  { %16893 = vst [vmem:[#allocation24_spill] sm:$0xff] %v11106_v36  ;;  %v11117_v53 = vmul.f32 %v11086_v11, %v16807_v20  ;;  %v11120_v40 = vmul.f32 49.0, %v11097_v6  ;;  %v2233_v58 = vmul.f32 %v6050_v47, %v10707_v1  ;;  %vm2066_vm15 = vcmp.ne.f32.partialorder %v1879_v41, %v10761_v35  ;;  %v11131_v20 = vpop.f32.mrf.mxu0 }
 0x260   :  { %v11125_v56 = vmul.f32 %v2232_v39, %v10758_v16  ;;  %v2510_v25 = vpack.c.bf16 %v2472_v32, %v2468_v50  ;;  %v2509_v33 = vpack.c.bf16 %v2470_v57, %v11057_v45  ;;  %v6051_v48 = vsel %vm2066_vm15, 1.0, %v16726_v24  ;;  %v1881_v19 = vpop.f32.mrf.mxu1  ;;  %4793 = vmatmul.mubr.bf16.gmra.mxu0 %v7354_v60  ;;  %v11135_v16 = vpop.eup %7007  ;;  %v7355_v45 = vld [vmem:[#allocation2 + $0xa4] ss:$8 sps:$4 sm:$0xff]   ;;  %v16900_v50 = vld [vmem:[#allocation18_spill] sm:$0xff]  ;;  %v16901_v57 = vld [vmem:[#allocation21_spill] sm:$0xff] }
 0x261   :  { %7017 = vrcp.f32 %v723_v27  ;;  %v724_v4 = vadd.f32 %v10605_v13, %v10597_v63  ;;  %16896 = vst [vmem:[#allocation389_spill] sm:$0xff] %v11135_v16  ;;  %v11138_v1 = vmul.f32 %v2233_v58, %v10773_v8  ;;  %v2234_v35 = vmul.f32 %v6051_v48, %v10723_v37  ;;  %v11150_v39 = vpop.eup %7009  ;;  %v2478_v41 = vpop.f32.mrf.mxu0  ;;  %v16904_v37 = vld [vmem:[#allocation15_spill] sm:$0xff]  ;;  %v16905_v32 = vld [vmem:[#allocation17_spill] sm:$0xff] }
 0x262   :  { %16895 = vst [vmem:[#allocation388_spill] sm:$0xff] %v11125_v56  ;;  %vm2067_vm11 = vcmp.ne.f32.partialorder %v1881_v19, %v10780_v12  ;;  %vm16898_vm7 = vcmask 785408   ;;  %vm16902_vm15 = vcmp.eq.f32.partialorder %v16900_v50, %v16901_v57  ;;  %16903 = vst [vmem:[#allocation18_spill] sm:$0xff] %v11150_v39  ;;  %v1885_v47 = vpop.f32.mrf.mxu1  ;;  %v11155_v12 = vmul.f32 %v11122_v55, %v16832_v18  ;;  %v16908_v19 = vld [vmem:[#allocation320_spill] sm:$0xff]  ;;  %v16911_v57 = vld [vmem:[#allocation67_spill] sm:$0xff] }
 0x263   :  { %16897 = vst [vmem:[#allocation390_spill] sm:$0xff] %v11138_v1  ;;  %6183 = vmatprep.mubr.msk.bf16.mxu1 %vm16898_vm7, %v2510_v25  ;;  %vm16899_vm4 = vmmov %vm16898_vm7  ;;  %v11148_v27 = vsel %vm16902_vm15, 1.0, %v16726_v24  ;;  %v6052_v8 = vsel %vm2067_vm11, 1.0, %v16726_v24  ;;  %vm16906_vm7 = vcmp.eq.f32.partialorder %v16904_v37, %v16905_v32  ;;  %v16907_v25 = vld [vmem:[#allocation74_spill] sm:$0xff]  ;;  %v11166_v60 = vmul.f32 %v2234_v35, %v16908_v19  ;;  %v2480_v43 = vpop.f32.mrf.mxu0  ;;  %v16915_v35 = vld [vmem:[#allocation385_spill] sm:$0xff] }
 0x264   :  { %6559 = vmatprep.mubr.msk.bf16.mxu0 %vm16899_vm4, %v7355_v45  ;;  %2708 = vmatmul.mubr.bf16.gmra.mxu1 %v2509_v33  ;;  %v11161_v58 = vsel %vm16906_vm7, 1.0, %v16726_v24  ;;  %v725_v48 = vadd.f32 %v16907_v25, %v10617_v7  ;;  %v16910_v45 = vld [vmem:[#allocation72_spill] sm:$0xff]  ;;  %vm2068_vm11 = vcmp.ne.f32.partialorder %v1885_v47, %v16911_v57  ;;  %v16912_v33 = vld [vmem:[#allocation19_spill] sm:$0xff]  ;;  %v16913_v18 = vld [vmem:[#allocation22_spill] sm:$0xff]  ;;  %v1887_v32 = vpop.f32.mrf.mxu1  ;;  %v11178_v15 = vmul.f32 49.0, %v11148_v27 }
 0x265   :  { %16909 = vst [vmem:[#allocation21_spill] sm:$0xff] %v11166_v60  ;;  %v2235_v50 = vmul.f32 %v6052_v8, %v16910_v45  ;;  %vm16914_vm4 = vcmp.eq.f32.partialorder %v16912_v33, %v16913_v18  ;;  %v6053_v37 = vsel %vm2068_vm11, 1.0, %v16726_v24  ;;  %7019 = vrcp.f32 %v724_v4  ;;  %v16916_v19 = vld [vmem:[#allocation387_spill] sm:$0xff]  ;;  %v16920_v55 = vld [vmem:[#allocation68_spill] sm:$0xff]  ;;  %v2482_v31 = vpop.f32.mrf.mxu0 }
 0x266   :  { %v11174_v13 = vsel %vm16914_vm4, 1.0, %v16726_v24  ;;  %v726_v25 = vadd.f32 %v16916_v19, %v16915_v35  ;;  %v16917_v8 = vld [vmem:[#allocation315_spill] sm:$0xff]  ;;  %vm2069_vm15 = vcmp.ne.f32.partialorder %v1887_v32, %v16920_v55  ;;  %v11189_v33 = vmul.f32 %v11135_v16, %v16849_v46  ;;  %v1889_v11 = vpop.f32.mrf.mxu1  ;;  %v16923_v55 = vld [vmem:[#allocation69_spill] sm:$0xff]  ;;  %v16924_v46 = vld [vmem:[#allocation316_spill] sm:$0xff] }
 0x267   :  { %v11183_v45 = vmul.f32 %v2235_v50, %v16917_v8  ;;  %v16919_v47 = vld [vmem:[#allocation319_spill] sm:$0xff]  ;;  %v6054_v18 = vsel %vm2069_vm15, 1.0, %v16726_v24  ;;  %v11193_v4 = vmul.f32 49.0, %v11161_v58  ;;  %v11196_v19 = vmul.f32 49.0, %v11174_v13  ;;  %v11198_v50 = vpop.eup %7011 }
 0x268   :  { %v2236_v57 = vmul.f32 %v6053_v37, %v16919_v47  ;;  %7021 = vrcp.f32 %v725_v48  ;;  %16921 = vst [vmem:[#allocation17_spill] sm:$0xff] %v11198_v50  ;;  %v2237_v32 = vmul.f32 %v6054_v18, %v16923_v55  ;;  %vm2070_vm7 = vcmp.ne.f32.partialorder %v1889_v11, %v16924_v46  ;;  %v1891_v62 = vpop.f32.mrf.mxu1  ;;  %v7356_v60 = vld [vmem:[#allocation2 + $0xa0] ss:$8 sps:$4 sm:$0xff]   ;;  %v16925_v48 = vld [vmem:[#allocation381_spill] sm:$0xff] }
 0x269   :  { %16918 = vst [vmem:[#allocation15_spill] sm:$0xff] %v11183_v45  ;;  %v2512_v8 = vpack.c.bf16 %v2482_v31, %v2478_v41  ;;  %v2511_v47 = vpack.c.bf16 %v2480_v43, %v11131_v20  ;;  %v6055_v16 = vsel %vm2070_vm7, 1.0, %v16726_v24  ;;  %v11207_v45 = vpop.f32.mrf.mxu0  ;;  %4803 = vmatmul.mubr.bf16.gmra.mxu0 %v7356_v60  ;;  %7023 = vrcp.f32 %v726_v25  ;;  %v16926_v56 = vld [vmem:[#allocation383_spill] sm:$0xff]  ;;  %v16930_v11 = vld [vmem:[#allocation61_spill] sm:$0xff]  ;;  %v16934_v20 = vld [vmem:[#allocation16_spill] sm:$0xff] }
 0x26a   :  { %v11201_v37 = vmul.f32 %v2236_v57, %v10820_v29  ;;  %v727_v1 = vadd.f32 %v16926_v56, %v16925_v48  ;;  %v11211_v29 = vpop.eup %7013  ;;  %v16928_v57 = vld [vmem:[#allocation62_spill] sm:$0xff]  ;;  %v2238_v31 = vmul.f32 %v6055_v16, %v16930_v11  ;;  %v16931_v41 = vld [vmem:[#allocation57_spill] sm:$0xff]  ;;  %vm16932_vm4 = vcmask 785408   ;;  %v16935_v25 = vld [vmem:[#allocation20_spill] sm:$0xff]  ;;  %v1895_v46 = vpop.f32.mrf.mxu1 }
 0x26b   :  { %16927 = vst [vmem:[#allocation72_spill] sm:$0xff] %v11211_v29  ;;  %v11214_v18 = vmul.f32 %v2237_v32, %v16928_v57  ;;  %vm2071_vm11 = vcmp.ne.f32.partialorder %v1891_v62, %v16931_v41  ;;  %6184 = vmatprep.mubr.msk.bf16.mxu1 %vm16932_vm4, %v2512_v8  ;;  %v7357_v43 = vld [vmem:[#allocation2 + $0xb4] ss:$8 sps:$4 sm:$0xff]   ;;  %vm16933_vm15 = vmmov %vm16932_vm4  ;;  %vm16936_vm7 = vcmp.eq.f32.partialorder %v16934_v20, %v16935_v25  ;;  %v11226_v55 = vpop.eup %7015  ;;  %v3982_v16 = vpop.f32.mrf.mxu0  ;;  %v16939_v57 = vld [vmem:[#allocation127_spill] sm:$0xff] }
 0x26c   :  { %16922 = vst [vmem:[#allocation320_spill] sm:$0xff] %v11201_v37  ;;  %6560 = vmatprep.mubr.msk.bf16.mxu0 %vm16933_vm15, %v7357_v43  ;;  %v11224_v60 = vsel %vm16936_vm7, 1.0, %v16726_v24  ;;  %16937 = vst [vmem:[#allocation19_spill] sm:$0xff] %v11226_v55  ;;  %v6056_v32 = vsel %vm2071_vm11, 1.0, %v16726_v24  ;;  %2718 = vmatmul.mubr.bf16.gmra.mxu1 %v2511_v47  ;;  %v11231_v62 = vmul.f32 %v11150_v39, %v16857_v17  ;;  %v16938_v8 = vld [vmem:[#allocation121_spill] sm:$0xff]  ;;  %v16943_v43 = vld [vmem:[#allocation379_spill] sm:$0xff]  ;;  %v1897_v5 = vpop.f32.mrf.mxu1  ;;  %7025 = vrcp.f32 %v727_v1 }
 0x26d   :  { %16929 = vst [vmem:[#allocation67_spill] sm:$0xff] %v11214_v18  ;;  %vm16940_vm4 = vcmp.eq.f32.partialorder %v16938_v8, %v16939_v57  ;;  %v16942_v41 = vld [vmem:[#allocation377_spill] sm:$0xff]  ;;  %v16944_v25 = vld [vmem:[#allocation58_spill] sm:$0xff]  ;;  %v11248_v17 = vmul.f32 %v11198_v50, %v16868_v38  ;;  %v3984_v8 = vpop.f32.mrf.mxu0  ;;  %v11253_v57 = vmul.f32 %v11211_v29, %v16877_v44  ;;  %vm2073_vm15 = vcmp.ne.f32.partialorder %v1897_v5, %v10889_v9  ;;  %v16951_v29 = vld [vmem:[#allocation119_spill] sm:$0xff] }
 0x26e   :  { %v11237_v11 = vsel %vm16940_vm4, 1.0, %v16726_v24  ;;  %v728_v20 = vadd.f32 %v16943_v43, %v16942_v41  ;;  %v11242_v56 = vmul.f32 %v2238_v31, %v16944_v25  ;;  %v16946_v37 = vld [vmem:[#allocation70_spill] sm:$0xff]  ;;  %v16947_v47 = vld [vmem:[#allocation49_spill] sm:$0xff]  ;;  %v11256_v43 = vmul.f32 49.0, %v11224_v60  ;;  %v11258_v31 = vpop.eup %7017  ;;  %v1899_v44 = vpop.f32.mrf.mxu1  ;;  %v16958_v9 = vld [vmem:[#allocation60_spill] sm:$0xff] }
 0x26f   :  { %16941 = vst [vmem:[#allocation22_spill] sm:$0xff] %v11237_v11  ;;  %v2239_v18 = vmul.f32 %v6056_v32, %v16946_v37  ;;  %vm2072_vm11 = vcmp.ne.f32.partialorder %v1895_v46, %v16947_v47  ;;  %16948 = vst [vmem:[#allocation315_spill] sm:$0xff] %v11258_v31  ;;  %v16950_v32 = vld [vmem:[#allocation309_spill] sm:$0xff]  ;;  %v11266_v46 = vmul.f32 49.0, %v11237_v11  ;;  %v6058_v25 = vsel %vm2073_vm15, 1.0, %v16726_v24  ;;  %v3986_v47 = vpop.f32.mrf.mxu0 }
 0x270   :  { %16945 = vst [vmem:[#allocation385_spill] sm:$0xff] %v11242_v56  ;;  %v6057_v39 = vsel %vm2072_vm11, 1.0, %v16726_v24  ;;  %v16952_v50 = vld [vmem:[#allocation125_spill] sm:$0xff]  ;;  %7027 = vrcp.f32 %v728_v20  ;;  %v2241_v5 = vmul.f32 %v6058_v25, %v16958_v9  ;;  %v4120_v56 = vpack.c.bf16 %v3986_v47, %v3982_v16  ;;  %v1901_v22 = vpop.f32.mrf.mxu1  ;;  %v16967_v47 = vld [vmem:[#allocation302_spill] sm:$0xff]  ;;  %v7359_v9 = vld [vmem:[#allocation2 + $0xc4] ss:$8 sps:$4 sm:$0xff]  }
 0x271   :  { %v11261_v37 = vmul.f32 %v2239_v18, %v10872_v42  ;;  %v2240_v38 = vmul.f32 %v6057_v39, %v16950_v32  ;;  %vm16953_vm7 = vcmp.eq.f32.partialorder %v16951_v29, %v16952_v50  ;;  %v16955_v42 = vld [vmem:[#allocation382_spill] sm:$0xff]  ;;  %v16956_v18 = vld [vmem:[#allocation384_spill] sm:$0xff]  ;;  %v4119_v36 = vpack.c.bf16 %v3984_v8, %v11207_v45  ;;  %v11284_v50 = vpop.f32.mrf.mxu0  ;;  %v16966_v45 = vld [vmem:[#allocation63_spill] sm:$0xff] }
 0x272   :  { %v11273_v1 = vsel %vm16953_vm7, 1.0, %v16726_v24  ;;  %v16959_v32 = vld [vmem:[#allocation52_spill] sm:$0xff]  ;;  %v11288_v20 = vmul.f32 %v11226_v55, %v16879_v52  ;;  %v11292_v25 = vpop.eup %7019  ;;  %vm2075_vm11 = vcmp.ne.f32.partialorder %v1901_v22, %v16967_v47  ;;  %vm16968_vm15 = vcmask 785408   ;;  %v16970_v52 = vld [vmem:[#allocation122_spill] sm:$0xff]  ;;  %v1905_v55 = vpop.f32.mrf.mxu1  ;;  %v16980_v47 = vld [vmem:[#allocation51_spill] sm:$0xff] }
 0x273   :  { %16949 = vst [vmem:[#allocation319_spill] sm:$0xff] %v11261_v37  ;;  %16954 = vst [vmem:[#allocation68_spill] sm:$0xff] %v11273_v1  ;;  %v729_v37 = vadd.f32 %v16956_v18, %v16955_v42  ;;  %v11278_v39 = vmul.f32 %v2240_v38, %v10886_v3  ;;  %vm2074_vm4 = vcmp.ne.f32.partialorder %v1899_v44, %v16959_v32  ;;  %v7358_v29 = vld [vmem:[#allocation2 + $0xb0] ss:$8 sps:$4 sm:$0xff]   ;;  %6423 = vmatprep.mubr.msk.bf16.mxu1 %vm16968_vm15, %v4120_v56 }
 0x274   :  { %v6059_v21 = vsel %vm2074_vm4, 1.0, %v16726_v24  ;;  %4813 = vmatmul.mubr.bf16.gmra.mxu0 %v7358_v29  ;;  %16960 = vst [vmem:[#allocation316_spill] sm:$0xff] %v11288_v20  ;;  %v16961_v3 = vld [vmem:[#allocation378_spill] sm:$0xff]  ;;  %v16962_v38 = vld [vmem:[#allocation380_spill] sm:$0xff]  ;;  %16963 = vst [vmem:[#allocation381_spill] sm:$0xff] %v11292_v25  ;;  %4222 = vmatmul.mubr.bf16.vlgmr.msra.gmra.mxu1 %v4119_v36 }
 0x275   :  { %16957 = vst [vmem:[#allocation69_spill] sm:$0xff] %v11278_v39  ;;  %v730_v18 = vadd.f32 %v16962_v38, %v16961_v3  ;;  %v16964_v44 = vld [vmem:[#allocation48_spill] sm:$0xff]  ;;  %v2242_v8 = vmul.f32 %v6059_v21, %v16966_v45  ;;  %vm16969_vm7 = vmmov %vm16968_vm15  ;;  %v6060_v38 = vsel %vm2075_vm11, 1.0, %v16726_v24  ;;  %v11309_v21 = vmul.f32 49.0, %v11273_v1  ;;  %v16976_v56 = vld [vmem:[#allocation126_spill] sm:$0xff]  ;;  %v11317_v45 = vpop.eup %7021 }
 0x276   :  { %v11295_v16 = vmul.f32 %v2241_v5, %v16964_v44  ;;  %6561 = vmatprep.mubr.msk.bf16.mxu0 %vm16969_vm7, %v7359_v9  ;;  %v16971_v32 = vld [vmem:[#allocation128_spill] sm:$0xff]  ;;  %v3992_v5 = vpop.f32.mrf.mxu0  ;;  %7029 = vrcp.f32 %v729_v37  ;;  %16979 = vst [vmem:[#allocation20_spill] sm:$0xff] %v11317_v45  ;;  %v16983_v39 = vld [vmem:[#allocation37_spill] sm:$0xff] }
 0x277   :  { %vm16972_vm4 = vcmp.eq.f32.partialorder %v16970_v52, %v16971_v32  ;;  %16974 = vst [vmem:[#allocation57_spill] sm:$0xff] %v11309_v21  ;;  %v16975_v22 = vld [vmem:[#allocation120_spill] sm:$0xff]  ;;  %v11320_v9 = vmul.f32 %v2242_v8, %v16980_v47  ;;  %v16982_v52 = vld [vmem:[#allocation53_spill] sm:$0xff]  ;;  %vm2076_vm11 = vcmp.ne.f32.partialorder %v1905_v55, %v16983_v39  ;;  %7031 = vrcp.f32 %v730_v18  ;;  %v11334_v55 = vpop.eup %7023 }
 0x278   :  { %16965 = vst [vmem:[#allocation62_spill] sm:$0xff] %v11295_v16  ;;  %v11305_v29 = vsel %vm16972_vm4, 1.0, %v16726_v24  ;;  %vm16977_vm15 = vcmp.eq.f32.partialorder %v16975_v22, %v16976_v56  ;;  %v2243_v32 = vmul.f32 %v6060_v38, %v16982_v52  ;;  %v7360_v36 = vld [vmem:[#allocation5 + $0x70] ss:$8 sps:$4 sm:$0xff]   ;;  %v11326_v16 = vmul.f32 %v11258_v31, %v10613_v10  ;;  %v1907_v56 = vpop.f32.mrf.mxu1  ;;  %v3994_v1 = vpop.f32.mrf.mxu0  ;;  %v7361_v37 = vld [vmem:[#allocation5 + $0x64] ss:$8 sps:$4 sm:$0xff]  }
 0x279   :  { %16973 = vst [vmem:[#allocation61_spill] sm:$0xff] %v11305_v29  ;;  %v11315_v44 = vsel %vm16977_vm15, 1.0, %v16726_v24  ;;  %16981 = vst [vmem:[#allocation121_spill] sm:$0xff] %v11320_v9  ;;  %4914 = vmatpush1.bf16.msra.mxu1 %v7360_v36  ;;  %v6061_v22 = vsel %vm2076_vm11, 1.0, %v16726_v24  ;;  %v11330_v21 = vmul.f32 49.0, %v11305_v29  ;;  %v16986_v8 = vld [vmem:[#allocation373_spill] sm:$0xff]  ;;  %v11347_v18 = vmul.f32 %v11292_v25, %v10597_v63 }
 0x27a   :  { %16978 = vst [vmem:[#allocation16_spill] sm:$0xff] %v11315_v44  ;;  %16984 = vst [vmem:[#allocation127_spill] sm:$0xff] %v11326_v16  ;;  %4915 = vmatprep.subr.bf16.mxu1 %v7361_v37  ;;  %v16987_v38 = vld [vmem:[#allocation375_spill] sm:$0xff]  ;;  %v16989_v39 = vld [vmem:[#allocation296_spill] sm:$0xff]  ;;  %v11342_v9 = vmul.f32 49.0, %v11315_v44  ;;  %v1909_v29 = vpop.f32.mrf.mxu1  ;;  %v4121_v63 = vpack.c.bf16 %v3994_v1, %v11284_v50 }
 0x27b   :  { %16985 = vst [vmem:[#allocation377_spill] sm:$0xff] %v11330_v21  ;;  %v731_v47 = vadd.f32 %v16987_v38, %v16986_v8  ;;  %16988 = vst [vmem:[#allocation58_spill] sm:$0xff] %v11334_v55  ;;  %v11337_v52 = vmul.f32 %v2243_v32, %v16989_v39  ;;  %v16991_v10 = vld [vmem:[#allocation47_spill] sm:$0xff]  ;;  %v16992_v31 = vld [vmem:[#allocation40_spill] sm:$0xff]  ;;  %v3996_v21 = vpop.f32.mrf.mxu0 }
 0x27c   :  { %v2244_v36 = vmul.f32 %v6061_v22, %v16991_v10  ;;  %vm2077_vm7 = vcmp.ne.f32.partialorder %v1907_v56, %v16992_v31  ;;  %16993 = vst [vmem:[#allocation49_spill] sm:$0xff] %v11342_v9  ;;  %16994 = vst [vmem:[#allocation309_spill] sm:$0xff] %v11347_v18  ;;  %v16995_v38 = vld [vmem:[#allocation114_spill] sm:$0xff]  ;;  %v16996_v16 = vld [vmem:[#allocation117_spill] sm:$0xff]  ;;  %v4122_v11 = vpack.c.bf16 %v3996_v21, %v3992_v5 }
 0x27d   :  { %16990 = vst [vmem:[#allocation70_spill] sm:$0xff] %v11337_v52  ;;  %v6062_v37 = vsel %vm2077_vm7, 1.0, %v16726_v24  ;;  %vm16997_vm4 = vcmp.eq.f32.partialorder %v16995_v38, %v16996_v16  ;;  %v16998_v22 = vld [vmem:[#allocation369_spill] sm:$0xff]  ;;  %v16999_v39 = vld [vmem:[#allocation371_spill] sm:$0xff]  ;;  %v17000_v56 = vld [vmem:[#allocation46_spill] sm:$0xff]  ;;  %v1911_v16 = vpop.f32.mrf.mxu1  ;;  %v11364_v38 = vpop.f32.mrf.mxu0  ;;  %7033 = vrcp.f32 %v731_v47  ;;  %vm17010_vm7 = vcmask 785408  }
 0x27e   :  { %v11353_v32 = vsel %vm16997_vm4, 1.0, %v16726_v24  ;;  %v732_v31 = vadd.f32 %v16999_v39, %v16998_v22  ;;  %v11358_v10 = vmul.f32 %v2244_v36, %v17000_v56  ;;  %v17002_v52 = vld [vmem:[#allocation55_spill] sm:$0xff]  ;;  %v17003_v9 = vld [vmem:[#allocation245_spill] sm:$0xff]  ;;  %v17004_v36 = vld [vmem:[#allocation374_spill] sm:$0xff]  ;;  %6424 = vmatprep.mubr.msk.bf16.mxu1 %vm17010_vm7, %v4122_v11 }
 0x27f   :  { %v2245_v44 = vmul.f32 %v6062_v37, %v17002_v52  ;;  %vm2078_vm15 = vcmp.ne.f32.partialorder %v1909_v29, %v17003_v9  ;;  %v7362_v20 = vld [vmem:[#allocation5 + $0x60] ss:$8 sps:$4 sm:$0xff]   ;;  %v7364_v39 = vld [vmem:[#allocation5 + $0x54] ss:$8 sps:$4 sm:$0xff]   ;;  %v11368_v37 = vpop.eup %7025  ;;  %vm17011_vm4 = vmmov %vm17010_vm7  ;;  %4232 = vmatmul.mubr.bf16.gmra.mxu1 %v4121_v63  ;;  %v11389_v11 = vmul.f32 49.0, %v11353_v32  ;;  %v11400_v63 = vmul.f32 %v11334_v55, %v16915_v35 }
 0x280   :  { %17001 = vst [vmem:[#allocation119_spill] sm:$0xff] %v11358_v10  ;;  %4916 = vmatpush1.bf16.msra.mxu1 %v7362_v20  ;;  %v6063_v25 = vsel %vm2078_vm15, 1.0, %v16726_v24  ;;  %v7363_v18 = vld [vmem:[#allocation2 + $0xc0] ss:$8 sps:$4 sm:$0xff]   ;;  %17006 = vst [vmem:[#allocation125_spill] sm:$0xff] %v11368_v37  ;;  %v17012_v21 = vld [vmem:[#allocation109_spill] sm:$0xff]  ;;  %7035 = vrcp.f32 %v732_v31 }
 0x281   :  { %4823 = vmatmul.mubr.bf16.gmra.mxu0 %v7363_v18  ;;  %4917 = vmatprep.subr.bf16.mxu1 %v7364_v39  ;;  %v17005_v56 = vld [vmem:[#allocation376_spill] sm:$0xff]  ;;  %v11371_v29 = vmul.f32 %v2245_v44, %v10980_v54  ;;  %v17008_v20 = vld [vmem:[#allocation42_spill] sm:$0xff]  ;;  %v17013_v9 = vld [vmem:[#allocation113_spill] sm:$0xff]  ;;  %v1915_v39 = vpop.f32.mrf.mxu1  ;;  %v4002_v54 = vpop.f32.mrf.mxu0 }
 0x282   :  { %v733_v52 = vadd.f32 %v17005_v56, %v17004_v36  ;;  %v2246_v1 = vmul.f32 %v6063_v25, %v17008_v20  ;;  %v17009_v50 = vld [vmem:[#allocation30_spill] sm:$0xff]  ;;  %vm17014_vm15 = vcmp.eq.f32.partialorder %v17012_v21, %v17013_v9  ;;  %v11386_v25 = vmul.f32 %v11317_v45, %v10617_v7  ;;  %v11391_v44 = vpop.eup %7027  ;;  %v17018_v20 = vld [vmem:[#allocation41_spill] sm:$0xff]  ;;  %v7367_v31 = vld [vmem:[#allocation5 + $0x44] ss:$8 sps:$4 sm:$0xff]  }
 0x283   :  { %17007 = vst [vmem:[#allocation382_spill] sm:$0xff] %v11371_v29  ;;  %vm2079_vm11 = vcmp.ne.f32.partialorder %v1911_v16, %v17009_v50  ;;  %v7365_v5 = vld [vmem:[#allocation2 + $0xd4] ss:$8 sps:$4 sm:$0xff]   ;;  %v11381_v47 = vsel %vm17014_vm15, 1.0, %v16726_v24  ;;  %17016 = vst [vmem:[#allocation52_spill] sm:$0xff] %v11391_v44  ;;  %v1917_v21 = vpop.f32.mrf.mxu1  ;;  %v4004_v9 = vpop.f32.mrf.mxu0  ;;  %v17022_v35 = vld [vmem:[#allocation239_spill] sm:$0xff] }
 0x284   :  { %6562 = vmatprep.mubr.msk.bf16.mxu0 %vm17011_vm4, %v7365_v5  ;;  %17015 = vst [vmem:[#allocation60_spill] sm:$0xff] %v11381_v47  ;;  %v6064_v18 = vsel %vm2079_vm11, 1.0, %v16726_v24  ;;  %v11394_v16 = vmul.f32 %v2246_v1, %v10984_v0  ;;  %vm2080_vm11 = vcmp.ne.f32.partialorder %v1915_v39, %v11001_v30  ;;  %v7366_v5 = vld [vmem:[#allocation5 + $0x50] ss:$8 sps:$4 sm:$0xff]   ;;  %v11404_v56 = vmul.f32 49.0, %v11381_v47 }
 0x285   :  { %v2247_v50 = vmul.f32 %v6064_v18, %v17018_v20  ;;  %4918 = vmatpush1.bf16.msra.mxu1 %v7366_v5  ;;  %v6065_v7 = vsel %vm2080_vm11, 1.0, %v16726_v24  ;;  %7037 = vrcp.f32 %v733_v52  ;;  %v17019_v0 = vld [vmem:[#allocation370_spill] sm:$0xff]  ;;  %v17020_v1 = vld [vmem:[#allocation372_spill] sm:$0xff]  ;;  %vm2081_vm7 = vcmp.ne.f32.partialorder %v1917_v21, %v17022_v35  ;;  %v1919_v45 = vpop.f32.mrf.mxu1  ;;  %v4006_v52 = vpop.f32.mrf.mxu0  ;;  %v17032_v21 = vld [vmem:[#allocation367_spill] sm:$0xff] }
 0x286   :  { %17017 = vst [vmem:[#allocation378_spill] sm:$0xff] %v11394_v16  ;;  %4919 = vmatprep.subr.bf16.mxu1 %v7367_v31  ;;  %v734_v18 = vadd.f32 %v17020_v1, %v17019_v0  ;;  %v2248_v39 = vmul.f32 %v6065_v7, %v10952_v59  ;;  %v17023_v20 = vld [vmem:[#allocation116_spill] sm:$0xff]  ;;  %v17024_v5 = vld [vmem:[#allocation118_spill] sm:$0xff]  ;;  %v6066_v31 = vsel %vm2081_vm7, 1.0, %v16726_v24  ;;  %v11422_v1 = vmul.f32 %v11368_v37, %v16925_v48  ;;  %v17031_v7 = vld [vmem:[#allocation365_spill] sm:$0xff] }
 0x287   :  { %v11409_v30 = vmul.f32 %v2247_v50, %v10998_v61  ;;  %vm17025_vm4 = vcmp.eq.f32.partialorder %v17023_v20, %v17024_v5  ;;  %v17027_v61 = vld [vmem:[#allocation112_spill] sm:$0xff]  ;;  %v17028_v50 = vld [vmem:[#allocation115_spill] sm:$0xff]  ;;  %v735_v35 = vadd.f32 %v17032_v21, %v17031_v7  ;;  %v11432_v20 = vpop.eup %7029  ;;  %v17036_v10 = vld [vmem:[#allocation34_spill] sm:$0xff]  ;;  %v4124_v48 = vpack.c.bf16 %v4006_v52, %v4002_v54  ;;  %v11441_v47 = vpop.f32.mrf.mxu0 }
 0x288   :  { %v11417_v55 = vsel %vm17025_vm4, 1.0, %v16726_v24  ;;  %17026 = vst [vmem:[#allocation63_spill] sm:$0xff] %v11422_v1  ;;  %vm17029_vm15 = vcmp.eq.f32.partialorder %v17027_v61, %v17028_v50  ;;  %17033 = vst [vmem:[#allocation122_spill] sm:$0xff] %v11432_v20  ;;  %v11435_v5 = vmul.f32 %v2248_v39, %v11011_v14  ;;  %v17035_v16 = vld [vmem:[#allocation35_spill] sm:$0xff]  ;;  %vm2082_vm11 = vcmp.ne.f32.partialorder %v1919_v45, %v17036_v10  ;;  %v1921_v50 = vpop.f32.mrf.mxu1  ;;  %v7369_v21 = vld [vmem:[#allocation2 + $0xd0] ss:$8 sps:$4 sm:$0xff]   ;;  %v11448_v10 = vpop.eup %7031 }
 0x289   :  { %17021 = vst [vmem:[#allocation48_spill] sm:$0xff] %v11409_v30  ;;  %v11428_v59 = vsel %vm17029_vm15, 1.0, %v16726_v24  ;;  %v2249_v30 = vmul.f32 %v6066_v31, %v17035_v16  ;;  %v7368_v37 = vld [vmem:[#allocation5 + $0x40] ss:$8 sps:$4 sm:$0xff]   ;;  %v4123_v29 = vpack.c.bf16 %v4004_v9, %v11364_v38  ;;  %v6067_v61 = vsel %vm2082_vm11, 1.0, %v16726_v24  ;;  %4833 = vmatmul.mubr.bf16.gmra.mxu0 %v7369_v21  ;;  %v17037_v16 = vld [vmem:[#allocation361_spill] sm:$0xff] }
 0x28a   :  { %17030 = vst [vmem:[#allocation302_spill] sm:$0xff] %v11428_v59  ;;  %17034 = vst [vmem:[#allocation128_spill] sm:$0xff] %v11435_v5  ;;  %4920 = vmatpush1.bf16.msra.mxu1 %v7368_v37  ;;  %v7370_v1 = vld [vmem:[#allocation5 + $0x34] ss:$8 sps:$4 sm:$0xff]   ;;  %v11444_v14 = vmul.f32 49.0, %v11417_v55  ;;  %v17038_v39 = vld [vmem:[#allocation363_spill] sm:$0xff]  ;;  %v4012_v5 = vpop.f32.mrf.mxu0  ;;  %7039 = vrcp.f32 %v734_v18 }
 0x28b   :  { %4921 = vmatprep.subr.bf16.mxu1 %v7370_v1  ;;  %v736_v45 = vadd.f32 %v17038_v39, %v17037_v16  ;;  %17039 = vst [vmem:[#allocation120_spill] sm:$0xff] %v11448_v10  ;;  %v11451_v37 = vmul.f32 %v2249_v30, %v11032_v51  ;;  %v17041_v38 = vld [vmem:[#allocation33_spill] sm:$0xff]  ;;  %vm17043_vm4 = vcmask 785408   ;;  %v17044_v31 = vld [vmem:[#allocation107_spill] sm:$0xff]  ;;  %v17045_v1 = vld [vmem:[#allocation110_spill] sm:$0xff]  ;;  %v1925_v39 = vpop.f32.mrf.mxu1  ;;  %v11465_v51 = vmul.f32 %v11391_v44, %v16942_v41 }
 0x28c   :  { %v2250_v54 = vmul.f32 %v6067_v61, %v17041_v38  ;;  %v17042_v9 = vld [vmem:[#allocation25_spill] sm:$0xff]  ;;  %6425 = vmatprep.mubr.msk.bf16.mxu1 %vm17043_vm4, %v4124_v48  ;;  %vm17046_vm15 = vcmp.eq.f32.partialorder %v17044_v31, %v17045_v1  ;;  %v11468_v30 = vmul.f32 49.0, %v11428_v59  ;;  %7041 = vrcp.f32 %v735_v35  ;;  %v7372_v41 = vld [vmem:[#allocation5 + $0x24] ss:$8 sps:$4 sm:$0xff]  }
 0x28d   :  { %17040 = vst [vmem:[#allocation126_spill] sm:$0xff] %v11451_v37  ;;  %vm2083_vm7 = vcmp.ne.f32.partialorder %v1921_v50, %v17042_v9  ;;  %v11460_v52 = vsel %vm17046_vm15, 1.0, %v16726_v24  ;;  %4242 = vmatmul.mubr.bf16.gmra.mxu1 %v4123_v29  ;;  %v17048_v48 = vld [vmem:[#allocation29_spill] sm:$0xff]  ;;  %v17050_v50 = vld [vmem:[#allocation36_spill] sm:$0xff]  ;;  %v17051_v9 = vld [vmem:[#allocation230_spill] sm:$0xff]  ;;  %v1927_v1 = vpop.f32.mrf.mxu1  ;;  %v4014_v37 = vpop.f32.mrf.mxu0  ;;  %v11478_v44 = vmul.f32 %v11432_v20, %v16955_v42  ;;  %7043 = vrcp.f32 %v736_v45 }
 0x28e   :  { %17047 = vst [vmem:[#allocation51_spill] sm:$0xff] %v11460_v52  ;;  %v6068_v21 = vsel %vm2083_vm7, 1.0, %v16726_v24  ;;  %v11471_v61 = vmul.f32 %v2250_v54, %v17048_v48  ;;  %vm2084_vm11 = vcmp.ne.f32.partialorder %v1925_v39, %v17051_v9  ;;  %v7371_v31 = vld [vmem:[#allocation5 + $0x30] ss:$8 sps:$4 sm:$0xff]   ;;  %v11481_v18 = vmul.f32 49.0, %v11460_v52  ;;  %v11483_v54 = vpop.eup %7033  ;;  %v17060_v20 = vld [vmem:[#allocation111_spill] sm:$0xff] }
 0x28f   :  { %v2251_v38 = vmul.f32 %v6068_v21, %v17050_v50  ;;  %4922 = vmatpush1.bf16.msra.mxu1 %v7371_v31  ;;  %v6069_v29 = vsel %vm2084_vm11, 1.0, %v16726_v24  ;;  %17053 = vst [vmem:[#allocation373_spill] sm:$0xff] %v11483_v54  ;;  %v17055_v35 = vld [vmem:[#allocation288_spill] sm:$0xff]  ;;  %vm2085_vm7 = vcmp.ne.f32.partialorder %v1927_v1, %v11084_v49  ;;  %v17056_v48 = vld [vmem:[#allocation102_spill] sm:$0xff]  ;;  %v17057_v50 = vld [vmem:[#allocation105_spill] sm:$0xff]  ;;  %v1929_v31 = vpop.f32.mrf.mxu1 }
 0x290   :  { %17049 = vst [vmem:[#allocation53_spill] sm:$0xff] %v11471_v61  ;;  %4923 = vmatprep.subr.bf16.mxu1 %v7372_v41  ;;  %17052 = vst [vmem:[#allocation37_spill] sm:$0xff] %v11481_v18  ;;  %v2252_v21 = vmul.f32 %v6069_v29, %v17055_v35  ;;  %vm17058_vm4 = vcmp.eq.f32.partialorder %v17056_v48, %v17057_v50  ;;  %v6070_v42 = vsel %vm2085_vm7, 1.0, %v16726_v24  ;;  %v4016_v41 = vpop.f32.mrf.mxu0  ;;  %v17059_v45 = vld [vmem:[#allocation108_spill] sm:$0xff]  ;;  %v17064_v49 = vld [vmem:[#allocation362_spill] sm:$0xff] }
 0x291   :  { %v11486_v39 = vmul.f32 %v2251_v38, %v11081_v28  ;;  %v11494_v9 = vsel %vm17058_vm4, 1.0, %v16726_v24  ;;  %vm17061_vm15 = vcmp.eq.f32.partialorder %v17059_v45, %v17060_v20  ;;  %v17062_v38 = vld [vmem:[#allocation366_spill] sm:$0xff]  ;;  %v17063_v29 = vld [vmem:[#allocation368_spill] sm:$0xff]  ;;  %v2253_v50 = vmul.f32 %v6070_v42, %v11046_v2 }
 0x292   :  { %v11501_v28 = vsel %vm17061_vm15, 1.0, %v16726_v24  ;;  %v737_v35 = vadd.f32 %v17063_v29, %v17062_v38  ;;  %v17065_v1 = vld [vmem:[#allocation364_spill] sm:$0xff]  ;;  %v11510_v48 = vmul.f32 %v2252_v21, %v11113_v34  ;;  %vm2086_vm11 = vcmp.ne.f32.partialorder %v1929_v31, %v11101_v26  ;;  %v1931_v29 = vpop.f32.mrf.mxu1  ;;  %v11516_v59 = vpop.f32.mrf.mxu0  ;;  %v7374_v34 = vld [vmem:[#allocation5 + $0x14] ss:$8 sps:$4 sm:$0xff]  }
 0x293   :  { %17054 = vst [vmem:[#allocation296_spill] sm:$0xff] %v11486_v39  ;;  %v738_v61 = vadd.f32 %v17065_v1, %v17064_v49  ;;  %v11507_v39 = vpop.eup %7035  ;;  %v4126_v52 = vpack.c.bf16 %v4016_v41, %v4012_v5  ;;  %v7373_v18 = vld [vmem:[#allocation5 + $0x20] ss:$8 sps:$4 sm:$0xff]   ;;  %v4125_v20 = vpack.c.bf16 %v4014_v37, %v11441_v47  ;;  %v6071_v45 = vsel %vm2086_vm11, 1.0, %v16726_v24 }
 0x294   :  { %17066 = vst [vmem:[#allocation47_spill] sm:$0xff] %v11507_v39  ;;  %17067 = vst [vmem:[#allocation40_spill] sm:$0xff] %v11510_v48  ;;  %4924 = vmatpush1.bf16.msra.mxu1 %v7373_v18  ;;  %v11520_v1 = vmul.f32 %v11448_v10, %v16961_v3  ;;  %v11523_v2 = vmul.f32 49.0, %v11494_v9  ;;  %v11525_v26 = vpop.eup %7037  ;;  %v11528_v5 = vmul.f32 %v2253_v50, %v11117_v53  ;;  %vm17070_vm4 = vcmask 785408   ;;  %v17071_v37 = vld [vmem:[#allocation104_spill] sm:$0xff]  ;;  %v17072_v3 = vld [vmem:[#allocation106_spill] sm:$0xff]  ;;  %v1935_v42 = vpop.f32.mrf.mxu1 }
 0x295   :  { %4925 = vmatprep.subr.bf16.mxu1 %v7374_v34  ;;  %17068 = vst [vmem:[#allocation114_spill] sm:$0xff] %v11525_v26  ;;  %v2254_v47 = vmul.f32 %v6071_v45, %v11074_v23  ;;  %vm2087_vm7 = vcmp.ne.f32.partialorder %v1931_v29, %v11120_v40  ;;  %6426 = vmatprep.mubr.msk.bf16.mxu1 %vm17070_vm4, %v4126_v52  ;;  %v4022_v31 = vpop.f32.mrf.mxu0  ;;  %v11541_v53 = vmul.f32 49.0, %v11501_v28  ;;  %7045 = vrcp.f32 %v737_v35  ;;  %v17074_v23 = vld [vmem:[#allocation357_spill] sm:$0xff]  ;;  %v17075_v41 = vld [vmem:[#allocation359_spill] sm:$0xff] }
 0x296   :  { %17069 = vst [vmem:[#allocation117_spill] sm:$0xff] %v11528_v5  ;;  %vm17073_vm15 = vcmp.eq.f32.partialorder %v17071_v37, %v17072_v3  ;;  %v6072_v21 = vsel %vm2087_vm7, 1.0, %v16726_v24  ;;  %4252 = vmatmul.mubr.bf16.gmra.mxu1 %v4125_v20  ;;  %v739_v40 = vadd.f32 %v17075_v41, %v17074_v23  ;;  %vm2088_vm11 = vcmp.ne.f32.partialorder %v1935_v42, %v11178_v15  ;;  %v7375_v50 = vld [vmem:[#allocation5 + $0x10] ss:$8 sps:$4 sm:$0xff]   ;;  %v1937_v20 = vpop.f32.mrf.mxu1 }
 0x297   :  { %v11537_v18 = vsel %vm17073_vm15, 1.0, %v16726_v24  ;;  %v11546_v52 = vmul.f32 %v2254_v47, %v11155_v12  ;;  %v2255_v29 = vmul.f32 %v6072_v21, %v11097_v6  ;;  %7047 = vrcp.f32 %v738_v61  ;;  %v4024_v34 = vpop.f32.mrf.mxu0  ;;  %v7376_v6 = vld [vmem:[#allocation5 + $0x4] ss:$8 sps:$4 sm:$0xff]   ;;  %v17078_v47 = vld [vmem:[#allocation97_spill] sm:$0xff]  ;;  %v17118_v5 = vld [vmem:[#allocation350_spill] sm:$0xff] }
 0x298   :  { %4926 = vmatpush1.bf16.msra.mxu1 %v7375_v50  ;;  %v6073_v45 = vsel %vm2088_vm11, 1.0, %v16726_v24  ;;  %v11553_v35 = vmul.f32 %v11483_v54, %v16986_v8  ;;  %v11557_v37 = vmul.f32 %v11507_v39, %v16998_v22  ;;  %v11560_v12 = vmul.f32 49.0, %v11537_v18  ;;  %v17079_v8 = vld [vmem:[#allocation101_spill] sm:$0xff]  ;;  %v1939_v21 = vpop.f32.mrf.mxu1 }
 0x299   :  { %17076 = vst [vmem:[#allocation369_spill] sm:$0xff] %v11546_v52  ;;  %4927 = vmatprep.subr.bf16.mxu1 %v7376_v6  ;;  %v11563_v15 = vmul.f32 %v2255_v29, %v11189_v33  ;;  %v2256_v61 = vmul.f32 %v6073_v45, %v11148_v27  ;;  %vm2089_vm7 = vcmp.ne.f32.partialorder %v1937_v20, %v11193_v4  ;;  %v4026_v42 = vpop.f32.mrf.mxu0  ;;  %7049 = vrcp.f32 %v739_v40  ;;  %v17081_v33 = vld [vmem:[#allocation353_spill] sm:$0xff]  ;;  %v17082_v29 = vld [vmem:[#allocation355_spill] sm:$0xff]  ;;  %v11580_v45 = vpop.eup %7039 }
 0x29a   :  { %vm17080_vm4 = vcmp.eq.f32.partialorder %v17078_v47, %v17079_v8  ;;  %v6074_v22 = vsel %vm2089_vm7, 1.0, %v16726_v24  ;;  %v11576_v50 = vmul.f32 %v11525_v26, %v17004_v36  ;;  %v740_v27 = vadd.f32 %v17082_v29, %v17081_v33  ;;  %17083 = vst [vmem:[#allocation55_spill] sm:$0xff] %v11580_v45  ;;  %v7377_v47 = vld [vmem:[#allocation5] ss:$8 sps:$4 sm:$0xff]   ;;  %v11587_v8 = vpop.eup %7041  ;;  %v1941_v41 = vpop.f32.mrf.mxu1 }
 0x29b   :  { %17077 = vst [vmem:[#allocation46_spill] sm:$0xff] %v11563_v15  ;;  %v11571_v3 = vsel %vm17080_vm4, 1.0, %v16726_v24  ;;  %v11583_v4 = vmul.f32 %v2256_v61, %v11231_v62  ;;  %v2257_v20 = vmul.f32 %v6074_v22, %v11161_v58  ;;  %vm2090_vm15 = vcmp.ne.f32.partialorder %v1939_v21, %v11196_v19  ;;  %17085 = vst [vmem:[#allocation374_spill] sm:$0xff] %v11587_v8  ;;  %v11591_v29 = vpop.f32.mrf.mxu0  ;;  %v7378_v62 = vld [vmem:[#allocation5 + $0xd4] ss:$8 sps:$4 sm:$0xff]   ;;  %v17087_v61 = vld [vmem:[#allocation360_spill] sm:$0xff] }
 0x29c   :  { %v4128_v6 = vpack.c.bf16 %v4026_v42, %v4022_v31  ;;  %4928 = vmatpush1.bf16.msra.mxu1 %v7377_v47  ;;  %v4127_v36 = vpack.c.bf16 %v4024_v34, %v11516_v59  ;;  %v6075_v40 = vsel %vm2090_vm15, 1.0, %v16726_v24  ;;  %v11594_v26 = vmul.f32 49.0, %v11571_v3  ;;  %v17086_v58 = vld [vmem:[#allocation358_spill] sm:$0xff]  ;;  %v11598_v31 = vpop.eup %7043  ;;  %v17091_v34 = vld [vmem:[#allocation95_spill] sm:$0xff] }
 0x29d   :  { %17084 = vst [vmem:[#allocation245_spill] sm:$0xff] %v11583_v4  ;;  %4933 = vmatprep.subr.bf16.mxu1 %v7378_v62  ;;  %v741_v19 = vadd.f32 %v17087_v61, %v17086_v58  ;;  %17088 = vst [vmem:[#allocation42_spill] sm:$0xff] %v11598_v31  ;;  %v11601_v22 = vmul.f32 %v2257_v20, %v11248_v17  ;;  %v2258_v59 = vmul.f32 %v6075_v40, %v11174_v13  ;;  %vm17090_vm7 = vcmask 785408   ;;  %v17092_v21 = vld [vmem:[#allocation98_spill] sm:$0xff]  ;;  %v1945_v62 = vpop.f32.mrf.mxu1  ;;  %v4032_v61 = vpop.f32.mrf.mxu0  ;;  %v17094_v17 = vld [vmem:[#allocation100_spill] sm:$0xff] }
 0x29e   :  { %vm2091_vm11 = vcmp.ne.f32.partialorder %v1941_v41, %v11256_v43  ;;  %6427 = vmatprep.mubr.msk.bf16.mxu1 %vm17090_vm7, %v4128_v6  ;;  %vm17093_vm4 = vcmp.eq.f32.partialorder %v17091_v34, %v17092_v21  ;;  %v17095_v20 = vld [vmem:[#allocation103_spill] sm:$0xff]  ;;  %7051 = vrcp.f32 %v740_v27  ;;  %v17098_v43 = vld [vmem:[#allocation354_spill] sm:$0xff]  ;;  %v17099_v41 = vld [vmem:[#allocation356_spill] sm:$0xff] }
 0x29f   :  { %17089 = vst [vmem:[#allocation30_spill] sm:$0xff] %v11601_v22  ;;  %v11610_v42 = vsel %vm17093_vm4, 1.0, %v16726_v24  ;;  %v6076_v47 = vsel %vm2091_vm11, 1.0, %v16726_v24  ;;  %4262 = vmatmul.mubr.bf16.gmra.mxu1 %v4127_v36  ;;  %vm17096_vm15 = vcmp.eq.f32.partialorder %v17094_v17, %v17095_v20  ;;  %v742_v6 = vadd.f32 %v17099_v41, %v17098_v43  ;;  %v7379_v21 = vld [vmem:[#allocation5 + $0xd0] ss:$8 sps:$4 sm:$0xff]   ;;  %v1947_v20 = vpop.f32.mrf.mxu1  ;;  %v4034_v27 = vpop.f32.mrf.mxu0  ;;  %v17108_v4 = vld [vmem:[#allocation99_spill] sm:$0xff] }
 0x2a0   :  { %v11617_v13 = vsel %vm17096_vm15, 1.0, %v16726_v24  ;;  %v11622_v40 = vmul.f32 %v2258_v59, %v11253_v57  ;;  %v2259_v34 = vmul.f32 %v6076_v47, %v11224_v60  ;;  %vm2092_vm11 = vcmp.ne.f32.partialorder %v1945_v62, %v11266_v46  ;;  %4934 = vmatpush2.bf16.msra.mxu1 %v7379_v21  ;;  %v17101_v57 = vld [vmem:[#allocation349_spill] sm:$0xff]  ;;  %v17102_v59 = vld [vmem:[#allocation351_spill] sm:$0xff]  ;;  %v17103_v46 = vld [vmem:[#allocation316_spill] sm:$0xff] }
 0x2a1   :  { %17097 = vst [vmem:[#allocation109_spill] sm:$0xff] %v11617_v13  ;;  %v11628_v36 = vmul.f32 %v11580_v45, %v17019_v0  ;;  %v6077_v17 = vsel %vm2092_vm11, 1.0, %v16726_v24  ;;  %v11632_v39 = vmul.f32 49.0, %v11610_v42  ;;  %7053 = vrcp.f32 %v741_v19  ;;  %v7380_v60 = vld [vmem:[#allocation5 + $0xc4] ss:$8 sps:$4 sm:$0xff]   ;;  %v17105_v0 = vld [vmem:[#allocation22_spill] sm:$0xff]  ;;  %v1949_v10 = vpop.f32.mrf.mxu1 }
 0x2a2   :  { %17100 = vst [vmem:[#allocation113_spill] sm:$0xff] %v11622_v40  ;;  %v743_v41 = vadd.f32 %v17102_v59, %v17101_v57  ;;  %4935 = vmatprep.subr.bf16.mxu1 %v7380_v60  ;;  %v11637_v47 = vmul.f32 %v2259_v34, %v17103_v46  ;;  %v2260_v62 = vmul.f32 %v6077_v17, %v17105_v0  ;;  %v17106_v45 = vld [vmem:[#allocation57_spill] sm:$0xff]  ;;  %v11642_v21 = vmul.f32 49.0, %v11617_v13  ;;  %v4036_v40 = vpop.f32.mrf.mxu0  ;;  %v17107_v19 = vld [vmem:[#allocation96_spill] sm:$0xff]  ;;  %v17111_v60 = vld [vmem:[#allocation347_spill] sm:$0xff]  ;;  %v11653_v17 = vpop.eup %7045 }
 0x2a3   :  { %vm2093_vm7 = vcmp.ne.f32.partialorder %v1947_v20, %v17106_v45  ;;  %vm17109_vm4 = vcmp.eq.f32.partialorder %v17107_v19, %v17108_v4  ;;  %7055 = vrcp.f32 %v742_v6  ;;  %v17110_v34 = vld [vmem:[#allocation345_spill] sm:$0xff]  ;;  %17112 = vst [vmem:[#allocation370_spill] sm:$0xff] %v11653_v17  ;;  %v17113_v45 = vld [vmem:[#allocation127_spill] sm:$0xff]  ;;  %v17115_v0 = vld [vmem:[#allocation68_spill] sm:$0xff]  ;;  %v4130_v52 = vpack.c.bf16 %v4036_v40, %v4032_v61  ;;  %v1951_v19 = vpop.f32.mrf.mxu1 }
 0x2a4   :  { %17104 = vst [vmem:[#allocation41_spill] sm:$0xff] %v11637_v47  ;;  %v6078_v54 = vsel %vm2093_vm7, 1.0, %v16726_v24  ;;  %v11649_v59 = vsel %vm17109_vm4, 1.0, %v16726_v24  ;;  %v744_v46 = vadd.f32 %v17111_v60, %v17110_v34  ;;  %v11656_v20 = vmul.f32 %v2260_v62, %v17113_v45  ;;  %v17116_v22 = vld [vmem:[#allocation377_spill] sm:$0xff]  ;;  %v7381_v15 = vld [vmem:[#allocation5 + $0xc0] ss:$8 sps:$4 sm:$0xff]   ;;  %v11660_v48 = vpop.eup %7047  ;;  %v11664_v60 = vpop.f32.mrf.mxu0 }
 0x2a5   :  { %v2261_v47 = vmul.f32 %v6078_v54, %v17115_v0  ;;  %vm2094_vm15 = vcmp.ne.f32.partialorder %v1949_v10, %v17116_v22  ;;  %4936 = vmatpush2.bf16.msra.mxu1 %v7381_v15  ;;  %17117 = vst [vmem:[#allocation116_spill] sm:$0xff] %v11660_v48  ;;  %v4129_v4 = vpack.c.bf16 %v4034_v27, %v11591_v29  ;;  %7057 = vrcp.f32 %v743_v41  ;;  %v17119_v62 = vld [vmem:[#allocation352_spill] sm:$0xff]  ;;  %v17120_v54 = vld [vmem:[#allocation309_spill] sm:$0xff]  ;;  %v17125_v29 = vld [vmem:[#allocation346_spill] sm:$0xff]  ;;  %v1955_v41 = vpop.f32.mrf.mxu1 }
 0x2a6   :  { %17114 = vst [vmem:[#allocation239_spill] sm:$0xff] %v11656_v20  ;;  %v6079_v6 = vsel %vm2094_vm15, 1.0, %v16726_v24  ;;  %v745_v45 = vadd.f32 %v17119_v62, %v17118_v5  ;;  %v7382_v20 = vld [vmem:[#allocation5 + $0xb4] ss:$8 sps:$4 sm:$0xff]   ;;  %vm17124_vm7 = vcmask 785408   ;;  %v17126_v40 = vld [vmem:[#allocation348_spill] sm:$0xff]  ;;  %v4042_v13 = vpop.f32.mrf.mxu0  ;;  %vm2096_vm15 = vcmp.ne.f32.partialorder %v1955_v41, %v11389_v11 }
 0x2a7   :  { %4937 = vmatprep.subr.bf16.mxu1 %v7382_v20  ;;  %v11669_v10 = vmul.f32 %v2261_v47, %v17120_v54  ;;  %v17122_v61 = vld [vmem:[#allocation61_spill] sm:$0xff]  ;;  %6428 = vmatprep.mubr.msk.bf16.mxu1 %vm17124_vm7, %v4130_v52  ;;  %v746_v27 = vadd.f32 %v17126_v40, %v17125_v29  ;;  %v11679_v20 = vmul.f32 %v11587_v8, %v17031_v7  ;;  %v11691_v54 = vpop.eup %7049  ;;  %7059 = vrcp.f32 %v744_v46  ;;  %v1957_v40 = vpop.f32.mrf.mxu1 }
 0x2a8   :  { %v2262_v15 = vmul.f32 %v6079_v6, %v17122_v61  ;;  %v17123_v22 = vld [vmem:[#allocation49_spill] sm:$0xff]  ;;  %4272 = vmatmul.mubr.bf16.gmra.mxu1 %v4129_v4  ;;  %v11683_v47 = vmul.f32 %v11598_v31, %v17037_v16  ;;  %v17127_v6 = vld [vmem:[#allocation90_spill] sm:$0xff]  ;;  %17130 = vst [vmem:[#allocation112_spill] sm:$0xff] %v11691_v54  ;;  %v17132_v4 = vld [vmem:[#allocation16_spill] sm:$0xff]  ;;  %v6081_v16 = vsel %vm2096_vm15, 1.0, %v16726_v24  ;;  %v4044_v62 = vpop.f32.mrf.mxu0  ;;  %7061 = vrcp.f32 %v745_v45 }
 0x2a9   :  { %17121 = vst [vmem:[#allocation118_spill] sm:$0xff] %v11669_v10  ;;  %vm2095_vm11 = vcmp.ne.f32.partialorder %v1951_v19, %v17123_v22  ;;  %v17128_v19 = vld [vmem:[#allocation93_spill] sm:$0xff]  ;;  %v2264_v11 = vmul.f32 %v6081_v16, %v11353_v32  ;;  %7063 = vrcp.f32 %v746_v27  ;;  %v17143_v16 = vld [vmem:[#allocation60_spill] sm:$0xff] }
 0x2aa   :  { %v6080_v0 = vsel %vm2095_vm11, 1.0, %v16726_v24  ;;  %vm17129_vm4 = vcmp.eq.f32.partialorder %v17127_v6, %v17128_v19  ;;  %v11694_v61 = vmul.f32 %v2262_v15, %v11386_v25  ;;  %v7383_v7 = vld [vmem:[#allocation5 + $0xb0] ss:$8 sps:$4 sm:$0xff]   ;;  %v11701_v6 = vmul.f32 %v11653_v17, %v17062_v38  ;;  %v7384_v25 = vld [vmem:[#allocation5 + $0xa4] ss:$8 sps:$4 sm:$0xff]   ;;  %v4046_v41 = vpop.f32.mrf.mxu0 }
 0x2ab   :  { %v11689_v52 = vsel %vm17129_vm4, 1.0, %v16726_v24  ;;  %v2263_v22 = vmul.f32 %v6080_v0, %v17132_v4  ;;  %4938 = vmatpush2.bf16.msra.mxu1 %v7383_v7  ;;  %v11704_v19 = vmul.f32 49.0, %v11649_v59  ;;  %vm2097_vm11 = vcmp.ne.f32.partialorder %v1957_v40, %v11404_v56  ;;  %v1959_v0 = vpop.f32.mrf.mxu1  ;;  %v17134_v4 = vld [vmem:[#allocation85_spill] sm:$0xff]  ;;  %v11727_v56 = vpop.eup %7051  ;;  %v17141_v40 = vld [vmem:[#allocation63_spill] sm:$0xff]  ;;  %v17248_v10 = vld [vmem:[#allocation136_spill] sm:$0xff] }
 0x2ac   :  { %17131 = vst [vmem:[#allocation115_spill] sm:$0xff] %v11694_v61  ;;  %4939 = vmatprep.subr.bf16.mxu1 %v7384_v25  ;;  %v6082_v46 = vsel %vm2097_vm11, 1.0, %v16726_v24  ;;  %v11713_v38 = vmul.f32 49.0, %v11689_v52  ;;  %v17135_v45 = vld [vmem:[#allocation89_spill] sm:$0xff]  ;;  %17140 = vst [vmem:[#allocation35_spill] sm:$0xff] %v11727_v56  ;;  %v11730_v27 = vmul.f32 %v2264_v11, %v17141_v40  ;;  %vm2098_vm15 = vcmp.ne.f32.partialorder %v1959_v0, %v11444_v14  ;;  %v17144_v11 = vld [vmem:[#allocation88_spill] sm:$0xff] }
 0x2ad   :  { %v11707_v15 = vmul.f32 %v2263_v22, %v11400_v63  ;;  %vm17136_vm7 = vcmp.eq.f32.partialorder %v17134_v4, %v17135_v45  ;;  %v17137_v63 = vld [vmem:[#allocation91_spill] sm:$0xff]  ;;  %v17138_v22 = vld [vmem:[#allocation94_spill] sm:$0xff]  ;;  %v2265_v25 = vmul.f32 %v6082_v46, %v17143_v16  ;;  %v4132_v17 = vpack.c.bf16 %v4046_v41, %v4042_v13  ;;  %v1961_v8 = vpop.f32.mrf.mxu1  ;;  %v17145_v40 = vld [vmem:[#allocation92_spill] sm:$0xff] }
 0x2ae   :  { %v11719_v7 = vsel %vm17136_vm7, 1.0, %v16726_v24  ;;  %vm17139_vm4 = vcmp.eq.f32.partialorder %v17137_v63, %v17138_v22  ;;  %17142 = vst [vmem:[#allocation34_spill] sm:$0xff] %v11730_v27  ;;  %v7385_v31 = vld [vmem:[#allocation5 + $0xa0] ss:$8 sps:$4 sm:$0xff]   ;;  %v4131_v4 = vpack.c.bf16 %v4044_v62, %v11664_v60  ;;  %v6083_v45 = vsel %vm2098_vm15, 1.0, %v16726_v24  ;;  %v11736_v63 = vpop.f32.mrf.mxu0 }
 0x2af   :  { %17133 = vst [vmem:[#allocation365_spill] sm:$0xff] %v11707_v15  ;;  %v11725_v32 = vsel %vm17139_vm4, 1.0, %v16726_v24  ;;  %4940 = vmatpush2.bf16.msra.mxu1 %v7385_v31  ;;  %v11740_v22 = vmul.f32 %v11660_v48, %v17064_v49  ;;  %vm17146_vm11 = vcmp.eq.f32.partialorder %v17144_v11, %v17145_v40  ;;  %v7386_v14 = vld [vmem:[#allocation5 + $0x94] ss:$8 sps:$4 sm:$0xff]   ;;  %v11748_v31 = vpop.eup %7053  ;;  %v11751_v13 = vmul.f32 %v2265_v25, %v11465_v51  ;;  %v17150_v49 = vld [vmem:[#allocation83_spill] sm:$0xff]  ;;  %v1965_v16 = vpop.f32.mrf.mxu1 }
 0x2b0   :  { %v11746_v46 = vsel %vm17146_vm11, 1.0, %v16726_v24  ;;  %4941 = vmatprep.subr.bf16.mxu1 %v7386_v14  ;;  %17147 = vst [vmem:[#allocation361_spill] sm:$0xff] %v11748_v31  ;;  %v2266_v60 = vmul.f32 %v6083_v45, %v11417_v55  ;;  %vm2099_vm7 = vcmp.ne.f32.partialorder %v1961_v8, %v11468_v30  ;;  %vm17149_vm4 = vcmask 785408   ;;  %v17151_v62 = vld [vmem:[#allocation86_spill] sm:$0xff]  ;;  %v4052_v11 = vpop.f32.mrf.mxu0  ;;  %v11773_v8 = vpop.eup %7055  ;;  %v17156_v40 = vld [vmem:[#allocation37_spill] sm:$0xff] }
 0x2b1   :  { %17148 = vst [vmem:[#allocation33_spill] sm:$0xff] %v11751_v13  ;;  %6429 = vmatprep.mubr.msk.bf16.mxu1 %vm17149_vm4, %v4132_v17  ;;  %vm17152_vm15 = vcmp.eq.f32.partialorder %v17150_v49, %v17151_v62  ;;  %v6084_v41 = vsel %vm2099_vm7, 1.0, %v16726_v24  ;;  %v11765_v51 = vmul.f32 %v11691_v54, %v17074_v23  ;;  %v11768_v55 = vmul.f32 49.0, %v11719_v7  ;;  %17153 = vst [vmem:[#allocation25_spill] sm:$0xff] %v11773_v8  ;;  %v17155_v25 = vld [vmem:[#allocation302_spill] sm:$0xff]  ;;  %v1967_v49 = vpop.f32.mrf.mxu1  ;;  %v17225_v13 = vld [vmem:[#allocation145_spill] sm:$0xff] }
 0x2b2   :  { %v11760_v0 = vsel %vm17152_vm15, 1.0, %v16726_v24  ;;  %4282 = vmatmul.mubr.bf16.gmra.mxu1 %v4131_v4  ;;  %v11771_v30 = vmul.f32 49.0, %v11725_v32  ;;  %v11776_v17 = vmul.f32 %v2266_v60, %v11478_v44  ;;  %v2267_v45 = vmul.f32 %v6084_v41, %v17155_v25  ;;  %v7387_v23 = vld [vmem:[#allocation5 + $0x90] ss:$8 sps:$4 sm:$0xff]   ;;  %v4054_v62 = vpop.f32.mrf.mxu0  ;;  %v7388_v41 = vld [vmem:[#allocation5 + $0x84] ss:$8 sps:$4 sm:$0xff]  }
 0x2b3   :  { %vm2100_vm11 = vcmp.ne.f32.partialorder %v1965_v16, %v17156_v40  ;;  %v11781_v4 = vmul.f32 49.0, %v11746_v46  ;;  %4942 = vmatpush2.bf16.msra.mxu1 %v7387_v23  ;;  %v11786_v54 = vmul.f32 %v11727_v56, %v17081_v33  ;;  %v11790_v44 = vmul.f32 %v11748_v31, %v17086_v58  ;;  %v11795_v16 = vpop.eup %7057  ;;  %v17159_v40 = vld [vmem:[#allocation51_spill] sm:$0xff]  ;;  %v17160_v33 = vld [vmem:[#allocation78_spill] sm:$0xff]  ;;  %v17161_v56 = vld [vmem:[#allocation81_spill] sm:$0xff]  ;;  %v1969_v48 = vpop.f32.mrf.mxu1 }
 0x2b4   :  { %17154 = vst [vmem:[#allocation107_spill] sm:$0xff] %v11776_v17  ;;  %v6085_v14 = vsel %vm2100_vm11, 1.0, %v16726_v24  ;;  %v11793_v60 = vmul.f32 49.0, %v11760_v0  ;;  %4943 = vmatprep.subr.bf16.mxu1 %v7388_v41  ;;  %17157 = vst [vmem:[#allocation110_spill] sm:$0xff] %v11795_v16  ;;  %v11798_v25 = vmul.f32 %v2267_v45, %v11520_v1  ;;  %vm2101_vm7 = vcmp.ne.f32.partialorder %v1967_v49, %v11523_v2  ;;  %v4056_v17 = vpop.f32.mrf.mxu0  ;;  %v17163_v1 = vld [vmem:[#allocation84_spill] sm:$0xff]  ;;  %v17164_v45 = vld [vmem:[#allocation87_spill] sm:$0xff] }
 0x2b5   :  { %v2268_v23 = vmul.f32 %v6085_v14, %v17159_v40  ;;  %vm17162_vm4 = vcmp.eq.f32.partialorder %v17160_v33, %v17161_v56  ;;  %v6086_v31 = vsel %vm2101_vm7, 1.0, %v16726_v24  ;;  %v11811_v41 = vmul.f32 %v11773_v8, %v17098_v43  ;;  %v17166_v2 = vld [vmem:[#allocation80_spill] sm:$0xff]  ;;  %v17167_v49 = vld [vmem:[#allocation82_spill] sm:$0xff]  ;;  %v1971_v27 = vpop.f32.mrf.mxu1 }
 0x2b6   :  { %17158 = vst [vmem:[#allocation29_spill] sm:$0xff] %v11798_v25  ;;  %v11806_v58 = vsel %vm17162_vm4, 1.0, %v16726_v24  ;;  %vm17165_vm15 = vcmp.eq.f32.partialorder %v17163_v1, %v17164_v45  ;;  %vm17168_vm11 = vcmp.eq.f32.partialorder %v17166_v2, %v17167_v49  ;;  %v2269_v33 = vmul.f32 %v6086_v31, %v11494_v9  ;;  %v7389_v8 = vld [vmem:[#allocation5 + $0x80] ss:$8 sps:$4 sm:$0xff]   ;;  %v11830_v25 = vpop.eup %7059  ;;  %v4060_v2 = vpop.f32.mrf.mxu0 }
 0x2b7   :  { %v11817_v14 = vsel %vm17165_vm15, 1.0, %v16726_v24  ;;  %v11823_v56 = vsel %vm17168_vm11, 1.0, %v16726_v24  ;;  %v11826_v40 = vmul.f32 %v2268_v23, %v11553_v35  ;;  %vm2102_vm7 = vcmp.ne.f32.partialorder %v1969_v48, %v11541_v53  ;;  %4944 = vmatpush2.bf16.msra.mxu1 %v7389_v8  ;;  %17170 = vst [vmem:[#allocation230_spill] sm:$0xff] %v11830_v25  ;;  %v11841_v9 = vpop.eup %7061  ;;  %v1975_v8 = vpop.f32.mrf.mxu1 }
 0x2b8   :  { %v4134_v43 = vpack.c.bf16 %v4056_v17, %v4052_v11  ;;  %v4133_v1 = vpack.c.bf16 %v4054_v62, %v11736_v63  ;;  %v6087_v45 = vsel %vm2102_vm7, 1.0, %v16726_v24  ;;  %v11836_v49 = vmul.f32 %v11795_v16, %v17101_v57  ;;  %17171 = vst [vmem:[#allocation288_spill] sm:$0xff] %v11841_v9  ;;  %v17174_v63 = vld [vmem:[#allocation167_spill] sm:$0xff]  ;;  %v11854_v57 = vpop.eup %7063  ;;  %v4062_v17 = vpop.f32.mrf.mxu0 }
 0x2b9   :  { %17169 = vst [vmem:[#allocation36_spill] sm:$0xff] %v11826_v40  ;;  %v11839_v35 = vmul.f32 49.0, %v11806_v58  ;;  %v11844_v48 = vmul.f32 %v2269_v33, %v11557_v37  ;;  %v2270_v53 = vmul.f32 %v6087_v45, %v11501_v28  ;;  %vm2103_vm4 = vcmp.ne.f32.partialorder %v1971_v27, %v11560_v12  ;;  %17176 = vst [vmem:[#allocation105_spill] sm:$0xff] %v11854_v57  ;;  %v17177_v12 = vld [vmem:[#allocation162_spill] sm:$0xff]  ;;  %v17180_v33 = vld [vmem:[#allocation168_spill] sm:$0xff]  ;;  %v1977_v45 = vpop.f32.mrf.mxu1 }
 0x2ba   :  { %vm17173_vm15 = vcmask 785408   ;;  %vm17175_vm11 = vcmp.eq.s32.totalorder %v17174_v63, 0  ;;  %v6088_v11 = vsel %vm2103_vm4, 1.0, %v16726_v24  ;;  %v11858_v37 = vmul.f32 49.0, %v11817_v14  ;;  %v4064_v63 = vpop.f32.mrf.mxu0  ;;  %v17186_v16 = vld [vmem:[#allocation159_spill] sm:$0xff]  ;;  %v17206_v40 = vld [vmem:[#allocation152_spill] sm:$0xff] }
 0x2bb   :  { %17172 = vst [vmem:[#allocation102_spill] sm:$0xff] %v11844_v48  ;;  %6430 = vmatprep.mubr.msk.bf16.mxu1 %vm17173_vm15, %v4134_v43  ;;  %v11852_v31 = vsel %vm17175_vm11, 1.0, %v16726_v24  ;;  %v11861_v28 = vmul.f32 49.0, %v11823_v56  ;;  %vm17178_vm7 = vcmp.eq.s32.totalorder %v17177_v12, 0  ;;  %v11869_v62 = vmul.f32 %v2270_v53, %v11576_v50 }
 0x2bc   :  { %4292 = vmatmul.mubr.bf16.gmra.mxu1 %v4133_v1  ;;  %v11866_v27 = vsel %vm17178_vm7, 1.0, %v16726_v24  ;;  %v2271_v23 = vmul.f32 %v6088_v11, %v11537_v18  ;;  %vm2104_vm4 = vcmp.ne.f32.partialorder %v1975_v8, %v11594_v26  ;;  %vm17181_vm15 = vcmp.eq.s32.totalorder %v17180_v33, 0  ;;  %v1979_v8 = vpop.f32.mrf.mxu1  ;;  %v4066_v33 = vpop.f32.mrf.mxu0 }
 0x2bd   :  { %17179 = vst [vmem:[#allocation108_spill] sm:$0xff] %v11869_v62  ;;  %v11876_v43 = vsel %vm17181_vm15, 1.0, %v16726_v24  ;;  %v6089_v1 = vsel %vm2104_vm4, 1.0, %v16726_v24  ;;  %v11881_v12 = vmul.f32 %v11830_v25, %v17110_v34  ;;  %v11885_v50 = vmul.f32 %v11841_v9, %v17118_v5 }
 0x2be   :  { %v11888_v18 = vmul.f32 49.0, %v11852_v31  ;;  %v11891_v26 = vmul.f32 %v2271_v23, %v11628_v36  ;;  %v2272_v53 = vmul.f32 %v6089_v1, %v11571_v3  ;;  %vm2105_vm11 = vcmp.ne.f32.partialorder %v1977_v45, %v11632_v39  ;;  %v17183_v36 = vld [vmem:[#allocation163_spill] sm:$0xff]  ;;  %v4070_v25 = vpop.f32.mrf.mxu0 }
 0x2bf   :  { %v11897_v11 = vmul.f32 %v11854_v57, %v17125_v29  ;;  %v6090_v34 = vsel %vm2105_vm11, 1.0, %v16726_v24  ;;  %v11901_v5 = vmul.f32 49.0, %v11866_v27  ;;  %v11904_v9 = vmul.f32 49.0, %v11876_v43  ;;  %v1981_v57 = vpop.f32.mrf.mxu1 }
 0x2c0   :  { %17182 = vst [vmem:[#allocation111_spill] sm:$0xff] %v11891_v26  ;;  %vm17184_vm7 = vcmp.eq.s32.totalorder %v17183_v36, 0  ;;  %v11912_v39 = vmul.f32 %v2272_v53, %v11679_v20  ;;  %v2273_v29 = vmul.f32 %v6090_v34, %v11610_v42  ;;  %vm2106_vm4 = vcmp.ne.f32.partialorder %v1979_v8, %v11642_v21  ;;  %v17188_v36 = vld [vmem:[#allocation157_spill] sm:$0xff]  ;;  %v4072_v34 = vpop.f32.mrf.mxu0 }
 0x2c1   :  { %v11909_v3 = vsel %vm17184_vm7, 1.0, %v16726_v24  ;;  %v4136_v23 = vpack.c.bf16 %v4066_v33, %v4062_v17  ;;  %v4135_v1 = vpack.c.bf16 %v4064_v63, %v4060_v2  ;;  %v6091_v45 = vsel %vm2106_vm4, 1.0, %v16726_v24  ;;  %v17191_v21 = vld [vmem:[#allocation109_spill] sm:$0xff]  ;;  %v17193_v2 = vld [vmem:[#allocation160_spill] sm:$0xff]  ;;  %v1985_v53 = vpop.f32.mrf.mxu1 }
 0x2c2   :  { %17185 = vst [vmem:[#allocation366_spill] sm:$0xff] %v11912_v39  ;;  %vm17187_vm15 = vcmp.eq.s32.totalorder %v17186_v16, 0  ;;  %vm17189_vm11 = vcmp.eq.s32.totalorder %v17188_v36, 0  ;;  %v11928_v42 = vmul.f32 %v2273_v29, %v11683_v47  ;;  %v2274_v17 = vmul.f32 %v6091_v45, %v17191_v21  ;;  %v17195_v47 = vld [vmem:[#allocation158_spill] sm:$0xff] }
 0x2c3   :  { %v11920_v62 = vsel %vm17187_vm15, 1.0, %v16726_v24  ;;  %v11925_v20 = vsel %vm17189_vm11, 1.0, %v16726_v24  ;;  %vm2107_vm7 = vcmp.ne.f32.partialorder %v1981_v57, %v11704_v19  ;;  %vm17192_vm4 = vcmask 785408   ;;  %v17197_v19 = vld [vmem:[#allocation154_spill] sm:$0xff]  ;;  %v1987_v21 = vpop.f32.mrf.mxu1 }
 0x2c4   :  { %17190 = vst [vmem:[#allocation362_spill] sm:$0xff] %v11928_v42  ;;  %6431 = vmatprep.mubr.msk.bf16.mxu1 %vm17192_vm4, %v4136_v23  ;;  %vm17194_vm9 = vcmp.eq.s32.totalorder %v17193_v2, 0  ;;  %v6092_v63 = vsel %vm2107_vm7, 1.0, %v16726_v24  ;;  %v11940_v8 = vmul.f32 49.0, %v11909_v3  ;;  %vm17196_vm15 = vcmp.eq.s32.totalorder %v17195_v47, 0  ;;  %v4074_v2 = vpop.f32.mrf.mxu0 }
 0x2c5   :  { %v11936_v16 = vsel %vm17194_vm9, 1.0, %v16726_v24  ;;  %4302 = vmatmul.mubr.bf16.gmra.mxu1 %v4135_v1  ;;  %v11945_v33 = vsel %vm17196_vm15, 1.0, %v16726_v24  ;;  %vm17198_vm11 = vcmp.eq.s32.totalorder %v17197_v19, 0  ;;  %v11953_v29 = vmul.f32 %v2274_v17, %v11701_v6  ;;  %v17200_v1 = vld [vmem:[#allocation151_spill] sm:$0xff] }
 0x2c6   :  { %v11950_v57 = vsel %vm17198_vm11, 1.0, %v16726_v24  ;;  %v2275_v23 = vmul.f32 %v6092_v63, %v11649_v59  ;;  %vm2108_vm9 = vcmp.ne.f32.partialorder %v1985_v53, %v11713_v38  ;;  %vm17201_vm7 = vcmp.eq.s32.totalorder %v17200_v1, 0  ;;  %v1989_v53 = vpop.f32.mrf.mxu1  ;;  %v4076_v1 = vpop.f32.mrf.mxu0 }
 0x2c7   :  { %17199 = vst [vmem:[#allocation104_spill] sm:$0xff] %v11953_v29  ;;  %v11960_v45 = vsel %vm17201_vm7, 1.0, %v16726_v24  ;;  %v6093_v36 = vsel %vm2108_vm9, 1.0, %v16726_v24  ;;  %v11964_v47 = vmul.f32 49.0, %v11920_v62  ;;  %v11967_v19 = vmul.f32 49.0, %v11925_v20 }
 0x2c8   :  { %v11970_v6 = vmul.f32 49.0, %v11936_v16  ;;  %v11973_v59 = vmul.f32 %v2275_v23, %v11740_v22  ;;  %v2276_v38 = vmul.f32 %v6093_v36, %v11689_v52  ;;  %vm2109_vm4 = vcmp.ne.f32.partialorder %v1987_v21, %v11768_v55  ;;  %v17203_v22 = vld [vmem:[#allocation155_spill] sm:$0xff]  ;;  %v1991_v42 = vpop.f32.mrf.mxu1  ;;  %v4080_v26 = vpop.f32.mrf.mxu0 }
 0x2c9   :  { %v11978_v17 = vmul.f32 49.0, %v11945_v33  ;;  %v6094_v63 = vsel %vm2109_vm4, 1.0, %v16726_v24  ;;  %v11982_v29 = vmul.f32 49.0, %v11950_v57  ;;  %v11985_v39 = vmul.f32 49.0, %v11960_v45 }
 0x2ca   :  { %17202 = vst [vmem:[#allocation106_spill] sm:$0xff] %v11973_v59  ;;  %vm17204_vm15 = vcmp.eq.s32.totalorder %v17203_v22, 0  ;;  %v11993_v52 = vmul.f32 %v2276_v38, %v11765_v51  ;;  %v2277_v55 = vmul.f32 %v6094_v63, %v11719_v7  ;;  %vm2110_vm11 = vcmp.ne.f32.partialorder %v1989_v53, %v11771_v30  ;;  %v17208_v22 = vld [vmem:[#allocation149_spill] sm:$0xff]  ;;  %v4082_v38 = vpop.f32.mrf.mxu0 }
 0x2cb   :  { %v11990_v23 = vsel %vm17204_vm15, 1.0, %v16726_v24  ;;  %v4138_v36 = vpack.c.bf16 %v4076_v1, %v4072_v34  ;;  %v4137_v21 = vpack.c.bf16 %v4074_v2, %v4070_v25  ;;  %v6095_v59 = vsel %vm2110_vm11, 1.0, %v16726_v24  ;;  %v17212_v25 = vld [vmem:[#allocation147_spill] sm:$0xff]  ;;  %v1995_v2 = vpop.f32.mrf.mxu1  ;;  %v17219_v1 = vld [vmem:[#allocation144_spill] sm:$0xff] }
 0x2cc   :  { %17205 = vst [vmem:[#allocation357_spill] sm:$0xff] %v11993_v52  ;;  %vm17207_vm9 = vcmp.eq.s32.totalorder %v17206_v40, 0  ;;  %vm17209_vm7 = vcmp.eq.s32.totalorder %v17208_v22, 0  ;;  %v12009_v7 = vmul.f32 %v2277_v55, %v11786_v54  ;;  %v2278_v30 = vmul.f32 %v6095_v59, %v11725_v32  ;;  %v17214_v54 = vld [vmem:[#allocation150_spill] sm:$0xff]  ;;  %v4084_v22 = vpop.f32.mrf.mxu0 }
 0x2cd   :  { %v12001_v48 = vsel %vm17207_vm9, 1.0, %v16726_v24  ;;  %v12006_v51 = vsel %vm17209_vm7, 1.0, %v16726_v24  ;;  %vm2111_vm4 = vcmp.ne.f32.partialorder %v1991_v42, %v11781_v4  ;;  %vm17211_vm15 = vcmask 785408   ;;  %v17216_v4 = vld [vmem:[#allocation148_spill] sm:$0xff] }
 0x2ce   :  { %17210 = vst [vmem:[#allocation97_spill] sm:$0xff] %v12009_v7  ;;  %6432 = vmatprep.mubr.msk.bf16.mxu1 %vm17211_vm15, %v4138_v36  ;;  %vm17213_vm11 = vcmp.eq.s32.totalorder %v17212_v25, 0  ;;  %v6096_v34 = vsel %vm2111_vm4, 1.0, %v16726_v24  ;;  %v12021_v63 = vmul.f32 49.0, %v11990_v23  ;;  %vm17215_vm9 = vcmp.eq.s32.totalorder %v17214_v54, 0 }
 0x2cf   :  { %v12017_v40 = vsel %vm17213_vm11, 1.0, %v16726_v24  ;;  %4312 = vmatmul.mubr.bf16.gmra.mxu1 %v4137_v21  ;;  %v12026_v32 = vsel %vm17215_vm9, 1.0, %v16726_v24  ;;  %vm17217_vm7 = vcmp.eq.s32.totalorder %v17216_v4, 0  ;;  %v12034_v59 = vmul.f32 %v2278_v30, %v11790_v44  ;;  %v1997_v21 = vpop.f32.mrf.mxu1  ;;  %v17222_v30 = vld [vmem:[#allocation141_spill] sm:$0xff] }
 0x2d0   :  { %v12031_v42 = vsel %vm17217_vm7, 1.0, %v16726_v24  ;;  %v2279_v53 = vmul.f32 %v6096_v34, %v11746_v46  ;;  %vm2112_vm4 = vcmp.ne.f32.partialorder %v1995_v2, %v11793_v60  ;;  %vm17220_vm15 = vcmp.eq.s32.totalorder %v17219_v1, 0  ;;  %v4086_v1 = vpop.f32.mrf.mxu0 }
 0x2d1   :  { %17218 = vst [vmem:[#allocation101_spill] sm:$0xff] %v12034_v59  ;;  %v12041_v55 = vsel %vm17220_vm15, 1.0, %v16726_v24  ;;  %v6097_v36 = vsel %vm2112_vm4, 1.0, %v16726_v24  ;;  %v12045_v25 = vmul.f32 49.0, %v12001_v48  ;;  %v12048_v54 = vmul.f32 49.0, %v12006_v51  ;;  %v1999_v4 = vpop.f32.mrf.mxu1 }
 0x2d2   :  { %v12051_v44 = vmul.f32 49.0, %v12017_v40  ;;  %v12054_v46 = vmul.f32 %v2279_v53, %v11811_v41  ;;  %v2280_v60 = vmul.f32 %v6097_v36, %v11760_v0  ;;  %vm2113_vm11 = vcmp.ne.f32.partialorder %v1997_v21, %v11839_v35 }
 0x2d3   :  { %vm17223_vm9 = vcmp.eq.s32.totalorder %v17222_v30, 0  ;;  %v6098_v2 = vsel %vm2113_vm11, 1.0, %v16726_v24  ;;  %v12065_v59 = vmul.f32 49.0, %v12026_v32  ;;  %v12068_v52 = vmul.f32 49.0, %v12031_v42  ;;  %v2001_v30 = vpop.f32.mrf.mxu1 }
 0x2d4   :  { %17221 = vst [vmem:[#allocation353_spill] sm:$0xff] %v12054_v46  ;;  %v12061_v34 = vsel %vm17223_vm9, 1.0, %v16726_v24  ;;  %v12071_v41 = vmul.f32 49.0, %v12041_v55  ;;  %v12074_v0 = vmul.f32 %v2280_v60, %v11836_v49  ;;  %v2281_v35 = vmul.f32 %v6098_v2, %v11806_v58  ;;  %v4090_v46 = vpop.f32.mrf.mxu0  ;;  %v17231_v60 = vld [vmem:[#allocation139_spill] sm:$0xff]  ;;  %v17235_v2 = vld [vmem:[#allocation140_spill] sm:$0xff] }
 0x2d5   :  { %vm2114_vm7 = vcmp.ne.f32.partialorder %v1999_v4, %v11858_v37  ;;  %v4140_v53 = vpack.c.bf16 %v4086_v1, %v4082_v38  ;;  %v4139_v36 = vpack.c.bf16 %v4084_v22, %v4080_v26  ;;  %v12080_v7 = vmul.f32 49.0, %v12061_v34  ;;  %v17229_v37 = vld [vmem:[#allocation142_spill] sm:$0xff]  ;;  %v2589_v22 = vpop.f32.mrf.mxu1 }
 0x2d6   :  { %17224 = vst [vmem:[#allocation358_spill] sm:$0xff] %v12074_v0  ;;  %v6099_v21 = vsel %vm2114_vm7, 1.0, %v16726_v24  ;;  %vm17226_vm4 = vcmp.eq.s32.totalorder %v17225_v13, 0  ;;  %v12088_v49 = vmul.f32 %v2281_v35, %v11881_v12  ;;  %vm2115_vm15 = vcmp.ne.f32.partialorder %v2001_v30, %v11861_v28  ;;  %v4092_v13 = vpop.f32.mrf.mxu0 }
 0x2d7   :  { %v12085_v61 = vsel %vm17226_vm4, 1.0, %v16726_v24  ;;  %v2282_v58 = vmul.f32 %v6099_v21, %v11817_v14  ;;  %vm17228_vm11 = vcmask 785408   ;;  %vm17230_vm9 = vcmp.eq.s32.totalorder %v17229_v37, 0  ;;  %v17233_v14 = vld [vmem:[#allocation137_spill] sm:$0xff]  ;;  %v2591_v30 = vpop.f32.mrf.mxu1 }
 0x2d8   :  { %17227 = vst [vmem:[#allocation95_spill] sm:$0xff] %v12088_v49  ;;  %6433 = vmatprep.mubr.msk.bf16.mxu1 %vm17228_vm11, %v4140_v53  ;;  %v12096_v26 = vsel %vm17230_vm9, 1.0, %v16726_v24  ;;  %v6100_v38 = vsel %vm2115_vm15, 1.0, %v16726_v24  ;;  %vm17232_vm7 = vcmp.eq.s32.totalorder %v17231_v60, 0  ;;  %vm17234_vm4 = vcmp.eq.s32.totalorder %v17233_v14, 0  ;;  %v17238_v53 = vld [vmem:[#allocation138_spill] sm:$0xff]  ;;  %v4094_v37 = vpop.f32.mrf.mxu0 }
 0x2d9   :  { %4322 = vmatmul.mubr.bf16.gmra.mxu1 %v4139_v36  ;;  %v12102_v12 = vsel %vm17232_vm7, 1.0, %v16726_v24  ;;  %v12107_v28 = vsel %vm17234_vm4, 1.0, %v16726_v24  ;;  %vm17236_vm11 = vcmp.eq.s32.totalorder %v17235_v2, 0  ;;  %v12115_v1 = vmul.f32 %v2282_v58, %v11885_v50  ;;  %v17241_v50 = vld [vmem:[#allocation135_spill] sm:$0xff]  ;;  %v2593_v2 = vpop.f32.mrf.mxu1 }
 0x2da   :  { %v12112_v4 = vsel %vm17236_vm11, 1.0, %v16726_v24  ;;  %v2283_v35 = vmul.f32 %v6100_v38, %v11823_v56  ;;  %vm2784_vm15 = vcmp.ne.f32.partialorder %v2589_v22, %v11888_v18  ;;  %vm17239_vm9 = vcmp.eq.s32.totalorder %v17238_v53, 0  ;;  %v4096_v53 = vpop.f32.mrf.mxu0 }
 0x2db   :  { %17237 = vst [vmem:[#allocation98_spill] sm:$0xff] %v12115_v1  ;;  %v12122_v36 = vsel %vm17239_vm9, 1.0, %v16726_v24  ;;  %v6185_v21 = vsel %vm2784_vm15, 1.0, %v16726_v24  ;;  %v12126_v60 = vmul.f32 49.0, %v12085_v61  ;;  %v12129_v14 = vmul.f32 49.0, %v12096_v26  ;;  %v2595_v49 = vpop.f32.mrf.mxu1 }
 0x2dc   :  { %17240 = vst [vmem:[#allocation100_spill] sm:$0xff] %v12122_v36  ;;  %vm17242_vm7 = vcmp.eq.s32.totalorder %v17241_v50, 0  ;;  %v12137_v18 = vmul.f32 %v2283_v35, %v11897_v11  ;;  %vm2785_vm4 = vcmp.ne.f32.partialorder %v2591_v30, %v11901_v5  ;;  %v12141_v58 = vmul.f32 49.0, %v12102_v12  ;;  %v4100_v15 = vpop.f32.mrf.mxu0 }
 0x2dd   :  { %v12134_v56 = vsel %vm17242_vm7, 1.0, %v16726_v24  ;;  %v12144_v38 = vmul.f32 49.0, %v12107_v28  ;;  %v6186_v22 = vsel %vm2785_vm4, 1.0, %v16726_v24  ;;  %v2952_v1 = vmul.f32 %v6185_v21, %v11852_v31  ;;  %v17246_v31 = vld [vmem:[#allocation131_spill] sm:$0xff] }
 0x2de   :  { %17243 = vst [vmem:[#allocation103_spill] sm:$0xff] %v12134_v56  ;;  %17244 = vst [vmem:[#allocation354_spill] sm:$0xff] %v12137_v18  ;;  %v12149_v50 = vmul.f32 49.0, %v12112_v4  ;;  %v12152_v11 = vmul.f32 49.0, %v12122_v36  ;;  %v2953_v5 = vmul.f32 %v6186_v22, %v11866_v27  ;;  %vm2786_vm11 = vcmp.ne.f32.partialorder %v2593_v2, %v11904_v9 }
 0x2df   :  { %v4142_v35 = vpack.c.bf16 %v4096_v53, %v4092_v13  ;;  %v12157_v30 = vmul.f32 49.0, %v12134_v56  ;;  %v4141_v18 = vpack.c.bf16 %v4094_v37, %v4090_v46  ;;  %v6187_v0 = vsel %vm2786_vm11, 1.0, %v16726_v24  ;;  %v17253_v46 = vld [vmem:[#allocation291_spill] sm:$0xff]  ;;  %v17254_v37 = vld [vmem:[#allocation132_spill] sm:$0xff]  ;;  %v2599_v53 = vpop.f32.mrf.mxu1  ;;  %v17257_v56 = vld [vmem:[#allocation26_spill] sm:$0xff] }
 0x2e0   :  { %vm17247_vm15 = vcmp.eq.s32.totalorder %v17246_v31, 0  ;;  %vm17249_vm9 = vcmp.eq.s32.totalorder %v17248_v10, 0  ;;  %vm2787_vm7 = vcmp.ne.f32.partialorder %v2595_v49, %v11940_v8  ;;  %vm17251_vm4 = vcmask 785408   ;;  %v4102_v31 = vpop.f32.mrf.mxu0  ;;  %v17258_v8 = vld [vmem:[#allocation129_spill] sm:$0xff] }
 0x2e1   :  { %17245 = vst [vmem:[#allocation349_spill] sm:$0xff] %v12157_v30  ;;  %v12163_v21 = vsel %vm17247_vm15, 1.0, %v16726_v24  ;;  %v12168_v27 = vsel %vm17249_vm9, 1.0, %v16726_v24  ;;  %6434 = vmatprep.mubr.msk.bf16.mxu1 %vm17251_vm4, %v4142_v35  ;;  %vm17252_vm2 = vmmov %vm17251_vm4  ;;  %v3065_v13 = vmul.f32 %v17253_v46, %v2953_v5  ;;  %vm17255_vm11 = vcmp.eq.s32.totalorder %v17254_v37, 0 }
 0x2e2   :  { %17250 = vst [vmem:[#allocation316_spill] sm:$0xff] %v12168_v27  ;;  %v3265_v9 = vsel %vm17252_vm2, %v2953_v5, 0.0  ;;  %v12177_v22 = vsel %vm17255_vm11, 1.0, %v16726_v24  ;;  %v6188_v2 = vsel %vm2787_vm7, 1.0, %v16726_v24  ;;  %4332 = vmatmul.mubr.bf16.gmra.mxu1 %v4141_v18  ;;  %v3064_v30 = vmul.f32 %v17257_v56, %v2952_v1  ;;  %vm17261_vm9 = vmmov %vm17251_vm4  ;;  %v4104_v36 = vpop.f32.mrf.mxu0  ;;  %v2601_v18 = vpop.f32.mrf.mxu1 }
 0x2e3   :  { %17256 = vst [vmem:[#allocation22_spill] sm:$0xff] %v12177_v22  ;;  %v3266_v10 = vadd.f32 %v3265_v9, %v2952_v1  ;;  %vm17259_vm15 = vcmp.eq.s32.totalorder %v17258_v8, 0  ;;  %vm2788_vm2 = vcmp.ne.f32.partialorder %v2599_v53, %v11964_v47  ;;  %v3120_v5 = vsel %vm17261_vm9, %v3065_v13, 0.0 }
 0x2e4   :  { %v12184_v49 = vsel %vm17259_vm15, 1.0, %v16726_v24  ;;  %v2954_v35 = vmul.f32 %v6187_v0, %v11876_v43  ;;  %v2955_v46 = vmul.f32 %v6188_v2, %v11909_v3  ;;  %v6189_v37 = vsel %vm2788_vm2, 1.0, %v16726_v24  ;;  %v2603_v13 = vpop.f32.mrf.mxu1  ;;  %v4106_v2 = vpop.f32.mrf.mxu0  ;;  %vm17265_vm15 = vmmov %vm17251_vm4 }
 0x2e5   :  { %17260 = vst [vmem:[#allocation57_spill] sm:$0xff] %v12184_v49  ;;  %3267 = vadd.xlane.f32.xlu0 %v3266_v10  ;;  %v3121_v9 = vadd.f32 %v3120_v5, %v3064_v30  ;;  %v12192_v1 = vmul.f32 49.0, %v12163_v21  ;;  %v12195_v56 = vmul.f32 49.0, %v12168_v27  ;;  %vm2789_vm7 = vcmp.ne.f32.partialorder %v2601_v18, %v11967_v19  ;;  %v17263_v10 = vld [vmem:[#allocation24_spill] sm:$0xff]  ;;  %v17264_v18 = vld [vmem:[#allocation31_spill] sm:$0xff] }
 0x2e6   :  { %v3269_v47 = vsel %vm17251_vm4, %v2955_v46, 0.0  ;;  %v12200_v43 = vmul.f32 49.0, %v12177_v22  ;;  %v12203_v3 = vmul.f32 49.0, %v12184_v49  ;;  %v2956_v0 = vmul.f32 %v6189_v37, %v11920_v62  ;;  %v2605_v62 = vpop.f32.mrf.mxu1 }
 0x2e7   :  { %v6190_v30 = vsel %vm2789_vm7, 1.0, %v16726_v24  ;;  %v3270_v53 = vadd.f32 %v3269_v47, %v2954_v35  ;;  %v3067_v8 = vmul.f32 %v17263_v10, %v2955_v46  ;;  %vm2790_vm11 = vcmp.ne.f32.partialorder %v2603_v13, %v11970_v6  ;;  %v17266_v47 = vld [vmem:[#allocation123_spill] sm:$0xff]  ;;  %vm17268_vm7 = vmmov %vm17251_vm4  ;;  %v17269_v6 = vld [vmem:[#allocation390_spill] sm:$0xff] }
 0x2e8   :  { %17262 = vst [vmem:[#allocation96_spill] sm:$0xff] %v12203_v3  ;;  %v2957_v5 = vmul.f32 %v6190_v30, %v11925_v20  ;;  %v4144_v19 = vpack.c.bf16 %v4106_v2, %v4102_v31  ;;  %v3066_v22 = vmul.f32 %v17264_v18, %v2954_v35  ;;  %v4143_v27 = vpack.c.bf16 %v4104_v36, %v4100_v15  ;;  %v4110_v3 = vpop.f32.mrf.mxu0  ;;  %v17270_v36 = vld [vmem:[#allocation130_spill] sm:$0xff]  ;;  %v2609_v30 = vpop.f32.mrf.mxu1  ;;  %v17273_v2 = vld [vmem:[#allocation388_spill] sm:$0xff] }
 0x2e9   :  { %v6191_v49 = vsel %vm2790_vm11, 1.0, %v16726_v24  ;;  %3122 = vadd.xlane.f32.xlu0 %v3121_v9  ;;  %3271 = vadd.xlane.f32.xlu1 %v3270_v53  ;;  %v3124_v37 = vsel %vm17265_vm15, %v3067_v8, 0.0  ;;  %vm17267_vm2 = vcmp.eq.s32.totalorder %v17266_v47, 0  ;;  %vm2791_vm9 = vcmp.ne.f32.partialorder %v2605_v62, %v11978_v17  ;;  %v17274_v17 = vld [vmem:[#allocation124_spill] sm:$0xff] }
 0x2ea   :  { %v12216_v46 = vsel %vm17267_vm2, 1.0, %v16726_v24  ;;  %6435 = vmatprep.mubr.msk.bf16.mxu1 %vm17268_vm7, %v4144_v19  ;;  %v3125_v20 = vadd.f32 %v3124_v37, %v3066_v22  ;;  %v3069_v15 = vmul.f32 %v17269_v6, %v2957_v5  ;;  %vm17271_vm4 = vcmp.eq.s32.totalorder %v17270_v36, 0  ;;  %v4112_v13 = vpop.f32.mrf.mxu0  ;;  %vm17277_vm2 = vmmov %vm17268_vm7 }
 0x2eb   :  { %v12224_v31 = vsel %vm17271_vm4, 1.0, %v16726_v24  ;;  %v2958_v35 = vmul.f32 %v6191_v49, %v11936_v16  ;;  %v6192_v9 = vsel %vm2791_vm9, 1.0, %v16726_v24  ;;  %4342 = vmatmul.mubr.bf16.gmra.mxu1 %v4143_v27  ;;  %v3068_v53 = vmul.f32 %v17273_v2, %v2956_v0  ;;  %vm17278_vm7 = vmmov %vm17277_vm2  ;;  %v2611_v27 = vpop.f32.mrf.mxu1  ;;  %v17283_v2 = vld [vmem:[#allocation15_spill] sm:$0xff] }
 0x2ec   :  { %17272 = vst [vmem:[#allocation99_spill] sm:$0xff] %v12224_v31  ;;  %vm17275_vm11 = vcmp.eq.s32.totalorder %v17274_v17, 0  ;;  %v2959_v10 = vmul.f32 %v6192_v9, %v11945_v33  ;;  %vm2792_vm15 = vcmp.ne.f32.partialorder %v2609_v30, %v11982_v29  ;;  %v3128_v8 = vsel %vm17277_vm2, %v3069_v15, 0.0  ;;  %v4114_v19 = vpop.f32.mrf.mxu0  ;;  %vm17279_vm4 = vmmov %vm17277_vm2  ;;  %v17282_v9 = vld [vmem:[#allocation21_spill] sm:$0xff] }
 0x2ed   :  { %v12232_v22 = vsel %vm17275_vm11, 1.0, %v16726_v24  ;;  %v3273_v16 = vsel %vm17278_vm7, %v2957_v5, 0.0  ;;  %v6193_v49 = vsel %vm2792_vm15, 1.0, %v16726_v24  ;;  %3126 = vadd.xlane.f32.xlu0 %v3125_v20  ;;  %v3129_v18 = vadd.f32 %v3128_v8, %v3068_v53  ;;  %v17280_v5 = vld [vmem:[#allocation204_spill] sm:$0xff]  ;;  %v2613_v15 = vpop.f32.mrf.mxu1 }
 0x2ee   :  { %17276 = vst [vmem:[#allocation345_spill] sm:$0xff] %v12232_v22  ;;  %v12240_v62 = vmul.f32 49.0, %v12216_v46  ;;  %v12243_v37 = vmul.f32 49.0, %v12224_v31  ;;  %vm2793_vm9 = vcmp.ne.f32.partialorder %v2611_v27, %v11985_v39  ;;  %v3277_v33 = vsel %vm17279_vm4, %v2959_v10, 0.0  ;;  %v4116_v6 = vpop.f32.mrf.mxu0  ;;  %vm17285_vm4 = vmmov %vm17277_vm2 }
 0x2ef   :  { %v12248_v29 = vmul.f32 49.0, %v12232_v22  ;;  %vm17281_vm11 = vcmp.eq.s32.totalorder %v17280_v5, 0  ;;  %v6194_v20 = vsel %vm2793_vm9, 1.0, %v16726_v24  ;;  %3130 = vadd.xlane.f32.xlu1 %v3129_v18  ;;  %v3274_v36 = vadd.f32 %v3273_v16, %v2956_v0  ;;  %v2615_v31 = vpop.f32.mrf.mxu1  ;;  %vm17284_vm9 = vmmov %vm17277_vm2 }
 0x2f0   :  { %v12253_v47 = vsel %vm17281_vm11, 1.0, %v16726_v24  ;;  %v3070_v30 = vmul.f32 %v17282_v9, %v2958_v35  ;;  %v3071_v39 = vmul.f32 %v17283_v2, %v2959_v10  ;;  %v2960_v53 = vmul.f32 %v6193_v49, %v11950_v57  ;;  %v4704_v22 = vpop.f32.mrf.mxu0  ;;  %v17290_v2 = vld [vmem:[#allocation205_spill] sm:$0xff] }
 0x2f1   :  { %v2961_v17 = vmul.f32 %v6194_v20, %v11960_v45  ;;  %v4146_v8 = vpack.c.bf16 %v4116_v6, %v4112_v13  ;;  %vm2794_vm15 = vcmp.ne.f32.partialorder %v2613_v15, %v12021_v63  ;;  %v4145_v27 = vpack.c.bf16 %v4114_v19, %v4110_v3  ;;  %3275 = vadd.xlane.f32.xlu0 %v3274_v36  ;;  %v17286_v45 = vld [vmem:[#allocation200_spill] sm:$0xff]  ;;  %v2619_v16 = vpop.f32.mrf.mxu1 }
 0x2f2   :  { %v6195_v5 = vsel %vm2794_vm15, 1.0, %v16726_v24  ;;  %v3278_v18 = vadd.f32 %v3277_v33, %v2958_v35  ;;  %v3132_v0 = vsel %vm17277_vm2, %v3071_v39, 0.0  ;;  %vm2795_vm7 = vcmp.ne.f32.partialorder %v2615_v31, %v12045_v25  ;;  %v4706_v35 = vpop.f32.mrf.mxu0  ;;  %v17288_v25 = vld [vmem:[#allocation67_spill] sm:$0xff]  ;;  %v17289_v33 = vld [vmem:[#allocation320_spill] sm:$0xff]  ;;  %v17292_v39 = vld [vmem:[#allocation201_spill] sm:$0xff] }
 0x2f3   :  { %6436 = vmatprep.mubr.msk.bf16.mxu1 %vm17284_vm9, %v4146_v8  ;;  %v3281_v57 = vsel %vm17285_vm4, %v2961_v17, 0.0  ;;  %v3133_v10 = vadd.f32 %v3132_v0, %v3070_v30  ;;  %vm17287_vm11 = vcmp.eq.s32.totalorder %v17286_v45, 0  ;;  %v2962_v3 = vmul.f32 %v6195_v5, %v11990_v23  ;;  %v2621_v36 = vpop.f32.mrf.mxu1  ;;  %v17298_v45 = vld [vmem:[#allocation319_spill] sm:$0xff] }
 0x2f4   :  { %v12269_v63 = vsel %vm17287_vm11, 1.0, %v16726_v24  ;;  %v6196_v13 = vsel %vm2795_vm7, 1.0, %v16726_v24  ;;  %4352 = vmatmul.mubr.bf16.gmra.mxu1 %v4145_v27  ;;  %3279 = vadd.xlane.f32.xlu1 %v3278_v18  ;;  %v3282_v49 = vadd.f32 %v3281_v57, %v2960_v53  ;;  %v3073_v31 = vmul.f32 %v17288_v25, %v2961_v17  ;;  %v4708_v15 = vpop.f32.mrf.mxu0  ;;  %v17294_v17 = vld [vmem:[#allocation198_spill] sm:$0xff]  ;;  %v17297_v57 = vld [vmem:[#allocation385_spill] sm:$0xff] }
 0x2f5   :  { %v2963_v19 = vmul.f32 %v6196_v13, %v12001_v48  ;;  %vm2796_vm15 = vcmp.ne.f32.partialorder %v2619_v16, %v12048_v54  ;;  %v3072_v20 = vmul.f32 %v17289_v33, %v2960_v53  ;;  %v12278_v6 = vmul.f32 49.0, %v12253_v47  ;;  %v2623_v18 = vpop.f32.mrf.mxu1 }
 0x2f6   :  { %v6197_v23 = vsel %vm2796_vm15, 1.0, %v16726_v24  ;;  %3283 = vadd.xlane.f32.xlu0 %v3282_v49  ;;  %v3136_v9 = vsel %vm17277_vm2, %v3073_v31, 0.0  ;;  %v12283_v30 = vmul.f32 49.0, %v12269_v63  ;;  %vm17291_vm7 = vcmp.eq.s32.totalorder %v17290_v2, 0  ;;  %v4710_v5 = vpop.f32.mrf.mxu0  ;;  %vm17296_vm15 = vmmov %vm17277_vm2 }
 0x2f7   :  { %v12288_v48 = vsel %vm17291_vm7, 1.0, %v16726_v24  ;;  %vm2797_vm9 = vcmp.ne.f32.partialorder %v2621_v36, %v12051_v44  ;;  %v3137_v54 = vadd.f32 %v3136_v9, %v3072_v20  ;;  %vm17293_vm4 = vcmp.eq.s32.totalorder %v17292_v39, 0  ;;  %vm17299_vm7 = vmmov %vm17296_vm15 }
 0x2f8   :  { %v12294_v53 = vsel %vm17293_vm4, 1.0, %v16726_v24  ;;  %vm17295_vm11 = vcmp.eq.s32.totalorder %v17294_v17, 0  ;;  %v6198_v27 = vsel %vm2797_vm9, 1.0, %v16726_v24  ;;  %3134 = vadd.xlane.f32.xlu1 %v3133_v10  ;;  %v3285_v0 = vsel %vm17296_vm15, %v2963_v19, 0.0  ;;  %v4714_v20 = vpop.f32.mrf.mxu0  ;;  %v2625_v10 = vpop.f32.mrf.mxu1  ;;  %vm17300_vm4 = vmmov %vm17299_vm7  ;;  %v17305_v17 = vld [vmem:[#allocation69_spill] sm:$0xff] }
 0x2f9   :  { %v12299_v8 = vsel %vm17295_vm11, 1.0, %v16726_v24  ;;  %v3074_v44 = vmul.f32 %v17297_v57, %v2962_v3  ;;  %v3075_v13 = vmul.f32 %v17298_v45, %v2963_v19  ;;  %v2964_v16 = vmul.f32 %v6197_v23, %v12006_v51  ;;  %vm17301_vm11 = vmmov %vm17300_vm4 }
 0x2fa   :  { %v2965_v49 = vmul.f32 %v6198_v27, %v12017_v40  ;;  %v4844_v25 = vpack.c.bf16 %v4710_v5, %v4706_v35  ;;  %vm2798_vm2 = vcmp.ne.f32.partialorder %v2623_v18, %v12065_v59  ;;  %v4843_v31 = vpack.c.bf16 %v4708_v15, %v4704_v22  ;;  %3138 = vadd.xlane.f32.xlu0 %v3137_v54  ;;  %v17302_v40 = vld [vmem:[#allocation196_spill] sm:$0xff]  ;;  %v4716_v35 = vpop.f32.mrf.mxu0  ;;  %v17304_v15 = vld [vmem:[#allocation62_spill] sm:$0xff] }
 0x2fb   :  { %v6199_v33 = vsel %vm2798_vm2, 1.0, %v16726_v24  ;;  %v3286_v36 = vadd.f32 %v3285_v0, %v2962_v3  ;;  %v3140_v9 = vsel %vm17299_vm7, %v3075_v13, 0.0  ;;  %vm2799_vm9 = vcmp.ne.f32.partialorder %v2625_v10, %v12068_v52  ;;  %v2629_v3 = vpop.f32.mrf.mxu1  ;;  %vm17306_vm7 = vmmov %vm17300_vm4 }
 0x2fc   :  { %6563 = vmatprep.mubr.msk.bf16.mxu1 %vm17300_vm4, %v4844_v25  ;;  %v3289_v51 = vsel %vm17301_vm11, %v2965_v49, 0.0  ;;  %v3141_v19 = vadd.f32 %v3140_v9, %v3074_v44  ;;  %vm17303_vm15 = vcmp.eq.s32.totalorder %v17302_v40, 0  ;;  %v6200_v22 = vsel %vm2799_vm9, 1.0, %v16726_v24  ;;  %v4718_v5 = vpop.f32.mrf.mxu0  ;;  %vm17310_vm11 = vmmov %vm17306_vm7  ;;  %v17313_v40 = vld [vmem:[#allocation121_spill] sm:$0xff] }
 0x2fd   :  { %v12316_v59 = vsel %vm17303_vm15, 1.0, %v16726_v24  ;;  %4946 = vmatmul.mubr.bf16.vlgmr.msra.gmra.mxu1 %v4843_v31  ;;  %3287 = vadd.xlane.f32.xlu1 %v3286_v36  ;;  %v3290_v23 = vadd.f32 %v3289_v51, %v2964_v16  ;;  %v3077_v2 = vmul.f32 %v17304_v15, %v2965_v49  ;;  %v12321_v52 = vmul.f32 49.0, %v12288_v48  ;;  %v2631_v18 = vpop.f32.mrf.mxu1  ;;  %v17309_v31 = vld [vmem:[#allocation70_spill] sm:$0xff]  ;;  %v17311_v36 = vld [vmem:[#allocation197_spill] sm:$0xff] }
 0x2fe   :  { %v2966_v54 = vmul.f32 %v6199_v33, %v12026_v32  ;;  %v2967_v39 = vmul.f32 %v6200_v22, %v12031_v42  ;;  %vm2800_vm2 = vcmp.ne.f32.partialorder %v2629_v3, %v12071_v41  ;;  %v3076_v27 = vmul.f32 %v17305_v17, %v2964_v16  ;;  %v17307_v41 = vld [vmem:[#allocation199_spill] sm:$0xff]  ;;  %v4720_v49 = vpop.f32.mrf.mxu0 }
 0x2ff   :  { %3291 = vadd.xlane.f32.xlu0 %v3290_v23  ;;  %v3144_v0 = vsel %vm17306_vm7, %v3077_v2, 0.0  ;;  %v12329_v57 = vmul.f32 49.0, %v12294_v53  ;;  %v12332_v44 = vmul.f32 49.0, %v12299_v8  ;;  %v12335_v45 = vmul.f32 49.0, %v12316_v59  ;;  %v2633_v25 = vpop.f32.mrf.mxu1 }
 0x300   :  { %v6201_v32 = vsel %vm2800_vm2, 1.0, %v16726_v24  ;;  %vm2801_vm9 = vcmp.ne.f32.partialorder %v2631_v18, %v12080_v7  ;;  %v3145_v42 = vadd.f32 %v3144_v0, %v3076_v27  ;;  %vm17308_vm4 = vcmp.eq.s32.totalorder %v17307_v41, 0  ;;  %v4724_v15 = vpop.f32.mrf.mxu0 }
 0x301   :  { %v12342_v13 = vsel %vm17308_vm4, 1.0, %v16726_v24  ;;  %v6202_v16 = vsel %vm2801_vm9, 1.0, %v16726_v24  ;;  %3142 = vadd.xlane.f32.xlu1 %v3141_v19  ;;  %v3079_v33 = vmul.f32 %v17309_v31, %v2967_v39  ;;  %v3293_v10 = vsel %vm17310_vm11, %v2967_v39, 0.0  ;;  %v2635_v2 = vpop.f32.mrf.mxu1  ;;  %vm17314_vm4 = vmmov %vm17306_vm7 }
 0x302   :  { %vm17312_vm15 = vcmp.eq.s32.totalorder %v17311_v36, 0  ;;  %v2969_v7 = vmul.f32 %v6202_v16, %v12061_v34  ;;  %v4846_v51 = vpack.c.bf16 %v4720_v49, %v4716_v35  ;;  %vm2802_vm2 = vcmp.ne.f32.partialorder %v2633_v25, %v12126_v60  ;;  %v17315_v60 = vld [vmem:[#allocation194_spill] sm:$0xff]  ;;  %v4726_v27 = vpop.f32.mrf.mxu0  ;;  %v17319_v49 = vld [vmem:[#allocation119_spill] sm:$0xff] }
 0x303   :  { %v12350_v9 = vsel %vm17312_vm15, 1.0, %v16726_v24  ;;  %v3078_v22 = vmul.f32 %v17313_v40, %v2966_v54  ;;  %v2968_v3 = vmul.f32 %v6201_v32, %v12041_v55  ;;  %v4845_v19 = vpack.c.bf16 %v4718_v5, %v4714_v20  ;;  %3146 = vadd.xlane.f32.xlu0 %v3145_v42  ;;  %v2639_v5 = vpop.f32.mrf.mxu1  ;;  %vm17317_vm15 = vmmov %vm17314_vm4  ;;  %v17322_v36 = vld [vmem:[#allocation190_spill] sm:$0xff] }
 0x304   :  { %v6203_v23 = vsel %vm2802_vm2, 1.0, %v16726_v24  ;;  %v3148_v39 = vsel %vm17306_vm7, %v3079_v33, 0.0  ;;  %vm2803_vm9 = vcmp.ne.f32.partialorder %v2635_v2, %v12129_v14  ;;  %6564 = vmatprep.mubr.msk.bf16.mxu1 %vm17314_vm4, %v4846_v51  ;;  %v3294_v35 = vadd.f32 %v3293_v10, %v2966_v54  ;;  %v17318_v14 = vld [vmem:[#allocation382_spill] sm:$0xff]  ;;  %v4728_v41 = vpop.f32.mrf.mxu0  ;;  %vm17320_vm7 = vmmov %vm17314_vm4  ;;  %v17321_v33 = vld [vmem:[#allocation48_spill] sm:$0xff] }
 0x305   :  { %v3149_v34 = vadd.f32 %v3148_v39, %v3078_v22  ;;  %vm17316_vm11 = vcmp.eq.s32.totalorder %v17315_v60, 0  ;;  %v12366_v55 = vmul.f32 %v6203_v23, %v12085_v61  ;;  %v6204_v20 = vsel %vm2803_vm9, 1.0, %v16726_v24  ;;  %4956 = vmatmul.mubr.bf16.gmra.mxu1 %v4845_v19  ;;  %v2641_v16 = vpop.f32.mrf.mxu1  ;;  %v17324_v23 = vld [vmem:[#allocation378_spill] sm:$0xff] }
 0x306   :  { %v12363_v17 = vsel %vm17316_vm11, 1.0, %v16726_v24  ;;  %v3297_v18 = vsel %vm17317_vm15, %v2969_v7, 0.0  ;;  %v3081_v0 = vmul.f32 %v17318_v14, %v2969_v7  ;;  %v2971_v32 = vmul.f32 %v6204_v20, %v12096_v26  ;;  %v4730_v19 = vpop.f32.mrf.mxu0  ;;  %vm17325_vm15 = vmmov %vm17320_vm7  ;;  %v17328_v14 = vld [vmem:[#allocation195_spill] sm:$0xff] }
 0x307   :  { %3150 = vadd.xlane.f32.xlu1 %v3149_v34  ;;  %vm2804_vm2 = vcmp.ne.f32.partialorder %v2639_v5, %v12141_v58  ;;  %v12374_v54 = vmul.f32 49.0, %v12342_v13  ;;  %v12377_v61 = vmul.f32 49.0, %v12350_v9  ;;  %3295 = vadd.xlane.f32.xlu0 %v3294_v35  ;;  %v3080_v25 = vmul.f32 %v17319_v49, %v2968_v3  ;;  %v2643_v22 = vpop.f32.mrf.mxu1 }
 0x308   :  { %v6205_v42 = vsel %vm2804_vm2, 1.0, %v16726_v24  ;;  %v3152_v31 = vsel %vm17320_vm7, %v3081_v0, 0.0  ;;  %v12383_v26 = vmul.f32 49.0, %v12363_v17  ;;  %vm2805_vm9 = vcmp.ne.f32.partialorder %v2641_v16, %v12144_v38  ;;  %v4734_v20 = vpop.f32.mrf.mxu0  ;;  %v17330_v16 = vld [vmem:[#allocation128_spill] sm:$0xff] }
 0x309   :  { %v3298_v58 = vadd.f32 %v3297_v18, %v2968_v3  ;;  %v3083_v10 = vmul.f32 %v17321_v33, %v2971_v32  ;;  %vm17323_vm4 = vcmp.eq.s32.totalorder %v17322_v36, 0  ;;  %v2972_v51 = vmul.f32 %v6205_v42, %v12102_v12  ;;  %v2645_v12 = vpop.f32.mrf.mxu1 }
 0x30a   :  { %v12390_v7 = vsel %vm17323_vm4, 1.0, %v16726_v24  ;;  %v6206_v40 = vsel %vm2805_vm9, 1.0, %v16726_v24  ;;  %v3082_v2 = vmul.f32 %v17324_v23, %v12366_v55  ;;  %v3153_v39 = vadd.f32 %v3152_v31, %v3080_v25  ;;  %vm17326_vm9 = vmmov %vm17320_vm7  ;;  %v17331_v25 = vld [vmem:[#allocation191_spill] sm:$0xff] }
 0x30b   :  { %v2973_v38 = vmul.f32 %v6206_v40, %v12107_v28  ;;  %vm2806_vm11 = vcmp.ne.f32.partialorder %v2643_v22, %v12149_v50  ;;  %v4848_v3 = vpack.c.bf16 %v4730_v19, %v4726_v27  ;;  %v3156_v34 = vsel %vm17325_vm15, %v3083_v10, 0.0  ;;  %3299 = vadd.xlane.f32.xlu0 %v3298_v58  ;;  %v17327_v50 = vld [vmem:[#allocation126_spill] sm:$0xff]  ;;  %v17333_v58 = vld [vmem:[#allocation100_spill] sm:$0xff]  ;;  %v17334_v10 = vld [vmem:[#allocation349_spill] sm:$0xff] }
 0x30c   :  { %v4847_v35 = vpack.c.bf16 %v4728_v41, %v4724_v15  ;;  %v6207_v60 = vsel %vm2806_vm11, 1.0, %v16726_v24  ;;  %v3157_v5 = vadd.f32 %v3156_v34, %v3082_v2  ;;  %v12401_v18 = vmul.f32 49.0, %v12390_v7  ;;  %v4736_v41 = vpop.f32.mrf.mxu0 }
 0x30d   :  { %vm2807_vm2 = vcmp.ne.f32.partialorder %v2645_v12, %v12152_v11  ;;  %6565 = vmatprep.mubr.msk.bf16.mxu1 %vm17320_vm7, %v4848_v3  ;;  %v3305_v28 = vsel %vm17326_vm9, %v2973_v38, 0.0  ;;  %v3085_v27 = vmul.f32 %v17327_v50, %v2973_v38  ;;  %vm17329_vm4 = vcmp.eq.s32.totalorder %v17328_v14, 0  ;;  %v2649_v11 = vpop.f32.mrf.mxu1  ;;  %vm17335_vm9 = vmmov %vm17320_vm7  ;;  %v17336_v3 = vld [vmem:[#allocation296_spill] sm:$0xff]  ;;  %v17339_v12 = vld [vmem:[#allocation103_spill] sm:$0xff] }
 0x30e   :  { %v12410_v15 = vsel %vm17329_vm4, 1.0, %v16726_v24  ;;  %v12413_v0 = vmul.f32 %v6207_v60, %v12112_v4  ;;  %v6208_v42 = vsel %vm2807_vm2, 1.0, %v16726_v24  ;;  %4966 = vmatmul.mubr.bf16.gmra.mxu1 %v4847_v35  ;;  %3158 = vadd.xlane.f32.xlu1 %v3157_v5  ;;  %v3084_v49 = vmul.f32 %v17330_v16, %v2972_v51  ;;  %v4738_v22 = vpop.f32.mrf.mxu0 }
 0x30f   :  { %vm17332_vm11 = vcmp.eq.s32.totalorder %v17331_v25, 0  ;;  %v2975_v33 = vmul.f32 %v6208_v42, %v17333_v58  ;;  %vm2808_vm15 = vcmp.ne.f32.partialorder %v2649_v11, %v17334_v10  ;;  %v3301_v4 = vsel %vm17320_vm7, %v2971_v32, 0.0  ;;  %3154 = vadd.xlane.f32.xlu0 %v3153_v39  ;;  %v2651_v19 = vpop.f32.mrf.mxu1  ;;  %v17337_v32 = vld [vmem:[#allocation186_spill] sm:$0xff] }
 0x310   :  { %v12420_v31 = vsel %vm17332_vm11, 1.0, %v16726_v24  ;;  %v3160_v36 = vsel %vm17335_vm9, %v3085_v27, 0.0  ;;  %v6209_v40 = vsel %vm2808_vm15, 1.0, %v16726_v24  ;;  %v3306_v23 = vadd.f32 %v3305_v28, %v2972_v51  ;;  %v4740_v5 = vpop.f32.mrf.mxu0  ;;  %vm17341_vm15 = vmmov %vm17320_vm7 }
 0x311   :  { %v3161_v2 = vadd.f32 %v3160_v36, %v3084_v49  ;;  %v12428_v38 = vmul.f32 49.0, %v12410_v15  ;;  %vm2809_vm2 = vcmp.ne.f32.partialorder %v2651_v19, %v12192_v1  ;;  %v3087_v34 = vmul.f32 %v17336_v3, %v2975_v33  ;;  %v2653_v28 = vpop.f32.mrf.mxu1  ;;  %v17340_v1 = vld [vmem:[#allocation53_spill] sm:$0xff] }
 0x312   :  { %v12433_v35 = vmul.f32 49.0, %v12420_v31  ;;  %vm17338_vm4 = vcmp.eq.s32.totalorder %v17337_v32, 0  ;;  %v2976_v39 = vmul.f32 %v6209_v40, %v17339_v12  ;;  %v6210_v51 = vsel %vm2809_vm2, 1.0, %v16726_v24  ;;  %3307 = vadd.xlane.f32.xlu1 %v3306_v23  ;;  %v4744_v25 = vpop.f32.mrf.mxu0  ;;  %vm17342_vm2 = vmmov %vm17335_vm9  ;;  %v17347_v23 = vld [vmem:[#allocation40_spill] sm:$0xff]  ;;  %v17350_v12 = vld [vmem:[#allocation22_spill] sm:$0xff] }
 0x313   :  { %v12438_v60 = vsel %vm17338_vm4, 1.0, %v16726_v24  ;;  %v3302_v50 = vadd.f32 %v3301_v4, %v12366_v55  ;;  %v3086_v27 = vmul.f32 %v17340_v1, %v12413_v0  ;;  %v2977_v14 = vmul.f32 %v6210_v51, %v12163_v21  ;;  %v2655_v58 = vpop.f32.mrf.mxu1  ;;  %v17343_v55 = vld [vmem:[#allocation117_spill] sm:$0xff]  ;;  %v17346_v4 = vld [vmem:[#allocation316_spill] sm:$0xff] }
 0x314   :  { %v4850_v42 = vpack.c.bf16 %v4740_v5, %v4736_v41  ;;  %vm2810_vm11 = vcmp.ne.f32.partialorder %v2653_v28, %v12195_v56  ;;  %v3164_v11 = vsel %vm17341_vm15, %v3087_v34, 0.0  ;;  %v4849_v16 = vpack.c.bf16 %v4738_v22, %v4734_v20  ;;  %v17344_v41 = vld [vmem:[#allocation184_spill] sm:$0xff]  ;;  %v4746_v19 = vpop.f32.mrf.mxu0  ;;  %v17348_v34 = vld [vmem:[#allocation187_spill] sm:$0xff] }
 0x315   :  { %v6211_v49 = vsel %vm2810_vm11, 1.0, %v16726_v24  ;;  %3303 = vadd.xlane.f32.xlu0 %v3302_v50  ;;  %v3165_v10 = vadd.f32 %v3164_v11, %v3086_v27  ;;  %v12450_v36 = vmul.f32 49.0, %v12438_v60  ;;  %vm2811_vm7 = vcmp.ne.f32.partialorder %v2655_v58, %v12200_v43  ;;  %v2659_v43 = vpop.f32.mrf.mxu1  ;;  %v17351_v5 = vld [vmem:[#allocation96_spill] sm:$0xff] }
 0x316   :  { %6566 = vmatprep.mubr.msk.bf16.mxu1 %vm17335_vm9, %v4850_v42  ;;  %v3313_v21 = vsel %vm17342_vm2, %v2977_v14, 0.0  ;;  %v3089_v56 = vmul.f32 %v17343_v55, %v2977_v14  ;;  %vm17345_vm4 = vcmp.eq.s32.totalorder %v17344_v41, 0  ;;  %v12462_v40 = vmul.f32 %v6211_v49, %v17346_v4  ;;  %vm17352_vm9 = vmmov %vm17342_vm2  ;;  %v4748_v27 = vpop.f32.mrf.mxu0  ;;  %v17353_v49 = vld [vmem:[#allocation46_spill] sm:$0xff] }
 0x317   :  { %v12459_v20 = vsel %vm17345_vm4, 1.0, %v16726_v24  ;;  %v6212_v22 = vsel %vm2811_vm7, 1.0, %v16726_v24  ;;  %4976 = vmatmul.mubr.bf16.gmra.mxu1 %v4849_v16  ;;  %3166 = vadd.xlane.f32.xlu1 %v3165_v10  ;;  %v3088_v3 = vmul.f32 %v17347_v23, %v2976_v39  ;;  %vm17349_vm11 = vcmp.eq.s32.totalorder %v17348_v34, 0  ;;  %v2661_v14 = vpop.f32.mrf.mxu1 }
 0x318   :  { %v12469_v32 = vsel %vm17349_vm11, 1.0, %v16726_v24  ;;  %v2979_v51 = vmul.f32 %v6212_v22, %v17350_v12  ;;  %vm2812_vm15 = vcmp.ne.f32.partialorder %v2659_v43, %v17351_v5  ;;  %v3309_v28 = vsel %vm17352_vm9, %v2975_v33, 0.0  ;;  %v17354_v33 = vld [vmem:[#allocation185_spill] sm:$0xff] }
 0x319   :  { %v3168_v50 = vsel %vm17342_vm2, %v3089_v56, 0.0  ;;  %v6213_v1 = vsel %vm2812_vm15, 1.0, %v16726_v24  ;;  %3162 = vadd.xlane.f32.xlu0 %v3161_v2  ;;  %v3314_v42 = vadd.f32 %v3313_v21, %v2976_v39  ;;  %v12477_v16 = vmul.f32 49.0, %v12459_v20  ;;  %v17356_v56 = vld [vmem:[#allocation57_spill] sm:$0xff]  ;;  %v4750_v21 = vpop.f32.mrf.mxu0  ;;  %v2663_v41 = vpop.f32.mrf.mxu1  ;;  %vm17358_vm15 = vmmov %vm17342_vm2 }
 0x31a   :  { %v3169_v11 = vadd.f32 %v3168_v50, %v3088_v3  ;;  %vm2813_vm7 = vcmp.ne.f32.partialorder %v2661_v14, %v12240_v62  ;;  %v3091_v58 = vmul.f32 %v17353_v49, %v2979_v51  ;;  %v12482_v10 = vmul.f32 49.0, %v12469_v32  ;;  %v17357_v62 = vld [vmem:[#allocation369_spill] sm:$0xff] }
 0x31b   :  { %vm17355_vm4 = vcmp.eq.s32.totalorder %v17354_v33, 0  ;;  %v2980_v2 = vmul.f32 %v6213_v1, %v17356_v56  ;;  %v6214_v39 = vsel %vm2813_vm7, 1.0, %v16726_v24  ;;  %3315 = vadd.xlane.f32.xlu1 %v3314_v42  ;;  %v3310_v4 = vadd.f32 %v3309_v28, %v12413_v0  ;;  %v4754_v5 = vpop.f32.mrf.mxu0  ;;  %v2665_v50 = vpop.f32.mrf.mxu1  ;;  %vm17359_vm7 = vmmov %vm17342_vm2  ;;  %v17360_v0 = vld [vmem:[#allocation30_spill] sm:$0xff]  ;;  %v17363_v28 = vld [vmem:[#allocation99_spill] sm:$0xff] }
 0x31c   :  { %v12487_v55 = vsel %vm17355_vm4, 1.0, %v16726_v24  ;;  %v3090_v22 = vmul.f32 %v17357_v62, %v12462_v40  ;;  %v2981_v43 = vmul.f32 %v6214_v39, %v12216_v46  ;;  %v4852_v23 = vpack.c.bf16 %v4750_v21, %v4746_v19  ;;  %v17361_v19 = vld [vmem:[#allocation181_spill] sm:$0xff]  ;;  %v17365_v56 = vld [vmem:[#allocation176_spill] sm:$0xff] }
 0x31d   :  { %vm2814_vm11 = vcmp.ne.f32.partialorder %v2663_v41, %v12243_v37  ;;  %v3172_v3 = vsel %vm17358_vm15, %v3091_v58, 0.0  ;;  %v4851_v34 = vpack.c.bf16 %v4748_v27, %v4744_v25  ;;  %3311 = vadd.xlane.f32.xlu0 %v3310_v4  ;;  %v12499_v14 = vmul.f32 49.0, %v12487_v55  ;;  %v4756_v49 = vpop.f32.mrf.mxu0  ;;  %v17364_v58 = vld [vmem:[#allocation245_spill] sm:$0xff] }
 0x31e   :  { %v6215_v12 = vsel %vm2814_vm11, 1.0, %v16726_v24  ;;  %v3173_v1 = vadd.f32 %v3172_v3, %v3090_v22  ;;  %vm2815_vm9 = vcmp.ne.f32.partialorder %v2665_v50, %v12248_v29  ;;  %6567 = vmatprep.mubr.msk.bf16.mxu1 %vm17342_vm2, %v4852_v23  ;;  %v3321_v46 = vsel %vm17359_vm7, %v2981_v43, 0.0  ;;  %v2669_v29 = vpop.f32.mrf.mxu1  ;;  %v17367_v21 = vld [vmem:[#allocation345_spill] sm:$0xff]  ;;  %vm17368_vm7 = vmmov %vm17342_vm2 }
 0x31f   :  { %v3093_v37 = vmul.f32 %v17360_v0, %v2981_v43  ;;  %vm17362_vm4 = vcmp.eq.s32.totalorder %v17361_v19, 0  ;;  %v12511_v27 = vmul.f32 %v6215_v12, %v17363_v28  ;;  %v6216_v42 = vsel %vm2815_vm9, 1.0, %v16726_v24  ;;  %4986 = vmatmul.mubr.bf16.gmra.mxu1 %v4851_v34  ;;  %v4758_v43 = vpop.f32.mrf.mxu0  ;;  %v17369_v50 = vld [vmem:[#allocation41_spill] sm:$0xff] }
 0x320   :  { %v12508_v25 = vsel %vm17362_vm4, 1.0, %v16726_v24  ;;  %3174 = vadd.xlane.f32.xlu1 %v3173_v1  ;;  %v3092_v33 = vmul.f32 %v17364_v58, %v2980_v2  ;;  %vm17366_vm11 = vcmp.eq.s32.totalorder %v17365_v56, 0  ;;  %v2983_v41 = vmul.f32 %v6216_v42, %v17367_v21  ;;  %v2671_v23 = vpop.f32.mrf.mxu1 }
 0x321   :  { %v12518_v39 = vsel %vm17366_vm11, 1.0, %v16726_v24  ;;  %vm2816_vm15 = vcmp.ne.f32.partialorder %v2669_v29, %v12278_v6  ;;  %v3317_v4 = vsel %vm17342_vm2, %v2979_v51, 0.0  ;;  %v3176_v62 = vsel %vm17368_vm7, %v3093_v37, 0.0  ;;  %3170 = vadd.xlane.f32.xlu0 %v3169_v11  ;;  %v17370_v51 = vld [vmem:[#allocation182_spill] sm:$0xff] }
 0x322   :  { %v6217_v22 = vsel %vm2816_vm15, 1.0, %v16726_v24  ;;  %v3322_v3 = vadd.f32 %v3321_v46, %v2980_v2  ;;  %v3177_v34 = vadd.f32 %v3176_v62, %v3092_v33  ;;  %v12526_v12 = vmul.f32 49.0, %v12508_v25  ;;  %v4760_v46 = vpop.f32.mrf.mxu0  ;;  %v2673_v37 = vpop.f32.mrf.mxu1  ;;  %vm17373_vm15 = vmmov %vm17342_vm2 }
 0x323   :  { %vm2817_vm9 = vcmp.ne.f32.partialorder %v2671_v23, %v12283_v30  ;;  %v3095_v1 = vmul.f32 %v17369_v50, %v2983_v41  ;;  %v12531_v6 = vmul.f32 49.0, %v12518_v39  ;;  %vm17371_vm4 = vcmp.eq.s32.totalorder %v17370_v51, 0  ;;  %v17372_v30 = vld [vmem:[#allocation113_spill] sm:$0xff] }
 0x324   :  { %v12536_v0 = vsel %vm17371_vm4, 1.0, %v16726_v24  ;;  %v2984_v11 = vmul.f32 %v6217_v22, %v12253_v47  ;;  %v6218_v2 = vsel %vm2817_vm9, 1.0, %v16726_v24  ;;  %3323 = vadd.xlane.f32.xlu1 %v3322_v3  ;;  %v3318_v19 = vadd.f32 %v3317_v4, %v12462_v40  ;;  %v4764_v56 = vpop.f32.mrf.mxu0  ;;  %v2675_v21 = vpop.f32.mrf.mxu1  ;;  %vm17374_vm9 = vmmov %vm17368_vm7  ;;  %v17375_v40 = vld [vmem:[#allocation118_spill] sm:$0xff]  ;;  %v17378_v3 = vld [vmem:[#allocation239_spill] sm:$0xff] }
 0x325   :  { %v3094_v28 = vmul.f32 %v17372_v30, %v12511_v27  ;;  %v2985_v42 = vmul.f32 %v6218_v2, %v12269_v63  ;;  %v4854_v29 = vpack.c.bf16 %v4760_v46, %v4756_v49  ;;  %vm2818_vm11 = vcmp.ne.f32.partialorder %v2673_v37, %v12321_v52  ;;  %v17376_v49 = vld [vmem:[#allocation177_spill] sm:$0xff] }
 0x326   :  { %v3180_v58 = vsel %vm17373_vm15, %v3095_v1, 0.0  ;;  %v4853_v33 = vpack.c.bf16 %v4758_v43, %v4754_v5  ;;  %v6219_v47 = vsel %vm2818_vm11, 1.0, %v16726_v24  ;;  %3319 = vadd.xlane.f32.xlu0 %v3318_v19  ;;  %v12548_v22 = vmul.f32 49.0, %v12536_v0  ;;  %v4766_v23 = vpop.f32.mrf.mxu0  ;;  %v17379_v1 = vld [vmem:[#allocation172_spill] sm:$0xff] }
 0x327   :  { %v3181_v62 = vadd.f32 %v3180_v58, %v3094_v28  ;;  %vm2819_vm2 = vcmp.ne.f32.partialorder %v2675_v21, %v12329_v57  ;;  %6568 = vmatprep.mubr.msk.bf16.mxu1 %vm17368_vm7, %v4854_v29  ;;  %v3329_v63 = vsel %vm17374_vm9, %v2985_v42, 0.0  ;;  %v3097_v52 = vmul.f32 %v17375_v40, %v2985_v42  ;;  %v2679_v57 = vpop.f32.mrf.mxu1  ;;  %vm17381_vm9 = vmmov %vm17368_vm7  ;;  %v17382_v58 = vld [vmem:[#allocation365_spill] sm:$0xff] }
 0x328   :  { %vm17377_vm4 = vcmp.eq.s32.totalorder %v17376_v49, 0  ;;  %v12560_v4 = vmul.f32 %v6219_v47, %v12288_v48  ;;  %v6220_v43 = vsel %vm2819_vm2, 1.0, %v16726_v24  ;;  %4996 = vmatmul.mubr.bf16.gmra.mxu1 %v4853_v33  ;;  %v3096_v50 = vmul.f32 %v17378_v3, %v2984_v11  ;;  %v4768_v19 = vpop.f32.mrf.mxu0 }
 0x329   :  { %v12557_v5 = vsel %vm17377_vm4, 1.0, %v16726_v24  ;;  %3182 = vadd.xlane.f32.xlu1 %v3181_v62  ;;  %vm17380_vm11 = vcmp.eq.s32.totalorder %v17379_v1, 0  ;;  %v2987_v2 = vmul.f32 %v6220_v43, %v12294_v53  ;;  %vm2820_vm15 = vcmp.ne.f32.partialorder %v2679_v57, %v12332_v44  ;;  %v2681_v30 = vpop.f32.mrf.mxu1 }
 0x32a   :  { %v12567_v51 = vsel %vm17380_vm11, 1.0, %v16726_v24  ;;  %v3325_v48 = vsel %vm17368_vm7, %v2983_v41, 0.0  ;;  %v3184_v46 = vsel %vm17381_vm9, %v3097_v52, 0.0  ;;  %v6221_v37 = vsel %vm2820_vm15, 1.0, %v16726_v24  ;;  %3178 = vadd.xlane.f32.xlu0 %v3177_v34  ;;  %v17383_v41 = vld [vmem:[#allocation170_spill] sm:$0xff]  ;;  %v4770_v47 = vpop.f32.mrf.mxu0  ;;  %vm17386_vm15 = vmmov %vm17368_vm7 }
 0x32b   :  { %v3330_v28 = vadd.f32 %v3329_v63, %v2984_v11  ;;  %v3185_v42 = vadd.f32 %v3184_v46, %v3096_v50  ;;  %v12575_v29 = vmul.f32 49.0, %v12557_v5  ;;  %vm2821_vm2 = vcmp.ne.f32.partialorder %v2681_v30, %v12335_v45  ;;  %v2683_v21 = vpop.f32.mrf.mxu1  ;;  %v17385_v45 = vld [vmem:[#allocation115_spill] sm:$0xff] }
 0x32c   :  { %v3099_v53 = vmul.f32 %v17382_v58, %v2987_v2  ;;  %v12580_v44 = vmul.f32 49.0, %v12567_v51  ;;  %vm17384_vm4 = vcmp.eq.s32.totalorder %v17383_v41, 0  ;;  %v2988_v34 = vmul.f32 %v6221_v37, %v12299_v8  ;;  %v4774_v57 = vpop.f32.mrf.mxu0 }
 0x32d   :  { %v12585_v33 = vsel %vm17384_vm4, 1.0, %v16726_v24  ;;  %v6222_v11 = vsel %vm2821_vm2, 1.0, %v16726_v24  ;;  %3331 = vadd.xlane.f32.xlu1 %v3330_v28  ;;  %v3326_v62 = vadd.f32 %v3325_v48, %v12511_v27  ;;  %v3098_v63 = vmul.f32 %v17385_v45, %v12560_v4  ;;  %v2685_v3 = vpop.f32.mrf.mxu1  ;;  %vm17387_vm2 = vmmov %vm17381_vm9  ;;  %v17388_v27 = vld [vmem:[#allocation33_spill] sm:$0xff]  ;;  %v17392_v28 = vld [vmem:[#allocation171_spill] sm:$0xff] }
 0x32e   :  { %v2989_v40 = vmul.f32 %v6222_v11, %v12316_v59  ;;  %v4856_v52 = vpack.c.bf16 %v4770_v47, %v4766_v23  ;;  %vm2822_vm11 = vcmp.ne.f32.partialorder %v2683_v21, %v12374_v54  ;;  %v3188_v49 = vsel %vm17386_vm15, %v3099_v53, 0.0  ;;  %v17389_v23 = vld [vmem:[#allocation173_spill] sm:$0xff]  ;;  %v4776_v37 = vpop.f32.mrf.mxu0 }
 0x32f   :  { %v4855_v43 = vpack.c.bf16 %v4768_v19, %v4764_v56  ;;  %v6223_v8 = vsel %vm2822_vm11, 1.0, %v16726_v24  ;;  %3327 = vadd.xlane.f32.xlu0 %v3326_v62  ;;  %v3189_v50 = vadd.f32 %v3188_v49, %v3098_v63  ;;  %v12597_v1 = vmul.f32 49.0, %v12585_v33  ;;  %v17391_v19 = vld [vmem:[#allocation34_spill] sm:$0xff] }
 0x330   :  { %vm2823_vm7 = vcmp.ne.f32.partialorder %v2685_v3, %v12377_v61  ;;  %6569 = vmatprep.mubr.msk.bf16.mxu1 %vm17381_vm9, %v4856_v52  ;;  %v3337_v59 = vsel %vm17387_vm2, %v2989_v40, 0.0  ;;  %v3101_v54 = vmul.f32 %v17388_v27, %v2989_v40  ;;  %vm17390_vm4 = vcmp.eq.s32.totalorder %v17389_v23, 0  ;;  %v2689_v61 = vpop.f32.mrf.mxu1  ;;  %vm17394_vm9 = vmmov %vm17387_vm2  ;;  %v4778_v47 = vpop.f32.mrf.mxu0  ;;  %v17395_v40 = vld [vmem:[#allocation29_spill] sm:$0xff] }
 0x331   :  { %v12606_v56 = vsel %vm17390_vm4, 1.0, %v16726_v24  ;;  %v12609_v48 = vmul.f32 %v6223_v8, %v12342_v13  ;;  %v6224_v46 = vsel %vm2823_vm7, 1.0, %v16726_v24  ;;  %5006 = vmatmul.mubr.bf16.gmra.mxu1 %v4855_v43  ;;  %3190 = vadd.xlane.f32.xlu1 %v3189_v50  ;;  %v3100_v30 = vmul.f32 %v17391_v19, %v2988_v34  ;;  %v17400_v19 = vld [vmem:[#allocation343_spill] sm:$0xff] }
 0x332   :  { %vm17393_vm11 = vcmp.eq.s32.totalorder %v17392_v28, 0  ;;  %v2991_v53 = vmul.f32 %v6224_v46, %v12350_v9  ;;  %vm2824_vm15 = vcmp.ne.f32.partialorder %v2689_v61, %v12383_v26  ;;  %v3333_v13 = vsel %vm17394_vm9, %v2987_v2, 0.0  ;;  %v2691_v21 = vpop.f32.mrf.mxu1  ;;  %v17396_v2 = vld [vmem:[#allocation260_spill] sm:$0xff]  ;;  %v4780_v49 = vpop.f32.mrf.mxu0 }
 0x333   :  { %v12616_v58 = vsel %vm17393_vm11, 1.0, %v16726_v24  ;;  %v3192_v41 = vsel %vm17387_vm2, %v3101_v54, 0.0  ;;  %v6225_v11 = vsel %vm2824_vm15, 1.0, %v16726_v24  ;;  %3186 = vadd.xlane.f32.xlu0 %v3185_v42  ;;  %v3338_v62 = vadd.f32 %v3337_v59, %v2988_v34  ;;  %vm17399_vm15 = vmmov %vm17387_vm2 }
 0x334   :  { %v3193_v45 = vadd.f32 %v3192_v41, %v3100_v30  ;;  %v12624_v63 = vmul.f32 49.0, %v12606_v56  ;;  %vm2825_vm7 = vcmp.ne.f32.partialorder %v2691_v21, %v12401_v18  ;;  %v3103_v9 = vmul.f32 %v17395_v40, %v2991_v53  ;;  %v2693_v43 = vpop.f32.mrf.mxu1  ;;  %v17398_v18 = vld [vmem:[#allocation107_spill] sm:$0xff]  ;;  %v4784_v23 = vpop.f32.mrf.mxu0  ;;  %v17401_v30 = vld [vmem:[#allocation73_spill] sm:$0xff] }
 0x335   :  { %v12629_v26 = vmul.f32 49.0, %v12616_v58  ;;  %vm17397_vm4 = vnez %v17396_v2  ;;  %v2992_v42 = vmul.f32 %v6225_v11, %v12363_v17  ;;  %v6226_v34 = vsel %vm2825_vm7, 1.0, %v16726_v24  ;;  %3339 = vadd.xlane.f32.xlu1 %v3338_v62  ;;  %vm17402_vm7 = vmmov %vm17387_vm2 }
 0x336   :  { %v12634_v52 = vsel %vm17397_vm4, 1.0, %v16726_v24  ;;  %v3334_v8 = vadd.f32 %v3333_v13, %v12560_v4  ;;  %v3102_v3 = vmul.f32 %v17398_v18, %v12609_v48  ;;  %v2993_v50 = vmul.f32 %v6226_v34, %v12390_v7  ;;  %v2695_v46 = vpop.f32.mrf.mxu1  ;;  %v4786_v11 = vpop.f32.mrf.mxu0 }
 0x337   :  { %v4858_v59 = vpack.c.bf16 %v4780_v49, %v4776_v37  ;;  %vm2826_vm11 = vcmp.ne.f32.partialorder %v2693_v43, %v12428_v38  ;;  %v3196_v27 = vsel %vm17399_vm15, %v3103_v9, 0.0  ;;  %v4857_v54 = vpack.c.bf16 %v4778_v47, %v4774_v57  ;;  %v17403_v38 = vld [vmem:[#allocation102_spill] sm:$0xff]  ;;  %v17406_v47 = vld [vmem:[#allocation36_spill] sm:$0xff]  ;;  %vm17407_vm15 = vmmov %vm17387_vm2 }
 0x338   :  { %v6227_v17 = vsel %vm2826_vm11, 1.0, %v16726_v24  ;;  %3335 = vadd.xlane.f32.xlu0 %v3334_v8  ;;  %v3197_v61 = vadd.f32 %v3196_v27, %v3102_v3  ;;  %v12647_v4 = vmul.f32 %v17401_v30, %v17400_v19  ;;  %vm2827_vm9 = vcmp.ne.f32.partialorder %v2695_v46, %v12433_v35  ;;  %v17404_v57 = vld [vmem:[#allocation258_spill] sm:$0xff]  ;;  %v2699_v35 = vpop.f32.mrf.mxu1  ;;  %v4788_v34 = vpop.f32.mrf.mxu0  ;;  %v17408_v3 = vld [vmem:[#allocation111_spill] sm:$0xff]  ;;  %v17413_v46 = vld [vmem:[#allocation108_spill] sm:$0xff] }
 0x339   :  { %6570 = vmatprep.mubr.msk.bf16.mxu1 %vm17387_vm2, %v4858_v59  ;;  %v3345_v7 = vsel %vm17402_vm7, %v2993_v50, 0.0  ;;  %v3105_v37 = vmul.f32 %v17403_v38, %v2993_v50  ;;  %vm17405_vm4 = vnez %v17404_v57  ;;  %v12659_v13 = vmul.f32 %v6227_v17, %v12410_v15  ;;  %v17409_v50 = vld [vmem:[#allocation341_spill] sm:$0xff] }
 0x33a   :  { %v12656_v28 = vsel %vm17405_vm4, 1.0, %v16726_v24  ;;  %v6228_v41 = vsel %vm2827_vm9, 1.0, %v16726_v24  ;;  %5016 = vmatmul.mubr.bf16.gmra.mxu1 %v4857_v54  ;;  %3198 = vadd.xlane.f32.xlu1 %v3197_v61  ;;  %v3104_v21 = vmul.f32 %v17406_v47, %v2992_v42  ;;  %v12664_v62 = vmul.f32 49.0, %v12634_v52  ;;  %v2701_v49 = vpop.f32.mrf.mxu1  ;;  %v4790_v54 = vpop.f32.mrf.mxu0 }
 0x33b   :  { %v2995_v40 = vmul.f32 %v6228_v41, %v12420_v31  ;;  %vm2828_vm11 = vcmp.ne.f32.partialorder %v2699_v35, %v12450_v36  ;;  %v3341_v9 = vsel %vm17407_vm15, %v2991_v53, 0.0  ;;  %v3200_v15 = vsel %vm17387_vm2, %v3105_v37, 0.0  ;;  %v17410_v36 = vld [vmem:[#allocation330_spill] sm:$0xff]  ;;  %v17411_v53 = vld [vmem:[#allocation261_spill] sm:$0xff] }
 0x33c   :  { %v6229_v2 = vsel %vm2828_vm11, 1.0, %v16726_v24  ;;  %3194 = vadd.xlane.f32.xlu0 %v3193_v45  ;;  %v3346_v43 = vadd.f32 %v3345_v7, %v2992_v42  ;;  %v3201_v8 = vadd.f32 %v3200_v15, %v3104_v21  ;;  %v12672_v18 = vmul.f32 49.0, %v12656_v28  ;;  %v2703_v17 = vpop.f32.mrf.mxu1  ;;  %vm17414_vm11 = vmmov %vm17387_vm2  ;;  %v4794_v37 = vpop.f32.mrf.mxu0  ;;  %v17419_v15 = vld [vmem:[#allocation366_spill] sm:$0xff] }
 0x33d   :  { %vm2829_vm9 = vcmp.ne.f32.partialorder %v2701_v49, %v12477_v16  ;;  %v3107_v31 = vmul.f32 %v17408_v3, %v2995_v40  ;;  %v12678_v59 = vmul.f32 %v17410_v36, %v17409_v50  ;;  %vm17412_vm7 = vnez %v17411_v53  ;;  %v17421_v49 = vld [vmem:[#allocation71_spill] sm:$0xff] }
 0x33e   :  { %v12683_v27 = vsel %vm17412_vm7, 1.0, %v16726_v24  ;;  %v2996_v45 = vmul.f32 %v6229_v2, %v12438_v60  ;;  %v6230_v42 = vsel %vm2829_vm9, 1.0, %v16726_v24  ;;  %3347 = vadd.xlane.f32.xlu1 %v3346_v43  ;;  %v3342_v16 = vadd.f32 %v3341_v9, %v12609_v48  ;;  %v2705_v57 = vpop.f32.mrf.mxu1  ;;  %vm17415_vm9 = vmmov %vm17387_vm2  ;;  %v17416_v48 = vld [vmem:[#allocation362_spill] sm:$0xff]  ;;  %v4796_v9 = vpop.f32.mrf.mxu0 }
 0x33f   :  { %v3106_v61 = vmul.f32 %v17413_v46, %v12659_v13  ;;  %v2997_v19 = vmul.f32 %v6230_v42, %v12459_v20  ;;  %v4860_v30 = vpack.c.bf16 %v4790_v54, %v4786_v11  ;;  %vm2830_vm4 = vcmp.ne.f32.partialorder %v2703_v17, %v12482_v10  ;;  %v17417_v11 = vld [vmem:[#allocation259_spill] sm:$0xff]  ;;  %v17424_v46 = vld [vmem:[#allocation342_spill] sm:$0xff] }
 0x340   :  { %v3204_v7 = vsel %vm17414_vm11, %v3107_v31, 0.0  ;;  %v4859_v38 = vpack.c.bf16 %v4788_v34, %v4784_v23  ;;  %v6231_v60 = vsel %vm2830_vm4, 1.0, %v16726_v24  ;;  %3343 = vadd.xlane.f32.xlu0 %v3342_v16  ;;  %v12695_v35 = vmul.f32 49.0, %v12683_v27  ;;  %v17420_v34 = vld [vmem:[#allocation344_spill] sm:$0xff]  ;;  %vm17422_vm11 = vmmov %vm17387_vm2  ;;  %v4798_v36 = vpop.f32.mrf.mxu0  ;;  %v17423_v16 = vld [vmem:[#allocation106_spill] sm:$0xff] }
 0x341   :  { %v3205_v41 = vadd.f32 %v3204_v7, %v3106_v61  ;;  %vm2831_vm15 = vcmp.ne.f32.partialorder %v2705_v57, %v12499_v14  ;;  %6571 = vmatprep.mubr.msk.bf16.mxu1 %vm17387_vm2, %v4860_v30  ;;  %v3353_v20 = vsel %vm17415_vm9, %v2997_v19, 0.0  ;;  %v3109_v10 = vmul.f32 %v17416_v48, %v2997_v19  ;;  %v2709_v14 = vpop.f32.mrf.mxu1 }
 0x342   :  { %vm17418_vm7 = vnez %v17417_v11  ;;  %v12707_v47 = vmul.f32 %v6231_v60, %v12469_v32  ;;  %v6232_v21 = vsel %vm2831_vm15, 1.0, %v16726_v24  ;;  %5026 = vmatmul.mubr.bf16.gmra.mxu1 %v4859_v38  ;;  %v3108_v2 = vmul.f32 %v17419_v15, %v2996_v45  ;;  %v4800_v30 = vpop.f32.mrf.mxu0  ;;  %v17428_v38 = vld [vmem:[#allocation104_spill] sm:$0xff] }
 0x343   :  { %v12704_v23 = vsel %vm17418_vm7, 1.0, %v16726_v24  ;;  %3206 = vadd.xlane.f32.xlu1 %v3205_v41  ;;  %v12713_v43 = vmul.f32 %v17421_v49, %v17420_v34  ;;  %v2999_v3 = vmul.f32 %v6232_v21, %v12487_v55  ;;  %vm2832_vm4 = vcmp.ne.f32.partialorder %v2709_v14, %v12526_v12  ;;  %v2711_v53 = vpop.f32.mrf.mxu1  ;;  %v17425_v12 = vld [vmem:[#allocation327_spill] sm:$0xff]  ;;  %v17434_v49 = vld [vmem:[#allocation357_spill] sm:$0xff] }
 0x344   :  { %v3349_v31 = vsel %vm17422_vm11, %v2995_v40, 0.0  ;;  %v3208_v32 = vsel %vm17387_vm2, %v3109_v10, 0.0  ;;  %v6233_v50 = vsel %vm2832_vm4, 1.0, %v16726_v24  ;;  %3202 = vadd.xlane.f32.xlu0 %v3201_v8  ;;  %v3354_v42 = vadd.f32 %v3353_v20, %v2996_v45  ;;  %v17426_v40 = vld [vmem:[#allocation134_spill] sm:$0xff]  ;;  %vm17429_vm4 = vmmov %vm17387_vm2  ;;  %v4804_v10 = vpop.f32.mrf.mxu0 }
 0x345   :  { %v3209_v54 = vadd.f32 %v3208_v32, %v3108_v2  ;;  %v12721_v17 = vmul.f32 49.0, %v12704_v23  ;;  %vm2833_vm15 = vcmp.ne.f32.partialorder %v2711_v53, %v12531_v6  ;;  %v3111_v55 = vmul.f32 %v17423_v16, %v2999_v3  ;;  %v2713_v7 = vpop.f32.mrf.mxu1  ;;  %v17435_v32 = vld [vmem:[#allocation339_spill] sm:$0xff] }
 0x346   :  { %v12727_v61 = vmul.f32 %v17425_v12, %v17424_v46  ;;  %vm17427_vm9 = vnez %v17426_v40  ;;  %v3000_v8 = vmul.f32 %v6233_v50, %v12508_v25  ;;  %v6234_v45 = vsel %vm2833_vm15, 1.0, %v16726_v24  ;;  %vm17430_vm15 = vmmov %vm17387_vm2  ;;  %v4806_v34 = vpop.f32.mrf.mxu0  ;;  %v17436_v50 = vld [vmem:[#allocation76_spill] sm:$0xff] }
 0x347   :  { %v12732_v19 = vsel %vm17427_vm9, 1.0, %v16726_v24  ;;  %3355 = vadd.xlane.f32.xlu1 %v3354_v42  ;;  %v3350_v6 = vadd.f32 %v3349_v31, %v12659_v13  ;;  %v3110_v60 = vmul.f32 %v17428_v38, %v12707_v47  ;;  %v3001_v57 = vmul.f32 %v6234_v45, %v12518_v39  ;;  %v2715_v11 = vpop.f32.mrf.mxu1  ;;  %v17431_v13 = vld [vmem:[#allocation97_spill] sm:$0xff] }
 0x348   :  { %v4862_v41 = vpack.c.bf16 %v4800_v30, %v4796_v9  ;;  %vm2834_vm7 = vcmp.ne.f32.partialorder %v2713_v7, %v12548_v22  ;;  %v3212_v20 = vsel %vm17429_vm4, %v3111_v55, 0.0  ;;  %v4861_v48 = vpack.c.bf16 %v4798_v36, %v4794_v37  ;;  %v17432_v9 = vld [vmem:[#allocation133_spill] sm:$0xff]  ;;  %vm17437_vm4 = vmmov %vm17387_vm2  ;;  %v4808_v55 = vpop.f32.mrf.mxu0 }
 0x349   :  { %v6235_v25 = vsel %vm2834_vm7, 1.0, %v16726_v24  ;;  %3351 = vadd.xlane.f32.xlu0 %v3350_v6  ;;  %v3213_v21 = vadd.f32 %v3212_v20, %v3110_v60  ;;  %v12744_v14 = vmul.f32 49.0, %v12732_v19  ;;  %vm2835_vm11 = vcmp.ne.f32.partialorder %v2715_v11, %v12575_v29  ;;  %v2719_v29 = vpop.f32.mrf.mxu1  ;;  %v17438_v30 = vld [vmem:[#allocation353_spill] sm:$0xff] }
 0x34a   :  { %6572 = vmatprep.mubr.msk.bf16.mxu1 %vm17387_vm2, %v4862_v41  ;;  %v3361_v39 = vsel %vm17430_vm15, %v3001_v57, 0.0  ;;  %v3113_v22 = vmul.f32 %v17431_v13, %v3001_v57  ;;  %vm17433_vm9 = vnez %v17432_v9  ;;  %v12756_v15 = vmul.f32 %v6235_v25, %v12536_v0  ;;  %v17439_v7 = vld [vmem:[#allocation337_spill] sm:$0xff]  ;;  %v4810_v60 = vpop.f32.mrf.mxu0 }
 0x34b   :  { %v12753_v37 = vsel %vm17433_vm9, 1.0, %v16726_v24  ;;  %v6236_v2 = vsel %vm2835_vm11, 1.0, %v16726_v24  ;;  %5036 = vmatmul.mubr.bf16.gmra.mxu1 %v4861_v48  ;;  %3214 = vadd.xlane.f32.xlu1 %v3213_v21  ;;  %v3112_v31 = vmul.f32 %v17434_v49, %v3000_v8  ;;  %v12762_v36 = vmul.f32 %v17436_v50, %v17435_v32  ;;  %v2721_v46 = vpop.f32.mrf.mxu1  ;;  %v17443_v41 = vld [vmem:[#allocation101_spill] sm:$0xff]  ;;  %v17450_v32 = vld [vmem:[#allocation254_spill] sm:$0xff] }
 0x34c   :  { %v3003_v53 = vmul.f32 %v6236_v2, %v12557_v5  ;;  %vm2836_vm7 = vcmp.ne.f32.partialorder %v2719_v29, %v12580_v44  ;;  %v3357_v42 = vsel %vm17437_vm4, %v2999_v3, 0.0  ;;  %v3216_v0 = vsel %vm17387_vm2, %v3113_v22, 0.0  ;;  %v17440_v44 = vld [vmem:[#allocation79_spill] sm:$0xff]  ;;  %v17441_v3 = vld [vmem:[#allocation257_spill] sm:$0xff]  ;;  %v17447_v2 = vld [vmem:[#allocation256_spill] sm:$0xff] }
 0x34d   :  { %v6237_v16 = vsel %vm2836_vm7, 1.0, %v16726_v24  ;;  %3210 = vadd.xlane.f32.xlu0 %v3209_v54  ;;  %v3362_v12 = vadd.f32 %v3361_v39, %v3000_v8  ;;  %v3217_v40 = vadd.f32 %v3216_v0, %v3112_v31  ;;  %v12770_v45 = vmul.f32 49.0, %v12753_v37  ;;  %v2723_v57 = vpop.f32.mrf.mxu1  ;;  %vm17444_vm7 = vmmov %vm17387_vm2  ;;  %v4814_v39 = vpop.f32.mrf.mxu0  ;;  %v17449_v31 = vld [vmem:[#allocation358_spill] sm:$0xff] }
 0x34e   :  { %vm2837_vm11 = vcmp.ne.f32.partialorder %v2721_v46, %v12597_v1  ;;  %v3115_v5 = vmul.f32 %v17438_v30, %v3003_v53  ;;  %v12776_v6 = vmul.f32 %v17440_v44, %v17439_v7  ;;  %vm17442_vm15 = vnez %v17441_v3  ;;  %v17455_v3 = vld [vmem:[#allocation340_spill] sm:$0xff] }
 0x34f   :  { %v12781_v38 = vsel %vm17442_vm15, 1.0, %v16726_v24  ;;  %v3004_v54 = vmul.f32 %v6237_v16, %v12567_v51  ;;  %v6238_v8 = vsel %vm2837_vm11, 1.0, %v16726_v24  ;;  %3363 = vadd.xlane.f32.xlu1 %v3362_v12  ;;  %v3358_v1 = vadd.f32 %v3357_v42, %v12707_v47  ;;  %v2725_v13 = vpop.f32.mrf.mxu1  ;;  %vm17445_vm11 = vmmov %vm17387_vm2  ;;  %v17446_v47 = vld [vmem:[#allocation95_spill] sm:$0xff]  ;;  %v4816_v29 = vpop.f32.mrf.mxu0  ;;  %v17452_v42 = vld [vmem:[#allocation252_spill] sm:$0xff] }
 0x350   :  { %v3114_v20 = vmul.f32 %v17443_v41, %v12756_v15  ;;  %v3005_v48 = vmul.f32 %v6238_v8, %v12585_v33  ;;  %v4864_v25 = vpack.c.bf16 %v4810_v60, %v4806_v34  ;;  %vm2838_vm9 = vcmp.ne.f32.partialorder %v2723_v57, %v12624_v63  ;;  %v17456_v8 = vld [vmem:[#allocation323_spill] sm:$0xff] }
 0x351   :  { %v3220_v11 = vsel %vm17444_vm7, %v3115_v5, 0.0  ;;  %v4863_v21 = vpack.c.bf16 %v4808_v55, %v4804_v10  ;;  %v6239_v51 = vsel %vm2838_vm9, 1.0, %v16726_v24  ;;  %3359 = vadd.xlane.f32.xlu0 %v3358_v1  ;;  %v12793_v9 = vmul.f32 49.0, %v12781_v38  ;;  %v12805_v49 = vpop.f32.mrf.mxu1  ;;  %v4818_v30 = vpop.f32.mrf.mxu0  ;;  %v17457_v57 = vld [vmem:[#allocation255_spill] sm:$0xff] }
 0x352   :  { %v3221_v22 = vadd.f32 %v3220_v11, %v3114_v20  ;;  %vm2839_vm4 = vcmp.ne.f32.partialorder %v2725_v13, %v12629_v26  ;;  %6573 = vmatprep.mubr.msk.bf16.mxu1 %vm17387_vm2, %v4864_v25  ;;  %v3369_v33 = vsel %vm17445_vm11, %v3005_v48, 0.0  ;;  %v3117_v63 = vmul.f32 %v17446_v47, %v3005_v48  ;;  %v17461_v41 = vld [vmem:[#allocation75_spill] sm:$0xff] }
 0x353   :  { %vm17448_vm15 = vnez %v17447_v2  ;;  %v6240_v34 = vsel %vm2839_vm4, 1.0, %v16726_v24  ;;  %5046 = vmatmul.mubr.bf16.gmra.mxu1 %v4863_v21  ;;  %v3116_v26 = vmul.f32 %v17449_v31, %v3004_v54  ;;  %vm17451_vm9 = vnez %v17450_v32  ;;  %vm17454_vm4 = vmmov %vm17387_vm2  ;;  %v12824_v5 = vpop.f32.mrf.mxu1  ;;  %v4820_v48 = vpop.f32.mrf.mxu0  ;;  %v17462_v21 = vld [vmem:[#allocation335_spill] sm:$0xff]  ;;  %v17468_v2 = vld [vmem:[#allocation98_spill] sm:$0xff] }
 0x354   :  { %v12802_v10 = vsel %vm17448_vm15, 1.0, %v16726_v24  ;;  %3222 = vadd.xlane.f32.xlu1 %v3221_v22  ;;  %v12811_v50 = vsel %vm17451_vm9, 1.0, %v16726_v24  ;;  %vm17453_vm7 = vnez %v17452_v42  ;;  %v12819_v16 = vmul.f32 %v6239_v51, %v12606_v56  ;;  %v17463_v51 = vld [vmem:[#allocation65_spill] sm:$0xff]  ;;  %vm17472_vm9 = vmmov %vm17387_vm2 }
 0x355   :  { %v12816_v0 = vsel %vm17453_vm7, 1.0, %v16726_v24  ;;  %v3007_v55 = vmul.f32 %v6240_v34, %v12616_v58  ;;  %v3365_v46 = vsel %vm17454_vm4, %v3003_v53, 0.0  ;;  %v3224_v12 = vsel %vm17387_vm2, %v3117_v63, 0.0  ;;  %3218 = vadd.xlane.f32.xlu0 %v3217_v40  ;;  %v17459_v58 = vld [vmem:[#allocation354_spill] sm:$0xff]  ;;  %v12846_v25 = vpop.f32.mrf.mxu1  ;;  %v17469_v31 = vld [vmem:[#allocation333_spill] sm:$0xff]  ;;  %vm17479_vm4 = vmmov %vm17387_vm2 }
 0x356   :  { %v3370_v7 = vadd.f32 %v3369_v33, %v3004_v54  ;;  %v3225_v44 = vadd.f32 %v3224_v12, %v3116_v26  ;;  %v12828_v60 = vmul.f32 %v17456_v8, %v17455_v3  ;;  %vm17458_vm11 = vnez %v17457_v57  ;;  %v17460_v53 = vld [vmem:[#allocation338_spill] sm:$0xff]  ;;  %v17465_v33 = vld [vmem:[#allocation253_spill] sm:$0xff]  ;;  %v17470_v26 = vld [vmem:[#allocation324_spill] sm:$0xff] }
 0x357   :  { %v12833_v56 = vsel %vm17458_vm11, 1.0, %v16726_v24  ;;  %v3119_v1 = vmul.f32 %v17459_v58, %v3007_v55  ;;  %v12838_v20 = vmul.f32 %v17461_v41, %v17460_v53  ;;  %v12841_v40 = vmul.f32 49.0, %v12802_v10  ;;  %v12870_v12 = vpop.f32.mrf.mxu1  ;;  %v17473_v3 = vld [vmem:[#allocation336_spill] sm:$0xff]  ;;  %v17474_v8 = vld [vmem:[#allocation66_spill] sm:$0xff] }
 0x358   :  { %v12844_v54 = vmul.f32 49.0, %v12811_v50  ;;  %3371 = vadd.xlane.f32.xlu1 %v3370_v7  ;;  %v3366_v11 = vadd.f32 %v3365_v46, %v12756_v15  ;;  %v12851_v13 = vmul.f32 %v17463_v51, %v17462_v21  ;;  %v12854_v22 = vmul.f32 49.0, %v12816_v0  ;;  %v4824_v46 = vpop.f32.mrf.mxu0  ;;  %v17476_v57 = vld [vmem:[#allocation250_spill] sm:$0xff] }
 0x359   :  { %vm17466_vm15 = vnez %v17465_v33  ;;  %v4866_v63 = vpack.c.bf16 %v4820_v48, %v4816_v29  ;;  %v3118_v34 = vmul.f32 %v17468_v2, %v12819_v16  ;;  %v12865_v32 = vmul.f32 %v17470_v26, %v17469_v31  ;;  %v17486_v51 = vld [vmem:[#allocation334_spill] sm:$0xff]  ;;  %v17487_v33 = vld [vmem:[#allocation64_spill] sm:$0xff]  ;;  %v17489_v2 = vld [vmem:[#allocation331_spill] sm:$0xff] }
 0x35a   :  { %17464 = vst [vmem:[#allocation127_spill] sm:$0xff] %v12851_v13  ;;  %v12859_v47 = vsel %vm17466_vm15, 1.0, %v16726_v24  ;;  %v12868_v15 = vmul.f32 49.0, %v12833_v56  ;;  %v4865_v42 = vpack.c.bf16 %v4818_v30, %v4814_v39  ;;  %3367 = vadd.xlane.f32.xlu0 %v3366_v11  ;;  %v3228_v7 = vsel %vm17472_vm9, %v3119_v1, 0.0  ;;  %v17480_v30 = vld [vmem:[#allocation248_spill] sm:$0xff]  ;;  %v17483_v1 = vld [vmem:[#allocation251_spill] sm:$0xff]  ;;  %v12896_v11 = vpop.f32.mrf.mxu1  ;;  %v4826_v21 = vpop.f32.mrf.mxu0 }
 0x35b   :  { %17467 = vst [vmem:[#allocation68_spill] sm:$0xff] %v12859_v47  ;;  %17471 = vst [vmem:[#allocation377_spill] sm:$0xff] %v12865_v32  ;;  %v12875_v29 = vmul.f32 %v17474_v8, %v17473_v3  ;;  %vm17477_vm7 = vnez %v17476_v57  ;;  %6574 = vmatprep.mubr.msk.bf16.mxu1 %vm17479_vm4, %v4866_v63  ;;  %v3229_v53 = vadd.f32 %v3228_v7, %v3118_v34  ;;  %v12884_v39 = vmul.f32 49.0, %v12859_v47  ;;  %v17490_v34 = vld [vmem:[#allocation59_spill] sm:$0xff]  ;;  %v17492_v26 = vld [vmem:[#allocation249_spill] sm:$0xff] }
 0x35c   :  { %v12880_v58 = vsel %vm17477_vm7, 1.0, %v16726_v24  ;;  %vm17481_vm2 = vnez %v17480_v30  ;;  %vm17484_vm11 = vnez %v17483_v1  ;;  %5056 = vmatmul.mubr.bf16.gmra.mxu1 %v4865_v42  ;;  %v12900_v63 = vmul.f32 %v17487_v33, %v17486_v51  ;;  %v17495_v3 = vld [vmem:[#allocation246_spill] sm:$0xff]  ;;  %vm17498_vm7 = vmmov %vm17479_vm4  ;;  %v17499_v30 = vld [vmem:[#allocation328_spill] sm:$0xff] }
 0x35d   :  { %17475 = vst [vmem:[#allocation350_spill] sm:$0xff] %v12875_v29  ;;  %17478 = vst [vmem:[#allocation309_spill] sm:$0xff] %v12880_v58  ;;  %v12889_v41 = vsel %vm17481_vm2, 1.0, %v16726_v24  ;;  %v12894_v48 = vsel %vm17484_vm11, 1.0, %v16726_v24  ;;  %v12904_v31 = vmul.f32 %v17490_v34, %v17489_v2  ;;  %vm17493_vm15 = vnez %v17492_v26  ;;  %3230 = vadd.xlane.f32.xlu1 %v3229_v53  ;;  %v17500_v1 = vld [vmem:[#allocation54_spill] sm:$0xff]  ;;  %v17502_v33 = vld [vmem:[#allocation243_spill] sm:$0xff]  ;;  %v4828_v34 = vpop.f32.mrf.mxu0  ;;  %v12929_v26 = vpop.f32.mrf.mxu1 }
 0x35e   :  { %17482 = vst [vmem:[#allocation61_spill] sm:$0xff] %v12889_v41  ;;  %17485 = vst [vmem:[#allocation49_spill] sm:$0xff] %v12894_v48  ;;  %v12909_v7 = vsel %vm17493_vm15, 1.0, %v16726_v24  ;;  %vm17496_vm9 = vnez %v17495_v3  ;;  %v3373_v42 = vsel %vm17498_vm7, %v3007_v55, 0.0  ;;  %v12918_v57 = vmul.f32 49.0, %v12880_v58  ;;  %3226 = vadd.xlane.f32.xlu0 %v3225_v44  ;;  %v17506_v55 = vld [vmem:[#allocation332_spill] sm:$0xff] }
 0x35f   :  { %17488 = vst [vmem:[#allocation346_spill] sm:$0xff] %v12900_v63  ;;  %17491 = vst [vmem:[#allocation90_spill] sm:$0xff] %v12904_v31  ;;  %v12914_v8 = vsel %vm17496_vm9, 1.0, %v16726_v24  ;;  %v12922_v51 = vmul.f32 %v17500_v1, %v17499_v30  ;;  %vm17503_vm4 = vnez %v17502_v33  ;;  %v12932_v53 = vmul.f32 49.0, %v12889_v41  ;;  %v17507_v3 = vld [vmem:[#allocation56_spill] sm:$0xff]  ;;  %v17510_v30 = vld [vmem:[#allocation329_spill] sm:$0xff] }
 0x360   :  { %17494 = vst [vmem:[#allocation93_spill] sm:$0xff] %v12909_v7  ;;  %17497 = vst [vmem:[#allocation16_spill] sm:$0xff] %v12914_v8  ;;  %v12927_v2 = vsel %vm17503_vm4, 1.0, %v16726_v24  ;;  %v12936_v31 = vmul.f32 %v17507_v3, %v17506_v55  ;;  %v12939_v63 = vmul.f32 49.0, %v12894_v48  ;;  %v17511_v1 = vld [vmem:[#allocation312_spill] sm:$0xff]  ;;  %v12946_v33 = vmul.f32 49.0, %v12909_v7  ;;  %v4830_v48 = vpop.f32.mrf.mxu0 }
 0x361   :  { %17501 = vst [vmem:[#allocation85_spill] sm:$0xff] %v12922_v51  ;;  %17504 = vst [vmem:[#allocation89_spill] sm:$0xff] %v12927_v2  ;;  %v12943_v51 = vmul.f32 %v17511_v1, %v17510_v30  ;;  %v17514_v44 = vld [vmem:[#allocation325_spill] sm:$0xff]  ;;  %v17515_v29 = vld [vmem:[#allocation50_spill] sm:$0xff]  ;;  %v12953_v41 = vmul.f32 49.0, %v12914_v8  ;;  %v3374_v30 = vadd.f32 %v3373_v42, %v12819_v16  ;;  %vm17544_vm4 = vcmask 785408  }
 0x362   :  { %17505 = vst [vmem:[#allocation91_spill] sm:$0xff] %v12932_v53  ;;  %17508 = vst [vmem:[#allocation94_spill] sm:$0xff] %v12936_v31  ;;  %v12950_v58 = vmul.f32 %v17515_v29, %v17514_v44  ;;  %v17518_v55 = vld [vmem:[#allocation247_spill] sm:$0xff]  ;;  %v12960_v31 = vpop.f32.mrf.mxu1  ;;  %v17521_v1 = vld [vmem:[#allocation321_spill] sm:$0xff]  ;;  %v12968_v29 = vmul.f32 49.0, %v12927_v2 }
 0x363   :  { %17509 = vst [vmem:[#allocation63_spill] sm:$0xff] %v12939_v63  ;;  %17512 = vst [vmem:[#allocation60_spill] sm:$0xff] %v12943_v51  ;;  %vm17519_vm2 = vnez %v17518_v55  ;;  %v17522_v51 = vld [vmem:[#allocation45_spill] sm:$0xff]  ;;  %v17525_v44 = vld [vmem:[#allocation244_spill] sm:$0xff]  ;;  %v4868_v55 = vpack.c.bf16 %v4830_v48, %v4826_v21  ;;  %3375 = vadd.xlane.f32.xlu0 %v3374_v30 }
 0x364   :  { %17513 = vst [vmem:[#allocation88_spill] sm:$0xff] %v12946_v33  ;;  %17516 = vst [vmem:[#allocation92_spill] sm:$0xff] %v12950_v58  ;;  %v12958_v3 = vsel %vm17519_vm2, 1.0, %v16726_v24  ;;  %v12965_v7 = vmul.f32 %v17522_v51, %v17521_v1  ;;  %vm17526_vm11 = vnez %v17525_v44  ;;  %v17528_v8 = vld [vmem:[#allocation326_spill] sm:$0xff]  ;;  %v17531_v63 = vld [vmem:[#allocation241_spill] sm:$0xff]  ;;  %v4867_v1 = vpack.c.bf16 %v4828_v34, %v4824_v46  ;;  %v4834_v44 = vpop.f32.mrf.mxu0 }
 0x365   :  { %17517 = vst [vmem:[#allocation83_spill] sm:$0xff] %v12953_v41  ;;  %17520 = vst [vmem:[#allocation86_spill] sm:$0xff] %v12958_v3  ;;  %v12973_v58 = vsel %vm17526_vm11, 1.0, %v16726_v24  ;;  %v17529_v41 = vld [vmem:[#allocation44_spill] sm:$0xff]  ;;  %vm17532_vm15 = vnez %v17531_v63  ;;  %v17534_v42 = vld [vmem:[#allocation235_spill] sm:$0xff]  ;;  %v12992_v48 = vmul.f32 49.0, %v12958_v3  ;;  %6575 = vmatprep.mubr.msk.bf16.mxu1 %vm17544_vm4, %v4868_v55 }
 0x366   :  { %17523 = vst [vmem:[#allocation302_spill] sm:$0xff] %v12965_v7  ;;  %17524 = vst [vmem:[#allocation37_spill] sm:$0xff] %v12968_v29  ;;  %v12977_v33 = vmul.f32 %v17529_v41, %v17528_v8  ;;  %v12982_v16 = vsel %vm17532_vm15, 1.0, %v16726_v24  ;;  %vm17535_vm9 = vnez %v17534_v42  ;;  %v12989_v7 = vpop.f32.mrf.mxu1  ;;  %v17538_v41 = vld [vmem:[#allocation322_spill] sm:$0xff]  ;;  %v17539_v21 = vld [vmem:[#allocation43_spill] sm:$0xff]  ;;  %v13005_v46 = vmul.f32 49.0, %v12973_v58  ;;  %v4836_v55 = vpop.f32.mrf.mxu0  ;;  %5066 = vmatmul.mubr.bf16.gmra.mxu1 %v4867_v1 }
 0x367   :  { %17527 = vst [vmem:[#allocation51_spill] sm:$0xff] %v12973_v58  ;;  %17533 = vst [vmem:[#allocation81_spill] sm:$0xff] %v12982_v16  ;;  %v12987_v51 = vsel %vm17535_vm9, 1.0, %v16726_v24  ;;  %v12996_v8 = vmul.f32 %v17539_v21, %v17538_v41  ;;  %v17541_v63 = vld [vmem:[#allocation242_spill] sm:$0xff]  ;;  %v17546_v34 = vld [vmem:[#allocation317_spill] sm:$0xff] }
 0x368   :  { %17530 = vst [vmem:[#allocation78_spill] sm:$0xff] %v12977_v33  ;;  %17536 = vst [vmem:[#allocation84_spill] sm:$0xff] %v12987_v51  ;;  %vm17542_vm7 = vnez %v17541_v63  ;;  %v17547_v42 = vld [vmem:[#allocation38_spill] sm:$0xff]  ;;  %v17549_v3 = vld [vmem:[#allocation236_spill] sm:$0xff]  ;;  %v13021_v63 = vpop.f32.mrf.mxu1 }
 0x369   :  { %17537 = vst [vmem:[#allocation87_spill] sm:$0xff] %v12992_v48  ;;  %17540 = vst [vmem:[#allocation80_spill] sm:$0xff] %v12996_v8  ;;  %v13001_v33 = vsel %vm17542_vm7, 1.0, %v16726_v24  ;;  %v13009_v30 = vmul.f32 %v17547_v42, %v17546_v34  ;;  %vm17550_vm2 = vnez %v17549_v3  ;;  %v17552_v41 = vld [vmem:[#allocation233_spill] sm:$0xff]  ;;  %v13024_v8 = vmul.f32 49.0, %v12982_v16  ;;  %v17557_v34 = vld [vmem:[#allocation39_spill] sm:$0xff] }
 0x36a   :  { %17543 = vst [vmem:[#allocation82_spill] sm:$0xff] %v13001_v33  ;;  %17545 = vst [vmem:[#allocation167_spill] sm:$0xff] %v13005_v46  ;;  %v13014_v2 = vsel %vm17550_vm2, 1.0, %v16726_v24  ;;  %vm17553_vm11 = vnez %v17552_v41  ;;  %v17556_v58 = vld [vmem:[#allocation313_spill] sm:$0xff]  ;;  %v13031_v3 = vmul.f32 49.0, %v12987_v51  ;;  %v17563_v46 = vld [vmem:[#allocation318_spill] sm:$0xff]  ;;  %v4838_v51 = vpop.f32.mrf.mxu0 }
 0x36b   :  { %17548 = vst [vmem:[#allocation162_spill] sm:$0xff] %v13009_v30  ;;  %17551 = vst [vmem:[#allocation168_spill] sm:$0xff] %v13014_v2  ;;  %v13019_v21 = vsel %vm17553_vm11, 1.0, %v16726_v24  ;;  %v13028_v42 = vmul.f32 %v17557_v34, %v17556_v58  ;;  %v17560_v30 = vld [vmem:[#allocation228_spill] sm:$0xff]  ;;  %v13043_v1 = vmul.f32 49.0, %v13001_v33  ;;  %v17567_v16 = vld [vmem:[#allocation234_spill] sm:$0xff] }
 0x36c   :  { %17554 = vst [vmem:[#allocation163_spill] sm:$0xff] %v13019_v21  ;;  %17555 = vst [vmem:[#allocation159_spill] sm:$0xff] %v13024_v8  ;;  %vm17561_vm15 = vnez %v17560_v30  ;;  %v17564_v48 = vld [vmem:[#allocation32_spill] sm:$0xff]  ;;  %vm17568_vm9 = vnez %v17567_v16  ;;  %v17570_v34 = vld [vmem:[#allocation229_spill] sm:$0xff]  ;;  %v13055_v30 = vpop.f32.mrf.mxu1 }
 0x36d   :  { %17558 = vst [vmem:[#allocation157_spill] sm:$0xff] %v13028_v42  ;;  %17559 = vst [vmem:[#allocation109_spill] sm:$0xff] %v13031_v3  ;;  %v13036_v41 = vsel %vm17561_vm15, 1.0, %v16726_v24  ;;  %v13040_v29 = vmul.f32 %v17564_v48, %v17563_v46  ;;  %v13048_v58 = vsel %vm17568_vm9, 1.0, %v16726_v24  ;;  %vm17571_vm7 = vnez %v17570_v34  ;;  %v17573_v3 = vld [vmem:[#allocation314_spill] sm:$0xff]  ;;  %v17574_v8 = vld [vmem:[#allocation23_spill] sm:$0xff] }
 0x36e   :  { %17562 = vst [vmem:[#allocation160_spill] sm:$0xff] %v13036_v41  ;;  %17566 = vst [vmem:[#allocation154_spill] sm:$0xff] %v13043_v1  ;;  %v13053_v42 = vsel %vm17571_vm7, 1.0, %v16726_v24  ;;  %v13059_v48 = vmul.f32 %v17574_v8, %v17573_v3  ;;  %v13062_v46 = vmul.f32 49.0, %v13014_v2  ;;  %v17577_v33 = vld [vmem:[#allocation286_spill] sm:$0xff]  ;;  %v13069_v1 = vmul.f32 49.0, %v13019_v21 }
 0x36f   :  { %17565 = vst [vmem:[#allocation158_spill] sm:$0xff] %v13040_v29  ;;  %17569 = vst [vmem:[#allocation151_spill] sm:$0xff] %v13048_v58  ;;  %v17576_v29 = vld [vmem:[#allocation307_spill] sm:$0xff]  ;;  %v17579_v34 = vld [vmem:[#allocation298_spill] sm:$0xff]  ;;  %v13076_v13 = vmul.f32 49.0, %v13036_v41  ;;  %v13097_v41 = vmul.f32 49.0, %v13053_v42  ;;  %vm4418_vm9 = vcmp.ne.f32.partialorder %v12805_v49, %v12664_v62 }
 0x370   :  { %17572 = vst [vmem:[#allocation155_spill] sm:$0xff] %v13053_v42  ;;  %17575 = vst [vmem:[#allocation152_spill] sm:$0xff] %v13059_v48  ;;  %v13066_v16 = vmul.f32 %v17577_v33, %v17576_v29  ;;  %v17580_v32 = vld [vmem:[#allocation28_spill] sm:$0xff]  ;;  %v17584_v8 = vld [vmem:[#allocation27_spill] sm:$0xff]  ;;  %v13087_v33 = vpop.f32.mrf.mxu1  ;;  %v4840_v29 = vpop.f32.mrf.mxu0  ;;  %vm17609_vm7 = vcmask 785408  }
 0x371   :  { %v13073_v47 = vmul.f32 %v17580_v32, %v17579_v34  ;;  %17582 = vst [vmem:[#allocation150_spill] sm:$0xff] %v13076_v13  ;;  %v17583_v53 = vld [vmem:[#allocation308_spill] sm:$0xff]  ;;  %v17586_v48 = vld [vmem:[#allocation226_spill] sm:$0xff]  ;;  %v17589_v32 = vld [vmem:[#allocation301_spill] sm:$0xff] }
 0x372   :  { %17578 = vst [vmem:[#allocation149_spill] sm:$0xff] %v13066_v16  ;;  %v13080_v3 = vmul.f32 %v17584_v8, %v17583_v53  ;;  %vm17587_vm4 = vnez %v17586_v48  ;;  %v13090_v16 = vmul.f32 49.0, %v13048_v58  ;;  %v17590_v34 = vld [vmem:[#allocation389_spill] sm:$0xff]  ;;  %v17592_v53 = vld [vmem:[#allocation208_spill] sm:$0xff]  ;;  %v4870_v48 = vpack.c.bf16 %v4840_v29, %v4836_v55  ;;  %v17596_v21 = vld [vmem:[#allocation18_spill] sm:$0xff]  ;;  %v13118_v42 = vpop.f32.mrf.mxu1 }
 0x373   :  { %17581 = vst [vmem:[#allocation147_spill] sm:$0xff] %v13073_v47  ;;  %v13085_v2 = vsel %vm17587_vm4, 1.0, %v16726_v24  ;;  %v13094_v47 = vmul.f32 %v17590_v34, %v17589_v32  ;;  %vm17593_vm2 = vnez %v17592_v53  ;;  %v17598_v58 = vld [vmem:[#allocation227_spill] sm:$0xff]  ;;  %v17601_v32 = vld [vmem:[#allocation209_spill] sm:$0xff]  ;;  %v17615_v49 = vld [vmem:[#allocation232_spill] sm:$0xff] }
 0x374   :  { %17585 = vst [vmem:[#allocation148_spill] sm:$0xff] %v13080_v3  ;;  %17588 = vst [vmem:[#allocation144_spill] sm:$0xff] %v13090_v16  ;;  %v13102_v8 = vsel %vm17593_vm2, 1.0, %v16726_v24  ;;  %v17595_v3 = vld [vmem:[#allocation237_spill] sm:$0xff]  ;;  %vm17599_vm11 = vnez %v17598_v58  ;;  %vm17602_vm15 = vnez %v17601_v32  ;;  %v13121_v53 = vmul.f32 49.0, %v13085_v2  ;;  %v17604_v55 = vld [vmem:[#allocation231_spill] sm:$0xff]  ;;  %6576 = vmatprep.mubr.msk.bf16.mxu1 %vm17609_vm7, %v4870_v48 }
 0x375   :  { %17591 = vst [vmem:[#allocation141_spill] sm:$0xff] %v13094_v47  ;;  %17594 = vst [vmem:[#allocation145_spill] sm:$0xff] %v13102_v8  ;;  %v13106_v13 = vmul.f32 %v17596_v21, %v17595_v3  ;;  %v13111_v16 = vsel %vm17599_vm11, 1.0, %v16726_v24  ;;  %v13116_v34 = vsel %vm17602_vm15, 1.0, %v16726_v24  ;;  %v4869_v47 = vpack.c.bf16 %v4838_v51, %v4834_v44  ;;  %v17605_v29 = vld [vmem:[#allocation17_spill] sm:$0xff]  ;;  %v17611_v32 = vld [vmem:[#allocation72_spill] sm:$0xff]  ;;  %v13149_v3 = vpop.f32.mrf.mxu1 }
 0x376   :  { %17600 = vst [vmem:[#allocation139_spill] sm:$0xff] %v13111_v16  ;;  %17603 = vst [vmem:[#allocation137_spill] sm:$0xff] %v13116_v34  ;;  %v13125_v21 = vmul.f32 %v17605_v29, %v17604_v55  ;;  %v13130_v58 = vsel %vm9637_vm10, 1.0, %v16726_v24  ;;  %v13136_v51 = vmul.f32 49.0, %v13102_v8  ;;  %v17610_v44 = vld [vmem:[#allocation293_spill] sm:$0xff]  ;;  %v13145_v29 = vsel %vm9597_vm0, 1.0, %v16726_v24 }
 0x377   :  { %17597 = vst [vmem:[#allocation142_spill] sm:$0xff] %v13106_v13  ;;  %17608 = vst [vmem:[#allocation138_spill] sm:$0xff] %v13130_v58  ;;  %v13140_v13 = vmul.f32 %v17611_v32, %v17610_v44  ;;  %vm4419_vm10 = vcmp.ne.f32.partialorder %v12824_v5, %v12672_v18  ;;  %5076 = vmatmul.mubr.bf16.gmra.mxu1 %v4869_v47  ;;  %v13152_v62 = vmul.f32 49.0, %v13111_v16  ;;  %v17616_v48 = vld [vmem:[#allocation19_spill] sm:$0xff]  ;;  %v13159_v44 = vmul.f32 49.0, %v13116_v34  ;;  %v17618_v32 = vld [vmem:[#allocation77_spill] sm:$0xff] }
 0x378   :  { %17606 = vst [vmem:[#allocation140_spill] sm:$0xff] %v13125_v21  ;;  %17614 = vst [vmem:[#allocation131_spill] sm:$0xff] %v13145_v29  ;;  %v13156_v21 = vmul.f32 %v17616_v48, %v17615_v49  ;;  %v17619_v55 = vld [vmem:[#allocation315_spill] sm:$0xff]  ;;  %v13166_v8 = vmul.f32 49.0, %v13130_v58  ;;  %v13171_v5 = vsel %vm9641_vm8, 1.0, %v16726_v24  ;;  %v13176_v49 = vsel %vm9607_vm6, 1.0, %v16726_v24 }
 0x379   :  { %17612 = vst [vmem:[#allocation135_spill] sm:$0xff] %v13140_v13  ;;  %v13163_v13 = vmul.f32 %v17619_v55, %v17618_v32  ;;  %17623 = vst [vmem:[#allocation26_spill] sm:$0xff] %v13171_v5  ;;  %v6437_v48 = vsel %vm4418_vm9, 1.0, %v16726_v24  ;;  %vm4420_vm0 = vcmp.ne.f32.partialorder %v12846_v25, %v12695_v35  ;;  %v13181_v32 = vpop.f32.mrf.mxu1  ;;  %v17625_v55 = vld [vmem:[#allocation386_spill] sm:$0xff]  ;;  %v13188_v18 = vmul.f32 49.0, %v13145_v29  ;;  %v17629_v34 = vld [vmem:[#allocation20_spill] sm:$0xff] }
 0x37a   :  { %17617 = vst [vmem:[#allocation136_spill] sm:$0xff] %v13156_v21  ;;  %17621 = vst [vmem:[#allocation132_spill] sm:$0xff] %v13166_v8  ;;  %v6438_v58 = vsel %vm4419_vm10, 1.0, %v16726_v24  ;;  %vm4421_vm6 = vcmp.ne.f32.partialorder %v12870_v12, %v12721_v17  ;;  %v17628_v47 = vld [vmem:[#allocation74_spill] sm:$0xff]  ;;  %v13200_v25 = vsel %vm16382_vm12, 1.0, %v16726_v24  ;;  %v13212_v17 = vmul.f32 49.0, %v13176_v49 }
 0x37b   :  { %17620 = vst [vmem:[#allocation291_spill] sm:$0xff] %v13163_v13  ;;  %v17626_v13 = vld [vmem:[#allocation381_spill] sm:$0xff]  ;;  %v13195_v16 = vmul.f32 %v17629_v34, %v17628_v47  ;;  %v13202_v8 = vpop.f32.mrf.mxu1  ;;  %v13217_v34 = vsel %vm16371_vm3, 1.0, %v16726_v24  ;;  %v4586_v47 = vmul.f32 %v6437_v48, %v12634_v52  ;;  %v6439_v35 = vsel %vm4420_vm0, 1.0, %v16726_v24 }
 0x37c   :  { %v13185_v21 = vmul.f32 %v17626_v13, %v17625_v55  ;;  %v13205_v13 = vmul.f32 49.0, %v13171_v5  ;;  %v17633_v55 = vld [vmem:[#allocation387_spill] sm:$0xff]  ;;  %17637 = vst [vmem:[#allocation390_spill] sm:$0xff] %v13217_v34  ;;  %vm4422_vm8 = vcmp.ne.f32.partialorder %v12896_v11, %v12744_v14  ;;  %v17639_v5 = vld [vmem:[#allocation125_spill] sm:$0xff]  ;;  %v13232_v12 = vmul.f32 49.0, %v13200_v25  ;;  %v17643_v11 = vld [vmem:[#allocation52_spill] sm:$0xff] }
 0x37d   :  { %17630 = vst [vmem:[#allocation24_spill] sm:$0xff] %v13195_v16  ;;  %v17638_v16 = vld [vmem:[#allocation383_spill] sm:$0xff]  ;;  %v13237_v48 = vsel %vm9564_vm14, 1.0, %v16726_v24  ;;  %vm4423_vm3 = vcmp.ne.f32.partialorder %v12929_v26, %v12770_v45  ;;  %v6441_v52 = vsel %vm4422_vm8, 1.0, %v16726_v24  ;;  %vm4424_vm14 = vcmp.ne.f32.partialorder %v12960_v31, %v12793_v9  ;;  %v17647_v26 = vld [vmem:[#allocation384_spill] sm:$0xff] }
 0x37e   :  { %17627 = vst [vmem:[#allocation129_spill] sm:$0xff] %v13185_v21  ;;  %17632 = vst [vmem:[#allocation31_spill] sm:$0xff] %v13205_v13  ;;  %v17634_v21 = vld [vmem:[#allocation58_spill] sm:$0xff]  ;;  %v13225_v13 = vmul.f32 %v17639_v5, %v17638_v16  ;;  %v17642_v14 = vld [vmem:[#allocation379_spill] sm:$0xff]  ;;  %v6442_v31 = vsel %vm4423_vm3, 1.0, %v16726_v24  ;;  %vm4425_vm2 = vcmp.ne.f32.partialorder %v12989_v7, %v12841_v40  ;;  %vm4426_vm9 = vcmp.ne.f32.partialorder %v13021_v63, %v12844_v54 }
 0x37f   :  { %v13209_v29 = vmul.f32 %v17634_v21, %v17633_v55  ;;  %v4587_v21 = vmul.f32 %v6438_v58, %v12656_v28  ;;  %v6440_v55 = vsel %vm4421_vm6, 1.0, %v16726_v24  ;;  %v13243_v16 = vmul.f32 %v17643_v11, %v17642_v14  ;;  %v17645_v58 = vld [vmem:[#allocation180_spill] sm:$0xff]  ;;  %v17648_v14 = vld [vmem:[#allocation122_spill] sm:$0xff]  ;;  %v17662_v40 = vld [vmem:[#allocation271_spill] sm:$0xff] }
 0x380   :  { %17640 = vst [vmem:[#allocation130_spill] sm:$0xff] %v13225_v13  ;;  %v13246_v28 = vmul.f32 49.0, %v13217_v34  ;;  %vm17646_vm12 = vnez %v17645_v58  ;;  %v4588_v13 = vmul.f32 %v6439_v35, %v12683_v27  ;;  %v13261_v11 = vmul.f32 %v17648_v14, %v17647_v26  ;;  %v17650_v27 = vld [vmem:[#allocation169_spill] sm:$0xff]  ;;  %v17653_v14 = vld [vmem:[#allocation380_spill] sm:$0xff] }
 0x381   :  { %17635 = vst [vmem:[#allocation123_spill] sm:$0xff] %v13209_v29  ;;  %v13229_v29 = vpop.f32.mrf.mxu1  ;;  %17644 = vst [vmem:[#allocation388_spill] sm:$0xff] %v13243_v16  ;;  %v13251_v5 = vsel %vm17646_vm12, 1.0, %v16726_v24  ;;  %v13264_v16 = vmul.f32 %v4586_v47, %v12647_v4  ;;  %v4589_v58 = vmul.f32 %v6440_v55, %v12704_v23  ;;  %v13268_v34 = vmul.f32 49.0, %v13237_v48  ;;  %v17654_v4 = vld [vmem:[#allocation120_spill] sm:$0xff] }
 0x382   :  { %vm17651_vm4 = vnez %v17650_v27  ;;  %v13276_v9 = vmul.f32 %v4587_v21, %v12678_v59  ;;  %v13283_v47 = vmul.f32 %v17654_v4, %v17653_v14  ;;  %v13286_v23 = vmul.f32 49.0, %v13251_v5  ;;  %v13292_v59 = vpop.xlane.xlu0 %3267  ;;  %v17656_v21 = vld [vmem:[#allocation270_spill] sm:$0xff]  ;;  %v17669_v63 = vld [vmem:[#allocation376_spill] sm:$0xff] }
 0x383   :  { %v13257_v45 = vpop.f32.mrf.mxu1  ;;  %17649 = vst [vmem:[#allocation124_spill] sm:$0xff] %v13264_v16  ;;  %v13273_v35 = vsel %vm17651_vm4, 1.0, %v16726_v24  ;;  %v4590_v55 = vmul.f32 %v6441_v52, %v12732_v19  ;;  %v6443_v27 = vsel %vm4424_vm14, 1.0, %v16726_v24  ;;  %vm17657_vm11 = vnez %v17656_v21  ;;  %v17659_v16 = vld [vmem:[#allocation375_spill] sm:$0xff] }
 0x384   :  { %17652 = vst [vmem:[#allocation204_spill] sm:$0xff] %v13276_v9  ;;  %17655 = vst [vmem:[#allocation21_spill] sm:$0xff] %v13283_v47  ;;  %v13297_v9 = vsel %vm17657_vm11, 1.0, %v16726_v24  ;;  %v13300_v14 = vmul.f32 %v4588_v13, %v12713_v43  ;;  %v17660_v47 = vld [vmem:[#allocation373_spill] sm:$0xff]  ;;  %v13309_v52 = vmul.f32 49.0, %v13273_v35  ;;  %vm17663_vm15 = vnez %v17662_v40  ;;  %v17665_v13 = vld [vmem:[#allocation371_spill] sm:$0xff] }
 0x385   :  { %v13279_v26 = vpop.f32.mrf.mxu1  ;;  %v13306_v19 = vmul.f32 %v17660_v47, %v17659_v16  ;;  %v13314_v7 = vsel %vm17663_vm15, 1.0, %v16726_v24  ;;  %v13317_v21 = vmul.f32 %v4589_v58, %v12727_v61  ;;  %v4591_v43 = vmul.f32 %v6442_v31, %v12753_v37  ;;  %v17670_v58 = vld [vmem:[#allocation114_spill] sm:$0xff] }
 0x386   :  { %17658 = vst [vmem:[#allocation15_spill] sm:$0xff] %v13300_v14  ;;  %v17666_v14 = vld [vmem:[#allocation47_spill] sm:$0xff]  ;;  %v4592_v47 = vmul.f32 %v6443_v27, %v12781_v38  ;;  %vm4427_vm7 = vcmp.ne.f32.partialorder %v13055_v30, %v12854_v22  ;;  %v13333_v61 = vmul.f32 49.0, %v13297_v9  ;;  %v13336_v37 = vmul.f32 %v4590_v55, %v12762_v36  ;;  %v13338_v54 = vpop.xlane.xlu0 %3122  ;;  %v17672_v27 = vld [vmem:[#allocation166_spill] sm:$0xff]  ;;  %v17675_v55 = vld [vmem:[#allocation372_spill] sm:$0xff] }
 0x387   :  { %v13302_v4 = vpop.f32.mrf.mxu1  ;;  %17661 = vst [vmem:[#allocation200_spill] sm:$0xff] %v13306_v19  ;;  %17664 = vst [vmem:[#allocation67_spill] sm:$0xff] %v13317_v21  ;;  %v13324_v16 = vmul.f32 %v17666_v14, %v17665_v13  ;;  %v6444_v19 = vsel %vm4425_vm2, 1.0, %v16726_v24  ;;  %v13342_v31 = vmul.f32 %v17670_v58, %v17669_v63  ;;  %v13345_v38 = vmul.f32 49.0, %v13314_v7  ;;  %v17676_v14 = vld [vmem:[#allocation55_spill] sm:$0xff]  ;;  %v17678_v63 = vld [vmem:[#allocation268_spill] sm:$0xff] }
 0x388   :  { %17668 = vst [vmem:[#allocation205_spill] sm:$0xff] %v13336_v37  ;;  %vm17673_vm10 = vnez %v17672_v27  ;;  %v6445_v30 = vsel %vm4426_vm9, 1.0, %v16726_v24  ;;  %vm4428_vm0 = vcmp.ne.f32.partialorder %v13087_v33, %v12868_v15  ;;  %v13359_v13 = vmul.f32 %v17676_v14, %v17675_v55  ;;  %v3272_v15 = vpop.xlane.xlu1 %3271 }
 0x389   :  { %17667 = vst [vmem:[#allocation320_spill] sm:$0xff] %v13324_v16  ;;  %v13330_v40 = vpop.f32.mrf.mxu1  ;;  %17671 = vst [vmem:[#allocation201_spill] sm:$0xff] %v13342_v31  ;;  %v13350_v22 = vsel %vm17673_vm10, 1.0, %v16726_v24  ;;  %vm17679_vm6 = vnez %v17678_v63  ;;  %v13367_v27 = vmul.f32 %v4591_v43, %v12776_v6  ;;  %v4593_v37 = vmul.f32 %v6444_v19, %v12802_v10  ;;  %v17683_v63 = vld [vmem:[#allocation367_spill] sm:$0xff]  ;;  %v17686_v10 = vld [vmem:[#allocation153_spill] sm:$0xff] }
 0x38a   :  { %17674 = vst [vmem:[#allocation198_spill] sm:$0xff] %v13350_v22  ;;  %17677 = vst [vmem:[#allocation385_spill] sm:$0xff] %v13359_v13  ;;  %v13364_v58 = vsel %vm17679_vm6, 1.0, %v16726_v24  ;;  %v6446_v21 = vsel %vm4427_vm7, 1.0, %v16726_v24  ;;  %vm4429_vm8 = vcmp.ne.f32.partialorder %v13118_v42, %v12884_v39  ;;  %v13374_v33 = vmul.f32 %v4592_v47, %v12828_v60  ;;  %v17684_v13 = vld [vmem:[#allocation374_spill] sm:$0xff]  ;;  %v3127_v60 = vpop.xlane.xlu0 %3126 }
 0x38b   :  { %v13355_v36 = vpop.f32.mrf.mxu1  ;;  %17680 = vst [vmem:[#allocation319_spill] sm:$0xff] %v13364_v58  ;;  %17681 = vst [vmem:[#allocation196_spill] sm:$0xff] %v13367_v27  ;;  %v13379_v14 = vmul.f32 49.0, %v13350_v22  ;;  %v13383_v6 = vmul.f32 %v17684_v13, %v17683_v63  ;;  %vm17687_vm3 = vnez %v17686_v10  ;;  %v4594_v39 = vmul.f32 %v6445_v30, %v12811_v50  ;;  %v17690_v10 = vld [vmem:[#allocation363_spill] sm:$0xff]  ;;  %v17693_v50 = vld [vmem:[#allocation269_spill] sm:$0xff] }
 0x38c   :  { %17682 = vst [vmem:[#allocation62_spill] sm:$0xff] %v13374_v33  ;;  %v13388_v19 = vsel %vm17687_vm3, 1.0, %v16726_v24  ;;  %v6447_v42 = vsel %vm4428_vm0, 1.0, %v16726_v24  ;;  %vm4430_vm12 = vcmp.ne.f32.partialorder %v13149_v3, %v12918_v57  ;;  %v13395_v43 = vmul.f32 49.0, %v13364_v58  ;;  %v13413_v3 = vpop.xlane.xlu1 %3130  ;;  %v17699_v58 = vld [vmem:[#allocation370_spill] sm:$0xff] }
 0x38d   :  { %v13376_v55 = vpop.f32.mrf.mxu1  ;;  %17685 = vst [vmem:[#allocation69_spill] sm:$0xff] %v13383_v6  ;;  %17688 = vst [vmem:[#allocation199_spill] sm:$0xff] %v13388_v19  ;;  %v4595_v47 = vmul.f32 %v6446_v21, %v12816_v0  ;;  %v6448_v13 = vsel %vm4429_vm8, 1.0, %v16726_v24  ;;  %v17691_v6 = vld [vmem:[#allocation42_spill] sm:$0xff]  ;;  %vm17694_vm14 = vnez %v17693_v50  ;;  %v13411_v57 = vmul.f32 %v4593_v37, %v12838_v20  ;;  %v17698_v21 = vld [vmem:[#allocation368_spill] sm:$0xff] }
 0x38e   :  { %17689 = vst [vmem:[#allocation70_spill] sm:$0xff] %v13395_v43  ;;  %v13403_v33 = vmul.f32 %v17691_v6, %v17690_v10  ;;  %v13408_v30 = vsel %vm17694_vm14, 1.0, %v16726_v24  ;;  %v13416_v0 = vmul.f32 49.0, %v13388_v19  ;;  %v13420_v27 = vmul.f32 %v17699_v58, %v17698_v21  ;;  %v17701_v6 = vld [vmem:[#allocation156_spill] sm:$0xff]  ;;  %v17704_v20 = vld [vmem:[#allocation91_spill] sm:$0xff]  ;;  %v17705_v19 = vld [vmem:[#allocation266_spill] sm:$0xff] }
 0x38f   :  { %v13399_v63 = vpop.f32.mrf.mxu1  ;;  %17695 = vst [vmem:[#allocation121_spill] sm:$0xff] %v13408_v30  ;;  %17696 = vst [vmem:[#allocation194_spill] sm:$0xff] %v13411_v57  ;;  %vm17702_vm4 = vnez %v17701_v6  ;;  %v4596_v50 = vmul.f32 %v6447_v42, %v12833_v56  ;;  %vm4431_vm2 = vcmp.ne.f32.partialorder %v13181_v32, %v17704_v20  ;;  %vm17706_vm11 = vnez %v17705_v19  ;;  %v17708_v58 = vld [vmem:[#allocation127_spill] sm:$0xff]  ;;  %v17710_v6 = vld [vmem:[#allocation68_spill] sm:$0xff] }
 0x390   :  { %17692 = vst [vmem:[#allocation197_spill] sm:$0xff] %v13403_v33  ;;  %17697 = vst [vmem:[#allocation382_spill] sm:$0xff] %v13416_v0  ;;  %v13425_v10 = vsel %vm17702_vm4, 1.0, %v16726_v24  ;;  %v6449_v33 = vsel %vm4430_vm12, 1.0, %v16726_v24  ;;  %v13436_v57 = vsel %vm17706_vm11, 1.0, %v16726_v24  ;;  %v13439_v21 = vmul.f32 %v4594_v39, %v17708_v58  ;;  %v3276_v0 = vpop.xlane.xlu0 %3275  ;;  %v17712_v42 = vld [vmem:[#allocation364_spill] sm:$0xff] }
 0x391   :  { %17700 = vst [vmem:[#allocation119_spill] sm:$0xff] %v13420_v27  ;;  %17703 = vst [vmem:[#allocation48_spill] sm:$0xff] %v13425_v10  ;;  %v13431_v37 = vpop.f32.mrf.mxu1  ;;  %v4597_v27 = vmul.f32 %v6448_v13, %v17710_v6  ;;  %v13443_v56 = vmul.f32 49.0, %v13408_v30  ;;  %v17713_v43 = vld [vmem:[#allocation116_spill] sm:$0xff]  ;;  %v17715_v32 = vld [vmem:[#allocation377_spill] sm:$0xff]  ;;  %v13455_v19 = vmul.f32 49.0, %v13425_v10 }
 0x392   :  { %17707 = vst [vmem:[#allocation190_spill] sm:$0xff] %v13436_v57  ;;  %17709 = vst [vmem:[#allocation378_spill] sm:$0xff] %v13439_v21  ;;  %v13447_v22 = vmul.f32 %v17713_v43, %v17712_v42  ;;  %v13450_v20 = vmul.f32 %v4595_v47, %v17715_v32  ;;  %v17718_v39 = vld [vmem:[#allocation359_spill] sm:$0xff]  ;;  %v17719_v58 = vld [vmem:[#allocation112_spill] sm:$0xff]  ;;  %v6450_v42 = vsel %vm4431_vm2, 1.0, %v16726_v24  ;;  %v3280_v32 = vpop.xlane.xlu1 %3279 }
 0x393   :  { %17711 = vst [vmem:[#allocation126_spill] sm:$0xff] %v13443_v56  ;;  %v13452_v31 = vpop.f32.mrf.mxu1  ;;  %17717 = vst [vmem:[#allocation191_spill] sm:$0xff] %v13455_v19  ;;  %v13459_v21 = vmul.f32 %v17719_v58, %v17718_v39  ;;  %v17721_v13 = vld [vmem:[#allocation264_spill] sm:$0xff]  ;;  %v17724_v30 = vld [vmem:[#allocation309_spill] sm:$0xff] }
 0x394   :  { %17714 = vst [vmem:[#allocation195_spill] sm:$0xff] %v13447_v22  ;;  %17716 = vst [vmem:[#allocation128_spill] sm:$0xff] %v13450_v20  ;;  %vm17722_vm15 = vnez %v17721_v13  ;;  %v4598_v43 = vmul.f32 %v6449_v33, %v17724_v30  ;;  %v17725_v47 = vld [vmem:[#allocation63_spill] sm:$0xff]  ;;  %v13471_v22 = vmul.f32 49.0, %v13436_v57  ;;  %v17727_v10 = vld [vmem:[#allocation350_spill] sm:$0xff]  ;;  %v3377_v20 = vadd.f32 %v3272_v15, %v13292_v59 }
 0x395   :  { %17720 = vst [vmem:[#allocation100_spill] sm:$0xff] %v13459_v21  ;;  %v13464_v6 = vsel %vm17722_vm15, 1.0, %v16726_v24  ;;  %vm4432_vm9 = vcmp.ne.f32.partialorder %v13202_v8, %v17725_v47  ;;  %v13474_v19 = vmul.f32 %v4596_v50, %v17727_v10  ;;  %v13476_v39 = vpop.f32.mrf.mxu1  ;;  %v17729_v58 = vld [vmem:[#allocation355_spill] sm:$0xff]  ;;  %v17735_v8 = vld [vmem:[#allocation265_spill] sm:$0xff]  ;;  %v17738_v57 = vld [vmem:[#allocation346_spill] sm:$0xff]  ;;  %v3284_v50 = vpop.xlane.xlu0 %3283 }
 0x396   :  { %17723 = vst [vmem:[#allocation349_spill] sm:$0xff] %v13464_v6  ;;  %17726 = vst [vmem:[#allocation296_spill] sm:$0xff] %v13471_v22  ;;  %v17730_v13 = vld [vmem:[#allocation35_spill] sm:$0xff]  ;;  %vm17736_vm10 = vnez %v17735_v8  ;;  %v13493_v22 = vmul.f32 %v4597_v27, %v17738_v57  ;;  %v17740_v10 = vld [vmem:[#allocation88_spill] sm:$0xff]  ;;  %v6451_v8 = vsel %vm4432_vm9, 1.0, %v16726_v24 }
 0x397   :  { %17728 = vst [vmem:[#allocation186_spill] sm:$0xff] %v13474_v19  ;;  %v13480_v21 = vmul.f32 %v17730_v13, %v17729_v58  ;;  %v17732_v33 = vld [vmem:[#allocation267_spill] sm:$0xff]  ;;  %v13490_v47 = vsel %vm17736_vm10, 1.0, %v16726_v24  ;;  %vm4433_vm0 = vcmp.ne.f32.partialorder %v13229_v29, %v17740_v10  ;;  %v13498_v58 = vmul.f32 49.0, %v13464_v6  ;;  %v17742_v13 = vld [vmem:[#allocation360_spill] sm:$0xff]  ;;  %v17745_v56 = vld [vmem:[#allocation61_spill] sm:$0xff]  ;;  %v13507_v16 = vpop.f32.mrf.mxu1  ;;  %v3135_v6 = vpop.xlane.xlu1 %3134 }
 0x398   :  { %vm17733_vm7 = vnez %v17732_v33  ;;  %17737 = vst [vmem:[#allocation117_spill] sm:$0xff] %v13490_v47  ;;  %17739 = vst [vmem:[#allocation184_spill] sm:$0xff] %v13493_v22  ;;  %v4599_v19 = vmul.f32 %v6450_v42, %v17745_v56  ;;  %v17746_v27 = vld [vmem:[#allocation262_spill] sm:$0xff]  ;;  %v17753_v56 = vld [vmem:[#allocation25_spill] sm:$0xff]  ;;  %v13525_v59 = vmul.f32 49.0, %v13490_v47  ;;  %v6452_v15 = vsel %vm4433_vm0, 1.0, %v16726_v24 }
 0x399   :  { %17731 = vst [vmem:[#allocation103_spill] sm:$0xff] %v13480_v21  ;;  %v13485_v30 = vsel %vm17733_vm7, 1.0, %v16726_v24  ;;  %17741 = vst [vmem:[#allocation316_spill] sm:$0xff] %v13498_v58  ;;  %v17743_v21 = vld [vmem:[#allocation361_spill] sm:$0xff]  ;;  %vm17747_vm6 = vnez %v17746_v27  ;;  %v17749_v57 = vld [vmem:[#allocation90_spill] sm:$0xff]  ;;  %v3232_v27 = vadd.f32 %v3127_v60, %v13338_v54  ;;  %v13529_v58 = vpop.f32.mrf.mxu1 }
 0x39a   :  { %17734 = vst [vmem:[#allocation53_spill] sm:$0xff] %v13485_v30  ;;  %v13502_v33 = vmul.f32 %v17743_v21, %v17742_v13  ;;  %v13512_v29 = vsel %vm17747_vm6, 1.0, %v16726_v24  ;;  %v13515_v10 = vmul.f32 %v4598_v43, %v17749_v57  ;;  %v13518_v21 = vmul.f32 49.0, %v13485_v30  ;;  %v17752_v13 = vld [vmem:[#allocation356_spill] sm:$0xff]  ;;  %17755 = vst [vmem:[#allocation185_spill] sm:$0xff] %v13525_v59  ;;  %v17756_v43 = vld [vmem:[#allocation143_spill] sm:$0xff] }
 0x39b   :  { %17748 = vst [vmem:[#allocation187_spill] sm:$0xff] %v13512_v29  ;;  %v13522_v42 = vmul.f32 %v17753_v56, %v17752_v13  ;;  %vm17757_vm8 = vnez %v17756_v43  ;;  %v17759_v30 = vld [vmem:[#allocation49_spill] sm:$0xff]  ;;  %v3139_v13 = vpop.xlane.xlu0 %3138  ;;  %v17761_v56 = vld [vmem:[#allocation351_spill] sm:$0xff]  ;;  %v13544_v54 = vmul.f32 49.0, %v13512_v29  ;;  %v13551_v43 = vpop.f32.mrf.mxu1 }
 0x39c   :  { %17744 = vst [vmem:[#allocation40_spill] sm:$0xff] %v13502_v33  ;;  %17750 = vst [vmem:[#allocation22_spill] sm:$0xff] %v13515_v10  ;;  %v3378_v33 = vadd.f32 %v3377_v20, %v3276_v0  ;;  %v13534_v57 = vsel %vm17757_vm8, 1.0, %v16726_v24  ;;  %v17760_v10 = vld [vmem:[#allocation83_spill] sm:$0xff]  ;;  %v17765_v60 = vld [vmem:[#allocation85_spill] sm:$0xff] }
 0x39d   :  { %17751 = vst [vmem:[#allocation96_spill] sm:$0xff] %v13518_v21  ;;  %17754 = vst [vmem:[#allocation46_spill] sm:$0xff] %v13522_v42  ;;  %v4600_v21 = vmul.f32 %v6451_v8, %v17759_v30  ;;  %vm4434_vm3 = vcmp.ne.f32.partialorder %v13257_v45, %v17760_v10  ;;  %v17762_v42 = vld [vmem:[#allocation110_spill] sm:$0xff]  ;;  %v13547_v0 = vmul.f32 %v4599_v19, %v17765_v60  ;;  %v17767_v20 = vld [vmem:[#allocation37_spill] sm:$0xff]  ;;  %v3288_v19 = vpop.xlane.xlu1 %3287  ;;  %v13566_v60 = vmul.f32 49.0, %v13534_v57 }
 0x39e   :  { %17758 = vst [vmem:[#allocation57_spill] sm:$0xff] %v13534_v57  ;;  %v13541_v47 = vmul.f32 %v17762_v42, %v17761_v56  ;;  %17764 = vst [vmem:[#allocation30_spill] sm:$0xff] %v13544_v54  ;;  %vm4435_vm12 = vcmp.ne.f32.partialorder %v13279_v26, %v17767_v20  ;;  %v17768_v30 = vld [vmem:[#allocation347_spill] sm:$0xff]  ;;  %v17769_v8 = vld [vmem:[#allocation230_spill] sm:$0xff] }
 0x39f   :  { %17766 = vst [vmem:[#allocation181_spill] sm:$0xff] %v13547_v0  ;;  %v13555_v59 = vmul.f32 %v17769_v8, %v17768_v30  ;;  %v17771_v45 = vld [vmem:[#allocation263_spill] sm:$0xff]  ;;  %v17774_v42 = vld [vmem:[#allocation93_spill] sm:$0xff]  ;;  %17776 = vst [vmem:[#allocation176_spill] sm:$0xff] %v13566_v60  ;;  %v6453_v30 = vsel %vm4434_vm3, 1.0, %v16726_v24  ;;  %v3233_v8 = vadd.f32 %v3232_v27, %v13413_v3  ;;  %v6454_v57 = vsel %vm4435_vm12, 1.0, %v16726_v24  ;;  %v3292_v60 = vpop.xlane.xlu0 %3291 }
 0x3a0   :  { %17763 = vst [vmem:[#allocation369_spill] sm:$0xff] %v13541_v47  ;;  %vm17772_vm14 = vnez %v17771_v45  ;;  %v4601_v56 = vmul.f32 %v6452_v15, %v17774_v42  ;;  %v17775_v47 = vld [vmem:[#allocation87_spill] sm:$0xff]  ;;  %v17777_v26 = vld [vmem:[#allocation146_spill] sm:$0xff]  ;;  %v3379_v45 = vadd.f32 %v3378_v33, %v3280_v32  ;;  %v17780_v15 = vld [vmem:[#allocation352_spill] sm:$0xff] }
 0x3a1   :  { %17770 = vst [vmem:[#allocation99_spill] sm:$0xff] %v13555_v59  ;;  %v13560_v10 = vsel %vm17772_vm14, 1.0, %v16726_v24  ;;  %vm4436_vm4 = vcmp.ne.f32.partialorder %v13302_v4, %v17775_v47  ;;  %vm17778_vm2 = vnez %v17777_v26  ;;  %v13575_v59 = vpop.f32.mrf.mxu1  ;;  %v17781_v42 = vld [vmem:[#allocation288_spill] sm:$0xff]  ;;  %v17783_v4 = vld [vmem:[#allocation94_spill] sm:$0xff]  ;;  %v17787_v0 = vld [vmem:[#allocation105_spill] sm:$0xff]  ;;  %v3234_v32 = vadd.f32 %v3233_v8, %v3135_v6 }
 0x3a2   :  { %17773 = vst [vmem:[#allocation245_spill] sm:$0xff] %v13560_v10  ;;  %v13571_v20 = vsel %vm17778_vm2, 1.0, %v16726_v24  ;;  %v13579_v29 = vmul.f32 %v17781_v42, %v17780_v15  ;;  %v13582_v47 = vmul.f32 %v4600_v21, %v17783_v4  ;;  %v13586_v26 = vmul.f32 49.0, %v13560_v10  ;;  %v17786_v54 = vld [vmem:[#allocation348_spill] sm:$0xff]  ;;  %v17798_v8 = vld [vmem:[#allocation89_spill] sm:$0xff]  ;;  %v17799_v21 = vld [vmem:[#allocation282_spill] sm:$0xff] }
 0x3a3   :  { %17779 = vst [vmem:[#allocation345_spill] sm:$0xff] %v13571_v20  ;;  %v13590_v22 = vmul.f32 %v17787_v0, %v17786_v54  ;;  %v6455_v3 = vsel %vm4436_vm4, 1.0, %v16726_v24  ;;  %v13593_v33 = vpop.f32.mrf.mxu1  ;;  %v13596_v27 = vmul.f32 49.0, %v13571_v20  ;;  %v13601_v15 = vsel %vm3750_vm5, 1.0, %v16726_v24  ;;  %v17792_v42 = vld [vmem:[#allocation60_spill] sm:$0xff]  ;;  %v17795_v54 = vld [vmem:[#allocation167_spill] sm:$0xff] }
 0x3a4   :  { %17782 = vst [vmem:[#allocation41_spill] sm:$0xff] %v13579_v29  ;;  %17784 = vst [vmem:[#allocation182_spill] sm:$0xff] %v13582_v47  ;;  %v13604_v4 = vmul.f32 %v4601_v56, %v17792_v42  ;;  %v17794_v29 = vld [vmem:[#allocation16_spill] sm:$0xff]  ;;  %vm4437_vm11 = vcmp.ne.f32.partialorder %v13330_v40, %v17795_v54  ;;  %v3380_v20 = vadd.f32 %v3379_v45, %v3284_v50  ;;  %vm17800_vm5 = vcmp.eq.s32.totalorder %v17799_v21, 1  ;;  %v17805_v40 = vld [vmem:[#allocation86_spill] sm:$0xff] }
 0x3a5   :  { %17785 = vst [vmem:[#allocation113_spill] sm:$0xff] %v13586_v26  ;;  %17788 = vst [vmem:[#allocation118_spill] sm:$0xff] %v13590_v22  ;;  %v4602_v10 = vmul.f32 %v6453_v30, %v17794_v29  ;;  %v17796_v6 = vld [vmem:[#allocation216_spill] sm:$0xff]  ;;  %v4603_v22 = vmul.f32 %v6454_v57, %v17798_v8  ;;  %v13620_v56 = vsel %vm17800_vm5, 1.0, %v16726_v24  ;;  %v17802_v29 = vld [vmem:[#allocation225_spill] sm:$0xff]  ;;  %v4604_v42 = vmul.f32 %v6455_v3, %v17805_v40  ;;  %v3147_v57 = vpop.xlane.xlu0 %3146 }
 0x3a6   :  { %17789 = vst [vmem:[#allocation177_spill] sm:$0xff] %v13596_v27  ;;  %17791 = vst [vmem:[#allocation239_spill] sm:$0xff] %v13601_v15  ;;  %vm17797_vm15 = vcmp.eq.s32.totalorder %v17796_v6, 1  ;;  %v13615_v27 = vpop.f32.mrf.mxu1  ;;  %vm17803_vm9 = vcmp.eq.s32.totalorder %v17802_v29, 1  ;;  %v17806_v54 = vld [vmem:[#allocation159_spill] sm:$0xff]  ;;  %v3143_v6 = vpop.xlane.xlu1 %3142  ;;  %v13631_v50 = vmul.f32 49.0, %v13601_v15  ;;  %v3235_v26 = vadd.f32 %v3234_v32, %v3139_v13 }
 0x3a7   :  { %17793 = vst [vmem:[#allocation172_spill] sm:$0xff] %v13604_v4  ;;  %v13612_v0 = vsel %vm17797_vm15, 1.0, %v16726_v24  ;;  %17801 = vst [vmem:[#allocation365_spill] sm:$0xff] %v13620_v56  ;;  %v13625_v30 = vsel %vm17803_vm9, 1.0, %v16726_v24  ;;  %vm4438_vm7 = vcmp.ne.f32.partialorder %v13355_v36, %v17806_v54  ;;  %v17808_v45 = vld [vmem:[#allocation224_spill] sm:$0xff]  ;;  %v6456_v21 = vsel %vm4437_vm11, 1.0, %v16726_v24 }
 0x3a8   :  { %17804 = vst [vmem:[#allocation170_spill] sm:$0xff] %v13625_v30  ;;  %17807 = vst [vmem:[#allocation115_spill] sm:$0xff] %v13631_v50  ;;  %vm17809_vm10 = vcmp.eq.s32.totalorder %v17808_v45, 1  ;;  %v17811_v29 = vld [vmem:[#allocation109_spill] sm:$0xff]  ;;  %v3381_v3 = vadd.f32 %v3380_v20, %v3288_v19  ;;  %v13641_v40 = vpop.f32.mrf.mxu1  ;;  %v17812_v36 = vld [vmem:[#allocation92_spill] sm:$0xff]  ;;  %v13647_v47 = vmul.f32 49.0, %v13612_v0  ;;  %v3236_v13 = vadd.f32 %v3235_v26, %v3143_v6 }
 0x3a9   :  { %v13636_v8 = vsel %vm17809_vm10, 1.0, %v16726_v24  ;;  %vm4439_vm0 = vcmp.ne.f32.partialorder %v13376_v55, %v17811_v29  ;;  %v13644_v54 = vmul.f32 %v4602_v10, %v17812_v36  ;;  %v13650_v4 = vmul.f32 49.0, %v13620_v56  ;;  %v17815_v15 = vld [vmem:[#allocation302_spill] sm:$0xff]  ;;  %v17817_v10 = vld [vmem:[#allocation213_spill] sm:$0xff]  ;;  %v17820_v32 = vld [vmem:[#allocation51_spill] sm:$0xff] }
 0x3aa   :  { %17810 = vst [vmem:[#allocation33_spill] sm:$0xff] %v13636_v8  ;;  %v13653_v45 = vmul.f32 49.0, %v13625_v30  ;;  %v13656_v50 = vmul.f32 %v4603_v22, %v17815_v15  ;;  %v6457_v55 = vsel %vm4438_vm7, 1.0, %v16726_v24  ;;  %v13659_v19 = vpop.f32.mrf.mxu1  ;;  %vm17818_vm6 = vcmp.eq.s32.totalorder %v17817_v10, 1  ;;  %v3296_v30 = vpop.xlane.xlu0 %3295  ;;  %v17823_v15 = vld [vmem:[#allocation78_spill] sm:$0xff]  ;;  %v17825_v10 = vld [vmem:[#allocation215_spill] sm:$0xff] }
 0x3ab   :  { %17813 = vst [vmem:[#allocation173_spill] sm:$0xff] %v13644_v54  ;;  %v13664_v20 = vsel %vm17818_vm6, 1.0, %v16726_v24  ;;  %v4605_v29 = vmul.f32 %v6456_v21, %v17820_v32  ;;  %v6458_v36 = vsel %vm4439_vm0, 1.0, %v16726_v24  ;;  %v17821_v54 = vld [vmem:[#allocation154_spill] sm:$0xff]  ;;  %v13671_v22 = vmul.f32 49.0, %v13636_v8 }
 0x3ac   :  { %17814 = vst [vmem:[#allocation34_spill] sm:$0xff] %v13653_v45  ;;  %17816 = vst [vmem:[#allocation171_spill] sm:$0xff] %v13656_v50  ;;  %vm4440_vm8 = vcmp.ne.f32.partialorder %v13399_v63, %v17821_v54  ;;  %v13674_v26 = vmul.f32 %v4604_v42, %v17823_v15  ;;  %v3382_v6 = vadd.f32 %v3381_v3, %v3292_v60  ;;  %v13676_v50 = vpop.f32.mrf.mxu1  ;;  %vm17826_vm3 = vcmp.eq.s32.totalorder %v17825_v10, 1  ;;  %v17828_v21 = vld [vmem:[#allocation214_spill] sm:$0xff]  ;;  %v17831_v63 = vld [vmem:[#allocation81_spill] sm:$0xff]  ;;  %v3151_v42 = vpop.xlane.xlu1 %3150 }
 0x3ad   :  { %17819 = vst [vmem:[#allocation29_spill] sm:$0xff] %v13664_v20  ;;  %17822 = vst [vmem:[#allocation260_spill] sm:$0xff] %v13671_v22  ;;  %v13681_v56 = vsel %vm17826_vm3, 1.0, %v16726_v24  ;;  %vm17829_vm12 = vcmp.eq.s32.totalorder %v17828_v21, 1  ;;  %v4606_v54 = vmul.f32 %v6457_v55, %v17831_v63  ;;  %vm4441_vm14 = vcmp.ne.f32.partialorder %v13431_v37, %v13062_v46  ;;  %v17832_v3 = vld [vmem:[#allocation222_spill] sm:$0xff]  ;;  %v17835_v10 = vld [vmem:[#allocation84_spill] sm:$0xff] }
 0x3ae   :  { %17824 = vst [vmem:[#allocation107_spill] sm:$0xff] %v13674_v26  ;;  %17827 = vst [vmem:[#allocation343_spill] sm:$0xff] %v13681_v56  ;;  %v13686_v32 = vsel %vm17829_vm12, 1.0, %v16726_v24  ;;  %v13692_v60 = vmul.f32 49.0, %v13664_v20  ;;  %vm17833_vm4 = vcmp.eq.s32.totalorder %v17832_v3, 1  ;;  %v4607_v26 = vmul.f32 %v6458_v36, %v17835_v10  ;;  %v13701_v45 = vpop.f32.mrf.mxu1  ;;  %v17836_v55 = vld [vmem:[#allocation80_spill] sm:$0xff]  ;;  %v3300_v46 = vpop.xlane.xlu0 %3299 }
 0x3af   :  { %17830 = vst [vmem:[#allocation73_spill] sm:$0xff] %v13686_v32  ;;  %v13697_v15 = vsel %vm17833_vm4, 1.0, %v16726_v24  ;;  %v6459_v21 = vsel %vm4440_vm8, 1.0, %v16726_v24  ;;  %v3237_v8 = vadd.f32 %v3236_v13, %v3147_v57  ;;  %v3383_v22 = vadd.f32 %v3382_v6, %v3296_v30  ;;  %v17839_v3 = vld [vmem:[#allocation211_spill] sm:$0xff]  ;;  %v17842_v6 = vld [vmem:[#allocation162_spill] sm:$0xff] }
 0x3b0   :  { %17834 = vst [vmem:[#allocation102_spill] sm:$0xff] %v13697_v15  ;;  %v13704_v63 = vmul.f32 %v4605_v29, %v17836_v55  ;;  %v13707_v37 = vmul.f32 49.0, %v13681_v56  ;;  %v13710_v20 = vmul.f32 49.0, %v13686_v32  ;;  %vm17840_vm2 = vcmp.eq.s32.totalorder %v17839_v3, 1  ;;  %v13720_v13 = vpop.f32.mrf.mxu1  ;;  %v17844_v55 = vld [vmem:[#allocation82_spill] sm:$0xff]  ;;  %v3159_v3 = vpop.xlane.xlu1 %3158  ;;  %v17846_v56 = vld [vmem:[#allocation223_spill] sm:$0xff] }
 0x3b1   :  { %v13715_v36 = vsel %vm17840_vm2, 1.0, %v16726_v24  ;;  %v6460_v57 = vsel %vm4441_vm14, 1.0, %v16726_v24  ;;  %vm4442_vm11 = vcmp.ne.f32.partialorder %v13452_v31, %v13069_v1  ;;  %v3384_v30 = vadd.f32 %v3383_v22, %v3300_v46  ;;  %v17845_v32 = vld [vmem:[#allocation150_spill] sm:$0xff]  ;;  %v17849_v1 = vld [vmem:[#allocation157_spill] sm:$0xff] }
 0x3b2   :  { %17837 = vst [vmem:[#allocation258_spill] sm:$0xff] %v13704_v63  ;;  %17838 = vst [vmem:[#allocation36_spill] sm:$0xff] %v13710_v20  ;;  %v13723_v29 = vmul.f32 49.0, %v13697_v15  ;;  %v13726_v10 = vmul.f32 %v4606_v54, %v17842_v6  ;;  %v4608_v63 = vmul.f32 %v6459_v21, %v17844_v55  ;;  %vm4443_vm15 = vcmp.ne.f32.partialorder %v13476_v39, %v17845_v32  ;;  %v13739_v46 = vpop.f32.mrf.mxu1  ;;  %v17852_v21 = vld [vmem:[#allocation212_spill] sm:$0xff] }
 0x3b3   :  { %17841 = vst [vmem:[#allocation111_spill] sm:$0xff] %v13715_v36  ;;  %vm17847_vm5 = vcmp.eq.s32.totalorder %v17846_v56, 1  ;;  %v13737_v31 = vmul.f32 %v4607_v26, %v17849_v1  ;;  %v3238_v22 = vadd.f32 %v3237_v8, %v3151_v42  ;;  %v13742_v54 = vmul.f32 49.0, %v13715_v36  ;;  %v17855_v39 = vld [vmem:[#allocation168_spill] sm:$0xff]  ;;  %v3155_v26 = vpop.xlane.xlu0 %3154  ;;  %v17857_v8 = vld [vmem:[#allocation206_spill] sm:$0xff] }
 0x3b4   :  { %17843 = vst [vmem:[#allocation341_spill] sm:$0xff] %v13726_v10  ;;  %v13734_v20 = vsel %vm17847_vm5, 1.0, %v16726_v24  ;;  %vm17853_vm9 = vcmp.eq.s32.totalorder %v17852_v21, 1  ;;  %v4609_v32 = vmul.f32 %v6460_v57, %v17855_v39  ;;  %v6461_v56 = vsel %vm4442_vm11, 1.0, %v16726_v24  ;;  %v17856_v55 = vld [vmem:[#allocation144_spill] sm:$0xff]  ;;  %v17861_v57 = vld [vmem:[#allocation210_spill] sm:$0xff] }
 0x3b5   :  { %17848 = vst [vmem:[#allocation330_spill] sm:$0xff] %v13734_v20  ;;  %17850 = vst [vmem:[#allocation261_spill] sm:$0xff] %v13737_v31  ;;  %v13747_v6 = vsel %vm17853_vm9, 1.0, %v16726_v24  ;;  %vm4444_vm7 = vcmp.ne.f32.partialorder %v13507_v16, %v17856_v55  ;;  %vm17858_vm10 = vcmp.eq.s32.totalorder %v17857_v8, 1  ;;  %v6462_v1 = vsel %vm4443_vm15, 1.0, %v16726_v24  ;;  %v13759_v31 = vpop.f32.mrf.mxu1  ;;  %v17864_v16 = vld [vmem:[#allocation158_spill] sm:$0xff]  ;;  %v3308_v8 = vpop.xlane.xlu1 %3307 }
 0x3b6   :  { %17851 = vst [vmem:[#allocation108_spill] sm:$0xff] %v13742_v54  ;;  %17854 = vst [vmem:[#allocation362_spill] sm:$0xff] %v13747_v6  ;;  %v13756_v42 = vsel %vm17858_vm10, 1.0, %v16726_v24  ;;  %v3239_v10 = vadd.f32 %v3238_v22, %v3155_v26  ;;  %v13762_v21 = vmul.f32 49.0, %v13734_v20  ;;  %vm17862_vm0 = vcmp.eq.s32.totalorder %v17861_v57, 1  ;;  %v17867_v22 = vld [vmem:[#allocation207_spill] sm:$0xff] }
 0x3b7   :  { %17859 = vst [vmem:[#allocation259_spill] sm:$0xff] %v13756_v42  ;;  %v13767_v39 = vsel %vm17862_vm0, 1.0, %v16726_v24  ;;  %v13770_v55 = vmul.f32 %v4608_v63, %v17864_v16  ;;  %vm4445_vm6 = vcmp.ne.f32.partialorder %v13529_v58, %v13097_v41  ;;  %v13775_v36 = vmul.f32 49.0, %v13747_v6  ;;  %v17870_v20 = vld [vmem:[#allocation163_spill] sm:$0xff]  ;;  %v13784_v15 = vpop.f32.mrf.mxu1  ;;  %v17871_v41 = vld [vmem:[#allocation152_spill] sm:$0xff]  ;;  %v17875_v54 = vld [vmem:[#allocation281_spill] sm:$0xff] }
 0x3b8   :  { %17860 = vst [vmem:[#allocation366_spill] sm:$0xff] %v13762_v21  ;;  %17863 = vst [vmem:[#allocation344_spill] sm:$0xff] %v13767_v39  ;;  %vm17868_vm8 = vcmp.eq.s32.totalorder %v17867_v22, 1  ;;  %v4610_v21 = vmul.f32 %v6461_v56, %v17870_v20  ;;  %v6463_v57 = vsel %vm4444_vm7, 1.0, %v16726_v24  ;;  %v3240_v63 = vadd.f32 %v3239_v10, %v3159_v3 }
 0x3b9   :  { %17865 = vst [vmem:[#allocation71_spill] sm:$0xff] %v13770_v55  ;;  %17866 = vst [vmem:[#allocation106_spill] sm:$0xff] %v13775_v36  ;;  %v13780_v26 = vsel %vm17868_vm8, 1.0, %v16726_v24  ;;  %v13787_v16 = vmul.f32 49.0, %v13756_v42  ;;  %v13790_v58 = vmul.f32 %v4609_v32, %v17871_v41  ;;  %v17873_v55 = vld [vmem:[#allocation160_spill] sm:$0xff]  ;;  %v3304_v36 = vpop.xlane.xlu0 %3303  ;;  %v13794_v22 = vmul.f32 49.0, %v13767_v39  ;;  %v13804_v3 = vpop.f32.mrf.mxu1 }
 0x3ba   :  { %17869 = vst [vmem:[#allocation342_spill] sm:$0xff] %v13780_v26  ;;  %v4611_v6 = vmul.f32 %v6462_v1, %v17873_v55  ;;  %vm17876_vm3 = vcmp.eq.s32.totalorder %v17875_v54, 1  ;;  %v6464_v56 = vsel %vm4445_vm6, 1.0, %v16726_v24  ;;  %vm4446_vm12 = vcmp.ne.f32.partialorder %v13551_v43, %v13121_v53  ;;  %v17878_v1 = vld [vmem:[#allocation151_spill] sm:$0xff]  ;;  %v3167_v41 = vpop.xlane.xlu1 %3166  ;;  %v17881_v39 = vld [vmem:[#allocation193_spill] sm:$0xff]  ;;  %v17895_v43 = vld [vmem:[#allocation202_spill] sm:$0xff] }
 0x3bb   :  { %17872 = vst [vmem:[#allocation327_spill] sm:$0xff] %v13790_v58  ;;  %17874 = vst [vmem:[#allocation134_spill] sm:$0xff] %v13794_v22  ;;  %v13799_v20 = vsel %vm17876_vm3, 1.0, %v16726_v24  ;;  %v3385_v10 = vadd.f32 %v3384_v30, %v3304_v36  ;;  %v13807_v32 = vmul.f32 49.0, %v13780_v26  ;;  %v4612_v55 = vmul.f32 %v6463_v57, %v17878_v1  ;;  %v17879_v54 = vld [vmem:[#allocation203_spill] sm:$0xff]  ;;  %v17884_v30 = vld [vmem:[#allocation149_spill] sm:$0xff]  ;;  %v13825_v26 = vpop.f32.mrf.mxu1 }
 0x3bc   :  { %vm4447_vm14 = vcmp.ne.f32.partialorder %v13575_v59, %v13136_v51  ;;  %vm17880_vm4 = vcmp.eq.s32.totalorder %v17879_v54, 1  ;;  %vm17882_vm2 = vcmp.eq.s32.totalorder %v17881_v39, 1  ;;  %v13823_v42 = vmul.f32 %v4610_v21, %v17884_v30  ;;  %v17886_v51 = vld [vmem:[#allocation280_spill] sm:$0xff]  ;;  %v17889_v54 = vld [vmem:[#allocation147_spill] sm:$0xff] }
 0x3bd   :  { %17877 = vst [vmem:[#allocation104_spill] sm:$0xff] %v13807_v32  ;;  %v13815_v58 = vsel %vm17880_vm4, 1.0, %v16726_v24  ;;  %v13820_v36 = vsel %vm17882_vm2, 1.0, %v16726_v24  ;;  %v3386_v57 = vadd.f32 %v3385_v10, %v3308_v8  ;;  %v13828_v1 = vmul.f32 49.0, %v13799_v20  ;;  %v17891_v39 = vld [vmem:[#allocation155_spill] sm:$0xff]  ;;  %v3163_v8 = vpop.xlane.xlu0 %3162 }
 0x3be   :  { %17883 = vst [vmem:[#allocation97_spill] sm:$0xff] %v13820_v36  ;;  %17885 = vst [vmem:[#allocation133_spill] sm:$0xff] %v13823_v42  ;;  %vm17887_vm11 = vcmp.eq.s32.totalorder %v17886_v51, 1  ;;  %v13836_v32 = vmul.f32 %v4611_v6, %v17889_v54  ;;  %v4613_v22 = vmul.f32 %v6464_v56, %v17891_v39  ;;  %v6465_v21 = vsel %vm4446_vm12, 1.0, %v16726_v24  ;;  %v13846_v51 = vpop.f32.mrf.mxu1  ;;  %v17892_v56 = vld [vmem:[#allocation148_spill] sm:$0xff]  ;;  %v3316_v53 = vpop.xlane.xlu1 %3315 }
 0x3bf   :  { %v13833_v59 = vsel %vm17887_vm11, 1.0, %v16726_v24  ;;  %vm4448_vm15 = vcmp.ne.f32.partialorder %v13593_v33, %v13152_v62  ;;  %v6466_v10 = vsel %vm4447_vm14, 1.0, %v16726_v24  ;;  %v3241_v30 = vadd.f32 %v3240_v63, %v3163_v8 }
 0x3c0   :  { %17888 = vst [vmem:[#allocation357_spill] sm:$0xff] %v13833_v59  ;;  %17890 = vst [vmem:[#allocation339_spill] sm:$0xff] %v13836_v32  ;;  %v13849_v42 = vmul.f32 49.0, %v13815_v58  ;;  %v13852_v6 = vmul.f32 49.0, %v13820_v36  ;;  %v13855_v54 = vmul.f32 %v4612_v55, %v17892_v56  ;;  %vm4449_vm5 = vcmp.ne.f32.partialorder %v13615_v27, %v13159_v44  ;;  %v13869_v8 = vpop.f32.mrf.mxu1  ;;  %v17898_v56 = vld [vmem:[#allocation189_spill] sm:$0xff] }
 0x3c1   :  { %v13860_v62 = vmul.f32 49.0, %v13833_v59  ;;  %vm17896_vm9 = vcmp.eq.s32.totalorder %v17895_v43, 1  ;;  %v4614_v63 = vmul.f32 %v6465_v21, %v13085_v2  ;;  %v6467_v39 = vsel %vm4448_vm15, 1.0, %v16726_v24  ;;  %v17901_v27 = vld [vmem:[#allocation141_spill] sm:$0xff]  ;;  %v17904_v43 = vld [vmem:[#allocation132_spill] sm:$0xff]  ;;  %v17905_v2 = vld [vmem:[#allocation179_spill] sm:$0xff] }
 0x3c2   :  { %17893 = vst [vmem:[#allocation76_spill] sm:$0xff] %v13855_v54  ;;  %v13865_v33 = vsel %vm17896_vm9, 1.0, %v16726_v24  ;;  %v3242_v55 = vadd.f32 %v3241_v30, %v3167_v41  ;;  %vm17899_vm7 = vcmp.eq.s32.totalorder %v17898_v56, 1  ;;  %v13877_v54 = vmul.f32 %v4613_v22, %v17901_v27  ;;  %v17903_v32 = vld [vmem:[#allocation145_spill] sm:$0xff]  ;;  %v13888_v56 = vpop.f32.mrf.mxu1  ;;  %v17909_v22 = vld [vmem:[#allocation192_spill] sm:$0xff]  ;;  %v3175_v27 = vpop.xlane.xlu1 %3174 }
 0x3c3   :  { %17894 = vst [vmem:[#allocation353_spill] sm:$0xff] %v13860_v62  ;;  %17897 = vst [vmem:[#allocation337_spill] sm:$0xff] %v13865_v33  ;;  %v13874_v44 = vsel %vm17899_vm7, 1.0, %v16726_v24  ;;  %v4615_v59 = vmul.f32 %v6466_v10, %v17903_v32  ;;  %vm4450_vm10 = vcmp.ne.f32.partialorder %v13641_v40, %v17904_v43  ;;  %v3312_v62 = vpop.xlane.xlu0 %3311  ;;  %vm17906_vm0 = vcmp.eq.s32.totalorder %v17905_v2, 1  ;;  %v17912_v40 = vld [vmem:[#allocation139_spill] sm:$0xff]  ;;  %v17917_v2 = vld [vmem:[#allocation142_spill] sm:$0xff] }
 0x3c4   :  { %17900 = vst [vmem:[#allocation79_spill] sm:$0xff] %v13874_v44  ;;  %17902 = vst [vmem:[#allocation257_spill] sm:$0xff] %v13877_v54  ;;  %v13885_v21 = vsel %vm17906_vm0, 1.0, %v16726_v24  ;;  %v6468_v41 = vsel %vm4449_vm5, 1.0, %v16726_v24  ;;  %v3387_v30 = vadd.f32 %v3386_v57, %v3312_v62  ;;  %v13891_v36 = vmul.f32 49.0, %v13865_v33  ;;  %v17914_v57 = vld [vmem:[#allocation188_spill] sm:$0xff]  ;;  %v13913_v33 = vpop.f32.mrf.mxu1 }
 0x3c5   :  { %17907 = vst [vmem:[#allocation101_spill] sm:$0xff] %v13885_v21  ;;  %vm17910_vm6 = vcmp.eq.s32.totalorder %v17909_v22, 1  ;;  %v4616_v10 = vmul.f32 %v6467_v39, %v17912_v40  ;;  %vm4451_vm8 = vcmp.ne.f32.partialorder %v13659_v19, %v13188_v18  ;;  %v13902_v43 = vmul.f32 49.0, %v13874_v44  ;;  %v17919_v18 = vld [vmem:[#allocation140_spill] sm:$0xff]  ;;  %v17921_v44 = vld [vmem:[#allocation137_spill] sm:$0xff] }
 0x3c6   :  { %17908 = vst [vmem:[#allocation95_spill] sm:$0xff] %v13891_v36  ;;  %v13896_v32 = vsel %vm17910_vm6, 1.0, %v16726_v24  ;;  %vm17915_vm3 = vcmp.eq.s32.totalorder %v17914_v57, 1  ;;  %v13910_v54 = vmul.f32 %v4614_v63, %v17917_v2  ;;  %v6469_v22 = vsel %vm4450_vm10, 1.0, %v16726_v24  ;;  %v17923_v63 = vld [vmem:[#allocation175_spill] sm:$0xff] }
 0x3c7   :  { %17911 = vst [vmem:[#allocation256_spill] sm:$0xff] %v13896_v32  ;;  %17913 = vst [vmem:[#allocation358_spill] sm:$0xff] %v13902_v43  ;;  %v13907_v62 = vsel %vm17915_vm3, 1.0, %v16726_v24  ;;  %v3388_v39 = vadd.f32 %v3387_v30, %v3316_v53  ;;  %v13916_v40 = vmul.f32 49.0, %v13885_v21  ;;  %v13919_v19 = vmul.f32 %v4615_v59, %v17919_v18  ;;  %v3171_v36 = vpop.xlane.xlu0 %3170  ;;  %v17926_v53 = vld [vmem:[#allocation31_spill] sm:$0xff]  ;;  %v13933_v21 = vpop.f32.mrf.mxu1  ;;  %v17929_v18 = vld [vmem:[#allocation138_spill] sm:$0xff] }
 0x3c8   :  { %17916 = vst [vmem:[#allocation254_spill] sm:$0xff] %v13907_v62  ;;  %17918 = vst [vmem:[#allocation252_spill] sm:$0xff] %v13910_v54  ;;  %v4617_v43 = vmul.f32 %v6468_v41, %v17921_v44  ;;  %v13923_v57 = vmul.f32 49.0, %v13896_v32  ;;  %vm17924_vm12 = vcmp.eq.s32.totalorder %v17923_v63, 1  ;;  %v6470_v54 = vsel %vm4451_vm8, 1.0, %v16726_v24  ;;  %v17927_v44 = vld [vmem:[#allocation135_spill] sm:$0xff]  ;;  %v3324_v63 = vpop.xlane.xlu1 %3323 }
 0x3c9   :  { %17920 = vst [vmem:[#allocation340_spill] sm:$0xff] %v13919_v19  ;;  %v13928_v2 = vsel %vm17924_vm12, 1.0, %v16726_v24  ;;  %vm4452_vm14 = vcmp.ne.f32.partialorder %v13676_v50, %v17926_v53  ;;  %v3243_v30 = vadd.f32 %v3242_v55, %v3171_v36  ;;  %v13936_v59 = vmul.f32 49.0, %v13907_v62  ;;  %v17930_v32 = vld [vmem:[#allocation165_spill] sm:$0xff]  ;;  %v13949_v36 = vpop.f32.mrf.mxu1 }
 0x3ca   :  { %17922 = vst [vmem:[#allocation323_spill] sm:$0xff] %v13923_v57  ;;  %17925 = vst [vmem:[#allocation255_spill] sm:$0xff] %v13928_v2  ;;  %v13939_v41 = vmul.f32 %v4616_v10, %v17927_v44  ;;  %v4618_v19 = vmul.f32 %v6469_v22, %v17929_v18  ;;  %vm4453_vm4 = vcmp.ne.f32.partialorder %v13701_v45, %v13212_v17  ;;  %vm17931_vm2 = vcmp.eq.s32.totalorder %v17930_v32, 1  ;;  %v17934_v10 = vld [vmem:[#allocation178_spill] sm:$0xff]  ;;  %v17939_v45 = vld [vmem:[#allocation136_spill] sm:$0xff] }
 0x3cb   :  { %v13947_v57 = vsel %vm17931_vm2, 1.0, %v16726_v24  ;;  %v3244_v55 = vadd.f32 %v3243_v30, %v3175_v27  ;;  %v13952_v62 = vmul.f32 49.0, %v13928_v2  ;;  %vm17935_vm11 = vcmp.eq.s32.totalorder %v17934_v10, 1  ;;  %v17937_v22 = vld [vmem:[#allocation174_spill] sm:$0xff]  ;;  %v17941_v18 = vld [vmem:[#allocation131_spill] sm:$0xff]  ;;  %v3320_v30 = vpop.xlane.xlu0 %3319 }
 0x3cc   :  { %17928 = vst [vmem:[#allocation354_spill] sm:$0xff] %v13939_v41  ;;  %17932 = vst [vmem:[#allocation338_spill] sm:$0xff] %v13947_v57  ;;  %v13957_v44 = vsel %vm17935_vm11, 1.0, %v16726_v24  ;;  %vm17938_vm15 = vcmp.eq.s32.totalorder %v17937_v22, 1  ;;  %v13965_v32 = vmul.f32 %v4617_v43, %v17939_v45  ;;  %v4619_v41 = vmul.f32 %v6470_v54, %v17941_v18  ;;  %v13975_v22 = vpop.f32.mrf.mxu1  ;;  %v17943_v43 = vld [vmem:[#allocation161_spill] sm:$0xff]  ;;  %v17945_v45 = vld [vmem:[#allocation291_spill] sm:$0xff]  ;;  %v3183_v53 = vpop.xlane.xlu1 %3182 }
 0x3cd   :  { %17933 = vst [vmem:[#allocation75_spill] sm:$0xff] %v13952_v62  ;;  %17936 = vst [vmem:[#allocation335_spill] sm:$0xff] %v13957_v44  ;;  %v13962_v17 = vsel %vm17938_vm15, 1.0, %v16726_v24  ;;  %v6471_v27 = vsel %vm4452_vm14, 1.0, %v16726_v24  ;;  %vm4454_vm5 = vcmp.ne.f32.partialorder %v13720_v13, %v13232_v12  ;;  %v6472_v10 = vsel %vm4453_vm4, 1.0, %v16726_v24  ;;  %v17948_v13 = vld [vmem:[#allocation278_spill] sm:$0xff] }
 0x3ce   :  { %17940 = vst [vmem:[#allocation65_spill] sm:$0xff] %v13965_v32  ;;  %v3389_v2 = vadd.f32 %v3388_v39, %v3320_v30  ;;  %17942 = vst [vmem:[#allocation253_spill] sm:$0xff] %v13975_v22  ;;  %v13978_v62 = vmul.f32 49.0, %v13947_v57  ;;  %vm17944_vm9 = vcmp.eq.s32.totalorder %v17943_v43, 1  ;;  %v13986_v50 = vmul.f32 %v4618_v19, %v17945_v45  ;;  %v17950_v18 = vld [vmem:[#allocation164_spill] sm:$0xff]  ;;  %v17952_v43 = vld [vmem:[#allocation26_spill] sm:$0xff]  ;;  %v14005_v19 = vpop.f32.mrf.mxu1 }
 0x3cf   :  { %v13983_v54 = vsel %vm17944_vm9, 1.0, %v16726_v24  ;;  %v13989_v12 = vmul.f32 49.0, %v13957_v44  ;;  %vm17949_vm7 = vcmp.eq.s32.totalorder %v17948_v13, 1  ;;  %vm17951_vm10 = vcmp.eq.s32.totalorder %v17950_v18, 1  ;;  %17953 = vst [vmem:[#allocation324_spill] sm:$0xff] %v14005_v19 }
 0x3d0   :  { %17946 = vst [vmem:[#allocation98_spill] sm:$0xff] %v13986_v50  ;;  %v13994_v39 = vsel %vm17949_vm7, 1.0, %v16726_v24  ;;  %v13999_v30 = vsel %vm17951_vm10, 1.0, %v16726_v24  ;;  %v4620_v32 = vmul.f32 %v6471_v27, %v17952_v43  ;;  %v6473_v22 = vsel %vm4454_vm5, 1.0, %v16726_v24  ;;  %v17954_v50 = vld [vmem:[#allocation129_spill] sm:$0xff] }
 0x3d1   :  { %17947 = vst [vmem:[#allocation333_spill] sm:$0xff] %v13989_v12  ;;  %vm4455_vm0 = vcmp.ne.f32.partialorder %v13739_v46, %v13246_v28  ;;  %v3390_v45 = vadd.f32 %v3389_v2, %v3324_v63  ;;  %v14008_v44 = vmul.f32 %v4619_v41, %v17954_v50  ;;  %v4621_v13 = vmul.f32 %v6472_v10, %v13176_v49  ;;  %v3179_v12 = vpop.xlane.xlu0 %3178  ;;  %v14019_v28 = vpop.f32.mrf.mxu1  ;;  %v17957_v2 = vld [vmem:[#allocation279_spill] sm:$0xff]  ;;  %v17959_v50 = vld [vmem:[#allocation24_spill] sm:$0xff] }
 0x3d2   :  { %v14012_v18 = vmul.f32 49.0, %v13962_v17  ;;  %v14015_v57 = vmul.f32 49.0, %v13983_v54  ;;  %vm4456_vm6 = vcmp.ne.f32.partialorder %v13759_v31, %v13268_v34  ;;  %v3245_v27 = vadd.f32 %v3244_v55, %v3179_v12  ;;  %17956 = vst [vmem:[#allocation66_spill] sm:$0xff] %v14019_v28  ;;  %v3332_v10 = vpop.xlane.xlu1 %3331  ;;  %v17971_v34 = vld [vmem:[#allocation130_spill] sm:$0xff] }
 0x3d3   :  { %17955 = vst [vmem:[#allocation336_spill] sm:$0xff] %v14008_v44  ;;  %v14022_v46 = vmul.f32 49.0, %v13994_v39  ;;  %vm17958_vm8 = vcmp.eq.s32.totalorder %v17957_v2, 1  ;;  %v4622_v41 = vmul.f32 %v6473_v22, %v13200_v25  ;;  %v6474_v63 = vsel %vm4455_vm0, 1.0, %v16726_v24  ;;  %v14039_v43 = vpop.f32.mrf.mxu1  ;;  %v17969_v25 = vld [vmem:[#allocation390_spill] sm:$0xff] }
 0x3d4   :  { %v14027_v49 = vsel %vm17958_vm8, 1.0, %v16726_v24  ;;  %vm4457_vm3 = vcmp.ne.f32.partialorder %v13784_v15, %v13286_v23  ;;  %v14034_v55 = vmul.f32 49.0, %v13999_v30  ;;  %v14037_v12 = vmul.f32 %v4620_v32, %v17959_v50  ;;  %17961 = vst [vmem:[#allocation248_spill] sm:$0xff] %v14039_v43  ;;  %v17964_v23 = vld [vmem:[#allocation123_spill] sm:$0xff] }
 0x3d5   :  { %v3246_v28 = vadd.f32 %v3245_v27, %v3183_v53  ;;  %v14044_v44 = vsel %vm3782_vm13, 1.0, %v16726_v24  ;;  %v14049_v22 = vsel %vm3783_vm1, 1.0, %v16726_v24  ;;  %v14052_v15 = vmul.f32 %v4621_v13, %v17964_v23  ;;  %v3328_v50 = vpop.xlane.xlu0 %3327  ;;  %v17966_v27 = vld [vmem:[#allocation311_spill] sm:$0xff]  ;;  %v14070_v23 = vpop.f32.mrf.mxu1 }
 0x3d6   :  { %17960 = vst [vmem:[#allocation250_spill] sm:$0xff] %v14037_v12  ;;  %v6475_v32 = vsel %vm4456_vm6, 1.0, %v16726_v24  ;;  %v14059_v53 = vmul.f32 49.0, %v14027_v49  ;;  %vm17967_vm13 = vcmp.eq.s32.totalorder %v17966_v27, 1  ;;  %v4623_v43 = vmul.f32 %v6474_v63, %v17969_v25  ;;  %17970 = vst [vmem:[#allocation64_spill] sm:$0xff] %v14070_v23 }
 0x3d7   :  { %17965 = vst [vmem:[#allocation251_spill] sm:$0xff] %v14052_v15  ;;  %v14064_v2 = vsel %vm17967_vm13, 1.0, %v16726_v24  ;;  %v6476_v12 = vsel %vm4457_vm3, 1.0, %v16726_v24  ;;  %vm4458_vm1 = vcmp.ne.f32.partialorder %v13804_v3, %v13309_v52  ;;  %v3391_v13 = vadd.f32 %v3390_v45, %v3328_v50  ;;  %v3191_v15 = vpop.xlane.xlu1 %3190  ;;  %v14084_v19 = vpop.f32.mrf.mxu1  ;;  %v17974_v3 = vld [vmem:[#allocation306_spill] sm:$0xff] }
 0x3d8   :  { %17968 = vst [vmem:[#allocation334_spill] sm:$0xff] %v14064_v2  ;;  %v14073_v31 = vmul.f32 %v4622_v41, %v17971_v34  ;;  %vm4459_vm12 = vcmp.ne.f32.partialorder %v13825_v26, %v13333_v61  ;;  %v14078_v27 = vmul.f32 49.0, %v14044_v44  ;;  %v14081_v63 = vmul.f32 49.0, %v14049_v22  ;;  %17973 = vst [vmem:[#allocation59_spill] sm:$0xff] %v14084_v19  ;;  %v17977_v41 = vld [vmem:[#allocation303_spill] sm:$0xff] }
 0x3d9   :  { %v4624_v25 = vmul.f32 %v6475_v32, %v13237_v48  ;;  %v3392_v52 = vadd.f32 %v3391_v13, %v3332_v10  ;;  %vm17975_vm14 = vcmp.eq.s32.totalorder %v17974_v3, 1  ;;  %vm17978_vm4 = vcmp.eq.s32.totalorder %v17977_v41, 1  ;;  %v3187_v48 = vpop.xlane.xlu0 %3186  ;;  %v17980_v32 = vld [vmem:[#allocation388_spill] sm:$0xff]  ;;  %v14107_v41 = vpop.f32.mrf.mxu1  ;;  %v17983_v19 = vld [vmem:[#allocation299_spill] sm:$0xff] }
 0x3da   :  { %17972 = vst [vmem:[#allocation331_spill] sm:$0xff] %v14073_v31  ;;  %v14089_v45 = vsel %vm17975_vm14, 1.0, %v16726_v24  ;;  %v14094_v61 = vsel %vm17978_vm4, 1.0, %v16726_v24  ;;  %v4625_v26 = vmul.f32 %v6476_v12, %v13251_v5  ;;  %v6477_v50 = vsel %vm4458_vm1, 1.0, %v16726_v24  ;;  %17982 = vst [vmem:[#allocation54_spill] sm:$0xff] %v14107_v41 }
 0x3db   :  { %17976 = vst [vmem:[#allocation249_spill] sm:$0xff] %v14089_v45  ;;  %17979 = vst [vmem:[#allocation246_spill] sm:$0xff] %v14094_v61  ;;  %vm4460_vm2 = vcmp.ne.f32.partialorder %v13846_v51, %v13345_v38  ;;  %v14101_v10 = vmul.f32 49.0, %v14064_v2  ;;  %v14104_v13 = vmul.f32 %v4623_v43, %v17980_v32  ;;  %v6478_v34 = vsel %vm4459_vm12, 1.0, %v16726_v24  ;;  %v3340_v12 = vpop.xlane.xlu1 %3339  ;;  %v17986_v43 = vld [vmem:[#allocation304_spill] sm:$0xff]  ;;  %v14135_v31 = vpop.f32.mrf.mxu1 }
 0x3dc   :  { %v3247_v3 = vadd.f32 %v3246_v28, %v3187_v48  ;;  %vm17984_vm11 = vcmp.eq.s32.totalorder %v17983_v19, 1  ;;  %v14115_v38 = vmul.f32 49.0, %v14089_v45  ;;  %v14118_v51 = vmul.f32 49.0, %v14094_v61  ;;  %v17989_v28 = vld [vmem:[#allocation300_spill] sm:$0xff]  ;;  %17993 = vst [vmem:[#allocation312_spill] sm:$0xff] %v14135_v31  ;;  %v17994_v61 = vld [vmem:[#allocation21_spill] sm:$0xff] }
 0x3dd   :  { %17981 = vst [vmem:[#allocation328_spill] sm:$0xff] %v14104_v13  ;;  %v14112_v5 = vsel %vm17984_vm11, 1.0, %v16726_v24  ;;  %vm17987_vm15 = vcmp.eq.s32.totalorder %v17986_v43, 1  ;;  %vm17990_vm5 = vcmp.eq.s32.totalorder %v17989_v28, 1  ;;  %v14131_v19 = vmul.f32 %v4624_v25, %v13261_v11  ;;  %v3336_v45 = vpop.xlane.xlu0 %3335  ;;  %v17996_v2 = vld [vmem:[#allocation240_spill] sm:$0xff]  ;;  %v4947_v25 = vpop.f32.mrf.mxu1 }
 0x3de   :  { %17985 = vst [vmem:[#allocation243_spill] sm:$0xff] %v14118_v51  ;;  %v14123_v32 = vsel %vm17987_vm15, 1.0, %v16726_v24  ;;  %v14128_v48 = vsel %vm17990_vm5, 1.0, %v16726_v24  ;;  %v4626_v41 = vmul.f32 %v6477_v50, %v13273_v35  ;;  %v6479_v23 = vsel %vm4460_vm2, 1.0, %v16726_v24 }
 0x3df   :  { %17988 = vst [vmem:[#allocation332_spill] sm:$0xff] %v14123_v32  ;;  %17991 = vst [vmem:[#allocation56_spill] sm:$0xff] %v14128_v48  ;;  %v3248_v13 = vadd.f32 %v3247_v3, %v3191_v15  ;;  %v14138_v51 = vmul.f32 %v4625_v26, %v17994_v61  ;;  %v4627_v43 = vmul.f32 %v6478_v34, %v13297_v9  ;;  %v14142_v28 = vmul.f32 49.0, %v14112_v5  ;;  %v18000_v26 = vld [vmem:[#allocation115_spill] sm:$0xff]  ;;  %v3199_v50 = vpop.xlane.xlu1 %3198  ;;  %v18004_v3 = vld [vmem:[#allocation297_spill] sm:$0xff] }
 0x3e0   :  { %17992 = vst [vmem:[#allocation329_spill] sm:$0xff] %v14131_v19  ;;  %vm17997_vm9 = vcmp.eq.s32.totalorder %v17996_v2, 1  ;;  %vm4461_vm7 = vcmp.ne.f32.partialorder %v13869_v8, %v13379_v14  ;;  %v3393_v35 = vadd.f32 %v3392_v52, %v3336_v45  ;;  %v14152_v15 = vmul.f32 49.0, %v14123_v32  ;;  %v18001_v2 = vld [vmem:[#allocation294_spill] sm:$0xff]  ;;  %v18007_v45 = vld [vmem:[#allocation200_spill] sm:$0xff] }
 0x3e1   :  { %17995 = vst [vmem:[#allocation325_spill] sm:$0xff] %v14138_v51  ;;  %v14147_v11 = vsel %vm17997_vm9, 1.0, %v16726_v24  ;;  %v14155_v61 = vmul.f32 49.0, %v14128_v48  ;;  %v4628_v9 = vmul.f32 %v6479_v23, %v13314_v7  ;;  %vm5142_vm10 = vcmp.ne.f32.partialorder %v4947_v25, %v18000_v26  ;;  %v4949_v51 = vpop.f32.mrf.mxu1  ;;  %v18010_v25 = vld [vmem:[#allocation320_spill] sm:$0xff] }
 0x3e2   :  { %17998 = vst [vmem:[#allocation50_spill] sm:$0xff] %v14147_v11  ;;  %vm18002_vm0 = vcmp.eq.s32.totalorder %v18001_v2, 1  ;;  %vm18005_vm6 = vcmp.eq.s32.totalorder %v18004_v3, 1  ;;  %v14170_v31 = vmul.f32 %v4626_v41, %v18007_v45  ;;  %v6577_v19 = vsel %vm5142_vm10, 1.0, %v16726_v24  ;;  %v18012_v3 = vld [vmem:[#allocation239_spill] sm:$0xff]  ;;  %v3195_v41 = vpop.xlane.xlu0 %3194 }
 0x3e3   :  { %17999 = vst [vmem:[#allocation247_spill] sm:$0xff] %v14155_v61  ;;  %v14162_v34 = vsel %vm18002_vm0, 1.0, %v16726_v24  ;;  %v14167_v52 = vsel %vm18005_vm6, 1.0, %v16726_v24  ;;  %v3394_v7 = vadd.f32 %v3393_v35, %v3340_v12  ;;  %v14174_v23 = vmul.f32 49.0, %v14147_v11  ;;  %v4951_v12 = vpop.f32.mrf.mxu1  ;;  %v3348_v8 = vpop.xlane.xlu1 %3347  ;;  %v18028_v61 = vld [vmem:[#allocation260_spill] sm:$0xff] }
 0x3e4   :  { %18003 = vst [vmem:[#allocation321_spill] sm:$0xff] %v14162_v34  ;;  %18006 = vst [vmem:[#allocation45_spill] sm:$0xff] %v14167_v52  ;;  %v14177_v26 = vmul.f32 %v4627_v43, %v18010_v25  ;;  %v6480_v2 = vsel %vm4461_vm7, 1.0, %v16726_v24  ;;  %v5310_v48 = vmul.f32 %v6577_v19, %v18012_v3  ;;  %vm5143_vm8 = vcmp.ne.f32.partialorder %v4949_v51, %v13647_v47  ;;  %v18015_v25 = vld [vmem:[#allocation201_spill] sm:$0xff]  ;;  %v18017_v47 = vld [vmem:[#allocation295_spill] sm:$0xff] }
 0x3e5   :  { %18008 = vst [vmem:[#allocation244_spill] sm:$0xff] %v14170_v31  ;;  %18009 = vst [vmem:[#allocation326_spill] sm:$0xff] %v14174_v23  ;;  %v6578_v45 = vsel %vm5143_vm8, 1.0, %v16726_v24  ;;  %v3249_v31 = vadd.f32 %v3248_v13, %v3195_v41  ;;  %v14187_v35 = vmul.f32 49.0, %v14162_v34  ;;  %v14190_v43 = vmul.f32 49.0, %v14167_v52  ;;  %v18020_v13 = vld [vmem:[#allocation198_spill] sm:$0xff]  ;;  %v4953_v52 = vpop.f32.mrf.mxu1 }
 0x3e6   :  { %18011 = vst [vmem:[#allocation44_spill] sm:$0xff] %v14177_v26  ;;  %v14193_v26 = vmul.f32 %v4628_v9, %v18015_v25  ;;  %v5311_v14 = vmul.f32 %v6578_v45, %v13612_v0  ;;  %vm5144_vm3 = vcmp.ne.f32.partialorder %v4951_v12, %v13650_v4  ;;  %vm18018_vm13 = vcmp.eq.s32.totalorder %v18017_v47, 1  ;;  %v18021_v3 = vld [vmem:[#allocation70_spill] sm:$0xff]  ;;  %v3344_v0 = vpop.xlane.xlu0 %3343  ;;  %v18024_v45 = vld [vmem:[#allocation124_spill] sm:$0xff] }
 0x3e7   :  { %18013 = vst [vmem:[#allocation241_spill] sm:$0xff] %v14187_v35  ;;  %18014 = vst [vmem:[#allocation235_spill] sm:$0xff] %v14190_v43  ;;  %v14200_v51 = vsel %vm18018_vm13, 1.0, %v16726_v24  ;;  %v4629_v19 = vmul.f32 %v6480_v2, %v18020_v13  ;;  %vm4462_vm1 = vcmp.ne.f32.partialorder %v13888_v56, %v18021_v3  ;;  %v6579_v41 = vsel %vm5144_vm3, 1.0, %v16726_v24  ;;  %v18022_v25 = vld [vmem:[#allocation34_spill] sm:$0xff]  ;;  %v18026_v43 = vld [vmem:[#allocation365_spill] sm:$0xff]  ;;  %v4957_v11 = vpop.f32.mrf.mxu1 }
 0x3e8   :  { %18016 = vst [vmem:[#allocation322_spill] sm:$0xff] %v14193_v26  ;;  %18019 = vst [vmem:[#allocation43_spill] sm:$0xff] %v14200_v51  ;;  %v3250_v9 = vadd.f32 %v3249_v31, %v3199_v50  ;;  %vm5145_vm12 = vcmp.ne.f32.partialorder %v4953_v52, %v18022_v25  ;;  %vm18023_vm14 = vcmask 785408   ;;  %v5422_v12 = vmul.f32 %v18024_v45, %v5310_v48  ;;  %v18025_v26 = vld [vmem:[#allocation204_spill] sm:$0xff]  ;;  %v18027_v23 = vld [vmem:[#allocation170_spill] sm:$0xff]  ;;  %v3207_v31 = vpop.xlane.xlu1 %3206 }
 0x3e9   :  { %v5623_v4 = vsel %vm18023_vm14, %v5311_v14, 0.0  ;;  %v5423_v47 = vmul.f32 %v18025_v26, %v5311_v14  ;;  %v5312_v34 = vmul.f32 %v6579_v41, %v18026_v43  ;;  %v6580_v2 = vsel %vm5145_vm12, 1.0, %v16726_v24  ;;  %vm18029_vm2 = vmmov %vm18023_vm14  ;;  %v18033_v25 = vld [vmem:[#allocation238_spill] sm:$0xff]  ;;  %v18035_v56 = vld [vmem:[#allocation33_spill] sm:$0xff] }
 0x3ea   :  { %v3395_v13 = vadd.f32 %v3394_v7, %v3344_v0  ;;  %v5624_v35 = vadd.f32 %v5623_v4, %v5310_v48  ;;  %v5313_v32 = vmul.f32 %v6580_v2, %v18027_v23  ;;  %vm5146_vm4 = vcmp.ne.f32.partialorder %v4957_v11, %v18028_v61  ;;  %v4959_v7 = vpop.f32.mrf.mxu1  ;;  %v3203_v11 = vpop.xlane.xlu0 %3202  ;;  %v18031_v61 = vld [vmem:[#allocation67_spill] sm:$0xff]  ;;  %vm18032_vm15 = vmmov %vm18029_vm2 }
 0x3eb   :  { %v5478_v50 = vsel %vm18029_vm2, %v5423_v47, 0.0  ;;  %v14216_v52 = vmul.f32 49.0, %v14200_v51  ;;  %v6481_v26 = vsel %vm4462_vm1, 1.0, %v16726_v24  ;;  %v6581_v43 = vsel %vm5146_vm4, 1.0, %v16726_v24  ;;  %vm18038_vm7 = vmmov %vm18029_vm2 }
 0x3ec   :  { %5625 = vadd.xlane.f32.xlu0 %v5624_v35  ;;  %v5479_v48 = vadd.f32 %v5478_v50, %v5422_v12  ;;  %v3396_v14 = vadd.f32 %v3395_v13, %v3348_v8  ;;  %vm5147_vm11 = vcmp.ne.f32.partialorder %v4959_v7, %v13692_v60  ;;  %v5425_v23 = vmul.f32 %v18031_v61, %v5313_v32  ;;  %v4961_v35 = vpop.f32.mrf.mxu1  ;;  %v18036_v8 = vld [vmem:[#allocation15_spill] sm:$0xff]  ;;  %v18037_v60 = vld [vmem:[#allocation29_spill] sm:$0xff]  ;;  %v3356_v2 = vpop.xlane.xlu1 %3355  ;;  %vm18043_vm6 = vmmov %vm18029_vm2 }
 0x3ed   :  { %18030 = vst [vmem:[#allocation242_spill] sm:$0xff] %v14216_v52  ;;  %v5627_v41 = vsel %vm18032_vm15, %v5313_v32, 0.0  ;;  %vm18034_vm5 = vcmp.eq.s32.totalorder %v18033_v25, 1  ;;  %v5314_v3 = vmul.f32 %v6581_v43, %v18035_v56  ;;  %v6582_v4 = vsel %vm5147_vm11, 1.0, %v16726_v24  ;;  %v18039_v13 = vld [vmem:[#allocation289_spill] sm:$0xff]  ;;  %v18042_v56 = vld [vmem:[#allocation36_spill] sm:$0xff]  ;;  %vm18049_vm3 = vmmov %vm18029_vm2 }
 0x3ee   :  { %v14229_v0 = vsel %vm18034_vm5, 1.0, %v16726_v24  ;;  %v3251_v45 = vadd.f32 %v3250_v9, %v3203_v11  ;;  %5480 = vadd.xlane.f32.xlu1 %v5479_v48  ;;  %v5424_v12 = vmul.f32 %v18036_v8, %v5312_v34  ;;  %v5315_v47 = vmul.f32 %v6582_v4, %v18037_v60  ;;  %v4963_v7 = vpop.f32.mrf.mxu1  ;;  %v18041_v61 = vld [vmem:[#allocation385_spill] sm:$0xff]  ;;  %v18045_v8 = vld [vmem:[#allocation343_spill] sm:$0xff]  ;;  %vm18053_vm12 = vmmov %vm18029_vm2 }
 0x3ef   :  { %vm5148_vm9 = vcmp.ne.f32.partialorder %v4961_v35, %v13707_v37  ;;  %v5482_v32 = vsel %vm18038_vm7, %v5425_v23, 0.0  ;;  %vm18040_vm10 = vcmp.eq.s32.totalorder %v18039_v13, 1  ;;  %v5628_v11 = vadd.f32 %v5627_v41, %v5312_v34  ;;  %v3352_v37 = vpop.xlane.xlu0 %3351  ;;  %v18044_v23 = vld [vmem:[#allocation196_spill] sm:$0xff]  ;;  %v18046_v34 = vld [vmem:[#allocation205_spill] sm:$0xff]  ;;  %v18047_v41 = vld [vmem:[#allocation319_spill] sm:$0xff] }
 0x3f0   :  { %v14240_v50 = vsel %vm18040_vm10, 1.0, %v16726_v24  ;;  %v6583_v43 = vsel %vm5148_vm9, 1.0, %v16726_v24  ;;  %v5483_v9 = vadd.f32 %v5482_v32, %v5424_v12  ;;  %v3252_v48 = vadd.f32 %v3251_v45, %v3207_v31  ;;  %v4967_v52 = vpop.f32.mrf.mxu1  ;;  %v18048_v45 = vld [vmem:[#allocation73_spill] sm:$0xff]  ;;  %v3215_v32 = vpop.xlane.xlu1 %3214  ;;  %vm18058_vm4 = vmmov %vm18029_vm2 }
 0x3f1   :  { %v14244_v25 = vmul.f32 %v4629_v19, %v18041_v61  ;;  %vm5149_vm0 = vcmp.ne.f32.partialorder %v4963_v7, %v18042_v56  ;;  %v5631_v4 = vsel %vm18043_vm6, %v5315_v47, 0.0  ;;  %v5427_v35 = vmul.f32 %v18044_v23, %v5315_v47  ;;  %vm18060_vm11 = vmmov %vm18049_vm3 }
 0x3f2   :  { %v5316_v60 = vmul.f32 %v6583_v43, %v18045_v8  ;;  %v6584_v13 = vsel %vm5149_vm0, 1.0, %v16726_v24  ;;  %v3397_v51 = vadd.f32 %v3396_v14, %v3352_v37  ;;  %5484 = vadd.xlane.f32.xlu0 %v5483_v9  ;;  %5629 = vadd.xlane.f32.xlu1 %v5628_v11  ;;  %v5426_v31 = vmul.f32 %v18046_v34, %v5314_v3  ;;  %v4969_v7 = vpop.f32.mrf.mxu1  ;;  %v18050_v9 = vld [vmem:[#allocation382_spill] sm:$0xff]  ;;  %v18051_v11 = vld [vmem:[#allocation108_spill] sm:$0xff]  ;;  %vm18065_vm5 = vmmov %vm18049_vm3 }
 0x3f3   :  { %v14253_v19 = vmul.f32 %v6481_v26, %v18047_v41  ;;  %v5317_v12 = vmul.f32 %v6584_v13, %v18048_v45  ;;  %vm5150_vm8 = vcmp.ne.f32.partialorder %v4967_v52, %v13723_v29  ;;  %v5486_v47 = vsel %vm18049_vm3, %v5427_v35, 0.0  ;;  %v3211_v26 = vpop.xlane.xlu0 %3210  ;;  %v18052_v37 = vld [vmem:[#allocation194_spill] sm:$0xff]  ;;  %vm18068_vm7 = vmmov %vm18049_vm3 }
 0x3f4   :  { %v6585_v43 = vsel %vm5150_vm8, 1.0, %v16726_v24  ;;  %v5632_v61 = vadd.f32 %v5631_v4, %v5314_v3  ;;  %v5487_v14 = vadd.f32 %v5486_v47, %v5426_v31  ;;  %v3398_v56 = vadd.f32 %v3397_v51, %v3356_v2  ;;  %v18054_v29 = vld [vmem:[#allocation102_spill] sm:$0xff]  ;;  %v4971_v34 = vpop.f32.mrf.mxu1  ;;  %v18056_v2 = vld [vmem:[#allocation111_spill] sm:$0xff]  ;;  %v3364_v41 = vpop.xlane.xlu1 %3363  ;;  %vm18076_vm6 = vmmov %vm18049_vm3 }
 0x3f5   :  { %vm4463_vm13 = vcmp.ne.f32.partialorder %v13913_v33, %v18050_v9  ;;  %vm5151_vm1 = vcmp.ne.f32.partialorder %v4969_v7, %v18051_v11  ;;  %v5429_v23 = vmul.f32 %v18052_v37, %v5317_v12  ;;  %v5635_v8 = vsel %vm18053_vm12, %v5317_v12, 0.0  ;;  %v18055_v3 = vld [vmem:[#allocation62_spill] sm:$0xff]  ;;  %vm18083_vm12 = vmmov %vm18058_vm4 }
 0x3f6   :  { %v5318_v52 = vmul.f32 %v6585_v43, %v18054_v29  ;;  %v6586_v35 = vsel %vm5151_vm1, 1.0, %v16726_v24  ;;  %v3253_v13 = vadd.f32 %v3252_v48, %v3211_v26  ;;  %5633 = vadd.xlane.f32.xlu0 %v5632_v61  ;;  %5488 = vadd.xlane.f32.xlu1 %v5487_v14  ;;  %v5428_v51 = vmul.f32 %v18055_v3, %v5316_v60  ;;  %v18057_v31 = vld [vmem:[#allocation366_spill] sm:$0xff]  ;;  %v4973_v43 = vpop.f32.mrf.mxu1 }
 0x3f7   :  { %v5319_v4 = vmul.f32 %v6586_v35, %v18056_v2  ;;  %vm5152_vm14 = vcmp.ne.f32.partialorder %v4971_v34, %v18057_v31  ;;  %v5490_v45 = vsel %vm18058_vm4, %v5429_v23, 0.0  ;;  %v14271_v47 = vmul.f32 49.0, %v14229_v0  ;;  %v18059_v14 = vld [vmem:[#allocation106_spill] sm:$0xff]  ;;  %v3360_v26 = vpop.xlane.xlu0 %3359  ;;  %v18061_v23 = vld [vmem:[#allocation128_spill] sm:$0xff] }
 0x3f8   :  { %v6587_v12 = vsel %vm5152_vm14, 1.0, %v16726_v24  ;;  %v5491_v7 = vadd.f32 %v5490_v45, %v5428_v51  ;;  %v5636_v48 = vadd.f32 %v5635_v8, %v5316_v60  ;;  %v3254_v11 = vadd.f32 %v3253_v13, %v3215_v32  ;;  %v18062_v35 = vld [vmem:[#allocation330_spill] sm:$0xff]  ;;  %v4977_v51 = vpop.f32.mrf.mxu1  ;;  %v3223_v9 = vpop.xlane.xlu1 %3222 }
 0x3f9   :  { %v6482_v61 = vsel %vm4463_vm13, 1.0, %v16726_v24  ;;  %vm5153_vm2 = vcmp.ne.f32.partialorder %v4973_v43, %v18059_v14  ;;  %v5639_v37 = vsel %vm18060_vm11, %v5319_v4, 0.0  ;;  %v5431_v29 = vmul.f32 %v18061_v23, %v5319_v4  ;;  %v18063_v60 = vld [vmem:[#allocation378_spill] sm:$0xff]  ;;  %v18067_v14 = vld [vmem:[#allocation184_spill] sm:$0xff]  ;;  %vm18078_vm13 = vmmov %vm18058_vm4 }
 0x3fa   :  { %v5320_v34 = vmul.f32 %v6587_v12, %v18062_v35  ;;  %v6588_v3 = vsel %vm5153_vm2, 1.0, %v16726_v24  ;;  %v3399_v2 = vadd.f32 %v3398_v56, %v3360_v26  ;;  %5492 = vadd.xlane.f32.xlu0 %v5491_v7  ;;  %5637 = vadd.xlane.f32.xlu1 %v5636_v48  ;;  %v5430_v32 = vmul.f32 %v18063_v60, %v5318_v52  ;;  %v18064_v8 = vld [vmem:[#allocation362_spill] sm:$0xff]  ;;  %v4979_v45 = vpop.f32.mrf.mxu1  ;;  %v18071_v35 = vld [vmem:[#allocation259_spill] sm:$0xff]  ;;  %vm18088_vm2 = vmmov %vm18065_vm5 }
 0x3fb   :  { %v5321_v33 = vmul.f32 %v6588_v3, %v18064_v8  ;;  %vm5154_vm15 = vcmp.ne.f32.partialorder %v4977_v51, %v13787_v16  ;;  %v5494_v13 = vsel %vm18065_vm5, %v5431_v29, 0.0  ;;  %v14288_v31 = vmul.f32 49.0, %v14240_v50  ;;  %v18066_v7 = vld [vmem:[#allocation134_spill] sm:$0xff]  ;;  %v3219_v48 = vpop.xlane.xlu0 %3218  ;;  %v18069_v16 = vld [vmem:[#allocation292_spill] sm:$0xff]  ;;  %vm18089_vm11 = vmmov %vm18088_vm2 }
 0x3fc   :  { %v6589_v4 = vsel %vm5154_vm15, 1.0, %v16726_v24  ;;  %v5640_v12 = vadd.f32 %v5639_v37, %v5318_v52  ;;  %v5495_v56 = vadd.f32 %v5494_v13, %v5430_v32  ;;  %v3400_v43 = vadd.f32 %v3399_v2, %v3364_v41  ;;  %v4981_v52 = vpop.f32.mrf.mxu1  ;;  %v18072_v41 = vld [vmem:[#allocation186_spill] sm:$0xff]  ;;  %v18073_v2 = vld [vmem:[#allocation69_spill] sm:$0xff]  ;;  %v18074_v8 = vld [vmem:[#allocation344_spill] sm:$0xff] }
 0x3fd   :  { %vm5155_vm9 = vcmp.ne.f32.partialorder %v4979_v45, %v18066_v7  ;;  %v5433_v26 = vmul.f32 %v18067_v14, %v5321_v33  ;;  %v5643_v23 = vsel %vm18068_vm7, %v5321_v33, 0.0  ;;  %vm18070_vm10 = vcmp.eq.s32.totalorder %v18069_v16, 1  ;;  %v18075_v13 = vld [vmem:[#allocation104_spill] sm:$0xff] }
 0x3fe   :  { %v14297_v29 = vsel %vm18070_vm10, 1.0, %v16726_v24  ;;  %v5322_v3 = vmul.f32 %v6589_v4, %v18071_v35  ;;  %v6590_v51 = vsel %vm5155_vm9, 1.0, %v16726_v24  ;;  %v3255_v60 = vadd.f32 %v3254_v11, %v3219_v48  ;;  %5641 = vadd.xlane.f32.xlu0 %v5640_v12  ;;  %5496 = vadd.xlane.f32.xlu1 %v5495_v56  ;;  %v4983_v7 = vpop.f32.mrf.mxu1  ;;  %v18077_v12 = vld [vmem:[#allocation126_spill] sm:$0xff]  ;;  %v3372_v56 = vpop.xlane.xlu1 %3371  ;;  %v18079_v35 = vld [vmem:[#allocation181_spill] sm:$0xff]  ;;  %vm18100_vm10 = vmmov %vm18088_vm2 }
 0x3ff   :  { %v5432_v37 = vmul.f32 %v18072_v41, %v5320_v34  ;;  %v14304_v32 = vmul.f32 %v14253_v19, %v18073_v2  ;;  %v5323_v33 = vmul.f32 %v6590_v51, %v18074_v8  ;;  %vm5156_vm0 = vcmp.ne.f32.partialorder %v4981_v52, %v18075_v13  ;;  %v3368_v19 = vpop.xlane.xlu0 %3367  ;;  %v18080_v52 = vld [vmem:[#allocation342_spill] sm:$0xff] }
 0x400   :  { %v5498_v45 = vsel %vm18076_vm6, %v5433_v26, 0.0  ;;  %v6591_v4 = vsel %vm5156_vm0, 1.0, %v16726_v24  ;;  %v5644_v11 = vadd.f32 %v5643_v23, %v5320_v34  ;;  %v3256_v48 = vadd.f32 %v3255_v60, %v3223_v9  ;;  %v4987_v8 = vpop.f32.mrf.mxu1  ;;  %v18081_v34 = vld [vmem:[#allocation22_spill] sm:$0xff]  ;;  %v18082_v23 = vld [vmem:[#allocation199_spill] sm:$0xff]  ;;  %vm18101_vm0 = vmmov %vm18088_vm2 }
 0x401   :  { %v5499_v14 = vadd.f32 %v5498_v45, %v5432_v37  ;;  %vm4464_vm8 = vcmp.ne.f32.partialorder %v13933_v21, %v18077_v12  ;;  %vm5157_vm3 = vcmp.ne.f32.partialorder %v4983_v7, %v13828_v1  ;;  %v5647_v16 = vsel %vm18078_vm13, %v5323_v33, 0.0  ;;  %v18086_v12 = vld [vmem:[#allocation97_spill] sm:$0xff]  ;;  %vm18108_vm13 = vmmov %vm18101_vm0 }
 0x402   :  { %v5435_v51 = vmul.f32 %v18079_v35, %v5323_v33  ;;  %v5324_v41 = vmul.f32 %v6591_v4, %v18080_v52  ;;  %v6592_v26 = vsel %vm5157_vm3, 1.0, %v16726_v24  ;;  %v3401_v2 = vadd.f32 %v3400_v43, %v3368_v19  ;;  %5645 = vadd.xlane.f32.xlu1 %v5644_v11  ;;  %v4989_v13 = vpop.f32.mrf.mxu1  ;;  %v3231_v21 = vpop.xlane.xlu1 %3230  ;;  %v18087_v52 = vld [vmem:[#allocation353_spill] sm:$0xff] }
 0x403   :  { %5500 = vadd.xlane.f32.xlu0 %v5499_v14  ;;  %v5434_v9 = vmul.f32 %v18081_v34, %v5322_v3  ;;  %v14319_v60 = vmul.f32 %v6482_v61, %v18082_v23  ;;  %v5325_v1 = vmul.f32 %v6592_v26, %v13799_v20  ;;  %vm5158_vm1 = vcmp.ne.f32.partialorder %v4987_v8, %v13849_v42  ;;  %v3227_v61 = vpop.xlane.xlu0 %3226  ;;  %v18084_v20 = vld [vmem:[#allocation172_spill] sm:$0xff]  ;;  %v18092_v23 = vld [vmem:[#allocation357_spill] sm:$0xff] }
 0x404   :  { %v5502_v37 = vsel %vm18083_vm12, %v5435_v51, 0.0  ;;  %v6593_v33 = vsel %vm5158_vm1, 1.0, %v16726_v24  ;;  %v5648_v45 = vadd.f32 %v5647_v16, %v5322_v3  ;;  %v3402_v4 = vadd.f32 %v3401_v2, %v3372_v56  ;;  %v4991_v19 = vpop.f32.mrf.mxu1  ;;  %v18085_v16 = vld [vmem:[#allocation182_spill] sm:$0xff] }
 0x405   :  { %v5503_v43 = vadd.f32 %v5502_v37, %v5434_v9  ;;  %v14329_v7 = vsel %vm4464_vm8, 1.0, %v16726_v24  ;;  %vm5159_vm14 = vcmp.ne.f32.partialorder %v4989_v13, %v13852_v6  ;;  %v5437_v14 = vmul.f32 %v18084_v20, %v5325_v1  ;;  %v18095_v20 = vld [vmem:[#allocation221_spill] sm:$0xff]  ;;  %vm18102_vm8 = vmmov %vm18101_vm0 }
 0x406   :  { %v14334_v42 = vmul.f32 49.0, %v14297_v29  ;;  %v5326_v11 = vmul.f32 %v6593_v33, %v13815_v58  ;;  %v6594_v3 = vsel %vm5159_vm14, 1.0, %v16726_v24  ;;  %v3257_v56 = vadd.f32 %v3256_v48, %v3227_v61  ;;  %5649 = vadd.xlane.f32.xlu1 %v5648_v45  ;;  %v4993_v58 = vpop.f32.mrf.mxu1  ;;  %v18090_v48 = vld [vmem:[#allocation290_spill] sm:$0xff]  ;;  %v18093_v33 = vld [vmem:[#allocation95_spill] sm:$0xff] }
 0x407   :  { %v5436_v35 = vmul.f32 %v18085_v16, %v5324_v41  ;;  %v5327_v51 = vmul.f32 %v6594_v3, %v18086_v12  ;;  %vm5160_vm4 = vcmp.ne.f32.partialorder %v4991_v19, %v18087_v52  ;;  %v5506_v6 = vsel %vm18088_vm2, %v5437_v14, 0.0  ;;  %v3376_v13 = vpop.xlane.xlu0 %3375  ;;  %v18094_v45 = vld [vmem:[#allocation171_spill] sm:$0xff]  ;;  %v18097_v16 = vld [vmem:[#allocation173_spill] sm:$0xff]  ;;  %vm18117_vm2 = vmmov %vm18101_vm0 }
 0x408   :  { %v5651_v26 = vsel %vm18089_vm11, %v5325_v1, 0.0  ;;  %v3258_v2 = vadd.f32 %v3257_v56, %v3231_v21  ;;  %v6595_v8 = vsel %vm5160_vm4, 1.0, %v16726_v24  ;;  %vm18091_vm15 = vcmp.eq.s32.totalorder %v18090_v48, 1  ;;  %v4997_v56 = vpop.f32.mrf.mxu1  ;;  %v18098_v12 = vld [vmem:[#allocation337_spill] sm:$0xff]  ;;  %vm18116_vm4 = vmmov %vm18101_vm0 }
 0x409   :  { %v5507_v34 = vadd.f32 %v5506_v6, %v5436_v35  ;;  %v14347_v9 = vsel %vm18091_vm15, 1.0, %v16726_v24  ;;  %v5328_v37 = vmul.f32 %v6595_v8, %v18092_v23  ;;  %vm5161_vm5 = vcmp.ne.f32.partialorder %v4993_v58, %v18093_v33  ;;  %v18099_v6 = vld [vmem:[#allocation358_spill] sm:$0xff]  ;;  %vm18118_vm15 = vmmov %vm18101_vm0 }
 0x40a   :  { %v5439_v61 = vmul.f32 %v18094_v45, %v5327_v51  ;;  %vm18096_vm9 = vcmp.eq.s32.totalorder %v18095_v20, 1  ;;  %v6596_v14 = vsel %vm5161_vm5, 1.0, %v16726_v24  ;;  %v3403_v3 = vadd.f32 %v3402_v4, %v3376_v13  ;;  %5504 = vadd.xlane.f32.xlu1 %v5503_v43  ;;  %v4999_v23 = vpop.f32.mrf.mxu1  ;;  %v18103_v43 = vld [vmem:[#allocation107_spill] sm:$0xff] }
 0x40b   :  { %v14355_v1 = vsel %vm18096_vm9, 1.0, %v16726_v24  ;;  %5508 = vadd.xlane.f32.xlu0 %v5507_v34  ;;  %v5652_v19 = vadd.f32 %v5651_v26, %v5324_v41  ;;  %v5438_v35 = vmul.f32 %v18097_v16, %v5326_v11  ;;  %v3259_v21 = vrot.slane %v3258_v2, 4  ;;  %v18104_v34 = vld [vmem:[#allocation258_spill] sm:$0xff]  ;;  %v18105_v20 = vld [vmem:[#allocation79_spill] sm:$0xff]  ;;  %vm18124_vm9 = vmmov %vm18101_vm0 }
 0x40c   :  { %v5329_v52 = vmul.f32 %v6596_v14, %v18098_v12  ;;  %vm5162_vm7 = vcmp.ne.f32.partialorder %v4997_v56, %v18099_v6  ;;  %v5510_v8 = vsel %vm18100_vm10, %v5439_v61, 0.0  ;;  %v3404_v58 = vrot.slane %v3403_v3, 4  ;;  %v5001_v56 = vpop.f32.mrf.mxu1  ;;  %v18106_v6 = vld [vmem:[#allocation101_spill] sm:$0xff] }
 0x40d   :  { %v6597_v48 = vsel %vm5162_vm7, 1.0, %v16726_v24  ;;  %v5655_v33 = vsel %vm18101_vm0, %v5327_v51, 0.0  ;;  %v5511_v4 = vadd.f32 %v5510_v8, %v5438_v35  ;;  %vm5163_vm6 = vcmp.ne.f32.partialorder %v4999_v23, %v13916_v40  ;;  %v18107_v35 = vld [vmem:[#allocation323_spill] sm:$0xff] }
 0x40e   :  { %v5659_v41 = vsel %vm18102_vm8, %v5329_v52, 0.0  ;;  %v5440_v26 = vmul.f32 %v18103_v43, %v5328_v37  ;;  %v5441_v13 = vmul.f32 %v18104_v34, %v5329_v52  ;;  %v3405_v45 = vadd.f32 %v3404_v58, %v3403_v3  ;;  %5653 = vadd.xlane.f32.xlu1 %v5652_v19  ;;  %v5003_v43 = vpop.f32.mrf.mxu1  ;;  %v18109_v58 = vld [vmem:[#allocation197_spill] sm:$0xff]  ;;  %v18110_v19 = vld [vmem:[#allocation256_spill] sm:$0xff]  ;;  %vm18129_vm8 = vmmov %vm18101_vm0 }
 0x40f   :  { %v5330_v14 = vmul.f32 %v6597_v48, %v18105_v20  ;;  %v6598_v61 = vsel %vm5163_vm6, 1.0, %v16726_v24  ;;  %v5660_v16 = vadd.f32 %v5659_v41, %v5328_v37  ;;  %v3260_v12 = vadd.f32 %v3259_v21, %v3258_v2  ;;  %v18111_v2 = vld [vmem:[#allocation261_spill] sm:$0xff]  ;;  %v18112_v41 = vld [vmem:[#allocation191_spill] sm:$0xff] }
 0x410   :  { %v5331_v51 = vmul.f32 %v6598_v61, %v18106_v6  ;;  %vm5164_vm3 = vcmp.ne.f32.partialorder %v5001_v56, %v18107_v35  ;;  %v5514_v40 = vsel %vm18108_vm13, %v5441_v13, 0.0  ;;  %v3406_v8 = vrot.slane %v3405_v45, 2  ;;  %v5007_v20 = vpop.f32.mrf.mxu1  ;;  %v18114_v61 = vld [vmem:[#allocation254_spill] sm:$0xff]  ;;  %v18115_v56 = vld [vmem:[#allocation75_spill] sm:$0xff] }
 0x411   :  { %v6599_v23 = vsel %vm5164_vm3, 1.0, %v16726_v24  ;;  %5661 = vadd.xlane.f32.xlu0 %v5660_v16  ;;  %v5656_v3 = vadd.f32 %v5655_v33, %v5326_v11  ;;  %v5515_v52 = vadd.f32 %v5514_v40, %v5440_v26  ;;  %v14376_v48 = vmul.f32 %v14319_v60, %v18109_v58  ;;  %v18113_v11 = vld [vmem:[#allocation341_spill] sm:$0xff]  ;;  %vm18130_vm3 = vmmov %vm18101_vm0 }
 0x412   :  { %v5332_v37 = vmul.f32 %v6599_v23, %v18110_v19  ;;  %vm5165_vm1 = vcmp.ne.f32.partialorder %v5003_v43, %v13936_v59  ;;  %v5443_v21 = vmul.f32 %v18111_v2, %v5331_v51  ;;  %vm4465_vm12 = vcmp.ne.f32.partialorder %v13949_v36, %v18112_v41  ;;  %v5009_v35 = vpop.f32.mrf.mxu1  ;;  %v18119_v23 = vld [vmem:[#allocation71_spill] sm:$0xff] }
 0x413   :  { %v3407_v34 = vadd.f32 %v3406_v8, %v3405_v45  ;;  %v6600_v13 = vsel %vm5165_vm1, 1.0, %v16726_v24  ;;  %5657 = vadd.xlane.f32.xlu1 %v5656_v3  ;;  %v5442_v33 = vmul.f32 %v18113_v11, %v5330_v14  ;;  %v3261_v26 = vrot.slane %v3260_v12, 2  ;;  %v18120_v3 = vld [vmem:[#allocation327_spill] sm:$0xff]  ;;  %vm18133_vm1 = vmmov %vm18101_vm0 }
 0x414   :  { %v5333_v60 = vmul.f32 %v6600_v13, %v18114_v61  ;;  %vm5166_vm14 = vcmp.ne.f32.partialorder %v5007_v20, %v18115_v56  ;;  %v5518_v16 = vsel %vm18116_vm4, %v5443_v21, 0.0  ;;  %v5663_v45 = vsel %vm18117_vm2, %v5331_v51, 0.0  ;;  %v18121_v2 = vld [vmem:[#allocation255_spill] sm:$0xff]  ;;  %v5011_v20 = vpop.f32.mrf.mxu1  ;;  %v18122_v61 = vld [vmem:[#allocation338_spill] sm:$0xff] }
 0x415   :  { %v3408_v59 = vrot.slane %v3407_v34, 1  ;;  %v6601_v6 = vsel %vm5166_vm14, 1.0, %v16726_v24  ;;  %5516 = vadd.xlane.f32.xlu0 %v5515_v52  ;;  %v5519_v40 = vadd.f32 %v5518_v16, %v5442_v33  ;;  %vm5167_vm11 = vcmp.ne.f32.partialorder %v5009_v35, %v13978_v62  ;;  %v18123_v33 = vld [vmem:[#allocation333_spill] sm:$0xff] }
 0x416   :  { %v5667_v8 = vsel %vm18118_vm15, %v5333_v60, 0.0  ;;  %v5444_v43 = vmul.f32 %v18119_v23, %v5332_v37  ;;  %v5445_v58 = vmul.f32 %v18120_v3, %v5333_v60  ;;  %v5334_v13 = vmul.f32 %v6601_v6, %v18121_v2  ;;  %v5013_v35 = vpop.f32.mrf.mxu1 }
 0x417   :  { %v3409_v19 = vadd.f32 %v3408_v59, %v3407_v34  ;;  %v6602_v21 = vsel %vm5167_vm11, 1.0, %v16726_v24  ;;  %5512 = vadd.xlane.f32.xlu1 %v5511_v4  ;;  %v5668_v11 = vadd.f32 %v5667_v8, %v5332_v37  ;;  %v3262_v52 = vadd.f32 %v3261_v26, %v3260_v12  ;;  %v18125_v59 = vld [vmem:[#allocation121_spill] sm:$0xff]  ;;  %v18126_v4 = vld [vmem:[#allocation339_spill] sm:$0xff]  ;;  %vm18142_vm11 = vmmov %vm18101_vm0 }
 0x418   :  { %v5335_v51 = vmul.f32 %v6602_v21, %v18122_v61  ;;  %vm5168_vm5 = vcmp.ne.f32.partialorder %v5011_v20, %v18123_v33  ;;  %v5522_v62 = vsel %vm18124_vm9, %v5445_v58, 0.0  ;;  %v5664_v34 = vadd.f32 %v5663_v45, %v5330_v14  ;;  %v18127_v26 = vld [vmem:[#allocation335_spill] sm:$0xff]  ;;  %v5017_v3 = vpop.f32.mrf.mxu1  ;;  %v18128_v58 = vld [vmem:[#allocation133_spill] sm:$0xff]  ;;  %vm18144_vm9 = vmmov %vm18101_vm0 }
 0x419   :  { %v3411_v56 = vadd.f32 1e-24, %v3409_v19  ;;  %v6603_v16 = vsel %vm5168_vm5, 1.0, %v16726_v24  ;;  %5669 = vadd.xlane.f32.xlu0 %v5668_v11  ;;  %v5523_v60 = vadd.f32 %v5522_v62, %v5444_v43  ;;  %v4632_v6 = vmul.f32 %v14329_v7, %v18125_v59  ;;  %vm18143_vm5 = vmmov %vm18101_vm0 }
 0x41a   :  { %vm5169_vm7 = vcmp.ne.f32.partialorder %v5013_v35, %v14012_v18  ;;  %v5447_v12 = vmul.f32 %v18126_v4, %v5335_v51  ;;  %v14405_v37 = vmul.f32 49.0, %v14347_v9  ;;  %v5336_v8 = vmul.f32 %v6603_v16, %v18127_v26  ;;  %v5019_v2 = vpop.f32.mrf.mxu1 }
 0x41b   :  { %7065 = vrcp.f32 %v3411_v56  ;;  %v6604_v23 = vsel %vm5169_vm7, 1.0, %v16726_v24  ;;  %5665 = vadd.xlane.f32.xlu1 %v5664_v34  ;;  %v5446_v14 = vmul.f32 %v18128_v58, %v5334_v13  ;;  %v6484_v7 = vsel %vm4465_vm12, 1.0, %v16726_v24  ;;  %v18132_v56 = vld [vmem:[#allocation76_spill] sm:$0xff] }
 0x41c   :  { %v5337_v18 = vmul.f32 %v6604_v23, %v13962_v17  ;;  %vm5170_vm10 = vcmp.ne.f32.partialorder %v5017_v3, %v14015_v57  ;;  %v5526_v45 = vsel %vm18101_vm0, %v5447_v12, 0.0  ;;  %v3263_v43 = vrot.slane %v3262_v52, 1  ;;  %v18131_v17 = vld [vmem:[#allocation257_spill] sm:$0xff]  ;;  %v5021_v33 = vpop.f32.mrf.mxu1  ;;  %v18134_v34 = vld [vmem:[#allocation220_spill] sm:$0xff]  ;;  %v18136_v12 = vld [vmem:[#allocation119_spill] sm:$0xff] }
 0x41d   :  { %v6605_v19 = vsel %vm5170_vm10, 1.0, %v16726_v24  ;;  %5524 = vadd.xlane.f32.xlu0 %v5523_v60  ;;  %v5527_v21 = vadd.f32 %v5526_v45, %v5446_v14  ;;  %v14419_v20 = vmul.f32 49.0, %v14355_v1  ;;  %vm5171_vm6 = vcmp.ne.f32.partialorder %v5019_v2, %v14022_v46  ;;  %v18140_v3 = vld [vmem:[#allocation48_spill] sm:$0xff]  ;;  %vm18147_vm10 = vmmov %vm18101_vm0 }
 0x41e   :  { %v5675_v36 = vsel %vm18129_vm8, %v5337_v18, 0.0  ;;  %v5671_v41 = vsel %vm18130_vm3, %v5335_v51, 0.0  ;;  %v5449_v11 = vmul.f32 %v18131_v17, %v5337_v18  ;;  %v5338_v57 = vmul.f32 %v6605_v19, %v13983_v54  ;;  %v5023_v59 = vpop.f32.mrf.mxu1 }
 0x41f   :  { %v6606_v61 = vsel %vm5171_vm6, 1.0, %v16726_v24  ;;  %5520 = vadd.xlane.f32.xlu1 %v5519_v40  ;;  %v5676_v62 = vadd.f32 %v5675_v36, %v5336_v8  ;;  %v5448_v16 = vmul.f32 %v18132_v56, %v5336_v8  ;;  %vm5172_vm13 = vcmp.ne.f32.partialorder %v5021_v33, %v14034_v55  ;;  %v18138_v8 = vld [vmem:[#allocation253_spill] sm:$0xff]  ;;  %v18139_v55 = vld [vmem:[#allocation340_spill] sm:$0xff]  ;;  %v18146_v56 = vld [vmem:[#allocation354_spill] sm:$0xff] }
 0x420   :  { %v5339_v35 = vmul.f32 %v6606_v61, %v13994_v39  ;;  %v5530_v46 = vsel %vm18133_vm1, %v5449_v11, 0.0  ;;  %vm18135_vm12 = vcmp.eq.s32.totalorder %v18134_v34, 1  ;;  %v3264_v60 = vadd.f32 %v3263_v43, %v3262_v52  ;;  %v18137_v39 = vld [vmem:[#allocation296_spill] sm:$0xff]  ;;  %v5027_v18 = vpop.f32.mrf.mxu1 }
 0x421   :  { %v14434_v51 = vsel %vm18135_vm12, 1.0, %v16726_v24  ;;  %v6607_v54 = vsel %vm5172_vm13, 1.0, %v16726_v24  ;;  %5677 = vadd.xlane.f32.xlu0 %v5676_v62  ;;  %v5672_v40 = vadd.f32 %v5671_v41, %v5334_v13  ;;  %v5531_v4 = vadd.f32 %v5530_v46, %v5448_v16  ;;  %v18141_v13 = vld [vmem:[#allocation252_spill] sm:$0xff] }
 0x422   :  { %v14438_v26 = vmul.f32 %v4632_v6, %v18136_v12  ;;  %vm4466_vm14 = vcmp.ne.f32.partialorder %v18138_v8, %v18137_v39  ;;  %vm5173_vm4 = vcmp.ne.f32.partialorder %v5023_v59, %v14059_v53  ;;  %v5451_v23 = vmul.f32 %v18139_v55, %v5339_v35  ;;  %v5029_v2 = vpop.f32.mrf.mxu1  ;;  %v18151_v12 = vld [vmem:[#allocation324_spill] sm:$0xff]  ;;  %v18153_v39 = vld [vmem:[#allocation285_spill] sm:$0xff]  ;;  %v18155_v55 = vld [vmem:[#allocation195_spill] sm:$0xff] }
 0x423   :  { %v4633_v58 = vmul.f32 %v6484_v7, %v18140_v3  ;;  %v5340_v52 = vmul.f32 %v6607_v54, %v13999_v30  ;;  %v6608_v14 = vsel %vm5173_vm4, 1.0, %v16726_v24  ;;  %5673 = vadd.xlane.f32.xlu1 %v5672_v40  ;;  %v5450_v45 = vmul.f32 %v18141_v13, %v5338_v57  ;;  %v18156_v3 = vld [vmem:[#allocation334_spill] sm:$0xff]  ;;  %vm18162_vm4 = vmmov %vm18133_vm1 }
 0x424   :  { %v5341_v6 = vmul.f32 %v6608_v14, %v14027_v49  ;;  %vm5174_vm2 = vcmp.ne.f32.partialorder %v5027_v18, %v14078_v27  ;;  %v5534_v43 = vsel %vm18142_vm11, %v5451_v23, 0.0  ;;  %v14452_v53 = vmul.f32 49.0, %v14434_v51  ;;  %v18145_v27 = vld [vmem:[#allocation65_spill] sm:$0xff]  ;;  %v5031_v33 = vpop.f32.mrf.mxu1  ;;  %v18157_v18 = vld [vmem:[#allocation98_spill] sm:$0xff]  ;;  %vm18166_vm11 = vmmov %vm18133_vm1 }
 0x425   :  { %v6485_v19 = vsel %vm4466_vm14, 1.0, %v16726_v24  ;;  %v3410_v7 = vadd.f32 1e-24, %v3264_v60  ;;  %v6609_v30 = vsel %vm5174_vm2, 1.0, %v16726_v24  ;;  %5532 = vadd.xlane.f32.xlu0 %v5531_v4  ;;  %v5535_v36 = vadd.f32 %v5534_v43, %v5450_v45  ;;  %v18150_v4 = vld [vmem:[#allocation316_spill] sm:$0xff]  ;;  %v18158_v45 = vld [vmem:[#allocation190_spill] sm:$0xff]  ;;  %vm18161_vm14 = vmmov %vm18133_vm1 }
 0x426   :  { %vm5175_vm15 = vcmp.ne.f32.partialorder %v5029_v2, %v14081_v63  ;;  %v5683_v41 = vsel %vm18143_vm5, %v5341_v6, 0.0  ;;  %v5679_v49 = vsel %vm18144_vm9, %v5339_v35, 0.0  ;;  %v5453_v17 = vmul.f32 %v18145_v27, %v5341_v6  ;;  %v18148_v35 = vld [vmem:[#allocation287_spill] sm:$0xff]  ;;  %v5033_v54 = vpop.f32.mrf.mxu1  ;;  %v18159_v6 = vld [vmem:[#allocation249_spill] sm:$0xff] }
 0x427   :  { %v5342_v11 = vmul.f32 %v6609_v30, %v14044_v44  ;;  %v6610_v61 = vsel %vm5175_vm15, 1.0, %v16726_v24  ;;  %5528 = vadd.xlane.f32.xlu1 %v5527_v21  ;;  %v5684_v62 = vadd.f32 %v5683_v41, %v5340_v52  ;;  %v5452_v16 = vmul.f32 %v18146_v56, %v5340_v52 }
 0x428   :  { %v7066_v46 = vpop.eup %7065  ;;  %v5343_v34 = vmul.f32 %v6610_v61, %v14049_v22  ;;  %vm5176_vm7 = vcmp.ne.f32.partialorder %v5031_v33, %v14101_v10  ;;  %v5538_v63 = vsel %vm18147_vm10, %v5453_v17, 0.0  ;;  %vm18149_vm0 = vcmp.eq.s32.totalorder %v18148_v35, 1  ;;  %v18152_v22 = vld [vmem:[#allocation336_spill] sm:$0xff]  ;;  %v5037_v14 = vpop.f32.mrf.mxu1  ;;  %v18163_v61 = vld [vmem:[#allocation251_spill] sm:$0xff]  ;;  %v18165_v35 = vld [vmem:[#allocation250_spill] sm:$0xff] }
 0x429   :  { %v14469_v60 = vsel %vm18149_vm0, 1.0, %v16726_v24  ;;  %v6611_v44 = vsel %vm5176_vm7, 1.0, %v16726_v24  ;;  %5685 = vadd.xlane.f32.xlu0 %v5684_v62  ;;  %v5680_v21 = vadd.f32 %v5679_v49, %v5338_v57  ;;  %v5539_v59 = vadd.f32 %v5538_v63, %v5452_v16  ;;  %v18164_v62 = vld [vmem:[#allocation246_spill] sm:$0xff]  ;;  %vm18179_vm10 = vmmov %vm18133_vm1 }
 0x42a   :  { %v14472_v40 = vmul.f32 %v7066_v46, %v3410_v7  ;;  %vm4467_vm6 = vcmp.ne.f32.partialorder %v18151_v12, %v18150_v4  ;;  %vm5177_vm8 = vcmp.ne.f32.partialorder %v5033_v54, %v14115_v38  ;;  %v5455_v10 = vmul.f32 %v18152_v22, %v5343_v34  ;;  %v18160_v7 = vld [vmem:[#allocation243_spill] sm:$0xff]  ;;  %v5039_v41 = vpop.f32.mrf.mxu1 }
 0x42b   :  { %vm18154_vm3 = vcmp.eq.s32.totalorder %v18153_v39, 1  ;;  %v14484_v23 = vmul.f32 %v4633_v58, %v18155_v55  ;;  %v5344_v57 = vmul.f32 %v6611_v44, %v18156_v3  ;;  %v6612_v52 = vsel %vm5177_vm8, 1.0, %v16726_v24  ;;  %5681 = vadd.xlane.f32.xlu1 %v5680_v21  ;;  %v18171_v39 = vld [vmem:[#allocation66_spill] sm:$0xff]  ;;  %v18172_v55 = vld [vmem:[#allocation247_spill] sm:$0xff]  ;;  %v18173_v3 = vld [vmem:[#allocation328_spill] sm:$0xff] }
 0x42c   :  { %v14481_v8 = vsel %vm18154_vm3, 1.0, %v16726_v24  ;;  %v5454_v13 = vmul.f32 %v18157_v18, %v5342_v11  ;;  %v4634_v38 = vmul.f32 %v6485_v19, %v18158_v45  ;;  %v5345_v43 = vmul.f32 %v6612_v52, %v18159_v6  ;;  %v5041_v46 = vpop.f32.mrf.mxu1  ;;  %v18174_v52 = vld [vmem:[#allocation349_spill] sm:$0xff]  ;;  %v18175_v18 = vld [vmem:[#allocation332_spill] sm:$0xff]  ;;  %v18176_v6 = vld [vmem:[#allocation331_spill] sm:$0xff] }
 0x42d   :  { %vm5178_vm13 = vcmp.ne.f32.partialorder %v5037_v14, %v18160_v7  ;;  %v5542_v30 = vsel %vm18133_vm1, %v5455_v10, 0.0  ;;  %v6486_v2 = vsel %vm4467_vm6, 1.0, %v16726_v24  ;;  %5540 = vadd.xlane.f32.xlu0 %v5539_v59  ;;  %v14496_v27 = vmul.f32 49.0, %v14469_v60  ;;  %v18169_v10 = vld [vmem:[#allocation100_spill] sm:$0xff]  ;;  %vm18183_vm8 = vmmov %vm18133_vm1 }
 0x42e   :  { %v6613_v58 = vsel %vm5178_vm13, 1.0, %v16726_v24  ;;  %v5543_v49 = vadd.f32 %v5542_v30, %v5454_v13  ;;  %vm5179_vm12 = vcmp.ne.f32.partialorder %v5039_v41, %v14142_v28  ;;  %v5691_v19 = vsel %vm18161_vm14, %v5345_v43, 0.0  ;;  %v5043_v59 = vpop.f32.mrf.mxu1  ;;  %v18177_v7 = vld [vmem:[#allocation56_spill] sm:$0xff]  ;;  %v18178_v30 = vld [vmem:[#allocation326_spill] sm:$0xff]  ;;  %vm18184_vm3 = vmmov %vm18133_vm1 }
 0x42f   :  { %v5687_v17 = vsel %vm18162_vm4, %v5343_v34, 0.0  ;;  %v5457_v33 = vmul.f32 %v18163_v61, %v5345_v43  ;;  %v5346_v56 = vmul.f32 %v6613_v58, %v18164_v62  ;;  %v6614_v16 = vsel %vm5179_vm12, 1.0, %v16726_v24  ;;  %5536 = vadd.xlane.f32.xlu1 %v5535_v36  ;;  %v18167_v36 = vld [vmem:[#allocation219_spill] sm:$0xff] }
 0x430   :  { %v5692_v63 = vadd.f32 %v5691_v19, %v5344_v57  ;;  %v5456_v44 = vmul.f32 %v18165_v35, %v5344_v57  ;;  %v5347_v54 = vmul.f32 %v6614_v16, %v14112_v5  ;;  %vm5180_vm2 = vcmp.ne.f32.partialorder %v5041_v46, %v14152_v15  ;;  %v18170_v15 = vld [vmem:[#allocation96_spill] sm:$0xff]  ;;  %v5047_v45 = vpop.f32.mrf.mxu1  ;;  %v18182_v16 = vld [vmem:[#allocation241_spill] sm:$0xff] }
 0x431   :  { %v5546_v28 = vsel %vm18166_vm11, %v5457_v33, 0.0  ;;  %v14509_v21 = vmul.f32 49.0, %v14481_v8  ;;  %v6615_v34 = vsel %vm5180_vm2, 1.0, %v16726_v24  ;;  %v5688_v4 = vadd.f32 %v5687_v17, %v5342_v11  ;;  %v18180_v33 = vld [vmem:[#allocation218_spill] sm:$0xff]  ;;  %v18185_v35 = vld [vmem:[#allocation325_spill] sm:$0xff]  ;;  %vm18201_vm11 = vmmov %vm18133_vm1 }
 0x432   :  { %5693 = vadd.xlane.f32.xlu0 %v5692_v63  ;;  %v5547_v12 = vadd.f32 %v5546_v28, %v5456_v44  ;;  %vm18168_vm15 = vcmp.eq.s32.totalorder %v18167_v36, 1  ;;  %v14518_v5 = vmul.f32 %v4634_v38, %v18169_v10  ;;  %vm4468_vm5 = vcmp.ne.f32.partialorder %v18171_v39, %v18170_v15  ;;  %v5049_v17 = vpop.f32.mrf.mxu1  ;;  %v18186_v28 = vld [vmem:[#allocation50_spill] sm:$0xff]  ;;  %v18187_v36 = vld [vmem:[#allocation329_spill] sm:$0xff] }
 0x433   :  { %v14515_v22 = vsel %vm18168_vm15, 1.0, %v16726_v24  ;;  %vm5181_vm9 = vcmp.ne.f32.partialorder %v5043_v59, %v18172_v55  ;;  %v5459_v57 = vmul.f32 %v18173_v3, %v5347_v54  ;;  %v4635_v14 = vmul.f32 %v6486_v2, %v18174_v52  ;;  %5689 = vadd.xlane.f32.xlu1 %v5688_v4  ;;  %v18188_v15 = vld [vmem:[#allocation321_spill] sm:$0xff]  ;;  %v18189_v55 = vld [vmem:[#allocation235_spill] sm:$0xff] }
 0x434   :  { %v5348_v11 = vmul.f32 %v6615_v34, %v18175_v18  ;;  %v6616_v13 = vsel %vm5181_vm9, 1.0, %v16726_v24  ;;  %v5458_v43 = vmul.f32 %v18176_v6, %v5346_v56  ;;  %vm5182_vm7 = vcmp.ne.f32.partialorder %v5047_v45, %v18178_v30  ;;  %v5051_v4 = vpop.f32.mrf.mxu1  ;;  %v18192_v52 = vld [vmem:[#allocation185_spill] sm:$0xff]  ;;  %v18193_v18 = vld [vmem:[#allocation248_spill] sm:$0xff]  ;;  %v18194_v6 = vld [vmem:[#allocation103_spill] sm:$0xff] }
 0x435   :  { %v5349_v38 = vmul.f32 %v6616_v13, %v18177_v7  ;;  %v5550_v58 = vsel %vm18179_vm10, %v5459_v57, 0.0  ;;  %v14532_v41 = vmul.f32 49.0, %v14515_v22  ;;  %v6487_v19 = vsel %vm4468_vm5, 1.0, %v16726_v24  ;;  %v18190_v57 = vld [vmem:[#allocation284_spill] sm:$0xff]  ;;  %v18195_v7 = vld [vmem:[#allocation53_spill] sm:$0xff]  ;;  %v18196_v30 = vld [vmem:[#allocation242_spill] sm:$0xff] }
 0x436   :  { %v6617_v2 = vsel %vm5182_vm7, 1.0, %v16726_v24  ;;  %5548 = vadd.xlane.f32.xlu0 %v5547_v12  ;;  %v5551_v61 = vadd.f32 %v5550_v58, %v5458_v43  ;;  %vm18181_vm0 = vcmp.eq.s32.totalorder %v18180_v33, 1  ;;  %vm5183_vm6 = vcmp.ne.f32.partialorder %v5049_v17, %v18182_v16  ;;  %v18197_v58 = vld [vmem:[#allocation44_spill] sm:$0xff]  ;;  %v18198_v17 = vld [vmem:[#allocation45_spill] sm:$0xff]  ;;  %vm18204_vm5 = vmmov %vm18133_vm1 }
 0x437   :  { %v14539_v62 = vsel %vm18181_vm0, 1.0, %v16726_v24  ;;  %v5699_v46 = vsel %vm18183_vm8, %v5349_v38, 0.0  ;;  %v5695_v63 = vsel %vm18184_vm3, %v5347_v54, 0.0  ;;  %v5461_v44 = vmul.f32 %v18185_v35, %v5349_v38  ;;  %5544 = vadd.xlane.f32.xlu1 %v5543_v49  ;;  %v5053_v49 = vpop.f32.mrf.mxu1  ;;  %v18199_v35 = vld [vmem:[#allocation244_spill] sm:$0xff]  ;;  %vm18205_vm7 = vmmov %vm18133_vm1 }
 0x438   :  { %v5350_v34 = vmul.f32 %v6617_v2, %v18186_v28  ;;  %v6618_v59 = vsel %vm5183_vm6, 1.0, %v16726_v24  ;;  %v5700_v12 = vadd.f32 %v5699_v46, %v5348_v11  ;;  %v5460_v10 = vmul.f32 %v18187_v36, %v5348_v11  ;;  %vm18208_vm0 = vmmov %vm18133_vm1 }
 0x439   :  { %v5351_v39 = vmul.f32 %v6618_v59, %v18188_v15  ;;  %vm5184_vm13 = vcmp.ne.f32.partialorder %v5051_v4, %v18189_v55  ;;  %v5554_v3 = vsel %vm18133_vm1, %v5461_v44, 0.0  ;;  %vm18191_vm12 = vcmp.eq.s32.totalorder %v18190_v57, 1  ;;  %v5057_v46 = vpop.f32.mrf.mxu1  ;;  %v18206_v57 = vld [vmem:[#allocation322_spill] sm:$0xff]  ;;  %vm18214_vm1 = vmmov %vm18208_vm0 }
 0x43a   :  { %v14554_v54 = vsel %vm18191_vm12, 1.0, %v16726_v24  ;;  %vm4469_vm14 = vcmp.ne.f32.partialorder %v18193_v18, %v18192_v52  ;;  %v6619_v13 = vsel %vm5184_vm13, 1.0, %v16726_v24  ;;  %5701 = vadd.xlane.f32.xlu0 %v5700_v12  ;;  %v5696_v45 = vadd.f32 %v5695_v63, %v5346_v56  ;;  %vm18216_vm12 = vmmov %vm18208_vm0 }
 0x43b   :  { %v5555_v11 = vadd.f32 %v5554_v3, %v5460_v10  ;;  %v14560_v43 = vmul.f32 %v4635_v14, %v18194_v6  ;;  %v4636_v38 = vmul.f32 %v6487_v19, %v18195_v7  ;;  %vm5185_vm4 = vcmp.ne.f32.partialorder %v5053_v49, %v18196_v30  ;;  %v18200_v19 = vld [vmem:[#allocation43_spill] sm:$0xff]  ;;  %v5059_v4 = vpop.f32.mrf.mxu1  ;;  %v18210_v30 = vld [vmem:[#allocation64_spill] sm:$0xff] }
 0x43c   :  { %v5463_v2 = vmul.f32 %v18197_v58, %v5351_v39  ;;  %v5352_v33 = vmul.f32 %v6619_v13, %v18198_v17  ;;  %v6620_v16 = vsel %vm5185_vm4, 1.0, %v16726_v24  ;;  %5697 = vadd.xlane.f32.xlu1 %v5696_v45  ;;  %v5462_v44 = vmul.f32 %v18199_v35, %v5350_v34  ;;  %v18202_v10 = vld [vmem:[#allocation283_spill] sm:$0xff] }
 0x43d   :  { %v14569_v56 = vmul.f32 49.0, %v14539_v62  ;;  %v6488_v14 = vsel %vm4469_vm14, 1.0, %v16726_v24  ;;  %v5353_v63 = vmul.f32 %v6620_v16, %v18200_v19  ;;  %vm5186_vm2 = vcmp.ne.f32.partialorder %v5057_v46, %v14271_v47  ;;  %v5061_v49 = vpop.f32.mrf.mxu1  ;;  %v18213_v16 = vld [vmem:[#allocation59_spill] sm:$0xff]  ;;  %vm18217_vm14 = vmmov %vm18208_vm0 }
 0x43e   :  { %v5558_v28 = vsel %vm18201_vm11, %v5463_v2, 0.0  ;;  %v6621_v59 = vsel %vm5186_vm2, 1.0, %v16726_v24  ;;  %5556 = vadd.xlane.f32.xlu0 %v5555_v11  ;;  %v14580_v36 = vmul.f32 49.0, %v14554_v54  ;;  %vm18203_vm15 = vcmp.eq.s32.totalorder %v18202_v10, 1  ;;  %v18207_v11 = vld [vmem:[#allocation117_spill] sm:$0xff]  ;;  %vm18219_vm11 = vmmov %vm18208_vm0 }
 0x43f   :  { %v5559_v12 = vadd.f32 %v5558_v28, %v5462_v44  ;;  %v14585_v15 = vsel %vm18203_vm15, 1.0, %v16726_v24  ;;  %v5465_v55 = vmul.f32 %v14244_v25, %v5353_v63  ;;  %v5707_v3 = vsel %vm18204_vm5, %v5353_v63, 0.0  ;;  %v5063_v58 = vpop.f32.mrf.mxu1 }
 0x440   :  { %vm5187_vm9 = vcmp.ne.f32.partialorder %v5059_v4, %v14288_v31  ;;  %v5703_v47 = vsel %vm18205_vm7, %v5351_v39, 0.0  ;;  %v5464_v52 = vmul.f32 %v18206_v57, %v5352_v33  ;;  %v5354_v18 = vmul.f32 %v6621_v59, %v14229_v0  ;;  %5552 = vadd.xlane.f32.xlu1 %v5551_v61  ;;  %v18209_v31 = vld [vmem:[#allocation30_spill] sm:$0xff]  ;;  %v18211_v61 = vld [vmem:[#allocation40_spill] sm:$0xff]  ;;  %v18218_v57 = vld [vmem:[#allocation57_spill] sm:$0xff] }
 0x441   :  { %v6622_v13 = vsel %vm5187_vm9, 1.0, %v16726_v24  ;;  %v5708_v45 = vadd.f32 %v5707_v3, %v5352_v33  ;;  %v4637_v6 = vmul.f32 %v6488_v14, %v18207_v11  ;;  %vm5188_vm10 = vcmp.ne.f32.partialorder %v5061_v49, %v14334_v42  ;;  %v18212_v33 = vld [vmem:[#allocation176_spill] sm:$0xff]  ;;  %v5067_v44 = vpop.f32.mrf.mxu1  ;;  %v18220_v49 = vld [vmem:[#allocation113_spill] sm:$0xff]  ;;  %vm18224_vm9 = vmmov %vm18208_vm0 }
 0x442   :  { %v5355_v7 = vmul.f32 %v6622_v13, %v14240_v50  ;;  %v5562_v25 = vsel %vm18208_vm0, %v5465_v55, 0.0  ;;  %vm4470_vm6 = vcmp.ne.f32.partialorder %v18210_v30, %v18209_v31  ;;  %v6623_v39 = vsel %vm5188_vm10, 1.0, %v16726_v24 }
 0x443   :  { %5709 = vadd.xlane.f32.xlu0 %v5708_v45  ;;  %v5704_v0 = vadd.f32 %v5703_v47, %v5350_v34  ;;  %v14601_v2 = vadd.f32 %v5562_v25, %v5464_v52  ;;  %v5416_v17 = vmul.f32 %v4636_v38, %v18211_v61  ;;  %vm4471_vm8 = vcmp.ne.f32.partialorder %v18213_v16, %v18212_v33  ;;  %v5069_v63 = vpop.f32.mrf.mxu1  ;;  %v18221_v45 = vld [vmem:[#allocation54_spill] sm:$0xff]  ;;  %v18226_v16 = vld [vmem:[#allocation99_spill] sm:$0xff] }
 0x444   :  { %v5467_v50 = vmul.f32 %v14376_v48, %v5355_v7  ;;  %vm5189_vm3 = vcmp.ne.f32.partialorder %v5063_v58, %v14405_v37  ;;  %v5466_v42 = vmul.f32 %v14304_v32, %v5354_v18  ;;  %v5356_v46 = vmul.f32 %v6623_v39, %v14297_v29  ;;  %v18215_v37 = vld [vmem:[#allocation46_spill] sm:$0xff] }
 0x445   :  { %v6624_v35 = vsel %vm5189_vm3, 1.0, %v16726_v24  ;;  %5705 = vadd.xlane.f32.xlu1 %v5704_v0  ;;  %v14612_v34 = vmul.f32 49.0, %v14585_v15  ;;  %v6489_v38 = vsel %vm4470_vm6, 1.0, %v16726_v24  ;;  %vm5190_vm13 = vcmp.ne.f32.partialorder %v5067_v44, %v14419_v20  ;;  %v5071_v3 = vpop.f32.mrf.mxu1  ;;  %vm18227_vm6 = vmmov %vm18208_vm0 }
 0x446   :  { %v5357_v48 = vmul.f32 %v6624_v35, %v14347_v9  ;;  %v5566_v32 = vsel %vm18214_vm1, %v5467_v50, 0.0  ;;  %v5417_v29 = vmul.f32 %v4637_v6, %v18215_v37  ;;  %v6490_v14 = vsel %vm4471_vm8, 1.0, %v16726_v24  ;;  %v18222_v6 = vld [vmem:[#allocation177_spill] sm:$0xff]  ;;  %vm18232_vm1 = vmmov %vm18208_vm0 }
 0x447   :  { %v6625_v19 = vsel %vm5190_vm13, 1.0, %v16726_v24  ;;  %v14624_v28 = vadd.f32 %v5566_v32, %v5466_v42  ;;  %v5711_v59 = vsel %vm18216_vm12, %v5355_v7, 0.0  ;;  %vm5191_vm4 = vcmp.ne.f32.partialorder %v5069_v63, %v14452_v53  ;;  %v5073_v53 = vpop.f32.mrf.mxu1  ;;  %vm18229_vm13 = vmmov %vm18208_vm0  ;;  %v18231_v63 = vld [vmem:[#allocation245_spill] sm:$0xff] }
 0x448   :  { %v5469_v4 = vmul.f32 %v14484_v23, %v5357_v48  ;;  %v5715_v10 = vsel %vm18217_vm14, %v5357_v48, 0.0  ;;  %v5468_v9 = vmul.f32 %v14438_v26, %v5356_v46  ;;  %v5358_v20 = vmul.f32 %v6625_v19, %v14355_v1  ;;  %v18228_v48 = vld [vmem:[#allocation345_spill] sm:$0xff]  ;;  %vm18234_vm14 = vmmov %vm18208_vm0 }
 0x449   :  { %v6626_v55 = vsel %vm5191_vm4, 1.0, %v16726_v24  ;;  %5560 = vadd.xlane.f32.xlu1 %v5559_v12  ;;  %v5716_v47 = vadd.f32 %v5715_v10, %v5356_v46  ;;  %v4639_v52 = vmul.f32 %v6490_v14, %v18218_v57  ;;  %vm5192_vm2 = vcmp.ne.f32.partialorder %v5071_v3, %v14496_v27  ;;  %v18223_v12 = vld [vmem:[#allocation312_spill] sm:$0xff]  ;;  %v18225_v27 = vld [vmem:[#allocation187_spill] sm:$0xff]  ;;  %v5077_v58 = vpop.f32.mrf.mxu1  ;;  %v18230_v14 = vld [vmem:[#allocation369_spill] sm:$0xff] }
 0x44a   :  { %v5359_v13 = vmul.f32 %v6626_v55, %v14434_v51  ;;  %v5570_v23 = vsel %vm18219_vm11, %v5469_v4, 0.0  ;;  %vm4472_vm15 = vcmp.ne.f32.partialorder %v18221_v45, %v18220_v49  ;;  %v6627_v26 = vsel %vm5192_vm2, 1.0, %v16726_v24  ;;  %v18233_v55 = vld [vmem:[#allocation118_spill] sm:$0xff]  ;;  %vm18236_vm4 = vmmov %vm18208_vm0 }
 0x44b   :  { %5717 = vadd.xlane.f32.xlu0 %v5716_v47  ;;  %v5712_v1 = vadd.f32 %v5711_v59, %v5354_v18  ;;  %v5571_v11 = vadd.f32 %v5570_v23, %v5468_v9  ;;  %vm4473_vm5 = vcmp.ne.f32.partialorder %v18223_v12, %v18222_v6  ;;  %vm5193_vm7 = vcmp.ne.f32.partialorder %v5073_v53, %v14509_v21  ;;  %vm18237_vm2 = vmmov %vm18208_vm0 }
 0x44c   :  { %v5471_v7 = vmul.f32 %v14560_v43, %v5359_v13  ;;  %v5719_v51 = vsel %vm18224_vm9, %v5359_v13, 0.0  ;;  %v4638_v25 = vmul.f32 %v6489_v38, %v18225_v27  ;;  %v5470_v31 = vmul.f32 %v14518_v5, %v5358_v20 }
 0x44d   :  { %v5360_v30 = vmul.f32 %v6627_v26, %v14469_v60  ;;  %v6628_v39 = vsel %vm5193_vm7, 1.0, %v16726_v24  ;;  %5713 = vadd.xlane.f32.xlu1 %v5712_v1  ;;  %v6491_v18 = vsel %vm4472_vm15, 1.0, %v16726_v24  ;;  %vm5194_vm10 = vcmp.ne.f32.partialorder %v5077_v58, %v14532_v41  ;;  %v5079_v60 = vpop.f32.mrf.mxu1 }
 0x44e   :  { %v5361_v43 = vmul.f32 %v6628_v39, %v14481_v8  ;;  %v5574_v21 = vsel %vm18208_vm0, %v5471_v7, 0.0  ;;  %v6492_v0 = vsel %vm4473_vm5, 1.0, %v16726_v24  ;;  %v6629_v5 = vsel %vm5194_vm10, 1.0, %v16726_v24 }
 0x44f   :  { %v5720_v61 = vadd.f32 %v5719_v51, %v5358_v20  ;;  %v5575_v33 = vadd.f32 %v5574_v21, %v5470_v31  ;;  %v5419_v50 = vmul.f32 %v4639_v52, %v18226_v16  ;;  %vm5195_vm8 = vcmp.ne.f32.partialorder %v5079_v60, %v14569_v56  ;;  %v5081_v44 = vpop.f32.mrf.mxu1  ;;  %v18235_v52 = vld [vmem:[#allocation41_spill] sm:$0xff] }
 0x450   :  { %v5473_v42 = vmul.f32 %v5417_v29, %v5361_v43  ;;  %v5723_v46 = vsel %vm18227_vm6, %v5361_v43, 0.0  ;;  %v5472_v35 = vmul.f32 %v5416_v17, %v5360_v30  ;;  %v5362_v8 = vmul.f32 %v6629_v5, %v14515_v22 }
 0x451   :  { %v6630_v41 = vsel %vm5195_vm8, 1.0, %v16726_v24  ;;  %5721 = vadd.xlane.f32.xlu1 %v5720_v61  ;;  %v5724_v38 = vadd.f32 %v5723_v46, %v5360_v30  ;;  %v4641_v32 = vmul.f32 %v6492_v0, %v18228_v48  ;;  %vm5196_vm3 = vcmp.ne.f32.partialorder %v5081_v44, %v14580_v36  ;;  %v5083_v22 = vpop.f32.mrf.mxu1 }
 0x452   :  { %v5363_v37 = vmul.f32 %v6630_v41, %v14539_v62  ;;  %v5578_v29 = vsel %vm18229_vm13, %v5473_v42, 0.0  ;;  %v5418_v19 = vmul.f32 %v4638_v25, %v18230_v14  ;;  %v4640_v56 = vmul.f32 %v6491_v18, %v18231_v63 }
 0x453   :  { %v6631_v17 = vsel %vm5196_vm3, 1.0, %v16726_v24  ;;  %5725 = vadd.xlane.f32.xlu0 %v5724_v38  ;;  %v5579_v59 = vadd.f32 %v5578_v29, %v5472_v35  ;;  %vm5197_vm12 = vcmp.ne.f32.partialorder %v5083_v22, %v14612_v34  ;;  %v5421_v3 = vmul.f32 %v4641_v32, %v18233_v55 }
 0x454   :  { %v5475_v4 = vmul.f32 %v5419_v50, %v5363_v37  ;;  %v5727_v10 = vsel %vm18232_vm1, %v5363_v37, 0.0  ;;  %v5474_v9 = vmul.f32 %v5418_v19, %v5362_v8  ;;  %v5364_v62 = vmul.f32 %v6631_v17, %v14554_v54 }
 0x455   :  { %v6632_v36 = vsel %vm5197_vm12, 1.0, %v16726_v24  ;;  %v5728_v20 = vadd.f32 %v5727_v10, %v5362_v8  ;;  %v5420_v13 = vmul.f32 %v4640_v56, %v18235_v52  ;;  %vm5772_vm11 = vcmask 7168  }
 0x456   :  { %v5365_v47 = vmul.f32 %v6632_v36, %v14585_v15  ;;  %v5582_v57 = vsel %vm18234_vm14, %v5475_v4, 0.0  ;;  %vm5774_vm15 = vcmask 8192  }
 0x457   :  { %5729 = vadd.xlane.f32.xlu1 %v5728_v20  ;;  %v5583_v23 = vadd.f32 %v5582_v57, %v5474_v9  ;;  %v5476_v34 = vmul.f32 %v5420_v13, %v5364_v62 }
 0x458   :  { %v5477_v49 = vmul.f32 %v5421_v3, %v5365_v47  ;;  %v5731_v45 = vsel %vm18236_vm4, %v5365_v47, 0.0 }
 0x459   :  { %v5732_v26 = vadd.f32 %v5731_v45, %v5364_v62 }
 0x45a   :  { %v5586_v54 = vsel %vm18237_vm2, %v5477_v49, 0.0 }
 0x45b   :  { %5733 = vadd.xlane.f32.xlu0 %v5732_v26  ;;  %5564 = vadd.xlane.f32.xlu1 %v14601_v2  ;;  %v5587_v24 = vadd.f32 %v5586_v54, %v5476_v34 }
 0x45f   :  { %5568 = vadd.xlane.f32.xlu0 %v14624_v28  ;;  %5572 = vadd.xlane.f32.xlu1 %v5571_v11 }
 0x463   :  { %5576 = vadd.xlane.f32.xlu0 %v5575_v33  ;;  %5580 = vadd.xlane.f32.xlu1 %v5579_v59 }
 0x467   :  { %5584 = vadd.xlane.f32.xlu0 %v5583_v23  ;;  %5588 = vadd.xlane.f32.xlu1 %v5587_v24 }
 0x475   :  { %v5626_v15 = vpop.xlane.xlu0 %5625 }
 0x477   :  { %v5481_v53 = vpop.xlane.xlu1 %5480 }
 0x47b   :  { %v5485_v1 = vpop.xlane.xlu0 %5484  ;;  %v5630_v6 = vpop.xlane.xlu1 %5629 }
 0x47c   :  { %v5735_v21 = vadd.f32 %v5630_v6, %v5626_v15  ;;  %v5590_v37 = vadd.f32 %v5485_v1, %v5481_v53 }
 0x47f   :  { %v5634_v12 = vpop.xlane.xlu0 %5633  ;;  %v5489_v7 = vpop.xlane.xlu1 %5488 }
 0x480   :  { %v5736_v5 = vadd.f32 %v5735_v21, %v5634_v12  ;;  %v5591_v19 = vadd.f32 %v5590_v37, %v5489_v7 }
 0x483   :  { %v5638_v51 = vpop.xlane.xlu1 %5637  ;;  %v5493_v27 = vpop.xlane.xlu0 %5492 }
 0x484   :  { %v5737_v61 = vadd.f32 %v5736_v5, %v5638_v51  ;;  %v5592_v17 = vadd.f32 %v5591_v19, %v5493_v27 }
 0x487   :  { %v5497_v25 = vpop.xlane.xlu1 %5496  ;;  %v5642_v31 = vpop.xlane.xlu0 %5641 }
 0x488   :  { %v5738_v16 = vadd.f32 %v5737_v61, %v5642_v31  ;;  %v5593_v59 = vadd.f32 %v5592_v17, %v5497_v25 }
 0x48b   :  { %v5646_v30 = vpop.xlane.xlu1 %5645 }
 0x48c   :  { %v5501_v39 = vpop.xlane.xlu0 %5500  ;;  %v5739_v42 = vadd.f32 %v5738_v16, %v5646_v30 }
 0x48d   :  { %v5594_v9 = vadd.f32 %v5593_v59, %v5501_v39 }
 0x48f   :  { %v5650_v2 = vpop.xlane.xlu1 %5649 }
 0x490   :  { %v5740_v35 = vadd.f32 %v5739_v42, %v5650_v2 }
 0x493   :  { %v5505_v58 = vpop.xlane.xlu1 %5504 }
 0x494   :  { %v5509_v28 = vpop.xlane.xlu0 %5508  ;;  %v5595_v20 = vadd.f32 %v5594_v9, %v5505_v58 }
 0x496   :  { %v5596_v57 = vadd.f32 %v5595_v20, %v5509_v28 }
 0x497   :  { %v5654_v11 = vpop.xlane.xlu1 %5653 }
 0x498   :  { %v5741_v41 = vadd.f32 %v5740_v35, %v5654_v11 }
 0x49a   :  { %v5662_v18 = vpop.xlane.xlu0 %5661 }
 0x49c   :  { %v5658_v43 = vpop.xlane.xlu1 %5657 }
 0x49d   :  { %v5742_v38 = vadd.f32 %v5741_v41, %v5658_v43 }
 0x49e   :  { %v5517_v0 = vpop.xlane.xlu0 %5516 }
 0x49f   :  { %v5743_v29 = vadd.f32 %v5742_v38, %v5662_v18 }
 0x4a0   :  { %v5513_v60 = vpop.xlane.xlu1 %5512 }
 0x4a1   :  { %v5597_v13 = vadd.f32 %v5596_v57, %v5513_v60 }
 0x4a2   :  { %v5670_v33 = vpop.xlane.xlu0 %5669 }
 0x4a3   :  { %v5598_v34 = vadd.f32 %v5597_v13, %v5517_v0 }
 0x4a4   :  { %v5666_v50 = vpop.xlane.xlu1 %5665 }
 0x4a5   :  { %v5744_v63 = vadd.f32 %v5743_v29, %v5666_v50 }
 0x4a6   :  { %v5525_v46 = vpop.xlane.xlu0 %5524 }
 0x4a7   :  { %v5745_v4 = vadd.f32 %v5744_v63, %v5670_v33 }
 0x4a8   :  { %v5521_v8 = vpop.xlane.xlu1 %5520 }
 0x4a9   :  { %v5599_v24 = vadd.f32 %v5598_v34, %v5521_v8 }
 0x4aa   :  { %v5678_v44 = vpop.xlane.xlu0 %5677 }
 0x4ab   :  { %v5600_v6 = vadd.f32 %v5599_v24, %v5525_v46 }
 0x4ac   :  { %v5674_v48 = vpop.xlane.xlu1 %5673 }
 0x4ad   :  { %v5746_v62 = vadd.f32 %v5745_v4, %v5674_v48 }
 0x4ae   :  { %v5533_v32 = vpop.xlane.xlu0 %5532 }
 0x4af   :  { %v5747_v3 = vadd.f32 %v5746_v62, %v5678_v44 }
 0x4b0   :  { %v5529_v14 = vpop.xlane.xlu1 %5528 }
 0x4b1   :  { %v5601_v7 = vadd.f32 %v5600_v6, %v5529_v14 }
 0x4b2   :  { %v5686_v56 = vpop.xlane.xlu0 %5685 }
 0x4b3   :  { %v5602_v31 = vadd.f32 %v5601_v7, %v5533_v32 }
 0x4b4   :  { %v5682_v22 = vpop.xlane.xlu1 %5681 }
 0x4b5   :  { %v5748_v52 = vadd.f32 %v5747_v3, %v5682_v22 }
 0x4b6   :  { %v5541_v10 = vpop.xlane.xlu0 %5540 }
 0x4b7   :  { %v5749_v45 = vadd.f32 %v5748_v52, %v5686_v56 }
 0x4b8   :  { %v5537_v36 = vpop.xlane.xlu1 %5536 }
 0x4b9   :  { %v5603_v39 = vadd.f32 %v5602_v31, %v5537_v36 }
 0x4bb   :  { %v5694_v55 = vpop.xlane.xlu0 %5693  ;;  %v5604_v18 = vadd.f32 %v5603_v39, %v5541_v10 }
 0x4bc   :  { %v5690_v47 = vpop.xlane.xlu1 %5689 }
 0x4bd   :  { %v5750_v26 = vadd.f32 %v5749_v45, %v5690_v47 }
 0x4bf   :  { %v5549_v23 = vpop.xlane.xlu0 %5548  ;;  %v5751_v53 = vadd.f32 %v5750_v26, %v5694_v55 }
 0x4c0   :  { %v5545_v49 = vpop.xlane.xlu1 %5544 }
 0x4c1   :  { %v5605_v0 = vadd.f32 %v5604_v18, %v5545_v49 }
 0x4c3   :  { %v5702_v15 = vpop.xlane.xlu0 %5701  ;;  %v5606_v61 = vadd.f32 %v5605_v0, %v5549_v23 }
 0x4c5   :  { %v5698_v54 = vpop.xlane.xlu1 %5697 }
 0x4c6   :  { %v5752_v12 = vadd.f32 %v5751_v53, %v5698_v54 }
 0x4c7   :  { %v5557_v51 = vpop.xlane.xlu0 %5556 }
 0x4c8   :  { %v5753_v25 = vadd.f32 %v5752_v12, %v5702_v15 }
 0x4c9   :  { %v5553_v1 = vpop.xlane.xlu1 %5552 }
 0x4ca   :  { %v5607_v50 = vadd.f32 %v5606_v61, %v5553_v1 }
 0x4cc   :  { %v5710_v58 = vpop.xlane.xlu0 %5709  ;;  %v5608_v35 = vadd.f32 %v5607_v50, %v5557_v51 }
 0x4ce   :  { %v5706_v27 = vpop.xlane.xlu1 %5705 }
 0x4cf   :  { %v5754_v30 = vadd.f32 %v5753_v25, %v5706_v27 }
 0x4d1   :  { %v5755_v28 = vadd.f32 %v5754_v30, %v5710_v58 }
 0x4d2   :  { %v5561_v2 = vpop.xlane.xlu1 %5560 }
 0x4d3   :  { %v5609_v38 = vadd.f32 %v5608_v35, %v5561_v2 }
 0x4d4   :  { %v5718_v21 = vpop.xlane.xlu0 %5717 }
 0x4d6   :  { %v5714_v11 = vpop.xlane.xlu1 %5713 }
 0x4d7   :  { %v5756_v43 = vadd.f32 %v5755_v28, %v5714_v11 }
 0x4d9   :  { %v5757_v5 = vadd.f32 %v5756_v43, %v5718_v21 }
 0x4da   :  { %v5722_v60 = vpop.xlane.xlu1 %5721 }
 0x4db   :  { %v5758_v33 = vadd.f32 %v5757_v5, %v5722_v60 }
 0x4dc   :  { %v5726_v16 = vpop.xlane.xlu0 %5725 }
 0x4dd   :  { %v5759_v46 = vadd.f32 %v5758_v33, %v5726_v16 }
 0x4e0   :  { %v5730_v42 = vpop.xlane.xlu1 %5729 }
 0x4e1   :  { %v5760_v8 = vadd.f32 %v5759_v46, %v5730_v42 }
 0x4e4   :  { %v5734_v41 = vpop.xlane.xlu0 %5733  ;;  %v5565_v44 = vpop.xlane.xlu1 %5564 }
 0x4e5   :  { %v5761_v48 = vadd.f32 %v5760_v8, %v5734_v41  ;;  %v5610_v37 = vadd.f32 %v5609_v38, %v5565_v44 }
 0x4e7   :  { %v5762_v32 = vrot.slane %v5761_v48, 4 }
 0x4e8   :  { %v5569_v29 = vpop.xlane.xlu0 %5568  ;;  %v5573_v14 = vpop.xlane.xlu1 %5572 }
 0x4e9   :  { %v5763_v19 = vadd.f32 %v5762_v32, %v5761_v48  ;;  %v5611_v63 = vadd.f32 %v5610_v37, %v5569_v29 }
 0x4eb   :  { %v5764_v56 = vrot.slane %v5763_v19, 2  ;;  %v5612_v17 = vadd.f32 %v5611_v63, %v5573_v14 }
 0x4ec   :  { %v5577_v22 = vpop.xlane.xlu0 %5576  ;;  %v5581_v59 = vpop.xlane.xlu1 %5580 }
 0x4ed   :  { %v5765_v4 = vadd.f32 %v5764_v56, %v5763_v19  ;;  %v5613_v10 = vadd.f32 %v5612_v17, %v5577_v22 }
 0x4ef   :  { %v5766_v9 = vrot.slane %v5765_v4, 1  ;;  %v5614_v62 = vadd.f32 %v5613_v10, %v5581_v59 }
 0x4f0   :  { %v5585_v36 = vpop.xlane.xlu0 %5584  ;;  %v5589_v3 = vpop.xlane.xlu1 %5588 }
 0x4f1   :  { %v5767_v20 = vadd.f32 %v5766_v9, %v5765_v4  ;;  %v5615_v55 = vadd.f32 %v5614_v62, %v5585_v36 }
 0x4f3   :  { %v5769_v47 = vadd.f32 1e-24, %v5767_v20  ;;  %v5616_v57 = vadd.f32 %v5615_v55, %v5589_v3 }
 0x4f5   :  { %7067 = vrcp.f32 %v5769_v47  ;;  %v5617_v52 = vrot.slane %v5616_v57, 4 }
 0x4f7   :  { %v5618_v13 = vadd.f32 %v5617_v52, %v5616_v57 }
 0x4f9   :  { %v5619_v23 = vrot.slane %v5618_v13, 2 }
 0x4fb   :  { %v5620_v49 = vadd.f32 %v5619_v23, %v5618_v13 }
 0x4fd   :  { %v5621_v45 = vrot.slane %v5620_v49, 1 }
 0x4ff   :  { %v5622_v34 = vadd.f32 %v5621_v45, %v5620_v49 }
 0x501   :  { %v5768_v26 = vadd.f32 1e-24, %v5622_v34 }
 0x502   :  { %v7068_v54 = vpop.eup %7067 }
 0x503   :  { %v5771_v24 = vmul.f32 %v7068_v54, %v5768_v26 }
 0x505   :  { %v5773_v15 = vsel %vm5772_vm11, %v14472_v40, %v5771_v24 }
 0x506   :  { %5775 = vst.msk [vmem:[#allocation10] sm:$0x1] %vm5774_vm15, %v5773_v15 }
 0x507   :  { %7481 = shalt.err (!%p7478_p10)
}
 0x508   :  { %5785 = dma.vmem_to_hbm [thread:$0]  %s5783_s3, 16, %s14690_s4, [#allocation4]  }
 0x509   :  { %7496 = dma.done.wait [#allocation4], 16  }
 0x50a   :  { %7497 = vsyncadd [#allocation4], 4294967280 }
 0x50b   :  { %5789 = vsyncpa [#allocation3], 1 }
 0x50c   :  { %5790 = vsyncpa [#allocation6], 1 }
 0x50d   :  { %5791 = vsyncpa [#allocation9], 1 }
 0x50e   :  { %5792 = vsyncpa [#allocation4], 1 }

</bundles_post_ra>
